<compile_context>
chip_gen: v7x
topology: tpu7x:2x2x1
jax: 0.10.0
libtpu: 0.0.40
codegen_flags: <defaults>
</compile_context>

<pallas_src>
import functools
import math

import jax
import jax.numpy as jnp
from jax.experimental import pallas as pl
from jax.experimental.pallas import tpu as pltpu


# ----------------------------------------------------------------------------
# Fused whole-forward kernel (NB batch items folded into the token axis)
# ----------------------------------------------------------------------------
def _fused_forward_kernel(
    patches_ref, cw_ref, cb_ref,
    ew_ref, eb_ref,
    t_wq_ref, t_bq_ref, t_wk_ref, t_bk_ref, t_wv_ref, t_bv_ref, t_wo_ref, t_bo_ref,
    s_wq_ref, s_bq_ref, s_wk_ref, s_bk_ref, s_wv_ref, s_bv_ref, s_wo_ref, s_bo_ref,
    hw_ref, hb_ref,
    out_ref,
    *, nb, s_item, n_c,
):
    f32, bf16 = jnp.float32, jnp.bfloat16
    d_model = ew_ref.shape[1]
    scale = 1.0 / math.sqrt(d_model)
    s_tot = nb * s_item

    # ---- ConvNetwork: Conv3d(1->1, k=3, s=2, p=1) + ReLU as a 27-tap VPU
    # weighted sum over im2col taps (no block-diagonal MXU weight). ----------
    p = patches_ref[0].astype(f32)                          # [27, S_tot, F]
    conv = jnp.sum(p * cw_ref[...], axis=0) + cb_ref[...]   # [S_tot, F]
    conv = jnp.maximum(conv, 0.0)

    # ---- token embedding ----------------------------------------------------
    tok = jnp.dot(conv.astype(bf16), ew_ref[...],
                  preferred_element_type=f32) + eb_ref[...]  # [S_tot, D]

    # ---- grouping masks generated in-kernel (iota + compare, no HBM masks).
    # Token index i within a grid step decomposes as (batch nb, slice t, d1 c)
    # with i = nb*S + t*Co + c.  Float-floor decomposition avoids vector
    # integer div/mod; the +0.5 offset keeps floor() exact.
    rowi = jax.lax.broadcasted_iota(jnp.int32, (s_tot, s_tot), 0)
    coli = jax.lax.broadcasted_iota(jnp.int32, (s_tot, s_tot), 1)
    rowf = rowi.astype(f32) + 0.5
    colf = coli.astype(f32) + 0.5
    rb = jnp.floor(rowf * (1.0 / s_item))
    cb = jnp.floor(colf * (1.0 / s_item))
    rr = rowf - rb * s_item
    cr = colf - cb * s_item
    rt = jnp.floor(rr * (1.0 / n_c))
    ct = jnp.floor(cr * (1.0 / n_c))
    rc = rr - rt * n_c
    cc = cr - ct * n_c
    same_b = rb == cb                                   # batch-block-diagonal
    mask_t = same_b & (rc == cc)   # attention over slice axis: same d1 index
    mask_s = same_b & (rt == ct)   # attention over d1 axis: same slice
    neg = jnp.float32(-1e30)

    def attn_block(tok, mask, wq, bq, wk, bk, wv, bv, wo, bo):
        tb = tok.astype(bf16)
        q = (jnp.dot(tb, wq, preferred_element_type=f32) + bq) * scale
        k = jnp.dot(tb, wk, preferred_element_type=f32) + bk
        v = jnp.dot(tb, wv, preferred_element_type=f32) + bv
        # contract both operands on D -> no transposed copy of k
        scores = jax.lax.dot_general(
            q.astype(bf16), k.astype(bf16),
            (((1,), (1,)), ((), ())), preferred_element_type=f32)  # [S, S]
        scores = jnp.where(mask, scores, neg)
        m = jnp.max(scores, axis=-1, keepdims=True)
        pr = jnp.exp(scores - m)
        pr = pr * pl.reciprocal(jnp.sum(pr, axis=-1, keepdims=True), approx=True)
        a = jnp.dot(pr.astype(bf16), v.astype(bf16),
                    preferred_element_type=f32)                    # [S, D]
        o = jnp.dot(a.astype(bf16), wo, preferred_element_type=f32) + bo
        return tok + o                                             # residual

    # Attention over the slice axis T, then over the spatial axis d1.
    tok = attn_block(tok, mask_t, t_wq_ref[...], t_bq_ref[...],
                     t_wk_ref[...], t_bk_ref[...], t_wv_ref[...], t_bv_ref[...],
                     t_wo_ref[...], t_bo_ref[...])
    tok = attn_block(tok, mask_s, s_wq_ref[...], s_bq_ref[...],
                     s_wk_ref[...], s_bk_ref[...], s_wv_ref[...], s_bv_ref[...],
                     s_wo_ref[...], s_bo_ref[...])

    # ---- per-item mean pool (tiny MXU matmul) + classifier head -------------
    prow = jax.lax.broadcasted_iota(jnp.int32, (nb, s_tot), 0).astype(f32)
    pcol = jax.lax.broadcasted_iota(jnp.int32, (nb, s_tot), 1).astype(f32) + 0.5
    pool = jnp.where(jnp.floor(pcol * (1.0 / s_item)) == prow,
                     1.0 / s_item, 0.0)                            # [NB, S]
    pooled = jnp.dot(pool, tok, preferred_element_type=f32)        # [NB, D]
    logits = jnp.dot(pooled.astype(bf16), hw_ref[...],
                     preferred_element_type=f32) + hb_ref[...]     # [NB, NCp]
    out_ref[0] = logits


# ----------------------------------------------------------------------------
# Wrapper: layout glue in XLA, all math in the single Pallas kernel
# ----------------------------------------------------------------------------
def model_forward(x, params, *, tokens_per_step=128):
    B, C, H, W, T = x.shape
    Co = (C + 2 - 3) // 2 + 1
    Ho = (H + 2 - 3) // 2 + 1
    Wo = (W + 2 - 3) // 2 + 1
    F = Ho * Wo
    S = T * Co                                  # tokens per batch element
    D = params["embed_w"].shape[1]
    NC = params["head_w"].shape[1]
    NCp = max(128, ((NC + 127) // 128) * 128)   # lane-dense logits slab

    # Fold NB batch items into the token axis per grid step (largest divisor
    # of B with NB*S <= tokens_per_step), so matmul M is filled and the grid
    # stays multi-step for megacore.
    cap = max(1, tokens_per_step // S)
    NB = 1
    for d in range(1, min(B, cap) + 1):
        if B % d == 0:
            NB = d
    G = B // NB
    S_tot = NB * S

    bf16, f32 = jnp.bfloat16, jnp.float32

    # ---- im2col glue (XLA addressing only): [G, 27, S_tot, F] in bf16 ------
    vol = jnp.transpose(x, (0, 4, 1, 2, 3)).reshape(B * T, C, H, W)
    xp = jnp.pad(vol, ((0, 0), (1, 1), (1, 1), (1, 1)))
    cols = [xp[:, kd:kd + 2 * Co:2, kh:kh + 2 * Ho:2, kw:kw + 2 * Wo:2]
            for kd in range(3) for kh in range(3) for kw in range(3)]
    patches = jnp.stack(cols, axis=0).reshape(27, G, NB, T, Co, F)
    patches = jnp.transpose(patches, (1, 0, 2, 3, 4, 5))
    patches = patches.reshape(G, 27, S_tot, F).astype(bf16)

    # Conv taps broadcast across the feature lane (VPU weighted sum operand).
    conv_w = jnp.broadcast_to(params["conv_w"].reshape(27, 1, 1),
                              (27, 1, F)).astype(f32)
    conv_b = jnp.broadcast_to(params["conv_b"].reshape(1, 1), (1, F)).astype(f32)

    # Lane-pad the classifier head so the per-step logits store is lane-dense.
    head_w = jnp.zeros((D, NCp), f32).at[:, :NC].set(params["head_w"]).astype(bf16)
    head_b = jnp.zeros((1, NCp), f32).at[:, :NC].set(params["head_b"])

    vmem_args = (
        params["embed_w"].astype(bf16), params["embed_b"].astype(f32),
        params["t_wq"].astype(bf16), params["t_bq"].astype(f32),
        params["t_wk"].astype(bf16), params["t_bk"].astype(f32),
        params["t_wv"].astype(bf16), params["t_bv"].astype(f32),
        params["t_wo"].astype(bf16), params["t_bo"].astype(f32),
        params["s_wq"].astype(bf16), params["s_bq"].astype(f32),
        params["s_wk"].astype(bf16), params["s_bk"].astype(f32),
        params["s_wv"].astype(bf16), params["s_bv"].astype(f32),
        params["s_wo"].astype(bf16), params["s_bo"].astype(f32),
        head_w, head_b,
    )

    def full(a):  # whole-array block, same tile every grid step
        return pl.BlockSpec(a.shape, lambda g, _nd=a.ndim: (0,) * _nd)

    kernel = functools.partial(_fused_forward_kernel, nb=NB, s_item=S, n_c=Co)

    out = pl.pallas_call(
        kernel,
        out_shape=jax.ShapeDtypeStruct((G, NB, NCp), jnp.float32),
        grid=(G,),
        in_specs=[pl.BlockSpec((1, 27, S_tot, F), lambda g: (g, 0, 0, 0)),
                  full(conv_w), full(conv_b)]
                 + [full(a) for a in vmem_args],
        out_specs=pl.BlockSpec((1, NB, NCp), lambda g: (g, 0, 0)),
        compiler_params=pltpu.CompilerParams(
            dimension_semantics=("parallel",)),
    )(patches, conv_w, conv_b, *vmem_args)
    return out.reshape(B, NCp)[:, :NC]


def init_params(key, feat, d_model, num_classes):
    ks = jax.random.split(key, 11)
    w = lambda k, shape, s=0.05: (s * jax.random.normal(k, shape)).astype(jnp.float32)
    z = lambda *shape: jnp.zeros(shape, jnp.float32)
    p = {
        "conv_w": w(ks[0], (3, 3, 3), 0.2),
        "conv_b": z(1),
        "embed_w": w(ks[1], (feat, d_model)),
        "embed_b": z(1, d_model),
        "head_w": w(ks[2], (d_model, num_classes)),
        "head_b": z(1, num_classes),
    }
    i = 3
    for pre in ("t", "s"):
        for name in ("wq", "wk", "wv", "wo"):
            p[f"{pre}_{name}"] = w(ks[i], (d_model, d_model)); i += 1
        for name in ("bq", "bk", "bv", "bo"):
            p[f"{pre}_{name}"] = z(1, d_model)
    return p


if __name__ == "__main__":
    key = jax.random.PRNGKey(0)
    B, C, H, W, T = 16, 8, 8, 8, 4           # septr_channels = T = 4
    d_model, num_classes = 128, 5
    Ho = (H + 2 - 3) // 2 + 1
    Wo = (W + 2 - 3) // 2 + 1
    feat = Ho * Wo                           # septr_input_size = d2*d3 = 16

    k_x, k_p = jax.random.split(key)
    x = jax.random.normal(k_x, (B, C, H, W, T), dtype=jnp.float32)
    params = init_params(k_p, feat, d_model, num_classes)

    fwd = jax.jit(lambda inp: model_forward(inp, params))
    out = fwd(x)
    jax.block_until_ready(out)
    assert out.shape == (B, num_classes), out.shape
    print("KERNEL_OK")
</pallas_src>

<mosaic_0001>
module attributes {stable_mosaic.version = 11 : i64} {
  func.func @_fused_forward_kernel(%arg0: i32, %arg1: memref<1x27x128x16xbf16, #tpu.memory_space<vmem>>, %arg2: memref<27x1x16xf32, #tpu.memory_space<vmem>>, %arg3: memref<1x16xf32, #tpu.memory_space<vmem>>, %arg4: memref<16x128xbf16, #tpu.memory_space<vmem>>, %arg5: memref<1x128xf32, #tpu.memory_space<vmem>>, %arg6: memref<128x128xbf16, #tpu.memory_space<vmem>>, %arg7: memref<1x128xf32, #tpu.memory_space<vmem>>, %arg8: memref<128x128xbf16, #tpu.memory_space<vmem>>, %arg9: memref<1x128xf32, #tpu.memory_space<vmem>>, %arg10: memref<128x128xbf16, #tpu.memory_space<vmem>>, %arg11: memref<1x128xf32, #tpu.memory_space<vmem>>, %arg12: memref<128x128xbf16, #tpu.memory_space<vmem>>, %arg13: memref<1x128xf32, #tpu.memory_space<vmem>>, %arg14: memref<128x128xbf16, #tpu.memory_space<vmem>>, %arg15: memref<1x128xf32, #tpu.memory_space<vmem>>, %arg16: memref<128x128xbf16, #tpu.memory_space<vmem>>, %arg17: memref<1x128xf32, #tpu.memory_space<vmem>>, %arg18: memref<128x128xbf16, #tpu.memory_space<vmem>>, %arg19: memref<1x128xf32, #tpu.memory_space<vmem>>, %arg20: memref<128x128xbf16, #tpu.memory_space<vmem>>, %arg21: memref<1x128xf32, #tpu.memory_space<vmem>>, %arg22: memref<128x128xbf16, #tpu.memory_space<vmem>>, %arg23: memref<1x128xf32, #tpu.memory_space<vmem>>, %arg24: memref<1x8x128xf32, #tpu.memory_space<vmem>>) attributes {dimension_semantics = [#tpu.dimension_semantics<parallel>], iteration_bounds = array<i64: 2>, scalar_prefetch = 0 : i64, scratch_operands = 0 : i64, tpu.core_type = #tpu.core_type<tc>, window_params = [{transform_indices = @transform_0, window_bounds = array<i64: 1, 27, 128, 16>}, {pipeline_mode = #tpu.pipeline_mode<synchronous>, transform_indices = @transform_1, window_bounds = array<i64: 27, 1, 16>}, {pipeline_mode = #tpu.pipeline_mode<synchronous>, transform_indices = @transform_2, window_bounds = array<i64: 1, 16>}, {pipeline_mode = #tpu.pipeline_mode<synchronous>, transform_indices = @transform_3, window_bounds = array<i64: 16, 128>}, {pipeline_mode = #tpu.pipeline_mode<synchronous>, transform_indices = @transform_4, window_bounds = array<i64: 1, 128>}, {pipeline_mode = #tpu.pipeline_mode<synchronous>, transform_indices = @transform_5, window_bounds = array<i64: 128, 128>}, {pipeline_mode = #tpu.pipeline_mode<synchronous>, transform_indices = @transform_6, window_bounds = array<i64: 1, 128>}, {pipeline_mode = #tpu.pipeline_mode<synchronous>, transform_indices = @transform_7, window_bounds = array<i64: 128, 128>}, {pipeline_mode = #tpu.pipeline_mode<synchronous>, transform_indices = @transform_8, window_bounds = array<i64: 1, 128>}, {pipeline_mode = #tpu.pipeline_mode<synchronous>, transform_indices = @transform_9, window_bounds = array<i64: 128, 128>}, {pipeline_mode = #tpu.pipeline_mode<synchronous>, transform_indices = @transform_10, window_bounds = array<i64: 1, 128>}, {pipeline_mode = #tpu.pipeline_mode<synchronous>, transform_indices = @transform_11, window_bounds = array<i64: 128, 128>}, {pipeline_mode = #tpu.pipeline_mode<synchronous>, transform_indices = @transform_12, window_bounds = array<i64: 1, 128>}, {pipeline_mode = #tpu.pipeline_mode<synchronous>, transform_indices = @transform_13, window_bounds = array<i64: 128, 128>}, {pipeline_mode = #tpu.pipeline_mode<synchronous>, transform_indices = @transform_14, window_bounds = array<i64: 1, 128>}, {pipeline_mode = #tpu.pipeline_mode<synchronous>, transform_indices = @transform_15, window_bounds = array<i64: 128, 128>}, {pipeline_mode = #tpu.pipeline_mode<synchronous>, transform_indices = @transform_16, window_bounds = array<i64: 1, 128>}, {pipeline_mode = #tpu.pipeline_mode<synchronous>, transform_indices = @transform_17, window_bounds = array<i64: 128, 128>}, {pipeline_mode = #tpu.pipeline_mode<synchronous>, transform_indices = @transform_18, window_bounds = array<i64: 1, 128>}, {pipeline_mode = #tpu.pipeline_mode<synchronous>, transform_indices = @transform_19, window_bounds = array<i64: 128, 128>}, {pipeline_mode = #tpu.pipeline_mode<synchronous>, transform_indices = @transform_20, window_bounds = array<i64: 1, 128>}, {pipeline_mode = #tpu.pipeline_mode<synchronous>, transform_indices = @transform_21, window_bounds = array<i64: 128, 128>}, {pipeline_mode = #tpu.pipeline_mode<synchronous>, transform_indices = @transform_22, window_bounds = array<i64: 1, 128>}, {transform_indices = @transform_23, window_bounds = array<i64: 1, 8, 128>}]} {
    %c0 = arith.constant 0 : index
    %c0_0 = arith.constant 0 : index
    %c0_1 = arith.constant 0 : index
    %c0_2 = arith.constant 0 : index
    %0 = vector.load %arg1[%c0, %c0_0, %c0_1, %c0_2] : memref<1x27x128x16xbf16, #tpu.memory_space<vmem>>, vector<1x27x128x16xbf16>
    %1 = vector.shape_cast %0 : vector<1x27x128x16xbf16> to vector<27x128x16xbf16>
    %2 = arith.extf %1 : vector<27x128x16xbf16> to vector<27x128x16xf32>
    %c0_3 = arith.constant 0 : index
    %c0_4 = arith.constant 0 : index
    %c0_5 = arith.constant 0 : index
    %3 = vector.load %arg2[%c0_3, %c0_4, %c0_5] : memref<27x1x16xf32, #tpu.memory_space<vmem>>, vector<27x1x16xf32>
    %4 = vector.broadcast %3 : vector<27x1x16xf32> to vector<27x128x16xf32>
    %5 = arith.mulf %2, %4 : vector<27x128x16xf32>
    %cst = arith.constant dense<0.000000e+00> : vector<128x16xf32>
    %6 = vector.multi_reduction <add>, %5, %cst [0] : vector<27x128x16xf32> to vector<128x16xf32>
    %c0_6 = arith.constant 0 : index
    %c0_7 = arith.constant 0 : index
    %7 = vector.load %arg3[%c0_6, %c0_7] : memref<1x16xf32, #tpu.memory_space<vmem>>, vector<1x16xf32>
    %8 = vector.broadcast %7 : vector<1x16xf32> to vector<128x16xf32>
    %9 = arith.addf %6, %8 : vector<128x16xf32>
    %cst_8 = arith.constant 0.000000e+00 : f32
    %10 = vector.broadcast %cst_8 : f32 to vector<128x16xf32>
    %11 = arith.maximumf %9, %10 : vector<128x16xf32>
    %12 = arith.truncf %11 : vector<128x16xf32> to vector<128x16xbf16>
    %c0_9 = arith.constant 0 : index
    %c0_10 = arith.constant 0 : index
    %13 = vector.load %arg4[%c0_9, %c0_10] : memref<16x128xbf16, #tpu.memory_space<vmem>>, vector<16x128xbf16>
    %cst_11 = arith.constant dense<0.000000e+00> : vector<128x128xf32>
    %14 = tpu.matmul %12, %13, %cst_11 {dimension_numbers = #tpu.dot_dimension_numbers<[1], [0], [0], [1], [0, 0, 1, 1], [], []>} : vector<128x16xbf16>, vector<16x128xbf16>, vector<128x128xf32> -> vector<128x128xf32>
    %c0_12 = arith.constant 0 : index
    %c0_13 = arith.constant 0 : index
    %15 = vector.load %arg5[%c0_12, %c0_13] : memref<1x128xf32, #tpu.memory_space<vmem>>, vector<1x128xf32>
    %16 = vector.broadcast %15 : vector<1x128xf32> to vector<128x128xf32>
    %17 = arith.addf %14, %16 : vector<128x128xf32>
    %18 = tpu.iota {dimensions = array<i32: 0>} : vector<128x128xi32>
    %19 = tpu.iota {dimensions = array<i32: 1>} : vector<128x128xi32>
    %20 = arith.sitofp %18 : vector<128x128xi32> to vector<128x128xf32>
    %cst_14 = arith.constant 5.000000e-01 : f32
    %21 = vector.broadcast %cst_14 : f32 to vector<128x128xf32>
    %22 = arith.addf %20, %21 : vector<128x128xf32>
    %23 = arith.sitofp %19 : vector<128x128xi32> to vector<128x128xf32>
    %cst_15 = arith.constant 5.000000e-01 : f32
    %24 = vector.broadcast %cst_15 : f32 to vector<128x128xf32>
    %25 = arith.addf %23, %24 : vector<128x128xf32>
    %cst_16 = arith.constant 6.250000e-02 : f32
    %26 = vector.broadcast %cst_16 : f32 to vector<128x128xf32>
    %27 = arith.mulf %22, %26 : vector<128x128xf32>
    %28 = math.floor %27 : vector<128x128xf32>
    %cst_17 = arith.constant 6.250000e-02 : f32
    %29 = vector.broadcast %cst_17 : f32 to vector<128x128xf32>
    %30 = arith.mulf %25, %29 : vector<128x128xf32>
    %31 = math.floor %30 : vector<128x128xf32>
    %cst_18 = arith.constant 1.600000e+01 : f32
    %32 = vector.broadcast %cst_18 : f32 to vector<128x128xf32>
    %33 = arith.mulf %28, %32 : vector<128x128xf32>
    %34 = arith.subf %22, %33 : vector<128x128xf32>
    %cst_19 = arith.constant 1.600000e+01 : f32
    %35 = vector.broadcast %cst_19 : f32 to vector<128x128xf32>
    %36 = arith.mulf %31, %35 : vector<128x128xf32>
    %37 = arith.subf %25, %36 : vector<128x128xf32>
    %cst_20 = arith.constant 2.500000e-01 : f32
    %38 = vector.broadcast %cst_20 : f32 to vector<128x128xf32>
    %39 = arith.mulf %34, %38 : vector<128x128xf32>
    %40 = math.floor %39 : vector<128x128xf32>
    %cst_21 = arith.constant 2.500000e-01 : f32
    %41 = vector.broadcast %cst_21 : f32 to vector<128x128xf32>
    %42 = arith.mulf %37, %41 : vector<128x128xf32>
    %43 = math.floor %42 : vector<128x128xf32>
    %cst_22 = arith.constant 4.000000e+00 : f32
    %44 = vector.broadcast %cst_22 : f32 to vector<128x128xf32>
    %45 = arith.mulf %40, %44 : vector<128x128xf32>
    %46 = arith.subf %34, %45 : vector<128x128xf32>
    %cst_23 = arith.constant 4.000000e+00 : f32
    %47 = vector.broadcast %cst_23 : f32 to vector<128x128xf32>
    %48 = arith.mulf %43, %47 : vector<128x128xf32>
    %49 = arith.subf %37, %48 : vector<128x128xf32>
    %50 = arith.cmpf oeq, %28, %31 : vector<128x128xf32>
    %51 = arith.cmpf oeq, %46, %49 : vector<128x128xf32>
    %52 = arith.andi %50, %51 : vector<128x128xi1>
    %53 = arith.cmpf oeq, %40, %43 : vector<128x128xf32>
    %54 = arith.andi %50, %53 : vector<128x128xi1>
    %c0_24 = arith.constant 0 : index
    %c0_25 = arith.constant 0 : index
    %55 = vector.load %arg6[%c0_24, %c0_25] : memref<128x128xbf16, #tpu.memory_space<vmem>>, vector<128x128xbf16>
    %c0_26 = arith.constant 0 : index
    %c0_27 = arith.constant 0 : index
    %56 = vector.load %arg7[%c0_26, %c0_27] : memref<1x128xf32, #tpu.memory_space<vmem>>, vector<1x128xf32>
    %c0_28 = arith.constant 0 : index
    %c0_29 = arith.constant 0 : index
    %57 = vector.load %arg8[%c0_28, %c0_29] : memref<128x128xbf16, #tpu.memory_space<vmem>>, vector<128x128xbf16>
    %c0_30 = arith.constant 0 : index
    %c0_31 = arith.constant 0 : index
    %58 = vector.load %arg9[%c0_30, %c0_31] : memref<1x128xf32, #tpu.memory_space<vmem>>, vector<1x128xf32>
    %c0_32 = arith.constant 0 : index
    %c0_33 = arith.constant 0 : index
    %59 = vector.load %arg10[%c0_32, %c0_33] : memref<128x128xbf16, #tpu.memory_space<vmem>>, vector<128x128xbf16>
    %c0_34 = arith.constant 0 : index
    %c0_35 = arith.constant 0 : index
    %60 = vector.load %arg11[%c0_34, %c0_35] : memref<1x128xf32, #tpu.memory_space<vmem>>, vector<1x128xf32>
    %c0_36 = arith.constant 0 : index
    %c0_37 = arith.constant 0 : index
    %61 = vector.load %arg12[%c0_36, %c0_37] : memref<128x128xbf16, #tpu.memory_space<vmem>>, vector<128x128xbf16>
    %c0_38 = arith.constant 0 : index
    %c0_39 = arith.constant 0 : index
    %62 = vector.load %arg13[%c0_38, %c0_39] : memref<1x128xf32, #tpu.memory_space<vmem>>, vector<1x128xf32>
    %63 = arith.truncf %17 : vector<128x128xf32> to vector<128x128xbf16>
    %cst_40 = arith.constant dense<0.000000e+00> : vector<128x128xf32>
    %64 = tpu.matmul %63, %55, %cst_40 {dimension_numbers = #tpu.dot_dimension_numbers<[1], [0], [0], [1], [0, 0, 1, 1], [], []>} : vector<128x128xbf16>, vector<128x128xbf16>, vector<128x128xf32> -> vector<128x128xf32>
    %65 = vector.broadcast %56 : vector<1x128xf32> to vector<128x128xf32>
    %66 = arith.addf %64, %65 : vector<128x128xf32>
    %cst_41 = arith.constant 0.0883883461 : f32
    %67 = vector.broadcast %cst_41 : f32 to vector<128x128xf32>
    %68 = arith.mulf %66, %67 : vector<128x128xf32>
    %cst_42 = arith.constant dense<0.000000e+00> : vector<128x128xf32>
    %69 = tpu.matmul %63, %57, %cst_42 {dimension_numbers = #tpu.dot_dimension_numbers<[1], [0], [0], [1], [0, 0, 1, 1], [], []>} : vector<128x128xbf16>, vector<128x128xbf16>, vector<128x128xf32> -> vector<128x128xf32>
    %70 = vector.broadcast %58 : vector<1x128xf32> to vector<128x128xf32>
    %71 = arith.addf %69, %70 : vector<128x128xf32>
    %cst_43 = arith.constant dense<0.000000e+00> : vector<128x128xf32>
    %72 = tpu.matmul %63, %59, %cst_43 {dimension_numbers = #tpu.dot_dimension_numbers<[1], [0], [0], [1], [0, 0, 1, 1], [], []>} : vector<128x128xbf16>, vector<128x128xbf16>, vector<128x128xf32> -> vector<128x128xf32>
    %73 = vector.broadcast %60 : vector<1x128xf32> to vector<128x128xf32>
    %74 = arith.addf %72, %73 : vector<128x128xf32>
    %75 = arith.truncf %68 : vector<128x128xf32> to vector<128x128xbf16>
    %76 = arith.truncf %71 : vector<128x128xf32> to vector<128x128xbf16>
    %cst_44 = arith.constant dense<0.000000e+00> : vector<128x128xf32>
    %77 = tpu.matmul %75, %76, %cst_44 {dimension_numbers = #tpu.dot_dimension_numbers<[1], [1], [0], [0], [0, 0, 1, 0], [], []>} : vector<128x128xbf16>, vector<128x128xbf16>, vector<128x128xf32> -> vector<128x128xf32>
    %cst_45 = arith.constant -1.000000e+30 : f32
    %78 = vector.broadcast %cst_45 : f32 to vector<128x128xf32>
    %79 = arith.select %52, %77, %78 : vector<128x128xi1>, vector<128x128xf32>
    %cst_46 = arith.constant dense<0xFF800000> : vector<128xf32>
    %80 = vector.multi_reduction <maximumf>, %79, %cst_46 [1] : vector<128x128xf32> to vector<128xf32>
    %81 = vector.shape_cast %80 : vector<128xf32> to vector<128x1xf32>
    %82 = vector.broadcast %81 : vector<128x1xf32> to vector<128x128xf32>
    %83 = arith.subf %79, %82 : vector<128x128xf32>
    %84 = math.exp %83 : vector<128x128xf32>
    %cst_47 = arith.constant dense<0.000000e+00> : vector<128xf32>
    %85 = vector.multi_reduction <add>, %84, %cst_47 [1] : vector<128x128xf32> to vector<128xf32>
    %86 = vector.shape_cast %85 : vector<128xf32> to vector<128x1xf32>
    %87 = tpu.reciprocal %86 {approx = true} : vector<128x1xf32> -> vector<128x1xf32>
    %88 = vector.broadcast %87 : vector<128x1xf32> to vector<128x128xf32>
    %89 = arith.mulf %84, %88 : vector<128x128xf32>
    %90 = arith.truncf %89 : vector<128x128xf32> to vector<128x128xbf16>
    %91 = arith.truncf %74 : vector<128x128xf32> to vector<128x128xbf16>
    %cst_48 = arith.constant dense<0.000000e+00> : vector<128x128xf32>
    %92 = tpu.matmul %90, %91, %cst_48 {dimension_numbers = #tpu.dot_dimension_numbers<[1], [0], [0], [1], [0, 0, 1, 1], [], []>} : vector<128x128xbf16>, vector<128x128xbf16>, vector<128x128xf32> -> vector<128x128xf32>
    %93 = arith.truncf %92 : vector<128x128xf32> to vector<128x128xbf16>
    %cst_49 = arith.constant dense<0.000000e+00> : vector<128x128xf32>
    %94 = tpu.matmul %93, %61, %cst_49 {dimension_numbers = #tpu.dot_dimension_numbers<[1], [0], [0], [1], [0, 0, 1, 1], [], []>} : vector<128x128xbf16>, vector<128x128xbf16>, vector<128x128xf32> -> vector<128x128xf32>
    %95 = vector.broadcast %62 : vector<1x128xf32> to vector<128x128xf32>
    %96 = arith.addf %94, %95 : vector<128x128xf32>
    %97 = arith.addf %17, %96 : vector<128x128xf32>
    %c0_50 = arith.constant 0 : index
    %c0_51 = arith.constant 0 : index
    %98 = vector.load %arg14[%c0_50, %c0_51] : memref<128x128xbf16, #tpu.memory_space<vmem>>, vector<128x128xbf16>
    %c0_52 = arith.constant 0 : index
    %c0_53 = arith.constant 0 : index
    %99 = vector.load %arg15[%c0_52, %c0_53] : memref<1x128xf32, #tpu.memory_space<vmem>>, vector<1x128xf32>
    %c0_54 = arith.constant 0 : index
    %c0_55 = arith.constant 0 : index
    %100 = vector.load %arg16[%c0_54, %c0_55] : memref<128x128xbf16, #tpu.memory_space<vmem>>, vector<128x128xbf16>
    %c0_56 = arith.constant 0 : index
    %c0_57 = arith.constant 0 : index
    %101 = vector.load %arg17[%c0_56, %c0_57] : memref<1x128xf32, #tpu.memory_space<vmem>>, vector<1x128xf32>
    %c0_58 = arith.constant 0 : index
    %c0_59 = arith.constant 0 : index
    %102 = vector.load %arg18[%c0_58, %c0_59] : memref<128x128xbf16, #tpu.memory_space<vmem>>, vector<128x128xbf16>
    %c0_60 = arith.constant 0 : index
    %c0_61 = arith.constant 0 : index
    %103 = vector.load %arg19[%c0_60, %c0_61] : memref<1x128xf32, #tpu.memory_space<vmem>>, vector<1x128xf32>
    %c0_62 = arith.constant 0 : index
    %c0_63 = arith.constant 0 : index
    %104 = vector.load %arg20[%c0_62, %c0_63] : memref<128x128xbf16, #tpu.memory_space<vmem>>, vector<128x128xbf16>
    %c0_64 = arith.constant 0 : index
    %c0_65 = arith.constant 0 : index
    %105 = vector.load %arg21[%c0_64, %c0_65] : memref<1x128xf32, #tpu.memory_space<vmem>>, vector<1x128xf32>
    %106 = arith.truncf %97 : vector<128x128xf32> to vector<128x128xbf16>
    %cst_66 = arith.constant dense<0.000000e+00> : vector<128x128xf32>
    %107 = tpu.matmul %106, %98, %cst_66 {dimension_numbers = #tpu.dot_dimension_numbers<[1], [0], [0], [1], [0, 0, 1, 1], [], []>} : vector<128x128xbf16>, vector<128x128xbf16>, vector<128x128xf32> -> vector<128x128xf32>
    %108 = vector.broadcast %99 : vector<1x128xf32> to vector<128x128xf32>
    %109 = arith.addf %107, %108 : vector<128x128xf32>
    %cst_67 = arith.constant 0.0883883461 : f32
    %110 = vector.broadcast %cst_67 : f32 to vector<128x128xf32>
    %111 = arith.mulf %109, %110 : vector<128x128xf32>
    %cst_68 = arith.constant dense<0.000000e+00> : vector<128x128xf32>
    %112 = tpu.matmul %106, %100, %cst_68 {dimension_numbers = #tpu.dot_dimension_numbers<[1], [0], [0], [1], [0, 0, 1, 1], [], []>} : vector<128x128xbf16>, vector<128x128xbf16>, vector<128x128xf32> -> vector<128x128xf32>
    %113 = vector.broadcast %101 : vector<1x128xf32> to vector<128x128xf32>
    %114 = arith.addf %112, %113 : vector<128x128xf32>
    %cst_69 = arith.constant dense<0.000000e+00> : vector<128x128xf32>
    %115 = tpu.matmul %106, %102, %cst_69 {dimension_numbers = #tpu.dot_dimension_numbers<[1], [0], [0], [1], [0, 0, 1, 1], [], []>} : vector<128x128xbf16>, vector<128x128xbf16>, vector<128x128xf32> -> vector<128x128xf32>
    %116 = vector.broadcast %103 : vector<1x128xf32> to vector<128x128xf32>
    %117 = arith.addf %115, %116 : vector<128x128xf32>
    %118 = arith.truncf %111 : vector<128x128xf32> to vector<128x128xbf16>
    %119 = arith.truncf %114 : vector<128x128xf32> to vector<128x128xbf16>
    %cst_70 = arith.constant dense<0.000000e+00> : vector<128x128xf32>
    %120 = tpu.matmul %118, %119, %cst_70 {dimension_numbers = #tpu.dot_dimension_numbers<[1], [1], [0], [0], [0, 0, 1, 0], [], []>} : vector<128x128xbf16>, vector<128x128xbf16>, vector<128x128xf32> -> vector<128x128xf32>
    %cst_71 = arith.constant -1.000000e+30 : f32
    %121 = vector.broadcast %cst_71 : f32 to vector<128x128xf32>
    %122 = arith.select %54, %120, %121 : vector<128x128xi1>, vector<128x128xf32>
    %cst_72 = arith.constant dense<0xFF800000> : vector<128xf32>
    %123 = vector.multi_reduction <maximumf>, %122, %cst_72 [1] : vector<128x128xf32> to vector<128xf32>
    %124 = vector.shape_cast %123 : vector<128xf32> to vector<128x1xf32>
    %125 = vector.broadcast %124 : vector<128x1xf32> to vector<128x128xf32>
    %126 = arith.subf %122, %125 : vector<128x128xf32>
    %127 = math.exp %126 : vector<128x128xf32>
    %cst_73 = arith.constant dense<0.000000e+00> : vector<128xf32>
    %128 = vector.multi_reduction <add>, %127, %cst_73 [1] : vector<128x128xf32> to vector<128xf32>
    %129 = vector.shape_cast %128 : vector<128xf32> to vector<128x1xf32>
    %130 = tpu.reciprocal %129 {approx = true} : vector<128x1xf32> -> vector<128x1xf32>
    %131 = vector.broadcast %130 : vector<128x1xf32> to vector<128x128xf32>
    %132 = arith.mulf %127, %131 : vector<128x128xf32>
    %133 = arith.truncf %132 : vector<128x128xf32> to vector<128x128xbf16>
    %134 = arith.truncf %117 : vector<128x128xf32> to vector<128x128xbf16>
    %cst_74 = arith.constant dense<0.000000e+00> : vector<128x128xf32>
    %135 = tpu.matmul %133, %134, %cst_74 {dimension_numbers = #tpu.dot_dimension_numbers<[1], [0], [0], [1], [0, 0, 1, 1], [], []>} : vector<128x128xbf16>, vector<128x128xbf16>, vector<128x128xf32> -> vector<128x128xf32>
    %136 = arith.truncf %135 : vector<128x128xf32> to vector<128x128xbf16>
    %cst_75 = arith.constant dense<0.000000e+00> : vector<128x128xf32>
    %137 = tpu.matmul %136, %104, %cst_75 {dimension_numbers = #tpu.dot_dimension_numbers<[1], [0], [0], [1], [0, 0, 1, 1], [], []>} : vector<128x128xbf16>, vector<128x128xbf16>, vector<128x128xf32> -> vector<128x128xf32>
    %138 = vector.broadcast %105 : vector<1x128xf32> to vector<128x128xf32>
    %139 = arith.addf %137, %138 : vector<128x128xf32>
    %140 = arith.addf %97, %139 : vector<128x128xf32>
    %141 = tpu.iota {dimensions = array<i32: 0>} : vector<8x128xi32>
    %142 = arith.sitofp %141 : vector<8x128xi32> to vector<8x128xf32>
    %143 = tpu.iota {dimensions = array<i32: 1>} : vector<8x128xi32>
    %144 = arith.sitofp %143 : vector<8x128xi32> to vector<8x128xf32>
    %cst_76 = arith.constant 5.000000e-01 : f32
    %145 = vector.broadcast %cst_76 : f32 to vector<8x128xf32>
    %146 = arith.addf %144, %145 : vector<8x128xf32>
    %cst_77 = arith.constant 6.250000e-02 : f32
    %147 = vector.broadcast %cst_77 : f32 to vector<8x128xf32>
    %148 = arith.mulf %146, %147 : vector<8x128xf32>
    %149 = math.floor %148 : vector<8x128xf32>
    %150 = arith.cmpf oeq, %149, %142 : vector<8x128xf32>
    %cst_78 = arith.constant 6.250000e-02 : f32
    %cst_79 = arith.constant 0.000000e+00 : f32
    %151 = vector.broadcast %cst_78 : f32 to vector<8x128xf32>
    %152 = vector.broadcast %cst_79 : f32 to vector<8x128xf32>
    %153 = arith.select %150, %151, %152 : vector<8x128xi1>, vector<8x128xf32>
    %cst_80 = arith.constant dense<0.000000e+00> : vector<8x128xf32>
    %154 = tpu.matmul %153, %140, %cst_80 {dimension_numbers = #tpu.dot_dimension_numbers<[1], [0], [0], [1], [0, 0, 1, 1], [], []>} : vector<8x128xf32>, vector<128x128xf32>, vector<8x128xf32> -> vector<8x128xf32>
    %155 = arith.truncf %154 : vector<8x128xf32> to vector<8x128xbf16>
    %c0_81 = arith.constant 0 : index
    %c0_82 = arith.constant 0 : index
    %156 = vector.load %arg22[%c0_81, %c0_82] : memref<128x128xbf16, #tpu.memory_space<vmem>>, vector<128x128xbf16>
    %cst_83 = arith.constant dense<0.000000e+00> : vector<8x128xf32>
    %157 = tpu.matmul %155, %156, %cst_83 {dimension_numbers = #tpu.dot_dimension_numbers<[1], [0], [0], [1], [0, 0, 1, 1], [], []>} : vector<8x128xbf16>, vector<128x128xbf16>, vector<8x128xf32> -> vector<8x128xf32>
    %c0_84 = arith.constant 0 : index
    %c0_85 = arith.constant 0 : index
    %158 = vector.load %arg23[%c0_84, %c0_85] : memref<1x128xf32, #tpu.memory_space<vmem>>, vector<1x128xf32>
    %159 = vector.broadcast %158 : vector<1x128xf32> to vector<8x128xf32>
    %160 = arith.addf %157, %159 : vector<8x128xf32>
    %c0_86 = arith.constant 0 : index
    %c0_87 = arith.constant 0 : index
    %c0_88 = arith.constant 0 : index
    %161 = vector.load %arg24[%c0_86, %c0_87, %c0_88] : memref<1x8x128xf32, #tpu.memory_space<vmem>>, vector<1x8x128xf32>
    %162 = vector.shape_cast %161 : vector<1x8x128xf32> to vector<8x128xf32>
    %163 = vector.shape_cast %160 : vector<8x128xf32> to vector<1x8x128xf32>
    tpu.vector_store %arg24[%c0_86, %c0_87, %c0_88], %163 {strides = array<i32>} : memref<1x8x128xf32, #tpu.memory_space<vmem>>, vector<1x8x128xf32>,
    return
  }
  func.func @transform_0(%arg0: i32) -> (i32, i32, i32, i32) {
    %c0_i32 = arith.constant 0 : i32
    %c0_i32_0 = arith.constant 0 : i32
    %c0_i32_1 = arith.constant 0 : i32
    %c0_i32_2 = arith.constant 0 : i32
    return %arg0, %c0_i32, %c0_i32_0, %c0_i32_1 : i32, i32, i32, i32
  }
  func.func @transform_1(%arg0: i32) -> (i32, i32, i32) {
    %c0_i32 = arith.constant 0 : i32
    %c0_i32_0 = arith.constant 0 : i32
    %c0_i32_1 = arith.constant 0 : i32
    %c0_i32_2 = arith.constant 0 : i32
    return %c0_i32, %c0_i32_0, %c0_i32_1 : i32, i32, i32
  }
  func.func @transform_2(%arg0: i32) -> (i32, i32) {
    %c0_i32 = arith.constant 0 : i32
    %c0_i32_0 = arith.constant 0 : i32
    %c0_i32_1 = arith.constant 0 : i32
    return %c0_i32, %c0_i32_0 : i32, i32
  }
  func.func @transform_3(%arg0: i32) -> (i32, i32) {
    %c0_i32 = arith.constant 0 : i32
    %c0_i32_0 = arith.constant 0 : i32
    %c0_i32_1 = arith.constant 0 : i32
    return %c0_i32, %c0_i32_0 : i32, i32
  }
  func.func @transform_4(%arg0: i32) -> (i32, i32) {
    %c0_i32 = arith.constant 0 : i32
    %c0_i32_0 = arith.constant 0 : i32
    %c0_i32_1 = arith.constant 0 : i32
    return %c0_i32, %c0_i32_0 : i32, i32
  }
  func.func @transform_5(%arg0: i32) -> (i32, i32) {
    %c0_i32 = arith.constant 0 : i32
    %c0_i32_0 = arith.constant 0 : i32
    %c0_i32_1 = arith.constant 0 : i32
    return %c0_i32, %c0_i32_0 : i32, i32
  }
  func.func @transform_6(%arg0: i32) -> (i32, i32) {
    %c0_i32 = arith.constant 0 : i32
    %c0_i32_0 = arith.constant 0 : i32
    %c0_i32_1 = arith.constant 0 : i32
    return %c0_i32, %c0_i32_0 : i32, i32
  }
  func.func @transform_7(%arg0: i32) -> (i32, i32) {
    %c0_i32 = arith.constant 0 : i32
    %c0_i32_0 = arith.constant 0 : i32
    %c0_i32_1 = arith.constant 0 : i32
    return %c0_i32, %c0_i32_0 : i32, i32
  }
  func.func @transform_8(%arg0: i32) -> (i32, i32) {
    %c0_i32 = arith.constant 0 : i32
    %c0_i32_0 = arith.constant 0 : i32
    %c0_i32_1 = arith.constant 0 : i32
    return %c0_i32, %c0_i32_0 : i32, i32
  }
  func.func @transform_9(%arg0: i32) -> (i32, i32) {
    %c0_i32 = arith.constant 0 : i32
    %c0_i32_0 = arith.constant 0 : i32
    %c0_i32_1 = arith.constant 0 : i32
    return %c0_i32, %c0_i32_0 : i32, i32
  }
  func.func @transform_10(%arg0: i32) -> (i32, i32) {
    %c0_i32 = arith.constant 0 : i32
    %c0_i32_0 = arith.constant 0 : i32
    %c0_i32_1 = arith.constant 0 : i32
    return %c0_i32, %c0_i32_0 : i32, i32
  }
  func.func @transform_11(%arg0: i32) -> (i32, i32) {
    %c0_i32 = arith.constant 0 : i32
    %c0_i32_0 = arith.constant 0 : i32
    %c0_i32_1 = arith.constant 0 : i32
    return %c0_i32, %c0_i32_0 : i32, i32
  }
  func.func @transform_12(%arg0: i32) -> (i32, i32) {
    %c0_i32 = arith.constant 0 : i32
    %c0_i32_0 = arith.constant 0 : i32
    %c0_i32_1 = arith.constant 0 : i32
    return %c0_i32, %c0_i32_0 : i32, i32
  }
  func.func @transform_13(%arg0: i32) -> (i32, i32) {
    %c0_i32 = arith.constant 0 : i32
    %c0_i32_0 = arith.constant 0 : i32
    %c0_i32_1 = arith.constant 0 : i32
    return %c0_i32, %c0_i32_0 : i32, i32
  }
  func.func @transform_14(%arg0: i32) -> (i32, i32) {
    %c0_i32 = arith.constant 0 : i32
    %c0_i32_0 = arith.constant 0 : i32
    %c0_i32_1 = arith.constant 0 : i32
    return %c0_i32, %c0_i32_0 : i32, i32
  }
  func.func @transform_15(%arg0: i32) -> (i32, i32) {
    %c0_i32 = arith.constant 0 : i32
    %c0_i32_0 = arith.constant 0 : i32
    %c0_i32_1 = arith.constant 0 : i32
    return %c0_i32, %c0_i32_0 : i32, i32
  }
  func.func @transform_16(%arg0: i32) -> (i32, i32) {
    %c0_i32 = arith.constant 0 : i32
    %c0_i32_0 = arith.constant 0 : i32
    %c0_i32_1 = arith.constant 0 : i32
    return %c0_i32, %c0_i32_0 : i32, i32
  }
  func.func @transform_17(%arg0: i32) -> (i32, i32) {
    %c0_i32 = arith.constant 0 : i32
    %c0_i32_0 = arith.constant 0 : i32
    %c0_i32_1 = arith.constant 0 : i32
    return %c0_i32, %c0_i32_0 : i32, i32
  }
  func.func @transform_18(%arg0: i32) -> (i32, i32) {
    %c0_i32 = arith.constant 0 : i32
    %c0_i32_0 = arith.constant 0 : i32
    %c0_i32_1 = arith.constant 0 : i32
    return %c0_i32, %c0_i32_0 : i32, i32
  }
  func.func @transform_19(%arg0: i32) -> (i32, i32) {
    %c0_i32 = arith.constant 0 : i32
    %c0_i32_0 = arith.constant 0 : i32
    %c0_i32_1 = arith.constant 0 : i32
    return %c0_i32, %c0_i32_0 : i32, i32
  }
  func.func @transform_20(%arg0: i32) -> (i32, i32) {
    %c0_i32 = arith.constant 0 : i32
    %c0_i32_0 = arith.constant 0 : i32
    %c0_i32_1 = arith.constant 0 : i32
    return %c0_i32, %c0_i32_0 : i32, i32
  }
  func.func @transform_21(%arg0: i32) -> (i32, i32) {
    %c0_i32 = arith.constant 0 : i32
    %c0_i32_0 = arith.constant 0 : i32
    %c0_i32_1 = arith.constant 0 : i32
    return %c0_i32, %c0_i32_0 : i32, i32
  }
  func.func @transform_22(%arg0: i32) -> (i32, i32) {
    %c0_i32 = arith.constant 0 : i32
    %c0_i32_0 = arith.constant 0 : i32
    %c0_i32_1 = arith.constant 0 : i32
    return %c0_i32, %c0_i32_0 : i32, i32
  }
  func.func @transform_23(%arg0: i32) -> (i32, i32, i32) {
    %c0_i32 = arith.constant 0 : i32
    %c0_i32_0 = arith.constant 0 : i32
    %c0_i32_1 = arith.constant 0 : i32
    return %arg0, %c0_i32, %c0_i32_0 : i32, i32, i32
  }
}

</mosaic_0001>

<bundles_post_ra>
// kernel: _lambda_.1
= control target key start
LH: loop header
LB: loop body
LE: loop exit
PB: predicated region body
PF: predicated region fallthrough
CT: control target
= control target key end

     0   :  { %s12653_s0 = inlined_call_operand.vmem [shape: bf16[2,27,128,16], index: 0, kind: input, shape index: {}]   ;;  %s12654_s1 = inlined_call_operand.vmem [shape: f32[27,1,16], index: 1, kind: input, shape index: {}]   ;;  %s12655_s2 = inlined_call_operand.vmem [shape: f32[1,16], index: 2, kind: input, shape index: {}]   ;;  %s12656_s3 = inlined_call_operand.vmem [shape: bf16[16,128], index: 3, kind: input, shape index: {}]   ;;  %s12657_s4 = inlined_call_operand.vmem [shape: f32[1,128], index: 4, kind: input, shape index: {}, may-alias: {4,6,8,10,12,14,16,18,20,22}]   ;;  %s12658_s5 = inlined_call_operand.vmem [shape: bf16[128,128], index: 5, kind: input, shape index: {}]   ;;  %s12659_s6 = inlined_call_operand.vmem [shape: f32[1,128], index: 6, kind: input, shape index: {}, may-alias: {4,6,8,10,12,14,16,18,20,22}]   ;;  %s12660_s7 = inlined_call_operand.vmem [shape: bf16[128,128], index: 7, kind: input, shape index: {}]   ;;  %s12661_s8 = inlined_call_operand.vmem [shape: f32[1,128], index: 8, kind: input, shape index: {}, may-alias: {4,6,8,10,12,14,16,18,20,22}]   ;;  %s12662_s9 = inlined_call_operand.vmem [shape: bf16[128,128], index: 9, kind: input, shape index: {}]   ;;  %s12663_s10 = inlined_call_operand.vmem [shape: f32[1,128], index: 10, kind: input, shape index: {}, may-alias: {4,6,8,10,12,14,16,18,20,22}]   ;;  %s12664_s11 = inlined_call_operand.vmem [shape: bf16[128,128], index: 11, kind: input, shape index: {}]   ;;  %s12665_s12 = inlined_call_operand.vmem [shape: f32[1,128], index: 12, kind: input, shape index: {}, may-alias: {4,6,8,10,12,14,16,18,20,22}]   ;;  %s12666_s13 = inlined_call_operand.vmem [shape: bf16[128,128], index: 13, kind: input, shape index: {}]   ;;  %s12667_s14 = inlined_call_operand.vmem [shape: f32[1,128], index: 14, kind: input, shape index: {}, may-alias: {4,6,8,10,12,14,16,18,20,22}]   ;;  %s12668_s15 = inlined_call_operand.vmem [shape: bf16[128,128], index: 15, kind: input, shape index: {}]   ;;  %s12669_s16 = inlined_call_operand.vmem [shape: f32[1,128], index: 16, kind: input, shape index: {}, may-alias: {4,6,8,10,12,14,16,18,20,22}]   ;;  %s12670_s17 = inlined_call_operand.vmem [shape: bf16[128,128], index: 17, kind: input, shape index: {}]   ;;  %s12671_s18 = inlined_call_operand.vmem [shape: f32[1,128], index: 18, kind: input, shape index: {}, may-alias: {4,6,8,10,12,14,16,18,20,22}]   ;;  %s12672_s19 = inlined_call_operand.vmem [shape: bf16[128,128], index: 19, kind: input, shape index: {}]   ;;  %s12673_s20 = inlined_call_operand.vmem [shape: f32[1,128], index: 20, kind: input, shape index: {}, may-alias: {4,6,8,10,12,14,16,18,20,22}]   ;;  %s12674_s21 = inlined_call_operand.vmem [shape: bf16[128,128], index: 21, kind: input, shape index: {}]   ;;  %s12675_s22 = inlined_call_operand.vmem [shape: f32[1,128], index: 22, kind: input, shape index: {}, may-alias: {4,6,8,10,12,14,16,18,20,22}]   ;;  %s12676_s23 = inlined_call_operand.vmem [shape: f32[2,8,128], index: 23, kind: output, shape index: {}]  }
   0x1   :  { %12763 = sst [smem:[#allocation25_spill]] %s12653_s0 }
   0x2   :  { %12764 = sst [smem:[#allocation26_spill]] %s12654_s1 }
   0x3   :  { %12765 = sst [smem:[#allocation27_spill]] %s12655_s2 }
   0x4   :  { %12766 = sst [smem:[#allocation28_spill]] %s12656_s3 }
   0x5   :  { %12767 = sst [smem:[#allocation29_spill]] %s12657_s4  ;;  %s8291_s4 = smov 0  }
   0x6   :  { %12768 = sst [smem:[#allocation30_spill]] %s12658_s5 }
   0x7   :  { %12769 = sst [smem:[#allocation31_spill]] %s12659_s6 }
   0x8   :  { %12770 = sst [smem:[#allocation32_spill]] %s12660_s7 }
   0x9 LB: > { %s5946_s30 = sadd.s32 4294967295, %s8165_s4   ;;  %p5950_p0 = scmp.ge.s32.totalorder %s8165_s4, 1  ;;  %s8165_s4 = sphi %s8291_s4, %s33_s4  }
   0xa   : > { %p637_p1 = scmp.lt.s32.totalorder %s8165_s4, 3 }
   0xc   : > { %p638_p2 = pnand %p5950_p0, %p637_p1 }
   0xe   : > { %641 = sbr.rel (%p638_p2) target bundleno = 3644 (0xe3c), region = 112 }
  0x15   : > { %s12771_s5 = sld [smem:[#allocation28_spill]]  ;;  %p700_p3 = scmp.lt.s32.totalorder %s5946_s30, 1  ;;  %vm2195_vm0 = vcmask 130048  }
  0x16   : > { %s12772_s6 = sld [smem:[#allocation25_spill]]  ;;  %s12773_s29 = sld [smem:[#allocation26_spill]] }
  0x17   : > { %s13063_s30 = smov (!%p700_p3, %s5946_s30), 1  ;;  %s12795_s28 = sld [smem:[#allocation27_spill]] }
  0x18   : > { %s7862_s1 = smul.u32 1728, %s13063_s30  ;;  %s12846_s24 = sld [smem:[#allocation30_spill]] }
  0x19   : > { %s12869_s26 = sld [smem:[#allocation29_spill]]  ;;  %s5952_s2 = sshll.u32 %s13063_s30, 3 }
  0x1a   : > { %s708_s0 = scalar_lea.vmem %s12676_s23, %s5952_s2 }
  0x1b   : > { %v7875_v0 = vld [vmem:[%s12771_s5] sm:$0xff]  }
  0x1c   : > { %7381 = vmatprep.subr.bf16.mxu1 %v7875_v0  ;;  %s8308_s27 = scalar_lea.vmem %s12772_s6, %s7862_s1  ;;  %v8336_v10 = vld [vmem:[%s12773_s29] ss:$0 sm:$0xff]  ;;  %v8351_v17 = vld [vmem:[%s12773_s29 + $0x1] ss:$0 sm:$0xff]  ;;  %v8363_v23 = vld [vmem:[%s12773_s29 + $0x2] ss:$0 sm:$0xff] }
  0x1d   : > { %7382 = vmatpush3.bf16.msra.mxu1 %v7875_v0  ;;  %v8311_v1 = vld [vmem:[%s8308_s27] sm:$0xff]   ;;  %12774 = vst [vmem:[#allocation2_spill] sm:$0xff] %v8363_v23  ;;  %v8469_v60 = vld [vmem:[%s12773_s29 + $0x8] ss:$0 sm:$0xff]  ;;  %v8498_v53 = vld [vmem:[%s12773_s29 + $0xc] ss:$0 sm:$0xff] }
  0x1e   : > { %v8314_v2 = vld [vmem:[%s8308_s27 + $0x40] sm:$0xff]   ;;  %v6077_v6 = vunpack.c.l.bf16 %v8311_v1  ;;  %v6078_v7 = vunpack.c.h.bf16 %v8311_v1  ;;  %12780 = vst [vmem:[#allocation8_spill] sm:$0xff] %v8469_v60  ;;  %s12847_s1 = sld [smem:[#allocation32_spill]] }
  0x1f   : > { %v8317_v3 = vld [vmem:[%s8308_s27 + $0x80] sm:$0xff]   ;;  %v6109_v11 = vunpack.c.l.bf16 %v8314_v2  ;;  %v6110_v12 = vunpack.c.h.bf16 %v8314_v2 }
  0x20   : > { %v8320_v4 = vld [vmem:[%s8308_s27 + $0xc0] sm:$0xff]   ;;  %v6141_v13 = vunpack.c.l.bf16 %v8317_v3  ;;  %v6142_v14 = vunpack.c.h.bf16 %v8317_v3  ;;  %v1763_v43 = vmul.f32 %v6077_v6, %v8336_v10 }
  0x21   : > { %v8323_v5 = vld [vmem:[%s8308_s27 + $0x100] sm:$0xff]   ;;  %v6173_v18 = vunpack.c.l.bf16 %v8320_v4  ;;  %v6174_v19 = vunpack.c.h.bf16 %v8320_v4  ;;  %v1779_v44 = vmul.f32 %v6109_v11, %v8351_v17  ;;  %v1780_v1 = vmul.f32 %v6110_v12, %v8351_v17 }
  0x22   : > { %v8328_v8 = vld [vmem:[%s8308_s27 + $0x140] sm:$0xff]   ;;  %v6205_v20 = vunpack.c.l.bf16 %v8323_v5  ;;  %v6206_v21 = vunpack.c.h.bf16 %v8323_v5  ;;  %v1795_v45 = vmul.f32 %v6141_v13, %v8363_v23  ;;  %v2196_v6 = vsel %vm2195_vm0, %v1763_v43, 0.0  ;;  %v8519_v5 = vld [vmem:[%s12773_s29 + $0xf] ss:$0 sm:$0xff] }
  0x23   : > { %v8331_v9 = vld [vmem:[%s8308_s27 + $0x180] sm:$0xff]   ;;  %v6237_v25 = vunpack.c.l.bf16 %v8328_v8  ;;  %v6238_v26 = vunpack.c.h.bf16 %v8328_v8  ;;  %v2197_v8 = vsel %vm2195_vm0, %v1779_v44, 0.0  ;;  %v1764_v44 = vmul.f32 %v6078_v7, %v8336_v10 }
  0x24   : > { %v8343_v15 = vld [vmem:[%s8308_s27 + $0x1c0] sm:$0xff]   ;;  %v6269_v27 = vunpack.c.l.bf16 %v8331_v9  ;;  %v6270_v28 = vunpack.c.h.bf16 %v8331_v9  ;;  %v2199_v11 = vsel %vm2195_vm0, %v1795_v45, 0.0  ;;  %v2198_v61 = vadd.f32 %v2197_v8, %v2196_v6  ;;  %v8474_v6 = vld [vmem:[%s12773_s29 + $0x9] ss:$0 sm:$0xff]  ;;  %v8479_v8 = vld [vmem:[%s12773_s29 + $0xa] ss:$0 sm:$0xff] }
  0x25   : > { %v8346_v16 = vld [vmem:[%s8308_s27 + $0x200] sm:$0xff]   ;;  %v6301_v32 = vunpack.c.l.bf16 %v8343_v15  ;;  %v6302_v33 = vunpack.c.h.bf16 %v8343_v15  ;;  %12781 = vst [vmem:[#allocation9_spill] sm:$0xff] %v8474_v6  ;;  %12782 = vst [vmem:[#allocation10_spill] sm:$0xff] %v8479_v8  ;;  %v1796_v7 = vmul.f32 %v6142_v14, %v8363_v23  ;;  %v8509_v14 = vld [vmem:[%s12773_s29 + $0xd] ss:$0 sm:$0xff]  ;;  %v2250_v52 = vsel %vm2195_vm0, %v1780_v1, 0.0 }
  0x26   : > { %v8358_v22 = vld [vmem:[%s8308_s27 + $0x240] sm:$0xff]   ;;  %v6333_v34 = vunpack.c.l.bf16 %v8346_v16  ;;  %v6334_v35 = vunpack.c.h.bf16 %v8346_v16  ;;  %v8540_v9 = vld [vmem:[%s12773_s29 + $0x11] ss:$0 sm:$0xff]  ;;  %v2249_v16 = vsel %vm2195_vm0, %v1764_v44, 0.0 }
  0x27   : > { %v8368_v24 = vld [vmem:[%s12773_s29 + $0x3] ss:$0 sm:$0xff]  ;;  %v6365_v39 = vunpack.c.l.bf16 %v8358_v22  ;;  %v8416_v50 = vld [vmem:[%s12773_s29 + $0x4] ss:$0 sm:$0xff]  ;;  %v8441_v63 = vld [vmem:[%s12773_s29 + $0x5] ss:$0 sm:$0xff] }
  0x28   : > { %12775 = vst [vmem:[#allocation3_spill] sm:$0xff] %v8368_v24  ;;  %v8375_v29 = vld [vmem:[%s8308_s27 + $0x280] sm:$0xff]   ;;  %12776 = vst [vmem:[#allocation4_spill] sm:$0xff] %v8416_v50  ;;  %v1811_v57 = vmul.f32 %v6173_v18, %v8368_v24  ;;  %v1827_v0 = vmul.f32 %v6205_v20, %v8416_v50  ;;  %v1843_v45 = vmul.f32 %v6237_v25, %v8441_v63  ;;  %v8493_v20 = vld [vmem:[%s12773_s29 + $0xb] ss:$0 sm:$0xff] }
  0x29   : > { %v8378_v30 = vld [vmem:[%s8308_s27 + $0x2c0] sm:$0xff]   ;;  %v6397_v47 = vunpack.c.l.bf16 %v8375_v29  ;;  %12777 = vst [vmem:[#allocation5_spill] sm:$0xff] %v8441_v63  ;;  %v1812_v25 = vmul.f32 %v6174_v19, %v8368_v24  ;;  %12783 = vst [vmem:[#allocation11_spill] sm:$0xff] %v8493_v20  ;;  %v1828_v2 = vmul.f32 %v6206_v21, %v8416_v50  ;;  %v1844_v3 = vmul.f32 %v6238_v26, %v8441_v63  ;;  %v8514_v19 = vld [vmem:[%s12773_s29 + $0xe] ss:$0 sm:$0xff] }
  0x2a   : > { %v8381_v31 = vld [vmem:[%s8308_s27 + $0x300] sm:$0xff]   ;;  %v6429_v49 = vunpack.c.l.bf16 %v8378_v30  ;;  %v2201_v48 = vsel %vm2195_vm0, %v1811_v57, 0.0  ;;  %v2200_v57 = vadd.f32 %v2199_v11, %v2198_v61  ;;  %v2203_v12 = vsel %vm2195_vm0, %v1827_v0, 0.0  ;;  %v8535_v0 = vld [vmem:[%s12773_s29 + $0x10] ss:$0 sm:$0xff] }
  0x2b   : > { %v8388_v36 = vld [vmem:[%s8308_s27 + $0x340] sm:$0xff]   ;;  %v6461_v51 = vunpack.c.l.bf16 %v8381_v31  ;;  %v8548_v15 = vmul.f32 %v6334_v35, %v8469_v60  ;;  %v1923_v11 = vmul.f32 %v6397_v47, %v8479_v8  ;;  %v8565_v35 = vld [vmem:[%s12773_s29 + $0x13] ss:$0 sm:$0xff]  ;;  %v8574_v47 = vld [vmem:[%s12773_s29 + $0x14] ss:$0 sm:$0xff] }
  0x2c   : > { %v8391_v37 = vld [vmem:[%s8308_s27 + $0x380] sm:$0xff]   ;;  %v2202_v61 = vadd.f32 %v2201_v48, %v2200_v57  ;;  %v8557_v48 = vld [vmem:[%s12773_s29 + $0x12] ss:$0 sm:$0xff] }
  0x2d   : > { %v8394_v38 = vld [vmem:[%s8308_s27 + $0x3c0] sm:$0xff]  }
  0x2e   : > { %v8398_v40 = vld [vmem:[%s8308_s27 + $0x400] sm:$0xff]   ;;  %v6557_v58 = vunpack.c.l.bf16 %v8394_v38  ;;  %v2204_v57 = vadd.f32 %v2203_v12, %v2202_v61  ;;  %v12785_v12 = vunpack.c.l.bf16 %v8391_v37 }
  0x2f   : > { %v8401_v41 = vld [vmem:[%s8308_s27 + $0x440] sm:$0xff]   ;;  %v6589_v59 = vunpack.c.l.bf16 %v8398_v40 }
  0x30   : > { %v8404_v42 = vld [vmem:[%s8308_s27 + $0x480] sm:$0xff]   ;;  %v12786_v63 = vunpack.c.l.bf16 %v8401_v41 }
  0x31   : > { %v8422_v54 = vld [vmem:[%s8308_s27 + $0x4c0] sm:$0xff]   ;;  %v2019_v1 = vmul.f32 %v6589_v59, %v8535_v0 }
  0x32   : > { %v8425_v55 = vld [vmem:[%s8308_s27 + $0x500] sm:$0xff]   ;;  %v6685_v13 = vunpack.c.l.bf16 %v8422_v54  ;;  %v2035_v50 = vmul.f32 %v12786_v63, %v8540_v9 }
  0x33   : > { %v8428_v56 = vld [vmem:[%s8308_s27 + $0x540] sm:$0xff]   ;;  %v6717_v18 = vunpack.c.l.bf16 %v8425_v55 }
  0x34   : > { %v8436_v62 = vld [vmem:[%s8308_s27 + $0x580] sm:$0xff]  }
  0x35   : > { %v8453_v46 = vld [vmem:[%s12773_s29 + $0x6] ss:$0 sm:$0xff]  ;;  %v8459_v43 = vld [vmem:[%s12773_s29 + $0x7] ss:$0 sm:$0xff]  ;;  %v2083_v59 = vmul.f32 %v6717_v18, %v8574_v47 }
  0x36   : > { %12778 = vst [vmem:[#allocation6_spill] sm:$0xff] %v8453_v46  ;;  %12779 = vst [vmem:[#allocation7_spill] sm:$0xff] %v8459_v43  ;;  %v1859_v4 = vmul.f32 %v6269_v27, %v8453_v46  ;;  %v1860_v21 = vmul.f32 %v6270_v28, %v8453_v46  ;;  %v1875_v26 = vmul.f32 %v6301_v32, %v8459_v43  ;;  %v2254_v46 = vsel %vm2195_vm0, %v1812_v25, 0.0 }
  0x37   : > { %v8530_v27 = vmul.f32 %v6302_v33, %v8459_v43  ;;  %v1891_v28 = vmul.f32 %v6333_v34, %v8469_v60  ;;  %v1907_v32 = vmul.f32 %v6365_v39, %v8474_v6  ;;  %v2205_v33 = vsel %vm2195_vm0, %v1843_v45, 0.0 }
  0x38   : > { %v1939_v34 = vmul.f32 %v6429_v49, %v8493_v20  ;;  %v1955_v39 = vmul.f32 %v6461_v51, %v8498_v53  ;;  %v2207_v45 = vsel %vm2195_vm0, %v1859_v4, 0.0  ;;  %v2252_v60 = vsel %vm2195_vm0, %v1796_v7, 0.0 }
  0x39   : > { %v12784_v49 = vunpack.c.l.bf16 %v8388_v36  ;;  %v1987_v51 = vmul.f32 %v12785_v12, %v8514_v19  ;;  %v2206_v61 = vadd.f32 %v2205_v33, %v2204_v57  ;;  %v2251_v4 = vadd.f32 %v2250_v52, %v2249_v16  ;;  %v8593_v52 = vld [vmem:[%s8308_s27 + $0x5c0] sm:$0xff]  }
  0x3a   : > { %v2003_v43 = vmul.f32 %v6557_v58, %v8519_v5  ;;  %v2209_v7 = vsel %vm2195_vm0, %v1875_v26, 0.0  ;;  %v2067_v58 = vmul.f32 %v6685_v13, %v8565_v35  ;;  %v2211_v26 = vsel %vm2195_vm0, %v1891_v28, 0.0 }
  0x3b   : > { %v1971_v44 = vmul.f32 %v12784_v49, %v8509_v14  ;;  %v12787_v49 = vunpack.c.l.bf16 %v8404_v42  ;;  %v2208_v12 = vadd.f32 %v2207_v45, %v2206_v61  ;;  %v2253_v33 = vadd.f32 %v2252_v60, %v2251_v4  ;;  %v8607_v60 = vld [vmem:[%s12773_s29 + $0x15] ss:$0 sm:$0xff]  ;;  %v8621_v4 = vld [vmem:[%s8308_s27 + $0x640] sm:$0xff]  }
  0x3c   : > { %v2256_v25 = vsel %vm2195_vm0, %v1828_v2, 0.0  ;;  %v2213_v63 = vsel %vm2195_vm0, %v1907_v32, 0.0  ;;  %v2215_v16 = vsel %vm2195_vm0, %v1923_v11, 0.0  ;;  %v2217_v13 = vsel %vm2195_vm0, %v1939_v34, 0.0 }
  0x3d   : > { %v2051_v24 = vmul.f32 %v12787_v49, %v8557_v48  ;;  %v2210_v57 = vadd.f32 %v2209_v7, %v2208_v12  ;;  %v2255_v23 = vadd.f32 %v2254_v46, %v2253_v33  ;;  %v8602_v49 = vld [vmem:[%s8308_s27 + $0x600] sm:$0xff]   ;;  %v2219_v18 = vsel %vm2195_vm0, %v1955_v39, 0.0  ;;  %v8616_v46 = vld [vmem:[%s12773_s29 + $0x16] ss:$0 sm:$0xff] }
  0x3e   : > { %v2221_v2 = vsel %vm2195_vm0, %v1971_v44, 0.0  ;;  %v2258_v28 = vsel %vm2195_vm0, %v1844_v3, 0.0  ;;  %v2223_v11 = vsel %vm2195_vm0, %v1987_v51, 0.0  ;;  %v2225_v45 = vsel %vm2195_vm0, %v2003_v43, 0.0  ;;  %v8641_v12 = vld [vmem:[%s8308_s27 + $0x680] sm:$0xff]  }
  0x3f   : > { %v2212_v32 = vadd.f32 %v2211_v26, %v2210_v57  ;;  %v2257_v61 = vadd.f32 %v2256_v25, %v2255_v23  ;;  %v8624_v34 = vsel %vm2195_vm0, %v2019_v1, 0.0  ;;  %v8627_v39 = vsel %vm2195_vm0, %v2035_v50, 0.0  ;;  %v8638_v23 = vld [vmem:[%s12773_s29 + $0x17] ss:$0 sm:$0xff] }
  0x40   : > { %v8630_v3 = vsel %vm2195_vm0, %v2051_v24, 0.0  ;;  %v2260_v44 = vsel %vm2195_vm0, %v1860_v21, 0.0  ;;  %v6430_v7 = vunpack.c.h.bf16 %v8378_v30  ;;  %v6813_v51 = vunpack.c.l.bf16 %v8593_v52 }
  0x41   : > { %v2214_v43 = vadd.f32 %v2213_v63, %v2212_v32  ;;  %v2259_v1 = vadd.f32 %v2258_v28, %v2257_v61  ;;  %v12788_v50 = vunpack.c.h.bf16 %v8358_v22  ;;  %v12789_v21 = vunpack.c.l.bf16 %v8428_v56  ;;  %v8659_v63 = vld [vmem:[%s12773_s29 + $0x18] ss:$0 sm:$0xff] }
  0x42   : > { %v8650_v30 = vsel %vm2195_vm0, %v2067_v58, 0.0  ;;  %v2262_v26 = vsel %vm2195_vm0, %v8530_v27, 0.0  ;;  %v6462_v25 = vunpack.c.h.bf16 %v8381_v31  ;;  %v6845_v57 = vunpack.c.l.bf16 %v8602_v49 }
  0x43   : > { %v1908_v24 = vmul.f32 %v12788_v50, %v8474_v6  ;;  %v2099_v33 = vmul.f32 %v12789_v21, %v8607_v60  ;;  %v2216_v22 = vadd.f32 %v2215_v16, %v2214_v43  ;;  %v2261_v28 = vadd.f32 %v2260_v44, %v2259_v1  ;;  %v8677_v16 = vld [vmem:[%s12773_s29 + $0x19] ss:$0 sm:$0xff] }
  0x44   : > { %v12790_v32 = vunpack.c.h.bf16 %v8375_v29  ;;  %v12791_v58 = vunpack.c.l.bf16 %v8436_v62  ;;  %v8668_v27 = vsel %vm2195_vm0, %v2083_v59, 0.0  ;;  %v2264_v31 = vsel %vm2195_vm0, %v8548_v15, 0.0 }
  0x45   : > { %v6494_v21 = vunpack.c.h.bf16 %v8388_v36  ;;  %v6877_v6 = vunpack.c.l.bf16 %v8621_v4  ;;  %v2218_v29 = vadd.f32 %v2217_v13, %v2216_v22  ;;  %v2263_v44 = vadd.f32 %v2262_v26, %v2261_v28 }
  0x46   : > { %v1924_v61 = vmul.f32 %v12790_v32, %v8479_v8  ;;  %v2115_v50 = vmul.f32 %v12791_v58, %v8616_v46  ;;  %v1940_v43 = vmul.f32 %v6430_v7, %v8493_v20  ;;  %v2131_v1 = vmul.f32 %v6813_v51, %v8638_v23  ;;  %v8690_v58 = vld [vmem:[%s12773_s29 + $0x1a] ss:$0 sm:$0xff] }
  0x47   : > { %v8682_v59 = vsel %vm2195_vm0, %v2099_v33, 0.0  ;;  %v2266_v15 = vsel %vm2195_vm0, %v1908_v24, 0.0  ;;  %v6526_v36 = vunpack.c.h.bf16 %v8391_v37  ;;  %v6909_v32 = vunpack.c.l.bf16 %v8641_v12 }
  0x48   : > { %v2220_v13 = vadd.f32 %v2219_v18, %v2218_v29  ;;  %v2265_v26 = vadd.f32 %v2264_v31, %v2263_v44  ;;  %v1956_v7 = vmul.f32 %v6462_v25, %v8498_v53  ;;  %v2147_v51 = vmul.f32 %v6845_v57, %v8659_v63 }
  0x49   : > { %v8695_v33 = vsel %vm2195_vm0, %v2115_v50, 0.0  ;;  %v2268_v24 = vsel %vm2195_vm0, %v1924_v61, 0.0  ;;  %v6558_v37 = vunpack.c.h.bf16 %v8394_v38  ;;  %v6590_v22 = vunpack.c.h.bf16 %v8398_v40 }
  0x4a   : > { %v2222_v28 = vadd.f32 %v2221_v2, %v2220_v13  ;;  %v2267_v20 = vadd.f32 %v2266_v15, %v2265_v26  ;;  %v1972_v8 = vmul.f32 %v6494_v21, %v8509_v14  ;;  %v2163_v18 = vmul.f32 %v6877_v6, %v8677_v16 }
  0x4b   : > { %v8703_v31 = vsel %vm2195_vm0, %v2131_v1, 0.0  ;;  %v2270_v25 = vsel %vm2195_vm0, %v1940_v43, 0.0  ;;  %v6622_v57 = vunpack.c.h.bf16 %v8401_v41  ;;  %v6654_v50 = vunpack.c.h.bf16 %v8404_v42 }
  0x4c   : > { %v2224_v61 = vadd.f32 %v2223_v11, %v2222_v28  ;;  %v2269_v29 = vadd.f32 %v2268_v24, %v2267_v20  ;;  %v1988_v38 = vmul.f32 %v6526_v36, %v8514_v19  ;;  %v2179_v40 = vmul.f32 %v6909_v32, %v8690_v58 }
  0x4d   : > { %v8711_v2 = vsel %vm2195_vm0, %v2147_v51, 0.0  ;;  %v2272_v6 = vsel %vm2195_vm0, %v1956_v7, 0.0  ;;  %v6686_v21 = vunpack.c.h.bf16 %v8422_v54  ;;  %v6718_v44 = vunpack.c.h.bf16 %v8425_v55 }
  0x4e   : > { %v2226_v43 = vadd.f32 %v2225_v45, %v2224_v61  ;;  %v2271_v1 = vadd.f32 %v2270_v25, %v2269_v29  ;;  %v2004_v41 = vmul.f32 %v6558_v37, %v8519_v5  ;;  %v2020_v42 = vmul.f32 %v6590_v22, %v8535_v0 }
  0x4f   : > { %v8719_v20 = vsel %vm2195_vm0, %v2163_v18, 0.0  ;;  %v2274_v11 = vsel %vm2195_vm0, %v1972_v8, 0.0  ;;  %v6750_v15 = vunpack.c.h.bf16 %v8428_v56  ;;  %v6782_v36 = vunpack.c.h.bf16 %v8436_v62 }
  0x50   : > { %v2228_v32 = vadd.f32 %v8624_v34, %v2226_v43  ;;  %v2273_v54 = vadd.f32 %v2272_v6, %v2271_v1  ;;  %v2036_v55 = vmul.f32 %v6622_v57, %v8540_v9  ;;  %v2052_v45 = vmul.f32 %v6654_v50, %v8557_v48  ;;  %v8752_v6 = vld [vmem:[%s8308_s27 + $0x8] sm:$0xff]  }
  0x51   : > { %v8728_v13 = vsel %vm2195_vm0, %v2179_v40, 0.0  ;;  %v2276_v26 = vsel %vm2195_vm0, %v1988_v38, 0.0  ;;  %v6814_v7 = vunpack.c.h.bf16 %v8593_v52  ;;  %v6846_v8 = vunpack.c.h.bf16 %v8602_v49 }
  0x52   : > { %v2230_v56 = vadd.f32 %v8627_v39, %v2228_v32  ;;  %v2275_v51 = vadd.f32 %v2274_v11, %v2273_v54  ;;  %v2068_v62 = vmul.f32 %v6686_v21, %v8565_v35  ;;  %v2084_v34 = vmul.f32 %v6718_v44, %v8574_v47  ;;  %v8755_v21 = vld [vmem:[%s8308_s27 + $0x48] sm:$0xff]  }
  0x53   : > { %v2278_v24 = vsel %vm2195_vm0, %v2004_v41, 0.0  ;;  %v2280_v37 = vsel %vm2195_vm0, %v2020_v42, 0.0  ;;  %v6878_v22 = vunpack.c.h.bf16 %v8621_v4  ;;  %v6910_v28 = vunpack.c.h.bf16 %v8641_v12  ;;  %v8762_v41 = vld [vmem:[%s8308_s27 + $0x88] sm:$0xff]  }
  0x54   : > { %v2232_v52 = vadd.f32 %v8630_v3, %v2230_v56  ;;  %v2277_v49 = vadd.f32 %v2276_v26, %v2275_v51  ;;  %v2100_v39 = vmul.f32 %v6750_v15, %v8607_v60  ;;  %v2116_v18 = vmul.f32 %v6782_v36, %v8616_v46  ;;  %v8766_v11 = vld [vmem:[%s8308_s27 + $0xc8] sm:$0xff]  }
  0x55   : > { %v2282_v25 = vsel %vm2195_vm0, %v2036_v55, 0.0  ;;  %v2284_v57 = vsel %vm2195_vm0, %v2052_v45, 0.0  ;;  %v2132_v4 = vmul.f32 %v6814_v7, %v8638_v23  ;;  %v2148_v12 = vmul.f32 %v6846_v8, %v8659_v63  ;;  %v8771_v32 = vld [vmem:[%s8308_s27 + $0x108] sm:$0xff]  }
  0x56   : > { %v2234_v50 = vadd.f32 %v8650_v30, %v2232_v52  ;;  %v2279_v61 = vadd.f32 %v2278_v24, %v2277_v49  ;;  %v2286_v3 = vsel %vm2195_vm0, %v2068_v62, 0.0  ;;  %v2288_v29 = vsel %vm2195_vm0, %v2084_v34, 0.0  ;;  %v8775_v45 = vld [vmem:[%s8308_s27 + $0x148] sm:$0xff]  }
  0x57   : > { %v2164_v30 = vmul.f32 %v6878_v22, %v8677_v16  ;;  %v2180_v44 = vmul.f32 %v6910_v28, %v8690_v58  ;;  %v2290_v43 = vsel %vm2195_vm0, %v2100_v39, 0.0  ;;  %v2292_v1 = vsel %vm2195_vm0, %v2116_v18, 0.0  ;;  %v8784_v56 = vld [vmem:[%s8308_s27 + $0x188] sm:$0xff]  }
  0x58   : > { %v2236_v38 = vadd.f32 %v8668_v27, %v2234_v50  ;;  %v2281_v40 = vadd.f32 %v2280_v37, %v2279_v61  ;;  %v2294_v15 = vsel %vm2195_vm0, %v2132_v4, 0.0  ;;  %v2296_v36 = vsel %vm2195_vm0, %v2148_v12, 0.0  ;;  %v8794_v52 = vld [vmem:[%s8308_s27 + $0x1c8] sm:$0xff]  }
  0x59   : > { %v2298_v26 = vsel %vm2195_vm0, %v2164_v30, 0.0  ;;  %v6081_v7 = vunpack.c.l.bf16 %v8752_v6  ;;  %v6113_v8 = vunpack.c.l.bf16 %v8755_v21  ;;  %v6082_v62 = vunpack.c.h.bf16 %v8752_v6  ;;  %v8797_v49 = vld [vmem:[%s8308_s27 + $0x208] sm:$0xff]  }
  0x5a   : > { %v2238_v42 = vadd.f32 %v8682_v59, %v2236_v38  ;;  %v2283_v27 = vadd.f32 %v2282_v25, %v2281_v40  ;;  %v8779_v59 = vsel %vm2195_vm0, %v2180_v44, 0.0  ;;  %v6145_v34 = vunpack.c.l.bf16 %v8762_v41  ;;  %v8805_v61 = vld [vmem:[%s8308_s27 + $0x248] sm:$0xff]   ;;  %v12792_v40 = vld [vmem:[#allocation2_spill] sm:$0xff] }
  0x5b   : > { %v6114_v24 = vunpack.c.h.bf16 %v8755_v21  ;;  %v6146_v37 = vunpack.c.h.bf16 %v8762_v41  ;;  %v6177_v22 = vunpack.c.l.bf16 %v8766_v11  ;;  %v6178_v28 = vunpack.c.h.bf16 %v8766_v11  ;;  %v12793_v41 = vld [vmem:[#allocation3_spill] sm:$0xff] }
  0x5c   : > { %v2240_v54 = vadd.f32 %v8695_v33, %v2238_v42  ;;  %v2285_v55 = vadd.f32 %v2284_v57, %v2283_v27  ;;  %v6209_v18 = vunpack.c.l.bf16 %v8771_v32  ;;  %v6210_v25 = vunpack.c.h.bf16 %v8771_v32  ;;  %v8848_v32 = vld [vmem:[%s8308_s27 + $0x348] sm:$0xff]  }
  0x5d   : > { %v6241_v57 = vunpack.c.l.bf16 %v8775_v45  ;;  %v1765_v4 = vmul.f32 %v6081_v7, %v8336_v10  ;;  %v1781_v12 = vmul.f32 %v6113_v8, %v8351_v17  ;;  %v1797_v6 = vmul.f32 %v6145_v34, %v12792_v40  ;;  %v8831_v34 = vld [vmem:[%s8308_s27 + $0x308] sm:$0xff]  }
  0x5e   : > { %v2242_v51 = vadd.f32 %v8703_v31, %v2240_v54  ;;  %v2287_v33 = vadd.f32 %v2286_v3, %v2285_v55  ;;  %v6305_v30 = vunpack.c.l.bf16 %v8794_v52  ;;  %v1813_v42 = vmul.f32 %v6177_v22, %v12793_v41  ;;  %v8824_v54 = vld [vmem:[%s8308_s27 + $0x2c8] sm:$0xff]   ;;  %v12794_v55 = vld [vmem:[#allocation4_spill] sm:$0xff] }
  0x5f   : > { %v6337_v11 = vunpack.c.l.bf16 %v8797_v49  ;;  %v1829_v7 = vmul.f32 %v6209_v18, %v12794_v55  ;;  %v2302_v8 = vsel %vm2195_vm0, %v1765_v4, 0.0 }
  0x60   : > { %v2244_v31 = vadd.f32 %v8711_v2, %v2242_v51  ;;  %v2289_v39 = vadd.f32 %v2288_v29, %v2287_v33  ;;  %v6273_v2 = vunpack.c.l.bf16 %v8784_v56  ;;  %v8812_v29 = vld [vmem:[%s8308_s27 + $0x288] sm:$0xff]   ;;  %v2303_v51 = vsel %vm2195_vm0, %v1781_v12, 0.0 }
  0x61   : > { %v2304_v22 = vadd.f32 %v2303_v51, %v2302_v8  ;;  %v6401_v18 = vunpack.c.l.bf16 %v8812_v29  ;;  %v2309_v4 = vsel %vm2195_vm0, %v1829_v7, 0.0  ;;  %v6498_v7 = vunpack.c.h.bf16 %v8848_v32 }
  0x62   : > { %v2246_v3 = vadd.f32 %v8719_v20, %v2244_v31  ;;  %v2291_v38 = vadd.f32 %v2290_v43, %v2289_v39  ;;  %v6369_v43 = vunpack.c.l.bf16 %v8805_v61  ;;  %v2305_v31 = vsel %vm2195_vm0, %v1797_v6, 0.0  ;;  %v8837_v39 = vld [vmem:[%s12795_s28] ss:$0 sm:$0xff] }
  0x63   : > { %v2306_v8 = vadd.f32 %v2305_v31, %v2304_v22  ;;  %v6465_v6 = vunpack.c.l.bf16 %v8831_v34  ;;  %v12797_v20 = vld [vmem:[#allocation6_spill] sm:$0xff]  ;;  %v1798_v22 = vmul.f32 %v6146_v37, %v12792_v40  ;;  %v12798_v31 = vld [vmem:[#allocation7_spill] sm:$0xff] }
  0x64   : > { %v2293_v27 = vadd.f32 %v2292_v1, %v2291_v38  ;;  %v2248_v33 = vadd.f32 %v8728_v13, %v2246_v3  ;;  %v12796_v38 = vld [vmem:[#allocation5_spill] sm:$0xff]  ;;  %v2307_v13 = vsel %vm2195_vm0, %v1813_v42, 0.0  ;;  %v1861_v44 = vmul.f32 %v6273_v2, %v12797_v20 }
  0x65   : > { %v1845_v12 = vmul.f32 %v6241_v57, %v12796_v38  ;;  %v1877_v21 = vmul.f32 %v6305_v30, %v12798_v31  ;;  %v6497_v2 = vunpack.c.l.bf16 %v8848_v32 }
  0x66   : > { %v2295_v1 = vadd.f32 %v2294_v15, %v2293_v27  ;;  %v6433_v15 = vunpack.c.l.bf16 %v8824_v54  ;;  %v3051_v42 = vadd.f32 %v8837_v39, %v2248_v33  ;;  %v1782_v27 = vmul.f32 %v6114_v24, %v8351_v17 }
  0x67   : > { %v2311_v51 = vsel %vm2195_vm0, %v1845_v12, 0.0  ;;  %v1830_v17 = vmul.f32 %v6210_v25, %v12794_v55  ;;  %v2313_v37 = vsel %vm2195_vm0, %v1861_v44, 0.0 }
  0x68   : > { %v2297_v3 = vadd.f32 %v2296_v36, %v2295_v1  ;;  %v1766_v36 = vmul.f32 %v6082_v62, %v8336_v10  ;;  %v2308_v1 = vadd.f32 %v2307_v13, %v2306_v8  ;;  %v1814_v10 = vmul.f32 %v6178_v28, %v12793_v41  ;;  %v12799_v62 = vld [vmem:[#allocation8_spill] sm:$0xff]  ;;  %v8876_v8 = vld [vmem:[%s8308_s27 + $0x3c8] sm:$0xff]  }
  0x69   : > { %v1893_v24 = vmul.f32 %v6337_v11, %v12799_v62  ;;  %v3067_v30 = vmax.f32 %v3051_v42, 0.0  ;;  %v2356_v28 = vsel %vm2195_vm0, %v1782_v27, 0.0  ;;  %v2358_v41 = vsel %vm2195_vm0, %v1798_v22, 0.0 }
  0x6a   : > { %v2299_v57 = vadd.f32 %v2298_v26, %v2297_v3  ;;  %v2310_v26 = vadd.f32 %v2309_v4, %v2308_v1  ;;  %v8862_v3 = vld [vmem:[%s8308_s27 + $0x388] sm:$0xff]   ;;  %v2315_v4 = vsel %vm2195_vm0, %v1877_v21, 0.0  ;;  %v2355_v13 = vsel %vm2195_vm0, %v1766_v36, 0.0 }
  0x6b   : > { %v6529_v11 = vunpack.c.l.bf16 %v8862_v3  ;;  %v2357_v44 = vadd.f32 %v2356_v28, %v2355_v13  ;;  %v2317_v21 = vsel %vm2195_vm0, %v1893_v24, 0.0  ;;  %v2360_v42 = vsel %vm2195_vm0, %v1814_v10, 0.0  ;;  %v8886_v1 = vld [vmem:[%s8308_s27 + $0x408] sm:$0xff]  }
  0x6c   : > { %v2301_v50 = vadd.f32 %v8779_v59, %v2299_v57  ;;  %v12800_v59 = vld [vmem:[#allocation9_spill] sm:$0xff]  ;;  %v2312_v12 = vadd.f32 %v2311_v51, %v2310_v26  ;;  %v12802_v51 = vld [vmem:[#allocation10_spill] sm:$0xff]  ;;  %v6530_v36 = vunpack.c.h.bf16 %v8862_v3  ;;  %v12805_v10 = vunpack.c.h.bf16 %v8794_v52 }
  0x6d   : > { %v1909_v33 = vmul.f32 %v6369_v43, %v12800_v59  ;;  %v1925_v57 = vmul.f32 %v6401_v18, %v12802_v51  ;;  %v2359_v26 = vadd.f32 %v2358_v41, %v2357_v44  ;;  %v12806_v13 = vunpack.c.h.bf16 %v8797_v49  ;;  %v8908_v41 = vld [vmem:[%s8308_s27 + $0x448] sm:$0xff]  }
  0x6e   : > { %v3052_v40 = vadd.f32 %v8837_v39, %v2301_v50  ;;  %v2314_v55 = vadd.f32 %v2313_v37, %v2312_v12  ;;  %v12801_v50 = vunpack.c.h.bf16 %v8775_v45  ;;  %v12803_v37 = vunpack.c.h.bf16 %v8784_v56  ;;  %v12804_v12 = vld [vmem:[#allocation11_spill] sm:$0xff] }
  0x6f   : > { %v1941_v45 = vmul.f32 %v6433_v15, %v12804_v12  ;;  %v2319_v18 = vsel %vm2195_vm0, %v1909_v33, 0.0  ;;  %v1878_v24 = vmul.f32 %v12805_v10, %v12798_v31  ;;  %v2361_v56 = vadd.f32 %v2360_v42, %v2359_v26  ;;  %v8920_v49 = vld [vmem:[%s8308_s27 + $0x4c8] sm:$0xff]  }
  0x70   : > { %v3068_v25 = vmax.f32 %v3052_v40, 0.0  ;;  %v1846_v43 = vmul.f32 %v12801_v50, %v12796_v38  ;;  %v2316_v22 = vadd.f32 %v2315_v4, %v2314_v55  ;;  %v1862_v40 = vmul.f32 %v12803_v37, %v12797_v20  ;;  %v8931_v26 = vld [vmem:[%s8308_s27 + $0x508] sm:$0xff]  }
  0x71   : > { %v2362_v38 = vsel %vm2195_vm0, %v1830_v17, 0.0  ;;  %v6561_v20 = vunpack.c.l.bf16 %v8876_v8  ;;  %v6593_v15 = vunpack.c.l.bf16 %v8886_v1  ;;  %v2321_v33 = vsel %vm2195_vm0, %v1925_v57, 0.0  ;;  %v8917_v57 = vld [vmem:[%s8308_s27 + $0x488] sm:$0xff]  }
  0x72   : > { %v3083_v27 = vpack.c.bf16 %v3068_v25, %v3067_v30  ;;  %v1957_v30 = vmul.f32 %v6465_v6, %v8498_v53  ;;  %v2318_v4 = vadd.f32 %v2317_v21, %v2316_v22  ;;  %v2364_v17 = vsel %vm2195_vm0, %v1846_v43, 0.0  ;;  %v8942_v10 = vld [vmem:[%s8308_s27 + $0x548] sm:$0xff]  }
  0x73   : > { %v1894_v28 = vmul.f32 %v12806_v13, %v12799_v62  ;;  %v1973_v52 = vmul.f32 %v6497_v2, %v8509_v14  ;;  %v2363_v6 = vadd.f32 %v2362_v38, %v2361_v56  ;;  %v12807_v25 = vunpack.c.h.bf16 %v8805_v61 }
  0x74   : > { %7383 = vmatprep.mubr.msk.bf16.mxu1 %vm2195_vm0, %v3083_v27  ;;  %v2320_v31 = vadd.f32 %v2319_v18, %v2318_v4  ;;  %v1989_v44 = vmul.f32 %v6529_v11, %v8514_v19  ;;  %v2323_v50 = vsel %vm2195_vm0, %v1941_v45, 0.0  ;;  %v2366_v43 = vsel %vm2195_vm0, %v1862_v40, 0.0 }
  0x75   : > { %v1910_v55 = vmul.f32 %v12807_v25, %v12800_v59  ;;  %v2325_v62 = vsel %vm2195_vm0, %v1957_v30, 0.0  ;;  %v2365_v21 = vadd.f32 %v2364_v17, %v2363_v6  ;;  %v2368_v42 = vsel %vm2195_vm0, %v1878_v24, 0.0 }
  0x76   : > { %v2322_v2 = vadd.f32 %v2321_v33, %v2320_v31  ;;  %v6562_v61 = vunpack.c.h.bf16 %v8876_v8  ;;  %v6594_v59 = vunpack.c.h.bf16 %v8886_v1  ;;  %v12808_v11 = vunpack.c.h.bf16 %v8812_v29 }
  0x77   : > { %v2005_v22 = vmul.f32 %v6561_v20, %v8519_v5  ;;  %v2327_v40 = vsel %vm2195_vm0, %v1973_v52, 0.0  ;;  %v2367_v45 = vadd.f32 %v2366_v43, %v2365_v21  ;;  %v2370_v18 = vsel %vm2195_vm0, %v1894_v28, 0.0 }
  0x78   : > { %v1926_v27 = vmul.f32 %v12808_v11, %v12802_v51  ;;  %v2324_v37 = vadd.f32 %v2323_v50, %v2322_v2  ;;  %v6625_v38 = vunpack.c.l.bf16 %v8908_v41  ;;  %v6626_v8 = vunpack.c.h.bf16 %v8908_v41  ;;  %v8958_v41 = vld [vmem:[%s8308_s27 + $0x5c8] sm:$0xff]  }
  0x79   : > { %v12809_v1 = vunpack.c.h.bf16 %v8824_v54  ;;  %v2021_v51 = vmul.f32 %v6593_v15, %v8535_v0  ;;  %v2329_v30 = vsel %vm2195_vm0, %v1989_v44, 0.0  ;;  %v2369_v4 = vadd.f32 %v2368_v42, %v2367_v45 }
  0x7a   : > { %v2326_v24 = vadd.f32 %v2325_v62, %v2324_v37  ;;  %v2372_v56 = vsel %vm2195_vm0, %v1910_v55, 0.0  ;;  %v6657_v20 = vunpack.c.l.bf16 %v8917_v57  ;;  %v6658_v33 = vunpack.c.h.bf16 %v8917_v57 }
  0x7b   : > { %v1942_v29 = vmul.f32 %v12809_v1, %v12804_v12  ;;  %v6689_v17 = vunpack.c.l.bf16 %v8920_v49  ;;  %v6690_v54 = vunpack.c.h.bf16 %v8920_v49  ;;  %v8951_v12 = vld [vmem:[%s8308_s27 + $0x588] sm:$0xff]   ;;  %v2331_v13 = vsel %vm2195_vm0, %v2005_v22, 0.0 }
  0x7c   : > { %v2328_v15 = vadd.f32 %v2327_v40, %v2326_v24  ;;  %v2371_v28 = vadd.f32 %v2370_v18, %v2369_v4  ;;  %v2374_v52 = vsel %vm2195_vm0, %v1926_v27, 0.0  ;;  %v6721_v31 = vunpack.c.l.bf16 %v8931_v26  ;;  %v7131_v22 = vld [vmem:[%s8308_s27 + $0x608] sm:$0xff]  }
  0x7d   : > { %v6722_v6 = vunpack.c.h.bf16 %v8931_v26  ;;  %v12810_v25 = vunpack.c.h.bf16 %v8831_v34  ;;  %v2037_v44 = vmul.f32 %v6625_v38, %v8540_v9  ;;  %v2333_v43 = vsel %vm2195_vm0, %v2021_v51, 0.0  ;;  %v7139_v38 = vld [vmem:[%s8308_s27 + $0x648] sm:$0xff]  }
  0x7e   : > { %v2330_v50 = vadd.f32 %v2329_v30, %v2328_v15  ;;  %v2373_v57 = vadd.f32 %v2372_v56, %v2371_v28  ;;  %v2376_v49 = vsel %vm2195_vm0, %v1942_v29, 0.0  ;;  %v6753_v2 = vunpack.c.l.bf16 %v8942_v10  ;;  %v7147_v30 = vld [vmem:[%s8308_s27 + $0x688] sm:$0xff]  }
  0x7f   : > { %v1958_v55 = vmul.f32 %v12810_v25, %v8498_v53  ;;  %v6754_v62 = vunpack.c.h.bf16 %v8942_v10  ;;  %v1974_v21 = vmul.f32 %v6498_v7, %v8509_v14  ;;  %v2053_v34 = vmul.f32 %v6657_v20, %v8557_v48 }
  0x80   : > { %v6785_v53 = vunpack.c.l.bf16 %v8951_v12  ;;  %v6786_v42 = vunpack.c.h.bf16 %v8951_v12  ;;  %v2332_v11 = vadd.f32 %v2331_v13, %v2330_v50  ;;  %v2375_v27 = vadd.f32 %v2374_v52, %v2373_v57 }
  0x81   : > { %v1990_v26 = vmul.f32 %v6530_v36, %v8514_v19  ;;  %v2069_v37 = vmul.f32 %v6689_v17, %v8565_v35  ;;  %v2335_v32 = vsel %vm2195_vm0, %v2037_v44, 0.0  ;;  %v2378_v14 = vsel %vm2195_vm0, %v1958_v55, 0.0 }
  0x82   : > { %v6817_v7 = vunpack.c.l.bf16 %v8958_v41  ;;  %v6818_v40 = vunpack.c.h.bf16 %v8958_v41  ;;  %v2334_v45 = vadd.f32 %v2333_v43, %v2332_v11  ;;  %v2377_v18 = vadd.f32 %v2376_v49, %v2375_v27 }
  0x83   : > { %v2006_v1 = vmul.f32 %v6562_v61, %v8519_v5  ;;  %v2085_v29 = vmul.f32 %v6721_v31, %v8574_v47  ;;  %v2337_v19 = vsel %vm2195_vm0, %v2053_v34, 0.0  ;;  %v2380_v3 = vsel %vm2195_vm0, %v1974_v21, 0.0 }
  0x84   : > { %v6849_v36 = vunpack.c.l.bf16 %v7131_v22  ;;  %v6850_v51 = vunpack.c.h.bf16 %v7131_v22  ;;  %v2336_v10 = vadd.f32 %v2335_v32, %v2334_v45  ;;  %v2379_v24 = vadd.f32 %v2378_v14, %v2377_v18 }
  0x85   : > { %v2022_v4 = vmul.f32 %v6594_v59, %v8535_v0  ;;  %v2101_v56 = vmul.f32 %v6753_v2, %v8607_v60  ;;  %v2339_v20 = vsel %vm2195_vm0, %v2069_v37, 0.0  ;;  %v2382_v17 = vsel %vm2195_vm0, %v1990_v26, 0.0 }
  0x86   : > { %v6881_v5 = vunpack.c.l.bf16 %v7139_v38  ;;  %v6882_v61 = vunpack.c.h.bf16 %v7139_v38  ;;  %v2338_v12 = vadd.f32 %v2337_v19, %v2336_v10  ;;  %v2381_v15 = vadd.f32 %v2380_v3, %v2379_v24 }
  0x87   : > { %v2038_v13 = vmul.f32 %v6626_v8, %v8540_v9  ;;  %v2117_v28 = vmul.f32 %v6785_v53, %v8616_v46  ;;  %v2341_v52 = vsel %vm2195_vm0, %v2085_v29, 0.0  ;;  %v2384_v31 = vsel %vm2195_vm0, %v2006_v1, 0.0 }
  0x88   : > { %v6913_v41 = vunpack.c.l.bf16 %v7147_v30  ;;  %v6914_v0 = vunpack.c.h.bf16 %v7147_v30  ;;  %v2340_v59 = vadd.f32 %v2339_v20, %v2338_v12  ;;  %v2383_v25 = vadd.f32 %v2382_v17, %v2381_v15  ;;  %v9054_v12 = vld [vmem:[%s8308_s27 + $0x190] sm:$0xff]  }
  0x89   : > { %v2054_v55 = vmul.f32 %v6658_v33, %v8557_v48  ;;  %v2133_v44 = vmul.f32 %v6817_v7, %v8638_v23  ;;  %v2343_v50 = vsel %vm2195_vm0, %v2101_v56, 0.0  ;;  %v2386_v43 = vsel %vm2195_vm0, %v2022_v4, 0.0  ;;  %v9048_v56 = vld [vmem:[%s8308_s27 + $0x150] sm:$0xff]  }
  0x8a   : > { %v2070_v9 = vmul.f32 %v6690_v54, %v8565_v35  ;;  %v2086_v8 = vmul.f32 %v6722_v6, %v8574_v47  ;;  %v2342_v57 = vadd.f32 %v2341_v52, %v2340_v59  ;;  %v2385_v49 = vadd.f32 %v2384_v31, %v2383_v25  ;;  %v9061_v31 = vld [vmem:[%s8308_s27 + $0x1d0] sm:$0xff]  }
  0x8b   : > { %v2102_v2 = vmul.f32 %v6754_v62, %v8607_v60  ;;  %v2149_v21 = vmul.f32 %v6849_v36, %v8659_v63  ;;  %v2345_v34 = vsel %vm2195_vm0, %v2117_v28, 0.0  ;;  %v2388_v48 = vsel %vm2195_vm0, %v2038_v13, 0.0  ;;  %v9036_v36 = vld [vmem:[%s8308_s27 + $0xd0] sm:$0xff]  }
  0x8c   : > { %v2165_v33 = vmul.f32 %v6881_v5, %v8677_v16  ;;  %v2181_v53 = vmul.f32 %v6913_v41, %v8690_v58  ;;  %v2344_v11 = vadd.f32 %v2343_v50, %v2342_v57  ;;  %v2387_v27 = vadd.f32 %v2386_v43, %v2385_v49  ;;  %v9073_v43 = vld [vmem:[%s8308_s27 + $0x290] sm:$0xff]   ;;  %v9084_v57 = vld [vmem:[%s12773_s29 + $0x1] ss:$0 sm:$0xff] }
  0x8d   : > { %v2118_v35 = vmul.f32 %v6786_v42, %v8616_v46  ;;  %v2134_v47 = vmul.f32 %v6818_v40, %v8638_v23  ;;  %v2347_v60 = vsel %vm2195_vm0, %v2133_v44, 0.0  ;;  %v2390_v54 = vsel %vm2195_vm0, %v2054_v55, 0.0  ;;  %v9021_v40 = vld [vmem:[%s8308_s27 + $0x10] sm:$0xff]  }
  0x8e   : > { %v2150_v6 = vmul.f32 %v6850_v51, %v8659_v63  ;;  %v2166_v62 = vmul.f32 %v6882_v61, %v8677_v16  ;;  %v2346_v22 = vadd.f32 %v2345_v34, %v2344_v11  ;;  %v2389_v26 = vadd.f32 %v2388_v48, %v2387_v27  ;;  %v9024_v63 = vld [vmem:[%s8308_s27 + $0x50] sm:$0xff]  }
  0x8f   : > { %v2182_v37 = vmul.f32 %v6914_v0, %v8690_v58  ;;  %v2349_v32 = vsel %vm2195_vm0, %v2149_v21, 0.0  ;;  %v2392_v46 = vsel %vm2195_vm0, %v2070_v9, 0.0  ;;  %v2351_v23 = vsel %vm2195_vm0, %v2165_v33, 0.0  ;;  %v9027_v16 = vld [vmem:[%s8308_s27 + $0x90] sm:$0xff]   ;;  %v9078_v9 = vld [vmem:[%s12773_s29] ss:$0 sm:$0xff] }
  0x90   : > { %v2348_v42 = vadd.f32 %v2347_v60, %v2346_v22  ;;  %v2353_v14 = vsel %vm2195_vm0, %v2181_v53, 0.0  ;;  %v2391_v7 = vadd.f32 %v2390_v54, %v2389_v26  ;;  %v2394_v58 = vsel %vm2195_vm0, %v2086_v8, 0.0  ;;  %v9039_v51 = vld [vmem:[%s8308_s27 + $0x110] sm:$0xff]   ;;  %12811 = vst [vmem:[#allocation2_spill] sm:$0xff] %v9078_v9  ;;  %v9105_v60 = vld [vmem:[%s12773_s29 + $0x3] ss:$0 sm:$0xff] }
  0x91   : > { %v2396_v45 = vsel %vm2195_vm0, %v2102_v2, 0.0  ;;  %v2398_v18 = vsel %vm2195_vm0, %v2118_v35, 0.0  ;;  %v2400_v38 = vsel %vm2195_vm0, %v2134_v47, 0.0  ;;  %v2402_v19 = vsel %vm2195_vm0, %v2150_v6, 0.0  ;;  %v9066_v55 = vld [vmem:[%s8308_s27 + $0x210] sm:$0xff]  }
  0x92   : > { %v2350_v1 = vadd.f32 %v2349_v32, %v2348_v42  ;;  %v2393_v29 = vadd.f32 %v2392_v46, %v2391_v7  ;;  %v2404_v3 = vsel %vm2195_vm0, %v2166_v62, 0.0  ;;  %v9042_v10 = vsel %vm2195_vm0, %v2182_v37, 0.0  ;;  %v9069_v44 = vld [vmem:[%s8308_s27 + $0x250] sm:$0xff]   ;;  %v9090_v2 = vld [vmem:[%s12773_s29 + $0x2] ss:$0 sm:$0xff] }
  0x93   : > { %v6085_v24 = vunpack.c.l.bf16 %v9021_v40  ;;  %v6117_v30 = vunpack.c.l.bf16 %v9024_v63  ;;  %v6149_v4 = vunpack.c.l.bf16 %v9027_v16  ;;  %v6086_v17 = vunpack.c.h.bf16 %v9021_v40  ;;  %v9100_v47 = vld [vmem:[%s8308_s27 + $0x2d0] sm:$0xff]   ;;  %v9116_v32 = vld [vmem:[%s12773_s29 + $0x4] ss:$0 sm:$0xff] }
  0x94   : > { %v2395_v20 = vadd.f32 %v2394_v58, %v2393_v29  ;;  %v6118_v5 = vunpack.c.h.bf16 %v9024_v63  ;;  %v6150_v61 = vunpack.c.h.bf16 %v9027_v16  ;;  %v6181_v15 = vunpack.c.l.bf16 %v9036_v36  ;;  %v9111_v37 = vld [vmem:[%s8308_s27 + $0x310] sm:$0xff]   ;;  %v9132_v29 = vld [vmem:[%s12773_s29 + $0x5] ss:$0 sm:$0xff] }
  0x95   : > { %v6182_v13 = vunpack.c.h.bf16 %v9036_v36  ;;  %v6213_v28 = vunpack.c.l.bf16 %v9039_v51  ;;  %v6214_v52 = vunpack.c.h.bf16 %v9039_v51  ;;  %v2352_v41 = vadd.f32 %v2351_v23, %v2350_v1 }
  0x96   : > { %v2397_v0 = vadd.f32 %v2396_v45, %v2395_v20  ;;  %v6245_v59 = vunpack.c.l.bf16 %v9048_v56  ;;  %v6246_v25 = vunpack.c.h.bf16 %v9048_v56  ;;  %v6277_v50 = vunpack.c.l.bf16 %v9054_v12  ;;  %v9125_v45 = vld [vmem:[%s8308_s27 + $0x350] sm:$0xff]  }
  0x97   : > { %v1767_v8 = vmul.f32 %v9078_v9, %v6085_v24  ;;  %v1783_v49 = vmul.f32 %v9084_v57, %v6117_v30  ;;  %v1799_v21 = vmul.f32 %v9090_v2, %v6149_v4  ;;  %v6278_v48 = vunpack.c.h.bf16 %v9054_v12 }
  0x98   : > { %v2399_v34 = vadd.f32 %v2398_v18, %v2397_v0  ;;  %v6309_v33 = vunpack.c.l.bf16 %v9061_v31  ;;  %v6310_v53 = vunpack.c.h.bf16 %v9061_v31  ;;  %v6341_v11 = vunpack.c.l.bf16 %v9066_v55 }
  0x99   : > { %v6342_v27 = vunpack.c.h.bf16 %v9066_v55  ;;  %v6373_v35 = vunpack.c.l.bf16 %v9069_v44  ;;  %v1815_v54 = vmul.f32 %v9105_v60, %v6181_v15  ;;  %v2354_v6 = vadd.f32 %v2353_v14, %v2352_v41  ;;  %v9139_v15 = vld [vmem:[%s8308_s27 + $0x390] sm:$0xff]  }
  0x9a   : > { %v2401_v62 = vadd.f32 %v2400_v38, %v2399_v34  ;;  %v6374_v22 = vunpack.c.h.bf16 %v9069_v44  ;;  %v6405_v26 = vunpack.c.l.bf16 %v9073_v43  ;;  %v1831_v46 = vmul.f32 %v9116_v32, %v6213_v28 }
  0x9b   : > { %v2408_v42 = vsel %vm2195_vm0, %v1767_v8, 0.0  ;;  %v2409_v23 = vsel %vm2195_vm0, %v1783_v49, 0.0  ;;  %v2411_v14 = vsel %vm2195_vm0, %v1799_v21, 0.0  ;;  %v6406_v40 = vunpack.c.h.bf16 %v9073_v43  ;;  %v9146_v8 = vld [vmem:[%s12773_s29 + $0x6] ss:$0 sm:$0xff] }
  0x9c   : > { %v2403_v7 = vadd.f32 %v2402_v19, %v2401_v62  ;;  %v6437_v58 = vunpack.c.l.bf16 %v9100_v47  ;;  %v2410_v18 = vadd.f32 %v2409_v23, %v2408_v42  ;;  %v6438_v38 = vunpack.c.h.bf16 %v9100_v47  ;;  %v9176_v42 = vld [vmem:[%s12773_s29 + $0x8] ss:$0 sm:$0xff] }
  0x9d   : > { %v6469_v1 = vunpack.c.l.bf16 %v9111_v37  ;;  %v1847_v24 = vmul.f32 %v9132_v29, %v6245_v59  ;;  %v2413_v19 = vsel %vm2195_vm0, %v1815_v54, 0.0  ;;  %v3053_v4 = vadd.f32 %v8837_v39, %v2354_v6 }
  0x9e   : > { %v2405_v30 = vadd.f32 %v2404_v3, %v2403_v7  ;;  %v6470_v20 = vunpack.c.h.bf16 %v9111_v37  ;;  %v2412_v28 = vadd.f32 %v2411_v14, %v2410_v18  ;;  %v6501_v41 = vunpack.c.l.bf16 %v9125_v45  ;;  %v9182_v14 = vld [vmem:[%s8308_s27 + $0x3d0] sm:$0xff]   ;;  %v9190_v18 = vld [vmem:[%s12773_s29 + $0x9] ss:$0 sm:$0xff] }
  0x9f   : > { %v1768_v0 = vmul.f32 %v9078_v9, %v6086_v17  ;;  %v1863_v59 = vmul.f32 %v9146_v8, %v6277_v50  ;;  %v2415_v3 = vsel %vm2195_vm0, %v1831_v46, 0.0  ;;  %v1784_v21 = vmul.f32 %v9084_v57, %v6118_v5  ;;  %v9162_v50 = vld [vmem:[%s12773_s29 + $0x7] ss:$0 sm:$0xff] }
  0xa0   : > { %v2407_v49 = vadd.f32 %v9042_v10, %v2405_v30  ;;  %v1800_v34 = vmul.f32 %v9090_v2, %v6150_v61  ;;  %v2414_v17 = vadd.f32 %v2413_v19, %v2412_v28  ;;  %v6502_v54 = vunpack.c.h.bf16 %v9125_v45 }
  0xa1   : > { %v6533_v6 = vunpack.c.l.bf16 %v9139_v15  ;;  %v1879_v10 = vmul.f32 %v9162_v50, %v6309_v33  ;;  %v2417_v63 = vsel %vm2195_vm0, %v1847_v24, 0.0  ;;  %v3069_v16 = vmax.f32 %v3053_v4, 0.0  ;;  %v9195_v4 = vld [vmem:[%s8308_s27 + $0x410] sm:$0xff]  }
  0xa2   : > { %v3054_v5 = vadd.f32 %v8837_v39, %v2407_v49  ;;  %v1816_v61 = vmul.f32 %v9105_v60, %v6182_v13  ;;  %v2416_v62 = vadd.f32 %v2415_v3, %v2414_v17  ;;  %v1832_v46 = vmul.f32 %v9116_v32, %v6214_v52  ;;  %v9205_v49 = vld [vmem:[%s12773_s29 + $0xa] ss:$0 sm:$0xff] }
  0xa3   : > { %v1895_v33 = vmul.f32 %v9176_v42, %v6341_v11  ;;  %v2419_v39 = vsel %vm2195_vm0, %v1863_v59, 0.0  ;;  %v2461_v23 = vsel %vm2195_vm0, %v1768_v0, 0.0  ;;  %v2462_v51 = vsel %vm2195_vm0, %v1784_v21, 0.0 }
  0xa4   : > { %v3070_v36 = vmax.f32 %v3054_v5, 0.0  ;;  %v2418_v13 = vadd.f32 %v2417_v63, %v2416_v62  ;;  %v2464_v52 = vsel %vm2195_vm0, %v1800_v34, 0.0  ;;  %v6534_v7 = vunpack.c.h.bf16 %v9139_v15  ;;  %v9230_v62 = vld [vmem:[%s8308_s27 + $0x490] sm:$0xff]  }
  0xa5   : > { %v1911_v11 = vmul.f32 %v9190_v18, %v6373_v35  ;;  %v2421_v24 = vsel %vm2195_vm0, %v1879_v10, 0.0  ;;  %v2463_v19 = vadd.f32 %v2462_v51, %v2461_v23  ;;  %v1848_v28 = vmul.f32 %v9132_v29, %v6246_v25  ;;  %v9212_v25 = vld [vmem:[%s8308_s27 + $0x450] sm:$0xff]  }
  0xa6   : > { %v3084_v30 = vpack.c.bf16 %v3070_v36, %v3069_v16  ;;  %v2420_v0 = vadd.f32 %v2419_v39, %v2418_v13  ;;  %v2466_v59 = vsel %vm2195_vm0, %v1816_v61, 0.0  ;;  %v6565_v3 = vunpack.c.l.bf16 %v9182_v14  ;;  %v9248_v51 = vld [vmem:[%s8308_s27 + $0x4d0] sm:$0xff]  }
  0xa7   : > { %v1927_v35 = vmul.f32 %v9205_v49, %v6405_v26  ;;  %v2423_v21 = vsel %vm2195_vm0, %v1895_v33, 0.0  ;;  %v2465_v34 = vadd.f32 %v2464_v52, %v2463_v19  ;;  %v6566_v56 = vunpack.c.h.bf16 %v9182_v14  ;;  %v9222_v26 = vld [vmem:[%s12773_s29 + $0xb] ss:$0 sm:$0xff]  ;;  %v7148_v15 = vld [vmem:[%s8308_s27 + $0x690] sm:$0xff]  }
  0xa8   : > { %7384 = vmatmul.mubr.msk.bf16.vlgmr.msra.gmra.mrb[0].mxu1 %vm2195_vm0, %v3084_v30  ;;  %v1864_v17 = vmul.f32 %v9146_v8, %v6278_v48  ;;  %v2422_v10 = vadd.f32 %v2421_v24, %v2420_v0  ;;  %v2468_v63 = vsel %vm2195_vm0, %v1832_v46, 0.0  ;;  %v6597_v5 = vunpack.c.l.bf16 %v9195_v4  ;;  %v9266_v0 = vld [vmem:[%s8308_s27 + $0x510] sm:$0xff]  }
  0xa9   : > { %v1943_v16 = vmul.f32 %v9222_v26, %v6437_v58  ;;  %v2425_v61 = vsel %vm2195_vm0, %v1911_v11, 0.0  ;;  %v2467_v12 = vadd.f32 %v2466_v59, %v2465_v34  ;;  %v6598_v48 = vunpack.c.h.bf16 %v9195_v4  ;;  %v9240_v58 = vld [vmem:[%s12773_s29 + $0xc] ss:$0 sm:$0xff] }
  0xaa   : > { %v1880_v46 = vmul.f32 %v9162_v50, %v6310_v53  ;;  %v2424_v33 = vadd.f32 %v2423_v21, %v2422_v10  ;;  %v2470_v39 = vsel %vm2195_vm0, %v1848_v28, 0.0  ;;  %v6629_v23 = vunpack.c.l.bf16 %v9212_v25 }
  0xab   : > { %v1959_v36 = vmul.f32 %v9240_v58, %v6469_v1  ;;  %v2427_v13 = vsel %vm2195_vm0, %v1927_v35, 0.0  ;;  %v2469_v31 = vadd.f32 %v2468_v63, %v2467_v12  ;;  %v6630_v53 = vunpack.c.h.bf16 %v9212_v25  ;;  %v9258_v1 = vld [vmem:[%s12773_s29 + $0xd] ss:$0 sm:$0xff]  ;;  %v9284_v63 = vld [vmem:[%s8308_s27 + $0x550] sm:$0xff]  }
  0xac   : > { %v1896_v52 = vmul.f32 %v9176_v42, %v6342_v27  ;;  %v2426_v11 = vadd.f32 %v2425_v61, %v2424_v33  ;;  %v2472_v24 = vsel %vm2195_vm0, %v1864_v17, 0.0  ;;  %v6661_v19 = vunpack.c.l.bf16 %v9230_v62 }
  0xad   : > { %v1975_v30 = vmul.f32 %v9258_v1, %v6501_v41  ;;  %v2429_v28 = vsel %vm2195_vm0, %v1943_v16, 0.0  ;;  %v2471_v55 = vadd.f32 %v2470_v39, %v2469_v31  ;;  %v6662_v27 = vunpack.c.h.bf16 %v9230_v62  ;;  %v9276_v41 = vld [vmem:[%s12773_s29 + $0xe] ss:$0 sm:$0xff] }
  0xae   : > { %v1912_v59 = vmul.f32 %v9190_v18, %v6374_v22  ;;  %v2428_v35 = vadd.f32 %v2427_v13, %v2426_v11  ;;  %v2474_v21 = vsel %vm2195_vm0, %v1880_v46, 0.0  ;;  %v6693_v34 = vunpack.c.l.bf16 %v9248_v51  ;;  %v9300_v13 = vld [vmem:[%s8308_s27 + $0x590] sm:$0xff]  }
  0xaf   : > { %v1991_v17 = vmul.f32 %v9276_v41, %v6533_v6  ;;  %v2431_v10 = vsel %vm2195_vm0, %v1959_v36, 0.0  ;;  %v2473_v44 = vadd.f32 %v2472_v24, %v2471_v55  ;;  %v6694_v22 = vunpack.c.h.bf16 %v9248_v51  ;;  %v9294_v6 = vld [vmem:[%s12773_s29 + $0xf] ss:$0 sm:$0xff]  ;;  %v9316_v55 = vld [vmem:[%s8308_s27 + $0x5d0] sm:$0xff]  }
  0xb0   : > { %v1928_v16 = vmul.f32 %v9205_v49, %v6406_v40  ;;  %v2430_v61 = vadd.f32 %v2429_v28, %v2428_v35  ;;  %v2476_v12 = vsel %vm2195_vm0, %v1896_v52, 0.0  ;;  %v6725_v46 = vunpack.c.l.bf16 %v9266_v0 }
  0xb1   : > { %v2007_v33 = vmul.f32 %v9294_v6, %v6565_v3  ;;  %v2433_v39 = vsel %vm2195_vm0, %v1975_v30, 0.0  ;;  %v2475_v36 = vadd.f32 %v2474_v21, %v2473_v44  ;;  %v6726_v43 = vunpack.c.h.bf16 %v9266_v0  ;;  %v9310_v3 = vld [vmem:[%s12773_s29 + $0x10] ss:$0 sm:$0xff]  ;;  %v9416_v0 = vld [vmem:[%s12773_s29 + $0x18] ss:$0 sm:$0xff] }
  0xb2   : > { %v1944_v40 = vmul.f32 %v9222_v26, %v6438_v38  ;;  %v2432_v31 = vadd.f32 %v2431_v10, %v2430_v61  ;;  %v2478_v52 = vsel %vm2195_vm0, %v1912_v59, 0.0  ;;  %v6757_v11 = vunpack.c.l.bf16 %v9284_v63  ;;  %12812 = vst [vmem:[#allocation3_spill] sm:$0xff] %v9416_v0 }
  0xb3   : > { %v2023_v24 = vmul.f32 %v9310_v3, %v6597_v5  ;;  %v2435_v30 = vsel %vm2195_vm0, %v1991_v17, 0.0  ;;  %v2477_v28 = vadd.f32 %v2476_v12, %v2475_v36  ;;  %v6758_v47 = vunpack.c.h.bf16 %v9284_v63  ;;  %v9326_v5 = vld [vmem:[%s12773_s29 + $0x11] ss:$0 sm:$0xff] }
  0xb4   : > { %v1960_v38 = vmul.f32 %v9240_v58, %v6470_v20  ;;  %v2434_v59 = vadd.f32 %v2433_v39, %v2432_v31  ;;  %v2480_v35 = vsel %vm2195_vm0, %v1928_v16, 0.0  ;;  %v6789_v21 = vunpack.c.l.bf16 %v9300_v13  ;;  %v9332_v63 = vld [vmem:[%s8308_s27 + $0x610] sm:$0xff]  }
  0xb5   : > { %v2039_v17 = vmul.f32 %v9326_v5, %v6629_v23  ;;  %v2437_v10 = vsel %vm2195_vm0, %v2007_v33, 0.0  ;;  %v2479_v44 = vadd.f32 %v2478_v52, %v2477_v28  ;;  %v6790_v37 = vunpack.c.h.bf16 %v9300_v13  ;;  %v9342_v23 = vld [vmem:[%s12773_s29 + $0x12] ss:$0 sm:$0xff]  ;;  %v9356_v28 = vld [vmem:[%s12773_s29 + $0x13] ss:$0 sm:$0xff] }
  0xb6   : > { %v1976_v20 = vmul.f32 %v9258_v1, %v6502_v54  ;;  %v2436_v16 = vadd.f32 %v2435_v30, %v2434_v59  ;;  %v2482_v61 = vsel %vm2195_vm0, %v1944_v40, 0.0  ;;  %v6821_v12 = vunpack.c.l.bf16 %v9316_v55  ;;  %v7140_v31 = vld [vmem:[%s8308_s27 + $0x650] sm:$0xff]  }
  0xb7   : > { %v2055_v33 = vmul.f32 %v9342_v23, %v6661_v19  ;;  %v2439_v39 = vsel %vm2195_vm0, %v2023_v24, 0.0  ;;  %v2481_v36 = vadd.f32 %v2480_v35, %v2479_v44  ;;  %v6822_v45 = vunpack.c.h.bf16 %v9316_v55  ;;  %v9369_v44 = vld [vmem:[%s12773_s29 + $0x14] ss:$0 sm:$0xff] }
  0xb8   : > { %v1992_v54 = vmul.f32 %v9276_v41, %v6534_v7  ;;  %v2438_v40 = vadd.f32 %v2437_v10, %v2436_v16  ;;  %v2484_v52 = vsel %vm2195_vm0, %v1960_v38, 0.0  ;;  %v6853_v30 = vunpack.c.l.bf16 %v9332_v63 }
  0xb9   : > { %v2071_v19 = vmul.f32 %v9356_v28, %v6693_v34  ;;  %v2441_v24 = vsel %vm2195_vm0, %v2039_v17, 0.0  ;;  %v2483_v55 = vadd.f32 %v2482_v61, %v2481_v36  ;;  %v6854_v59 = vunpack.c.h.bf16 %v9332_v63 }
  0xba   : > { %v2008_v7 = vmul.f32 %v9294_v6, %v6566_v56  ;;  %v2440_v38 = vadd.f32 %v2439_v39, %v2438_v40  ;;  %v2486_v35 = vsel %vm2195_vm0, %v1976_v20, 0.0  ;;  %v6885_v10 = vunpack.c.l.bf16 %v7140_v31  ;;  %v9380_v39 = vld [vmem:[%s12773_s29 + $0x15] ss:$0 sm:$0xff] }
  0xbb   : > { %v2087_v34 = vmul.f32 %v9369_v44, %v6725_v46  ;;  %v2443_v17 = vsel %vm2195_vm0, %v2055_v33, 0.0  ;;  %v2485_v16 = vadd.f32 %v2484_v52, %v2483_v55  ;;  %v6886_v63 = vunpack.c.h.bf16 %v7140_v31  ;;  %v9394_v52 = vld [vmem:[%s12773_s29 + $0x16] ss:$0 sm:$0xff] }
  0xbc   : > { %v2024_v14 = vmul.f32 %v9310_v3, %v6598_v48  ;;  %v2442_v56 = vadd.f32 %v2441_v24, %v2440_v38  ;;  %v2488_v61 = vsel %vm2195_vm0, %v1992_v54, 0.0  ;;  %v6917_v20 = vunpack.c.l.bf16 %v7148_v15 }
  0xbd   : > { %v2103_v36 = vmul.f32 %v9380_v39, %v6757_v11  ;;  %v2445_v46 = vsel %vm2195_vm0, %v2071_v19, 0.0  ;;  %v2487_v33 = vadd.f32 %v2486_v35, %v2485_v16  ;;  %v6918_v40 = vunpack.c.h.bf16 %v7148_v15 }
  0xbe   : > { %v2040_v4 = vmul.f32 %v9326_v5, %v6630_v53  ;;  %v2444_v48 = vadd.f32 %v2443_v17, %v2442_v56  ;;  %v2490_v31 = vsel %vm2195_vm0, %v2008_v7, 0.0  ;;  %v2056_v54 = vmul.f32 %v9342_v23, %v6662_v27 }
  0xbf   : > { %v2119_v11 = vmul.f32 %v9394_v52, %v6789_v21  ;;  %v2447_v19 = vsel %vm2195_vm0, %v2087_v34, 0.0  ;;  %v2489_v24 = vadd.f32 %v2488_v61, %v2487_v33  ;;  %v2072_v25 = vmul.f32 %v9356_v28, %v6694_v22  ;;  %v9409_v21 = vld [vmem:[%s12773_s29 + $0x17] ss:$0 sm:$0xff]  ;;  %v9432_v34 = vld [vmem:[%s12773_s29 + $0x1a] ss:$0 sm:$0xff] }
  0xc0   : > { %v2088_v62 = vmul.f32 %v9369_v44, %v6726_v43  ;;  %v2446_v53 = vadd.f32 %v2445_v46, %v2444_v48  ;;  %v2492_v27 = vsel %vm2195_vm0, %v2024_v14, 0.0  ;;  %v2104_v55 = vmul.f32 %v9380_v39, %v6758_v47  ;;  %v9422_v43 = vld [vmem:[%s12773_s29 + $0x19] ss:$0 sm:$0xff]  ;;  %12814 = vst [vmem:[#allocation5_spill] sm:$0xff] %v9432_v34 }
  0xc1   : > { %v2135_v15 = vmul.f32 %v9409_v21, %v6821_v12  ;;  %v2449_v51 = vsel %vm2195_vm0, %v2103_v36, 0.0  ;;  %v2491_v7 = vadd.f32 %v2490_v31, %v2489_v24  ;;  %v2151_v22 = vmul.f32 %v9416_v0, %v6853_v30  ;;  %12813 = vst [vmem:[#allocation4_spill] sm:$0xff] %v9422_v43  ;;  %v9449_v48 = vld [vmem:[%s8308_s27 + $0x58] sm:$0xff]  }
  0xc2   : > { %v2167_v47 = vmul.f32 %v9422_v43, %v6885_v10  ;;  %v2448_v38 = vadd.f32 %v2447_v19, %v2446_v53  ;;  %v2494_v12 = vsel %vm2195_vm0, %v2040_v4, 0.0  ;;  %v2120_v35 = vmul.f32 %v9394_v52, %v6790_v37 }
  0xc3   : > { %v2183_v30 = vmul.f32 %v9432_v34, %v6917_v20  ;;  %v2451_v17 = vsel %vm2195_vm0, %v2119_v11, 0.0  ;;  %v2493_v16 = vadd.f32 %v2492_v27, %v2491_v7  ;;  %v2136_v10 = vmul.f32 %v9409_v21, %v6822_v45  ;;  %v9455_v11 = vld [vmem:[%s8308_s27 + $0x98] sm:$0xff]  }
  0xc4   : > { %v2152_v14 = vmul.f32 %v9416_v0, %v6854_v59  ;;  %v2450_v56 = vadd.f32 %v2449_v51, %v2448_v38  ;;  %v2496_v13 = vsel %vm2195_vm0, %v2056_v54, 0.0  ;;  %v2168_v37 = vmul.f32 %v9422_v43, %v6886_v63  ;;  %v9446_v59 = vld [vmem:[%s8308_s27 + $0x18] sm:$0xff]  }
  0xc5   : > { %v2184_v61 = vmul.f32 %v9432_v34, %v6918_v40  ;;  %v2453_v36 = vsel %vm2195_vm0, %v2135_v15, 0.0  ;;  %v2495_v46 = vadd.f32 %v2494_v12, %v2493_v16  ;;  %v2455_v33 = vsel %vm2195_vm0, %v2151_v22, 0.0  ;;  %v9461_v27 = vld [vmem:[%s8308_s27 + $0xd8] sm:$0xff]  }
  0xc6   : > { %v2452_v20 = vadd.f32 %v2451_v17, %v2450_v56  ;;  %v2457_v4 = vsel %vm2195_vm0, %v2167_v47, 0.0  ;;  %v2498_v45 = vsel %vm2195_vm0, %v2072_v25, 0.0  ;;  %v2459_v63 = vsel %vm2195_vm0, %v2183_v30, 0.0  ;;  %v9470_v22 = vld [vmem:[%s8308_s27 + $0x158] sm:$0xff]  }
  0xc7   : > { %v2497_v40 = vadd.f32 %v2496_v13, %v2495_v46  ;;  %v2500_v31 = vsel %vm2195_vm0, %v2088_v62, 0.0  ;;  %v2502_v54 = vsel %vm2195_vm0, %v2104_v55, 0.0  ;;  %v2504_v24 = vsel %vm2195_vm0, %v2120_v35, 0.0  ;;  %v9467_v55 = vld [vmem:[%s8308_s27 + $0x118] sm:$0xff]  }
  0xc8   : > { %v2454_v19 = vadd.f32 %v2453_v36, %v2452_v20  ;;  %v2506_v25 = vsel %vm2195_vm0, %v2136_v10, 0.0  ;;  %v2508_v53 = vsel %vm2195_vm0, %v2152_v14, 0.0  ;;  %v2510_v51 = vsel %vm2195_vm0, %v2168_v37, 0.0  ;;  %v9479_v14 = vld [vmem:[%s8308_s27 + $0x198] sm:$0xff]  }
  0xc9   : > { %v2499_v15 = vadd.f32 %v2498_v45, %v2497_v40  ;;  %v6089_v7 = vunpack.c.l.bf16 %v9446_v59  ;;  %v6121_v62 = vunpack.c.l.bf16 %v9449_v48  ;;  %v2512_v38 = vsel %vm2195_vm0, %v2184_v61, 0.0  ;;  %v9486_v36 = vld [vmem:[%s8308_s27 + $0x1d8] sm:$0xff]  }
  0xca   : > { %v2456_v47 = vadd.f32 %v2455_v33, %v2454_v19  ;;  %v6090_v12 = vunpack.c.h.bf16 %v9446_v59  ;;  %v6153_v35 = vunpack.c.l.bf16 %v9455_v11  ;;  %v6122_v17 = vunpack.c.h.bf16 %v9449_v48  ;;  %v9489_v33 = vld [vmem:[%s8308_s27 + $0x218] sm:$0xff]  }
  0xcb   : > { %v2501_v30 = vadd.f32 %v2500_v31, %v2499_v15  ;;  %v6154_v16 = vunpack.c.h.bf16 %v9455_v11  ;;  %v6185_v10 = vunpack.c.l.bf16 %v9461_v27  ;;  %v6186_v56 = vunpack.c.h.bf16 %v9461_v27  ;;  %v9492_v45 = vld [vmem:[%s8308_s27 + $0x258] sm:$0xff]  }
  0xcc   : > { %v6217_v13 = vunpack.c.l.bf16 %v9467_v55  ;;  %v6249_v61 = vunpack.c.l.bf16 %v9470_v22  ;;  %v2458_v46 = vadd.f32 %v2457_v4, %v2456_v47  ;;  %v1769_v59 = vmul.f32 %v9078_v9, %v6089_v7  ;;  %v9503_v15 = vld [vmem:[%s8308_s27 + $0x298] sm:$0xff]  }
  0xcd   : > { %v2503_v20 = vadd.f32 %v2502_v54, %v2501_v30  ;;  %v1785_v48 = vmul.f32 %v9084_v57, %v6121_v62  ;;  %v6281_v31 = vunpack.c.l.bf16 %v9479_v14  ;;  %v1801_v19 = vmul.f32 %v9090_v2, %v6153_v35  ;;  %v9511_v35 = vld [vmem:[%s8308_s27 + $0x2d8] sm:$0xff]  }
  0xce   : > { %v6313_v54 = vunpack.c.l.bf16 %v9486_v36  ;;  %v1817_v7 = vmul.f32 %v9105_v60, %v6185_v10  ;;  %v6345_v62 = vunpack.c.l.bf16 %v9489_v33  ;;  %v6377_v30 = vunpack.c.l.bf16 %v9492_v45 }
  0xcf   : > { %v2505_v4 = vadd.f32 %v2504_v24, %v2503_v20  ;;  %v1833_v40 = vmul.f32 %v9116_v32, %v6217_v13  ;;  %v2460_v11 = vadd.f32 %v2459_v63, %v2458_v46  ;;  %v9514_v24 = vld [vmem:[%s8308_s27 + $0x318] sm:$0xff]   ;;  %v2514_v20 = vsel %vm2195_vm0, %v1769_v59, 0.0 }
  0xd0   : > { %v2515_v27 = vsel %vm2195_vm0, %v1785_v48, 0.0  ;;  %v6409_v34 = vunpack.c.l.bf16 %v9503_v15  ;;  %v2517_v43 = vsel %vm2195_vm0, %v1801_v19, 0.0  ;;  %v2519_v13 = vsel %vm2195_vm0, %v1817_v7, 0.0 }
  0xd1   : > { %v2507_v37 = vadd.f32 %v2506_v25, %v2505_v4  ;;  %v2516_v47 = vadd.f32 %v2515_v27, %v2514_v20  ;;  %v1849_v25 = vmul.f32 %v9132_v29, %v6249_v61  ;;  %v6441_v46 = vunpack.c.l.bf16 %v9511_v35  ;;  %v9530_v27 = vld [vmem:[%s12795_s28] ss:$0 sm:$0xff] }
  0xd2   : > { %v6473_v48 = vunpack.c.l.bf16 %v9514_v24  ;;  %v1865_v61 = vmul.f32 %v9146_v8, %v6281_v31  ;;  %v2521_v19 = vsel %vm2195_vm0, %v1833_v40, 0.0  ;;  %v1770_v20 = vmul.f32 %v9078_v9, %v6090_v12 }
  0xd3   : > { %v2509_v0 = vadd.f32 %v2508_v53, %v2507_v37  ;;  %v2518_v4 = vadd.f32 %v2517_v43, %v2516_v47  ;;  %v3055_v53 = vadd.f32 %v9530_v27, %v2460_v11  ;;  %v9534_v37 = vld [vmem:[%s8308_s27 + $0x358] sm:$0xff]   ;;  %v1802_v47 = vmul.f32 %v9090_v2, %v6154_v16 }
  0xd4   : > { %v1881_v59 = vmul.f32 %v9162_v50, %v6313_v54  ;;  %v2523_v11 = vsel %vm2195_vm0, %v1849_v25, 0.0  ;;  %v6505_v31 = vunpack.c.l.bf16 %v9534_v37  ;;  %v1818_v40 = vmul.f32 %v9105_v60, %v6186_v56 }
  0xd5   : > { %v2511_v10 = vadd.f32 %v2510_v51, %v2509_v0  ;;  %v1786_v0 = vmul.f32 %v9084_v57, %v6122_v17  ;;  %v2520_v43 = vadd.f32 %v2519_v13, %v2518_v4  ;;  %v3071_v9 = vmax.f32 %v3055_v53, 0.0  ;;  %v9549_v17 = vld [vmem:[%s8308_s27 + $0x398] sm:$0xff]  }
  0xd6   : > { %v2525_v16 = vsel %vm2195_vm0, %v1865_v61, 0.0  ;;  %v12815_v54 = vunpack.c.h.bf16 %v9467_v55  ;;  %v1913_v25 = vmul.f32 %v9190_v18, %v6377_v30  ;;  %v2567_v56 = vsel %vm2195_vm0, %v1770_v20, 0.0  ;;  %v9569_v20 = vld [vmem:[%s8308_s27 + $0x418] sm:$0xff]  }
  0xd7   : > { %v2513_v51 = vadd.f32 %v2512_v38, %v2511_v10  ;;  %v2522_v7 = vadd.f32 %v2521_v19, %v2520_v43  ;;  %v1897_v38 = vmul.f32 %v9176_v42, %v6345_v62  ;;  %v9559_v19 = vld [vmem:[%s8308_s27 + $0x3d8] sm:$0xff]   ;;  %v2527_v53 = vsel %vm2195_vm0, %v1881_v59, 0.0 }
  0xd8   : > { %v1834_v10 = vmul.f32 %v9116_v32, %v12815_v54  ;;  %v2568_v43 = vsel %vm2195_vm0, %v1786_v0, 0.0  ;;  %v2570_v62 = vsel %vm2195_vm0, %v1802_v47, 0.0  ;;  %v6537_v61 = vunpack.c.l.bf16 %v9549_v17 }
  0xd9   : > { %v3056_v12 = vadd.f32 %v9530_v27, %v2513_v51  ;;  %v2524_v13 = vadd.f32 %v2523_v11, %v2522_v7  ;;  %v12816_v55 = vunpack.c.h.bf16 %v9470_v22  ;;  %v2569_v7 = vadd.f32 %v2568_v43, %v2567_v56 }
  0xda   : > { %v2529_v59 = vsel %vm2195_vm0, %v1897_v38, 0.0  ;;  %v2572_v0 = vsel %vm2195_vm0, %v1818_v40, 0.0  ;;  %v6538_v47 = vunpack.c.h.bf16 %v9549_v17  ;;  %v6569_v54 = vunpack.c.l.bf16 %v9559_v19 }
  0xdb   : > { %v3072_v4 = vmax.f32 %v3056_v12, 0.0  ;;  %v1850_v51 = vmul.f32 %v9132_v29, %v12816_v55  ;;  %v2526_v30 = vadd.f32 %v2525_v16, %v2524_v13  ;;  %v1929_v12 = vmul.f32 %v9205_v49, %v6409_v34  ;;  %v9578_v16 = vld [vmem:[%s8308_s27 + $0x458] sm:$0xff]  }
  0xdc   : > { %v2571_v22 = vadd.f32 %v2570_v62, %v2569_v7  ;;  %v1945_v34 = vmul.f32 %v9222_v26, %v6441_v46  ;;  %v2531_v38 = vsel %vm2195_vm0, %v1913_v25, 0.0  ;;  %v2574_v40 = vsel %vm2195_vm0, %v1834_v10, 0.0  ;;  %v9589_v62 = vld [vmem:[%s8308_s27 + $0x498] sm:$0xff]  }
  0xdd   : > { %v3085_v11 = vpack.c.bf16 %v3072_v4, %v3071_v9  ;;  %v2528_v63 = vadd.f32 %v2527_v53, %v2526_v30  ;;  %v12817_v9 = vunpack.c.h.bf16 %v9479_v14  ;;  %v6570_v56 = vunpack.c.h.bf16 %v9559_v19 }
  0xde   : > { %v6601_v4 = vunpack.c.l.bf16 %v9569_v20  ;;  %v2573_v43 = vadd.f32 %v2572_v0, %v2571_v22  ;;  %v12818_v55 = vunpack.c.h.bf16 %v9486_v36  ;;  %v1961_v30 = vmul.f32 %v9240_v58, %v6473_v48 }
  0xdf   : > { %7387 = vmatprep.mubr.msk.bf16.mxu1 %vm2195_vm0, %v3085_v11  ;;  %v1866_v13 = vmul.f32 %v9146_v8, %v12817_v9  ;;  %v2530_v53 = vadd.f32 %v2529_v59, %v2528_v63  ;;  %v2533_v46 = vsel %vm2195_vm0, %v1929_v12, 0.0  ;;  %v2576_v25 = vsel %vm2195_vm0, %v1850_v51, 0.0  ;;  %v9600_v59 = vld [vmem:[%s8308_s27 + $0x4d8] sm:$0xff]  }
  0xe0   : > { %v1882_v14 = vmul.f32 %v9162_v50, %v12818_v55  ;;  %v6633_v7 = vunpack.c.l.bf16 %v9578_v16  ;;  %v2575_v63 = vadd.f32 %v2574_v40, %v2573_v43  ;;  %v12819_v0 = vunpack.c.h.bf16 %v9489_v33  ;;  %v9611_v40 = vld [vmem:[%s8308_s27 + $0x518] sm:$0xff]  }
  0xe1   : > { %v2532_v11 = vadd.f32 %v2531_v38, %v2530_v53  ;;  %v1977_v22 = vmul.f32 %v9258_v1, %v6505_v31  ;;  %v2535_v48 = vsel %vm2195_vm0, %v1945_v34, 0.0  ;;  %v2578_v12 = vsel %vm2195_vm0, %v1866_v13, 0.0 }
  0xe2   : > { %v1898_v36 = vmul.f32 %v9176_v42, %v12819_v0  ;;  %v6665_v9 = vunpack.c.l.bf16 %v9589_v62  ;;  %v2577_v38 = vadd.f32 %v2576_v25, %v2575_v63  ;;  %v12820_v53 = vunpack.c.h.bf16 %v9492_v45  ;;  %v9622_v25 = vld [vmem:[%s8308_s27 + $0x558] sm:$0xff]  }
  0xe3   : > { %v2534_v55 = vadd.f32 %v2533_v46, %v2532_v11  ;;  %v1993_v43 = vmul.f32 %v9276_v41, %v6537_v61  ;;  %v2537_v31 = vsel %vm2195_vm0, %v1961_v30, 0.0  ;;  %v2580_v34 = vsel %vm2195_vm0, %v1882_v14, 0.0 }
  0xe4   : > { %v1914_v33 = vmul.f32 %v9190_v18, %v12820_v53  ;;  %v6697_v0 = vunpack.c.l.bf16 %v9600_v59  ;;  %v2579_v46 = vadd.f32 %v2578_v12, %v2577_v38  ;;  %v12821_v11 = vunpack.c.h.bf16 %v9503_v15  ;;  %v9633_v12 = vld [vmem:[%s8308_s27 + $0x598] sm:$0xff]  }
  0xe5   : > { %v2536_v51 = vadd.f32 %v2535_v48, %v2534_v55  ;;  %v2009_v63 = vmul.f32 %v9294_v6, %v6569_v54  ;;  %v2539_v61 = vsel %vm2195_vm0, %v1977_v22, 0.0  ;;  %v2582_v30 = vsel %vm2195_vm0, %v1898_v36, 0.0 }
  0xe6   : > { %v1930_v45 = vmul.f32 %v9205_v49, %v12821_v11  ;;  %v6729_v53 = vunpack.c.l.bf16 %v9611_v40  ;;  %v2581_v48 = vadd.f32 %v2580_v34, %v2579_v46  ;;  %v12822_v55 = vunpack.c.h.bf16 %v9511_v35 }
  0xe7   : > { %v2538_v13 = vadd.f32 %v2537_v31, %v2536_v51  ;;  %v2025_v38 = vmul.f32 %v9310_v3, %v6601_v4  ;;  %v2541_v54 = vsel %vm2195_vm0, %v1993_v43, 0.0  ;;  %v2584_v22 = vsel %vm2195_vm0, %v1914_v33, 0.0  ;;  %v9644_v31 = vld [vmem:[%s8308_s27 + $0x5d8] sm:$0xff]  }
  0xe8   : > { %v1946_v15 = vmul.f32 %v9222_v26, %v12822_v55  ;;  %v6730_v36 = vunpack.c.h.bf16 %v9611_v40  ;;  %v6761_v11 = vunpack.c.l.bf16 %v9622_v25  ;;  %v2583_v51 = vadd.f32 %v2582_v30, %v2581_v48 }
  0xe9   : > { %v2540_v14 = vadd.f32 %v2539_v61, %v2538_v13  ;;  %v12823_v34 = vunpack.c.h.bf16 %v9514_v24  ;;  %v2041_v46 = vmul.f32 %v9326_v5, %v6633_v7  ;;  %v2543_v4 = vsel %vm2195_vm0, %v2009_v63, 0.0  ;;  %v7133_v61 = vld [vmem:[%s8308_s27 + $0x618] sm:$0xff]  }
  0xea   : > { %v2586_v43 = vsel %vm2195_vm0, %v1930_v45, 0.0  ;;  %v6762_v33 = vunpack.c.h.bf16 %v9622_v25  ;;  %v6793_v40 = vunpack.c.l.bf16 %v9633_v12  ;;  %v2585_v13 = vadd.f32 %v2584_v22, %v2583_v51 }
  0xeb   : > { %v1962_v35 = vmul.f32 %v9240_v58, %v12823_v34  ;;  %v2542_v55 = vadd.f32 %v2541_v54, %v2540_v14  ;;  %v12824_v30 = vunpack.c.h.bf16 %v9534_v37  ;;  %v2057_v48 = vmul.f32 %v9342_v23, %v6665_v9  ;;  %v7141_v14 = vld [vmem:[%s8308_s27 + $0x658] sm:$0xff]  }
  0xec   : > { %v2545_v7 = vsel %vm2195_vm0, %v2025_v38, 0.0  ;;  %v2588_v63 = vsel %vm2195_vm0, %v1946_v15, 0.0  ;;  %v6794_v45 = vunpack.c.h.bf16 %v9633_v12  ;;  %v6825_v25 = vunpack.c.l.bf16 %v9644_v31 }
  0xed   : > { %v1978_v24 = vmul.f32 %v9258_v1, %v12824_v30  ;;  %v2544_v34 = vadd.f32 %v2543_v4, %v2542_v55  ;;  %v2587_v10 = vadd.f32 %v2586_v43, %v2585_v13  ;;  %v1994_v37 = vmul.f32 %v9276_v41, %v6538_v47  ;;  %v7149_v30 = vld [vmem:[%s8308_s27 + $0x698] sm:$0xff]  }
  0xee   : > { %v2073_v54 = vmul.f32 %v9356_v28, %v6697_v0  ;;  %v2547_v9 = vsel %vm2195_vm0, %v2041_v46, 0.0  ;;  %v2590_v22 = vsel %vm2195_vm0, %v1962_v35, 0.0  ;;  %v6826_v38 = vunpack.c.h.bf16 %v9644_v31 }
  0xef   : > { %v6857_v15 = vunpack.c.l.bf16 %v7133_v61  ;;  %v2546_v51 = vadd.f32 %v2545_v7, %v2544_v34  ;;  %v2589_v12 = vadd.f32 %v2588_v63, %v2587_v10  ;;  %v2010_v4 = vmul.f32 %v9294_v6, %v6570_v56 }
  0xf0   : > { %v2089_v17 = vmul.f32 %v9369_v44, %v6729_v53  ;;  %v2549_v47 = vsel %vm2195_vm0, %v2057_v48, 0.0  ;;  %v2592_v0 = vsel %vm2195_vm0, %v1978_v24, 0.0  ;;  %v6858_v43 = vunpack.c.h.bf16 %v7133_v61 }
  0xf1   : > { %v6889_v46 = vunpack.c.l.bf16 %v7141_v14  ;;  %v2548_v55 = vadd.f32 %v2547_v9, %v2546_v51  ;;  %v2591_v35 = vadd.f32 %v2590_v22, %v2589_v12  ;;  %v12825_v31 = vunpack.c.h.bf16 %v9569_v20 }
  0xf2   : > { %v2105_v10 = vmul.f32 %v9380_v39, %v6761_v11  ;;  %v2551_v19 = vsel %vm2195_vm0, %v2073_v54, 0.0  ;;  %v2594_v56 = vsel %vm2195_vm0, %v1994_v37, 0.0  ;;  %v6890_v7 = vunpack.c.h.bf16 %v7141_v14 }
  0xf3   : > { %v2026_v13 = vmul.f32 %v9310_v3, %v12825_v31  ;;  %v6921_v53 = vunpack.c.l.bf16 %v7149_v30  ;;  %v2550_v63 = vadd.f32 %v2549_v47, %v2548_v55  ;;  %v2593_v48 = vadd.f32 %v2592_v0, %v2591_v35  ;;  %v12829_v0 = vld [vmem:[#allocation3_spill] sm:$0xff]  ;;  %v12830_v35 = vld [vmem:[#allocation4_spill] sm:$0xff] }
  0xf4   : > { %v12826_v24 = vunpack.c.h.bf16 %v9578_v16  ;;  %v2121_v34 = vmul.f32 %v9394_v52, %v6793_v40  ;;  %v2553_v20 = vsel %vm2195_vm0, %v2089_v17, 0.0  ;;  %v2596_v9 = vsel %vm2195_vm0, %v2010_v4, 0.0 }
  0xf5   : > { %v6922_v22 = vunpack.c.h.bf16 %v7149_v30  ;;  %v12827_v11 = vunpack.c.h.bf16 %v9589_v62  ;;  %v2552_v37 = vadd.f32 %v2551_v19, %v2550_v63  ;;  %v2595_v14 = vadd.f32 %v2594_v56, %v2593_v48 }
  0xf6   : > { %v2042_v61 = vmul.f32 %v9326_v5, %v12826_v24  ;;  %v12828_v51 = vunpack.c.h.bf16 %v9600_v59  ;;  %v2137_v16 = vmul.f32 %v9409_v21, %v6825_v25  ;;  %v2555_v47 = vsel %vm2195_vm0, %v2105_v10, 0.0  ;;  %v12831_v10 = vld [vmem:[#allocation5_spill] sm:$0xff] }
  0xf7   : > { %v2058_v54 = vmul.f32 %v9342_v23, %v12827_v11  ;;  %v2598_v40 = vsel %vm2195_vm0, %v2026_v13, 0.0  ;;  %v2090_v17 = vmul.f32 %v9369_v44, %v6730_v36  ;;  %v2106_v30 = vmul.f32 %v9380_v39, %v6762_v33 }
  0xf8   : > { %v2074_v12 = vmul.f32 %v9356_v28, %v12828_v51  ;;  %v2554_v4 = vadd.f32 %v2553_v20, %v2552_v37  ;;  %v2597_v62 = vadd.f32 %v2596_v9, %v2595_v14  ;;  %v2153_v55 = vmul.f32 %v12829_v0, %v6857_v15  ;;  %v9717_v20 = vld [vmem:[%s8308_s27 + $0x20] sm:$0xff]  }
  0xf9   : > { %v2169_v31 = vmul.f32 %v12830_v35, %v6889_v46  ;;  %v2557_v59 = vsel %vm2195_vm0, %v2121_v34, 0.0  ;;  %v2600_v19 = vsel %vm2195_vm0, %v2042_v61, 0.0  ;;  %v2122_v25 = vmul.f32 %v9394_v52, %v6794_v45  ;;  %v9725_v37 = vld [vmem:[%s8308_s27 + $0xa0] sm:$0xff]  }
  0xfa   : > { %v2185_v13 = vmul.f32 %v12831_v10, %v6921_v53  ;;  %v2556_v56 = vadd.f32 %v2555_v47, %v2554_v4  ;;  %v2599_v36 = vadd.f32 %v2598_v40, %v2597_v62  ;;  %v2138_v33 = vmul.f32 %v9409_v21, %v6826_v38 }
  0xfb   : > { %v2154_v63 = vmul.f32 %v12829_v0, %v6858_v43  ;;  %v2559_v15 = vsel %vm2195_vm0, %v2137_v16, 0.0  ;;  %v2602_v46 = vsel %vm2195_vm0, %v2058_v54, 0.0  ;;  %v2170_v48 = vmul.f32 %v12830_v35, %v6890_v7  ;;  %v9720_v43 = vld [vmem:[%s8308_s27 + $0x60] sm:$0xff]  }
  0xfc   : > { %v2558_v24 = vadd.f32 %v2557_v59, %v2556_v56  ;;  %v2601_v61 = vadd.f32 %v2600_v19, %v2599_v36  ;;  %v2186_v45 = vmul.f32 %v12831_v10, %v6922_v22  ;;  %v2561_v53 = vsel %vm2195_vm0, %v2153_v55, 0.0  ;;  %v9732_v16 = vld [vmem:[%s8308_s27 + $0xe0] sm:$0xff]  }
  0xfd   : > { %v2563_v34 = vsel %vm2195_vm0, %v2169_v31, 0.0  ;;  %v2604_v38 = vsel %vm2195_vm0, %v2074_v12, 0.0  ;;  %v2565_v7 = vsel %vm2195_vm0, %v2185_v13, 0.0  ;;  %v2606_v54 = vsel %vm2195_vm0, %v2090_v17, 0.0  ;;  %v9737_v17 = vld [vmem:[%s8308_s27 + $0x120] sm:$0xff]  }
  0xfe   : > { %v2560_v9 = vadd.f32 %v2559_v15, %v2558_v24  ;;  %v2603_v11 = vadd.f32 %v2602_v46, %v2601_v61  ;;  %v2608_v22 = vsel %vm2195_vm0, %v2106_v30, 0.0  ;;  %v2610_v14 = vsel %vm2195_vm0, %v2122_v25, 0.0  ;;  %v9740_v55 = vld [vmem:[%s8308_s27 + $0x160] sm:$0xff]  }
  0xff   : > { %v2612_v51 = vsel %vm2195_vm0, %v2138_v33, 0.0  ;;  %v2614_v12 = vsel %vm2195_vm0, %v2154_v63, 0.0  ;;  %v6093_v4 = vunpack.c.l.bf16 %v9717_v20  ;;  %v6125_v62 = vunpack.c.l.bf16 %v9720_v43  ;;  %v9750_v33 = vld [vmem:[%s8308_s27 + $0x1a0] sm:$0xff]  }
 0x100   : > { %v2562_v47 = vadd.f32 %v2561_v53, %v2560_v9  ;;  %v2605_v40 = vadd.f32 %v2604_v38, %v2603_v11  ;;  %v2616_v30 = vsel %vm2195_vm0, %v2170_v48, 0.0  ;;  %v2618_v31 = vsel %vm2195_vm0, %v2186_v45, 0.0  ;;  %v9757_v24 = vld [vmem:[%s8308_s27 + $0x1e0] sm:$0xff]  }
 0x101   : > { %v6094_v59 = vunpack.c.h.bf16 %v9717_v20  ;;  %v6157_v19 = vunpack.c.l.bf16 %v9725_v37  ;;  %v6126_v13 = vunpack.c.h.bf16 %v9720_v43  ;;  %v6158_v56 = vunpack.c.h.bf16 %v9725_v37  ;;  %v9760_v53 = vld [vmem:[%s8308_s27 + $0x220] sm:$0xff]  }
 0x102   : > { %v2607_v25 = vadd.f32 %v2606_v54, %v2605_v40  ;;  %v6189_v36 = vunpack.c.l.bf16 %v9732_v16  ;;  %v6190_v63 = vunpack.c.h.bf16 %v9732_v16  ;;  %v6221_v15 = vunpack.c.l.bf16 %v9737_v17  ;;  %v9763_v38 = vld [vmem:[%s8308_s27 + $0x260] sm:$0xff]  }
 0x103   : > { %v6222_v46 = vunpack.c.h.bf16 %v9737_v17  ;;  %v6253_v48 = vunpack.c.l.bf16 %v9740_v55  ;;  %v2564_v61 = vadd.f32 %v2563_v34, %v2562_v47  ;;  %v12832_v20 = vld [vmem:[#allocation2_spill] sm:$0xff]  ;;  %v1787_v9 = vmul.f32 %v9084_v57, %v6125_v62 }
 0x104   : > { %v2609_v45 = vadd.f32 %v2608_v22, %v2607_v25  ;;  %v1771_v43 = vmul.f32 %v12832_v20, %v6093_v4  ;;  %v6285_v54 = vunpack.c.l.bf16 %v9750_v33  ;;  %v1803_v16 = vmul.f32 %v9090_v2, %v6157_v19  ;;  %v9774_v40 = vld [vmem:[%s8308_s27 + $0x2a0] sm:$0xff]  }
 0x105   : > { %v6317_v22 = vunpack.c.l.bf16 %v9757_v24  ;;  %v1819_v4 = vmul.f32 %v9105_v60, %v6189_v36  ;;  %v6349_v57 = vunpack.c.l.bf16 %v9760_v53  ;;  %v6381_v17 = vunpack.c.l.bf16 %v9763_v38  ;;  %v9782_v2 = vld [vmem:[%s8308_s27 + $0x2e0] sm:$0xff]  }
 0x106   : > { %v2611_v34 = vadd.f32 %v2610_v14, %v2609_v45  ;;  %v1835_v25 = vmul.f32 %v9116_v32, %v6221_v15  ;;  %v2566_v20 = vadd.f32 %v2565_v7, %v2564_v61  ;;  %v9785_v14 = vld [vmem:[%s8308_s27 + $0x320] sm:$0xff]   ;;  %v2620_v19 = vsel %vm2195_vm0, %v1771_v43, 0.0 }
 0x107   : > { %v2621_v45 = vsel %vm2195_vm0, %v1787_v9, 0.0  ;;  %v6413_v36 = vunpack.c.l.bf16 %v9774_v40  ;;  %v2623_v47 = vsel %vm2195_vm0, %v1803_v16, 0.0  ;;  %v1851_v7 = vmul.f32 %v9132_v29, %v6253_v48  ;;  %v9808_v48 = vld [vmem:[%s12773_s29] ss:$0 sm:$0xff] }
 0x108   : > { %v2613_v37 = vadd.f32 %v2612_v51, %v2611_v34  ;;  %v2622_v62 = vadd.f32 %v2621_v45, %v2620_v19  ;;  %v2625_v51 = vsel %vm2195_vm0, %v1819_v4, 0.0  ;;  %v6445_v15 = vunpack.c.l.bf16 %v9782_v2  ;;  %v9800_v19 = vld [vmem:[%s8308_s27 + $0x360] sm:$0xff]  }
 0x109   : > { %v6477_v43 = vunpack.c.l.bf16 %v9785_v14  ;;  %v3057_v60 = vadd.f32 %v9530_v27, %v2566_v20  ;;  %v1772_v16 = vmul.f32 %v9808_v48, %v6094_v59  ;;  %v2629_v59 = vsel %vm2195_vm0, %v1851_v7, 0.0  ;;  %v9835_v20 = vld [vmem:[%s12773_s29 + $0x4] ss:$0 sm:$0xff] }
 0x10a   : > { %v2615_v11 = vadd.f32 %v2614_v12, %v2613_v37  ;;  %v2624_v9 = vadd.f32 %v2623_v47, %v2622_v62  ;;  %v1867_v12 = vmul.f32 %v9146_v8, %v6285_v54  ;;  %v2627_v37 = vsel %vm2195_vm0, %v1835_v25, 0.0  ;;  %v9820_v54 = vld [vmem:[%s12773_s29 + $0x2] ss:$0 sm:$0xff] }
 0x10b   : > { %v1804_v4 = vmul.f32 %v9820_v54, %v6158_v56  ;;  %v1883_v62 = vmul.f32 %v9162_v50, %v6317_v22  ;;  %v6509_v25 = vunpack.c.l.bf16 %v9800_v19  ;;  %v1836_v56 = vmul.f32 %v9835_v20, %v6222_v46  ;;  %v9845_v32 = vld [vmem:[%s8308_s27 + $0x3a0] sm:$0xff]  }
 0x10c   : > { %v2617_v34 = vadd.f32 %v2616_v30, %v2615_v11  ;;  %v9814_v30 = vld [vmem:[%s12773_s29 + $0x1] ss:$0 sm:$0xff]  ;;  %v2626_v47 = vadd.f32 %v2625_v51, %v2624_v9  ;;  %v3073_v45 = vmax.f32 %v3057_v60, 0.0  ;;  %v1899_v7 = vmul.f32 %v9176_v42, %v6349_v57  ;;  %v9853_v57 = vld [vmem:[%s12773_s29 + $0x5] ss:$0 sm:$0xff] }
 0x10d   : > { %v1788_v11 = vmul.f32 %v9814_v30, %v6126_v13  ;;  %v9829_v13 = vld [vmem:[%s12773_s29 + $0x3] ss:$0 sm:$0xff]  ;;  %v2631_v51 = vsel %vm2195_vm0, %v1867_v12, 0.0  ;;  %v1915_v9 = vmul.f32 %v9190_v18, %v6381_v17  ;;  %v2633_v46 = vsel %vm2195_vm0, %v1883_v62, 0.0 }
 0x10e   : > { %v2619_v8 = vadd.f32 %v2618_v31, %v2617_v34  ;;  %v1820_v31 = vmul.f32 %v9829_v13, %v6190_v63  ;;  %v2628_v50 = vadd.f32 %v2627_v37, %v2626_v47  ;;  %v2673_v63 = vsel %vm2195_vm0, %v1772_v16, 0.0  ;;  %v9860_v47 = vld [vmem:[%s8308_s27 + $0x3e0] sm:$0xff]  }
 0x10f   : > { %v2674_v29 = vsel %vm2195_vm0, %v1788_v11, 0.0  ;;  %v2676_v60 = vsel %vm2195_vm0, %v1804_v4, 0.0  ;;  %v6510_v42 = vunpack.c.h.bf16 %v9800_v19  ;;  %v12833_v18 = vunpack.c.h.bf16 %v9740_v55  ;;  %v9868_v55 = vld [vmem:[%s12773_s29 + $0x6] ss:$0 sm:$0xff]  ;;  %v9999_v19 = vld [vmem:[%s12773_s29 + $0xe] ss:$0 sm:$0xff] }
 0x110   : > { %v3058_v22 = vadd.f32 %v9530_v27, %v2619_v8  ;;  %v2630_v34 = vadd.f32 %v2629_v59, %v2628_v50  ;;  %v2675_v37 = vadd.f32 %v2674_v29, %v2673_v63  ;;  %v2678_v16 = vsel %vm2195_vm0, %v1820_v31, 0.0 }
 0x111   : > { %v1852_v17 = vmul.f32 %v9853_v57, %v12833_v18  ;;  %v1931_v29 = vmul.f32 %v9205_v49, %v6413_v36  ;;  %v2635_v8 = vsel %vm2195_vm0, %v1899_v7, 0.0  ;;  %v6541_v62 = vunpack.c.l.bf16 %v9845_v32  ;;  %v9877_v36 = vld [vmem:[%s8308_s27 + $0x420] sm:$0xff]  }
 0x112   : > { %v3074_v61 = vmax.f32 %v3058_v22, 0.0  ;;  %v2632_v12 = vadd.f32 %v2631_v51, %v2630_v34  ;;  %v2677_v4 = vadd.f32 %v2676_v60, %v2675_v37  ;;  %v12834_v59 = vunpack.c.h.bf16 %v9750_v33  ;;  %v9885_v33 = vld [vmem:[%s12773_s29 + $0x7] ss:$0 sm:$0xff] }
 0x113   : > { %v2680_v50 = vsel %vm2195_vm0, %v1836_v56, 0.0  ;;  %v6542_v49 = vunpack.c.h.bf16 %v9845_v32  ;;  %v1947_v22 = vmul.f32 %v9222_v26, %v6445_v15  ;;  %v6573_v51 = vunpack.c.l.bf16 %v9860_v47  ;;  %v9893_v15 = vld [vmem:[%s8308_s27 + $0x460] sm:$0xff]   ;;  %v10015_v32 = vld [vmem:[%s12773_s29 + $0xf] ss:$0 sm:$0xff] }
 0x114   : > { %v3086_v11 = vpack.c.bf16 %v3074_v61, %v3073_v45  ;;  %v1868_v31 = vmul.f32 %v9868_v55, %v12834_v59  ;;  %v2634_v61 = vadd.f32 %v2633_v46, %v2632_v12  ;;  %v2637_v45 = vsel %vm2195_vm0, %v1915_v9, 0.0 }
 0x115   : > { %v2679_v7 = vadd.f32 %v2678_v16, %v2677_v4  ;;  %v12835_v56 = vunpack.c.h.bf16 %v9757_v24  ;;  %v2682_v46 = vsel %vm2195_vm0, %v1852_v17, 0.0  ;;  %v6574_v26 = vunpack.c.h.bf16 %v9860_v47  ;;  %v9903_v24 = vld [vmem:[%s12773_s29 + $0x8] ss:$0 sm:$0xff] }
 0x116   : > { %7388 = vmatmul.mubr.msk.bf16.gmra.mrb[4].mxu1 %vm2195_vm0, %v3086_v11  ;;  %v2636_v63 = vadd.f32 %v2635_v8, %v2634_v61  ;;  %v1963_v9 = vmul.f32 %v9240_v58, %v6477_v43  ;;  %v2639_v37 = vsel %vm2195_vm0, %v1931_v29, 0.0  ;;  %v6605_v18 = vunpack.c.l.bf16 %v9877_v36  ;;  %v9911_v43 = vld [vmem:[%s8308_s27 + $0x4a0] sm:$0xff]  }
 0x117   : > { %v1884_v34 = vmul.f32 %v9885_v33, %v12835_v56  ;;  %v2681_v60 = vadd.f32 %v2680_v50, %v2679_v7  ;;  %v12836_v17 = vunpack.c.h.bf16 %v9760_v53  ;;  %v2684_v11 = vsel %vm2195_vm0, %v1868_v31, 0.0  ;;  %v9919_v53 = vld [vmem:[%s12773_s29 + $0x9] ss:$0 sm:$0xff] }
 0x118   : > { %v2638_v16 = vadd.f32 %v2637_v45, %v2636_v63  ;;  %v6606_v58 = vunpack.c.h.bf16 %v9877_v36  ;;  %v1979_v29 = vmul.f32 %v9258_v1, %v6509_v25  ;;  %v2641_v8 = vsel %vm2195_vm0, %v1947_v22, 0.0  ;;  %v9927_v25 = vld [vmem:[%s8308_s27 + $0x4e0] sm:$0xff]  }
 0x119   : > { %v1900_v12 = vmul.f32 %v9903_v24, %v12836_v17  ;;  %v2683_v4 = vadd.f32 %v2682_v46, %v2681_v60  ;;  %v6637_v59 = vunpack.c.l.bf16 %v9893_v15  ;;  %v12837_v61 = vunpack.c.h.bf16 %v9763_v38  ;;  %v9935_v38 = vld [vmem:[%s12773_s29 + $0xa] ss:$0 sm:$0xff] }
 0x11a   : > { %v2640_v50 = vadd.f32 %v2639_v37, %v2638_v16  ;;  %v2686_v45 = vsel %vm2195_vm0, %v1884_v34, 0.0  ;;  %v6638_v1 = vunpack.c.h.bf16 %v9893_v15  ;;  %v1995_v22 = vmul.f32 %v9276_v41, %v6541_v62  ;;  %v9943_v62 = vld [vmem:[%s8308_s27 + $0x520] sm:$0xff]  }
 0x11b   : > { %v1916_v31 = vmul.f32 %v9919_v53, %v12837_v61  ;;  %v2643_v7 = vsel %vm2195_vm0, %v1963_v9, 0.0  ;;  %v2685_v56 = vadd.f32 %v2684_v11, %v2683_v4  ;;  %v6669_v63 = vunpack.c.l.bf16 %v9911_v43 }
 0x11c   : > { %v12838_v46 = vunpack.c.h.bf16 %v9774_v40  ;;  %v2642_v37 = vadd.f32 %v2641_v8, %v2640_v50  ;;  %v2688_v60 = vsel %vm2195_vm0, %v1900_v12, 0.0  ;;  %v6670_v41 = vunpack.c.h.bf16 %v9911_v43  ;;  %v9951_v40 = vld [vmem:[%s12773_s29 + $0xb] ss:$0 sm:$0xff] }
 0x11d   : > { %v2011_v9 = vmul.f32 %v9294_v6, %v6573_v51  ;;  %v2645_v17 = vsel %vm2195_vm0, %v1979_v29, 0.0  ;;  %v2687_v16 = vadd.f32 %v2686_v45, %v2685_v56  ;;  %v6701_v11 = vunpack.c.l.bf16 %v9927_v25  ;;  %v9959_v51 = vld [vmem:[%s8308_s27 + $0x560] sm:$0xff]  }
 0x11e   : > { %v1932_v34 = vmul.f32 %v9935_v38, %v12838_v46  ;;  %v12839_v8 = vunpack.c.h.bf16 %v9782_v2  ;;  %v2644_v4 = vadd.f32 %v2643_v7, %v2642_v37  ;;  %v2690_v61 = vsel %vm2195_vm0, %v1916_v31, 0.0  ;;  %v9967_v2 = vld [vmem:[%s12773_s29 + $0xc] ss:$0 sm:$0xff] }
 0x11f   : > { %v6702_v6 = vunpack.c.h.bf16 %v9927_v25  ;;  %v2027_v29 = vmul.f32 %v9310_v3, %v6605_v18  ;;  %v2647_v50 = vsel %vm2195_vm0, %v1995_v22, 0.0  ;;  %v2689_v45 = vadd.f32 %v2688_v60, %v2687_v16  ;;  %v9975_v18 = vld [vmem:[%s8308_s27 + $0x5a0] sm:$0xff]  }
 0x120   : > { %v1948_v12 = vmul.f32 %v9951_v40, %v12839_v8  ;;  %v6733_v56 = vunpack.c.l.bf16 %v9943_v62  ;;  %v12840_v7 = vunpack.c.h.bf16 %v9785_v14  ;;  %v2646_v46 = vadd.f32 %v2645_v17, %v2644_v4  ;;  %v9983_v14 = vld [vmem:[%s12773_s29 + $0xd] ss:$0 sm:$0xff] }
 0x121   : > { %v2692_v37 = vsel %vm2195_vm0, %v1932_v34, 0.0  ;;  %v6734_v3 = vunpack.c.h.bf16 %v9943_v62  ;;  %v2043_v22 = vmul.f32 %v9326_v5, %v6637_v59  ;;  %v2649_v60 = vsel %vm2195_vm0, %v2011_v9, 0.0  ;;  %v9991_v59 = vld [vmem:[%s8308_s27 + $0x5e0] sm:$0xff]  }
 0x122   : > { %v1964_v31 = vmul.f32 %v9967_v2, %v12840_v7  ;;  %v2691_v16 = vadd.f32 %v2690_v61, %v2689_v45  ;;  %v6765_v8 = vunpack.c.l.bf16 %v9959_v51  ;;  %v1980_v34 = vmul.f32 %v9983_v14, %v6510_v42 }
 0x123   : > { %v2648_v17 = vadd.f32 %v2647_v50, %v2646_v46  ;;  %v2694_v4 = vsel %vm2195_vm0, %v1948_v12, 0.0  ;;  %v6766_v5 = vunpack.c.h.bf16 %v9959_v51  ;;  %v2059_v9 = vmul.f32 %v9342_v23, %v6669_v63  ;;  %v10007_v63 = vld [vmem:[%s8308_s27 + $0x620] sm:$0xff]  }
 0x124   : > { %v2651_v61 = vsel %vm2195_vm0, %v2027_v29, 0.0  ;;  %v2693_v45 = vadd.f32 %v2692_v37, %v2691_v16  ;;  %v6797_v7 = vunpack.c.l.bf16 %v9975_v18  ;;  %v1996_v42 = vmul.f32 %v9999_v19, %v6542_v49 }
 0x125   : > { %v2650_v12 = vadd.f32 %v2649_v60, %v2648_v17  ;;  %v2696_v51 = vsel %vm2195_vm0, %v1964_v31, 0.0  ;;  %v6798_v23 = vunpack.c.h.bf16 %v9975_v18  ;;  %v2075_v29 = vmul.f32 %v9356_v28, %v6701_v11  ;;  %v7142_v11 = vld [vmem:[%s8308_s27 + $0x660] sm:$0xff]  }
 0x126   : > { %v2653_v50 = vsel %vm2195_vm0, %v2043_v22, 0.0  ;;  %v2695_v46 = vadd.f32 %v2694_v4, %v2693_v45  ;;  %v6829_v37 = vunpack.c.l.bf16 %v9991_v59  ;;  %v2012_v49 = vmul.f32 %v10015_v32, %v6574_v26  ;;  %v10029_v4 = vld [vmem:[%s12773_s29 + $0x10] ss:$0 sm:$0xff] }
 0x127   : > { %v2652_v31 = vadd.f32 %v2651_v61, %v2650_v12  ;;  %v2698_v18 = vsel %vm2195_vm0, %v1980_v34, 0.0  ;;  %v6830_v28 = vunpack.c.h.bf16 %v9991_v59  ;;  %v2091_v22 = vmul.f32 %v9369_v44, %v6733_v56  ;;  %v7150_v44 = vld [vmem:[%s8308_s27 + $0x6a0] sm:$0xff]   ;;  %v10042_v12 = vld [vmem:[%s12773_s29 + $0x11] ss:$0 sm:$0xff] }
 0x128   : > { %v2655_v60 = vsel %vm2195_vm0, %v2059_v9, 0.0  ;;  %v2697_v16 = vadd.f32 %v2696_v51, %v2695_v46  ;;  %v6861_v17 = vunpack.c.l.bf16 %v10007_v63  ;;  %v2028_v47 = vmul.f32 %v10029_v4, %v6606_v58 }
 0x129   : > { %v2654_v26 = vadd.f32 %v2653_v50, %v2652_v31  ;;  %v2700_v34 = vsel %vm2195_vm0, %v1996_v42, 0.0  ;;  %v6862_v59 = vunpack.c.h.bf16 %v10007_v63  ;;  %v2107_v56 = vmul.f32 %v9380_v39, %v6765_v8  ;;  %v10053_v50 = vld [vmem:[%s12773_s29 + $0x12] ss:$0 sm:$0xff] }
 0x12a   : > { %v2657_v9 = vsel %vm2195_vm0, %v2075_v29, 0.0  ;;  %v2699_v61 = vadd.f32 %v2698_v18, %v2697_v16  ;;  %v6893_v45 = vunpack.c.l.bf16 %v7142_v11  ;;  %v2044_v36 = vmul.f32 %v10042_v12, %v6638_v1  ;;  %v10064_v18 = vld [vmem:[%s12773_s29 + $0x13] ss:$0 sm:$0xff] }
 0x12b   : > { %v2656_v58 = vadd.f32 %v2655_v60, %v2654_v26  ;;  %v2702_v42 = vsel %vm2195_vm0, %v2012_v49, 0.0  ;;  %v6894_v51 = vunpack.c.h.bf16 %v7142_v11  ;;  %v2123_v63 = vmul.f32 %v9394_v52, %v6797_v7  ;;  %v10081_v60 = vld [vmem:[%s12773_s29 + $0x15] ss:$0 sm:$0xff] }
 0x12c   : > { %v2659_v39 = vsel %vm2195_vm0, %v2091_v22, 0.0  ;;  %v2701_v8 = vadd.f32 %v2700_v34, %v2699_v61  ;;  %v6925_v29 = vunpack.c.l.bf16 %v7150_v44  ;;  %v2060_v15 = vmul.f32 %v10053_v50, %v6670_v41  ;;  %v10072_v41 = vld [vmem:[%s12773_s29 + $0x14] ss:$0 sm:$0xff] }
 0x12d   : > { %v2658_v1 = vadd.f32 %v2657_v9, %v2656_v58  ;;  %v2704_v46 = vsel %vm2195_vm0, %v2028_v47, 0.0  ;;  %v6926_v49 = vunpack.c.h.bf16 %v7150_v44  ;;  %v2139_v31 = vmul.f32 %v9409_v21, %v6829_v37  ;;  %v10092_v44 = vld [vmem:[%s12773_s29 + $0x16] ss:$0 sm:$0xff] }
 0x12e   : > { %v2661_v52 = vsel %vm2195_vm0, %v2107_v56, 0.0  ;;  %v2703_v7 = vadd.f32 %v2702_v42, %v2701_v8  ;;  %v2076_v43 = vmul.f32 %v10064_v18, %v6702_v6  ;;  %v2092_v37 = vmul.f32 %v10072_v41, %v6734_v3  ;;  %v10103_v8 = vld [vmem:[%s8308_s27 + $0x28] sm:$0xff]  }
 0x12f   : > { %v2660_v11 = vadd.f32 %v2659_v39, %v2658_v1  ;;  %v2706_v22 = vsel %vm2195_vm0, %v2044_v36, 0.0  ;;  %v2108_v25 = vmul.f32 %v10081_v60, %v6766_v5  ;;  %v2155_v6 = vmul.f32 %v12829_v0, %v6861_v17  ;;  %v10118_v1 = vld [vmem:[%s8308_s27 + $0xe8] sm:$0xff]  }
 0x130   : > { %v2663_v16 = vsel %vm2195_vm0, %v2123_v63, 0.0  ;;  %v2705_v47 = vadd.f32 %v2704_v46, %v2703_v7  ;;  %v2171_v26 = vmul.f32 %v12830_v35, %v6893_v45  ;;  %v2187_v62 = vmul.f32 %v12831_v10, %v6925_v29  ;;  %v10124_v7 = vld [vmem:[%s8308_s27 + $0x128] sm:$0xff]  }
 0x131   : > { %v2662_v3 = vadd.f32 %v2661_v52, %v2660_v11  ;;  %v2708_v34 = vsel %vm2195_vm0, %v2060_v15, 0.0  ;;  %v2124_v5 = vmul.f32 %v10092_v44, %v6798_v23  ;;  %v2140_v17 = vmul.f32 %v9409_v21, %v6830_v28  ;;  %v10106_v21 = vld [vmem:[%s8308_s27 + $0x68] sm:$0xff]  }
 0x132   : > { %v2665_v56 = vsel %vm2195_vm0, %v2139_v31, 0.0  ;;  %v2707_v9 = vadd.f32 %v2706_v22, %v2705_v47  ;;  %v2156_v61 = vmul.f32 %v12829_v0, %v6862_v59  ;;  %v2710_v36 = vsel %vm2195_vm0, %v2076_v43, 0.0  ;;  %v10109_v23 = vld [vmem:[%s8308_s27 + $0xa8] sm:$0xff]  }
 0x133   : > { %v2664_v45 = vadd.f32 %v2663_v16, %v2662_v3  ;;  %v2172_v58 = vmul.f32 %v12830_v35, %v6894_v51  ;;  %v2188_v42 = vmul.f32 %v12831_v10, %v6926_v49  ;;  %v2667_v63 = vsel %vm2195_vm0, %v2155_v6, 0.0 }
 0x134   : > { %v2709_v39 = vadd.f32 %v2708_v34, %v2707_v9  ;;  %v2669_v0 = vsel %vm2195_vm0, %v2171_v26, 0.0  ;;  %v2671_v59 = vsel %vm2195_vm0, %v2187_v62, 0.0  ;;  %v2712_v29 = vsel %vm2195_vm0, %v2092_v37, 0.0  ;;  %v10134_v26 = vld [vmem:[%s8308_s27 + $0x168] sm:$0xff]  }
 0x135   : > { %v2666_v28 = vadd.f32 %v2665_v56, %v2664_v45  ;;  %v2714_v10 = vsel %vm2195_vm0, %v2108_v25, 0.0  ;;  %v2716_v51 = vsel %vm2195_vm0, %v2124_v5, 0.0  ;;  %v2718_v15 = vsel %vm2195_vm0, %v2140_v17, 0.0  ;;  %v10137_v62 = vld [vmem:[%s8308_s27 + $0x1a8] sm:$0xff]  }
 0x136   : > { %v2711_v35 = vadd.f32 %v2710_v36, %v2709_v39  ;;  %v6097_v49 = vunpack.c.l.bf16 %v10103_v8  ;;  %v6129_v31 = vunpack.c.l.bf16 %v10106_v21  ;;  %v6161_v52 = vunpack.c.l.bf16 %v10109_v23  ;;  %v10142_v56 = vld [vmem:[%s8308_s27 + $0x1e8] sm:$0xff]  }
 0x137   : > { %v2668_v46 = vadd.f32 %v2667_v63, %v2666_v28  ;;  %v2720_v37 = vsel %vm2195_vm0, %v2156_v61, 0.0  ;;  %v2722_v11 = vsel %vm2195_vm0, %v2172_v58, 0.0  ;;  %v2724_v22 = vsel %vm2195_vm0, %v2188_v42, 0.0  ;;  %v10146_v61 = vld [vmem:[%s8308_s27 + $0x228] sm:$0xff]  }
 0x138   : > { %v2713_v43 = vadd.f32 %v2712_v29, %v2711_v35  ;;  %v6098_v25 = vunpack.c.h.bf16 %v10103_v8  ;;  %v6130_v6 = vunpack.c.h.bf16 %v10106_v21  ;;  %v6162_v16 = vunpack.c.h.bf16 %v10109_v23 }
 0x139   : > { %v6193_v47 = vunpack.c.l.bf16 %v10118_v1  ;;  %v2670_v3 = vadd.f32 %v2669_v0, %v2668_v46  ;;  %v6194_v5 = vunpack.c.h.bf16 %v10118_v1  ;;  %v6225_v17 = vunpack.c.l.bf16 %v10124_v7  ;;  %v10158_v0 = vld [vmem:[%s8308_s27 + $0x268] sm:$0xff]  }
 0x13a   : > { %v2715_v34 = vadd.f32 %v2714_v10, %v2713_v43  ;;  %v6226_v9 = vunpack.c.h.bf16 %v10124_v7  ;;  %v1773_v45 = vmul.f32 %v9808_v48, %v6097_v49  ;;  %v1789_v36 = vmul.f32 %v9814_v30, %v6129_v31  ;;  %v10164_v46 = vld [vmem:[%s8308_s27 + $0x2a8] sm:$0xff]  }
 0x13b   : > { %v1805_v58 = vmul.f32 %v9820_v54, %v6161_v52  ;;  %v6257_v63 = vunpack.c.l.bf16 %v10134_v26  ;;  %v6258_v39 = vunpack.c.h.bf16 %v10134_v26  ;;  %v6289_v8 = vunpack.c.l.bf16 %v10137_v62  ;;  %v10167_v49 = vld [vmem:[%s8308_s27 + $0x2e8] sm:$0xff]  }
 0x13c   : > { %v2717_v42 = vadd.f32 %v2716_v51, %v2715_v34  ;;  %v6290_v21 = vunpack.c.h.bf16 %v10137_v62  ;;  %v6321_v23 = vunpack.c.l.bf16 %v10142_v56  ;;  %v1821_v29 = vmul.f32 %v9829_v13, %v6193_v47  ;;  %v10176_v47 = vld [vmem:[%s8308_s27 + $0x328] sm:$0xff]  }
 0x13d   : > { %v2672_v35 = vadd.f32 %v2671_v59, %v2670_v3  ;;  %v6353_v51 = vunpack.c.l.bf16 %v10146_v61  ;;  %v1837_v31 = vmul.f32 %v9835_v20, %v6225_v17  ;;  %v2726_v52 = vsel %vm2195_vm0, %v1773_v45, 0.0 }
 0x13e   : > { %v2719_v10 = vadd.f32 %v2718_v15, %v2717_v42  ;;  %v2727_v7 = vsel %vm2195_vm0, %v1789_v36, 0.0  ;;  %v2729_v43 = vsel %vm2195_vm0, %v1805_v58, 0.0  ;;  %v6385_v59 = vunpack.c.l.bf16 %v10158_v0  ;;  %v10189_v42 = vld [vmem:[%s8308_s27 + $0x368] sm:$0xff]  }
 0x13f   : > { %v2728_v3 = vadd.f32 %v2727_v7, %v2726_v52  ;;  %v6417_v34 = vunpack.c.l.bf16 %v10164_v46  ;;  %v1853_v17 = vmul.f32 %v9853_v57, %v6257_v63  ;;  %v2731_v45 = vsel %vm2195_vm0, %v1821_v29, 0.0 }
 0x140   : > { %v2721_v26 = vadd.f32 %v2720_v37, %v2719_v10  ;;  %v3059_v58 = vadd.f32 %v9530_v27, %v2672_v35  ;;  %v6449_v37 = vunpack.c.l.bf16 %v10167_v49  ;;  %v6450_v15 = vunpack.c.h.bf16 %v10167_v49 }
 0x141   : > { %v2730_v10 = vadd.f32 %v2729_v43, %v2728_v3  ;;  %v6481_v1 = vunpack.c.l.bf16 %v10176_v47  ;;  %v1869_v52 = vmul.f32 %v9868_v55, %v6289_v8  ;;  %v2733_v7 = vsel %vm2195_vm0, %v1837_v31, 0.0 }
 0x142   : > { %v2723_v36 = vadd.f32 %v2722_v11, %v2721_v26  ;;  %v1774_v63 = vmul.f32 %v9808_v48, %v6098_v25  ;;  %v1790_v11 = vmul.f32 %v9814_v30, %v6130_v6  ;;  %v1806_v43 = vmul.f32 %v9820_v54, %v6162_v16 }
 0x143   : > { %v2732_v29 = vadd.f32 %v2731_v45, %v2730_v10  ;;  %v1885_v26 = vmul.f32 %v9885_v33, %v6321_v23  ;;  %v2735_v3 = vsel %vm2195_vm0, %v1853_v17, 0.0  ;;  %v3075_v31 = vmax.f32 %v3059_v58, 0.0 }
 0x144   : > { %v2725_v28 = vadd.f32 %v2724_v22, %v2723_v36  ;;  %v1822_v22 = vmul.f32 %v9829_v13, %v6194_v5  ;;  %v6513_v25 = vunpack.c.l.bf16 %v10189_v42  ;;  %v1838_v6 = vmul.f32 %v9835_v20, %v6226_v9 }
 0x145   : > { %v2734_v36 = vadd.f32 %v2733_v7, %v2732_v29  ;;  %v1901_v45 = vmul.f32 %v9903_v24, %v6353_v51  ;;  %v2737_v10 = vsel %vm2195_vm0, %v1869_v52, 0.0  ;;  %v2779_v23 = vsel %vm2195_vm0, %v1774_v63, 0.0 }
 0x146   : > { %v3060_v8 = vadd.f32 %v9530_v27, %v2725_v28  ;;  %v2780_v17 = vsel %vm2195_vm0, %v1790_v11, 0.0  ;;  %v10206_v27 = vld [vmem:[%s8308_s27 + $0x3a8] sm:$0xff]   ;;  %v1917_v5 = vmul.f32 %v9919_v53, %v6385_v59  ;;  %v2739_v28 = vsel %vm2195_vm0, %v1885_v26, 0.0 }
 0x147   : > { %v2736_v35 = vadd.f32 %v2735_v3, %v2734_v36  ;;  %v2781_v58 = vadd.f32 %v2780_v17, %v2779_v23  ;;  %v2782_v9 = vsel %vm2195_vm0, %v1806_v43, 0.0  ;;  %v1854_v7 = vmul.f32 %v9853_v57, %v6258_v39  ;;  %v10215_v3 = vld [vmem:[%s8308_s27 + $0x3e8] sm:$0xff]  }
 0x148   : > { %v3076_v16 = vmax.f32 %v3060_v8, 0.0  ;;  %v2784_v29 = vsel %vm2195_vm0, %v1822_v22, 0.0  ;;  %v6514_v63 = vunpack.c.h.bf16 %v10189_v42  ;;  %v1933_v11 = vmul.f32 %v9935_v38, %v6417_v34  ;;  %v10227_v22 = vld [vmem:[%s8308_s27 + $0x428] sm:$0xff]  }
 0x149   : > { %v2738_v52 = vadd.f32 %v2737_v10, %v2736_v35  ;;  %v2741_v59 = vsel %vm2195_vm0, %v1901_v45, 0.0  ;;  %v2783_v8 = vadd.f32 %v2782_v9, %v2781_v58  ;;  %v6545_v43 = vunpack.c.l.bf16 %v10206_v27  ;;  %v10238_v17 = vld [vmem:[%s8308_s27 + $0x468] sm:$0xff]  }
 0x14a   : > { %v3087_v51 = vpack.c.bf16 %v3076_v16, %v3075_v31  ;;  %v1870_v39 = vmul.f32 %v9868_v55, %v6290_v21  ;;  %v2786_v26 = vsel %vm2195_vm0, %v1838_v6, 0.0  ;;  %v6546_v31 = vunpack.c.h.bf16 %v10206_v27 }
 0x14b   : > { %v2740_v35 = vadd.f32 %v2739_v28, %v2738_v52  ;;  %v1949_v34 = vmul.f32 %v9951_v40, %v6449_v37  ;;  %v2743_v36 = vsel %vm2195_vm0, %v1917_v5, 0.0  ;;  %v2785_v45 = vadd.f32 %v2784_v29, %v2783_v8  ;;  %v10249_v29 = vld [vmem:[%s8308_s27 + $0x4a8] sm:$0xff]  }
 0x14c   : > { %7391 = vmatprep.mubr.msk.bf16.mxu1 %vm2195_vm0, %v3087_v51  ;;  %v6577_v10 = vunpack.c.l.bf16 %v10215_v3  ;;  %v12841_v16 = vunpack.c.h.bf16 %v10142_v56  ;;  %v2788_v23 = vsel %vm2195_vm0, %v1854_v7, 0.0  ;;  %v6578_v6 = vunpack.c.h.bf16 %v10215_v3 }
 0x14d   : > { %v2742_v21 = vadd.f32 %v2741_v59, %v2740_v35  ;;  %v1965_v28 = vmul.f32 %v9967_v2, %v6481_v1  ;;  %v2745_v37 = vsel %vm2195_vm0, %v1933_v11, 0.0  ;;  %v2787_v5 = vadd.f32 %v2786_v26, %v2785_v45  ;;  %v10260_v45 = vld [vmem:[%s8308_s27 + $0x4e8] sm:$0xff]  }
 0x14e   : > { %v1886_v62 = vmul.f32 %v9885_v33, %v12841_v16  ;;  %v6609_v58 = vunpack.c.l.bf16 %v10227_v22  ;;  %v12842_v9 = vunpack.c.h.bf16 %v10146_v61  ;;  %v2790_v52 = vsel %vm2195_vm0, %v1870_v39, 0.0 }
 0x14f   : > { %v2744_v51 = vadd.f32 %v2743_v36, %v2742_v21  ;;  %v6610_v7 = vunpack.c.h.bf16 %v10227_v22  ;;  %v1981_v59 = vmul.f32 %v9983_v14, %v6513_v25  ;;  %v2747_v1 = vsel %vm2195_vm0, %v1949_v34, 0.0 }
 0x150   : > { %v1902_v56 = vmul.f32 %v9903_v24, %v12842_v9  ;;  %v2789_v11 = vadd.f32 %v2788_v23, %v2787_v5  ;;  %v6641_v8 = vunpack.c.l.bf16 %v10238_v17  ;;  %v12843_v35 = vunpack.c.h.bf16 %v10158_v0  ;;  %v10271_v9 = vld [vmem:[%s8308_s27 + $0x528] sm:$0xff]  }
 0x151   : > { %v2746_v26 = vadd.f32 %v2745_v37, %v2744_v51  ;;  %v2792_v36 = vsel %vm2195_vm0, %v1886_v62, 0.0  ;;  %v6642_v39 = vunpack.c.h.bf16 %v10238_v17  ;;  %v1997_v16 = vmul.f32 %v9999_v19, %v6545_v43 }
 0x152   : > { %v1918_v61 = vmul.f32 %v9919_v53, %v12843_v35  ;;  %v2749_v25 = vsel %vm2195_vm0, %v1965_v28, 0.0  ;;  %v2791_v34 = vadd.f32 %v2790_v52, %v2789_v11  ;;  %v6673_v21 = vunpack.c.l.bf16 %v10249_v29  ;;  %v10282_v35 = vld [vmem:[%s8308_s27 + $0x568] sm:$0xff]  }
 0x153   : > { %v12844_v23 = vunpack.c.h.bf16 %v10164_v46  ;;  %v2748_v5 = vadd.f32 %v2747_v1, %v2746_v26  ;;  %v2794_v37 = vsel %vm2195_vm0, %v1902_v56, 0.0  ;;  %v6674_v62 = vunpack.c.h.bf16 %v10249_v29 }
 0x154   : > { %v2013_v51 = vmul.f32 %v10015_v32, %v6577_v10  ;;  %v2751_v43 = vsel %vm2195_vm0, %v1981_v59, 0.0  ;;  %v2793_v28 = vadd.f32 %v2792_v36, %v2791_v34  ;;  %v6705_v52 = vunpack.c.l.bf16 %v10260_v45 }
 0x155   : > { %v1934_v0 = vmul.f32 %v9935_v38, %v12844_v23  ;;  %v1950_v46 = vmul.f32 %v9951_v40, %v6450_v15  ;;  %v2750_v11 = vadd.f32 %v2749_v25, %v2748_v5  ;;  %v2796_v1 = vsel %vm2195_vm0, %v1918_v61, 0.0  ;;  %v10293_v23 = vld [vmem:[%s8308_s27 + $0x5a8] sm:$0xff]  }
 0x156   : > { %v6706_v56 = vunpack.c.h.bf16 %v10260_v45  ;;  %v2029_v26 = vmul.f32 %v10029_v4, %v6609_v58  ;;  %v2753_v10 = vsel %vm2195_vm0, %v1997_v16, 0.0  ;;  %v2795_v59 = vadd.f32 %v2794_v37, %v2793_v28 }
 0x157   : > { %v6737_v36 = vunpack.c.l.bf16 %v10271_v9  ;;  %v12845_v34 = vunpack.c.h.bf16 %v10176_v47  ;;  %v2752_v15 = vadd.f32 %v2751_v43, %v2750_v11  ;;  %v2798_v25 = vsel %vm2195_vm0, %v1934_v0, 0.0 }
 0x158   : > { %v6738_v61 = vunpack.c.h.bf16 %v10271_v9  ;;  %v2045_v5 = vmul.f32 %v10042_v12, %v6641_v8  ;;  %v2755_v58 = vsel %vm2195_vm0, %v2013_v51, 0.0  ;;  %v2797_v16 = vadd.f32 %v2796_v1, %v2795_v59  ;;  %v10304_v9 = vld [vmem:[%s8308_s27 + $0x5e8] sm:$0xff]  }
 0x159   : > { %v1966_v49 = vmul.f32 %v9967_v2, %v12845_v34  ;;  %v6769_v37 = vunpack.c.l.bf16 %v10282_v35  ;;  %v1982_v47 = vmul.f32 %v9983_v14, %v6514_v63  ;;  %v2754_v28 = vadd.f32 %v2753_v10, %v2752_v15 }
 0x15a   : > { %v2800_v43 = vsel %vm2195_vm0, %v1950_v46, 0.0  ;;  %v6770_v0 = vunpack.c.h.bf16 %v10282_v35  ;;  %v2061_v11 = vmul.f32 %v10053_v50, %v6673_v21  ;;  %v2757_v8 = vsel %vm2195_vm0, %v2029_v26, 0.0  ;;  %v7135_v35 = vld [vmem:[%s8308_s27 + $0x628] sm:$0xff]  }
 0x15b   : > { %v2799_v51 = vadd.f32 %v2798_v25, %v2797_v16  ;;  %v6801_v1 = vunpack.c.l.bf16 %v10293_v23  ;;  %v1998_v42 = vmul.f32 %v9999_v19, %v6546_v31  ;;  %v2756_v63 = vadd.f32 %v2755_v58, %v2754_v28  ;;  %v7143_v25 = vld [vmem:[%s8308_s27 + $0x668] sm:$0xff]  }
 0x15c   : > { %v2802_v10 = vsel %vm2195_vm0, %v1966_v49, 0.0  ;;  %v6802_v46 = vunpack.c.h.bf16 %v10293_v23  ;;  %v2077_v59 = vmul.f32 %v10064_v18, %v6705_v52  ;;  %v2759_v21 = vsel %vm2195_vm0, %v2045_v5, 0.0 }
 0x15d   : > { %v2801_v26 = vadd.f32 %v2800_v43, %v2799_v51  ;;  %v6833_v34 = vunpack.c.l.bf16 %v10304_v9  ;;  %v2014_v27 = vmul.f32 %v10015_v32, %v6578_v6  ;;  %v2758_v15 = vadd.f32 %v2757_v8, %v2756_v63  ;;  %v7151_v43 = vld [vmem:[%s8308_s27 + $0x6a8] sm:$0xff]  }
 0x15e   : > { %v2804_v31 = vsel %vm2195_vm0, %v1982_v47, 0.0  ;;  %v6834_v49 = vunpack.c.h.bf16 %v10304_v9  ;;  %v2093_v23 = vmul.f32 %v10072_v41, %v6737_v36  ;;  %v2761_v52 = vsel %vm2195_vm0, %v2061_v11, 0.0 }
 0x15f   : > { %v2803_v58 = vadd.f32 %v2802_v10, %v2801_v26  ;;  %v6865_v5 = vunpack.c.l.bf16 %v7135_v35  ;;  %v2030_v16 = vmul.f32 %v10029_v4, %v6610_v7  ;;  %v2760_v28 = vadd.f32 %v2759_v21, %v2758_v15 }
 0x160   : > { %v2806_v3 = vsel %vm2195_vm0, %v1998_v42, 0.0  ;;  %v6866_v6 = vunpack.c.h.bf16 %v7135_v35  ;;  %v2109_v47 = vmul.f32 %v10081_v60, %v6769_v37  ;;  %v2763_v9 = vsel %vm2195_vm0, %v2077_v59, 0.0 }
 0x161   : > { %v2805_v8 = vadd.f32 %v2804_v31, %v2803_v58  ;;  %v6897_v51 = vunpack.c.l.bf16 %v7143_v25  ;;  %v2046_v36 = vmul.f32 %v10042_v12, %v6642_v39  ;;  %v2762_v11 = vadd.f32 %v2761_v52, %v2760_v28  ;;  %v10346_v39 = vld [vmem:[%s12773_s29 + $0x17] ss:$0 sm:$0xff] }
 0x162   : > { %v2808_v22 = vsel %vm2195_vm0, %v2014_v27, 0.0  ;;  %v6898_v63 = vunpack.c.h.bf16 %v7143_v25  ;;  %v2125_v7 = vmul.f32 %v10092_v44, %v6801_v1  ;;  %v2765_v42 = vsel %vm2195_vm0, %v2093_v23, 0.0  ;;  %v10358_v25 = vld [vmem:[%s12773_s29 + $0x18] ss:$0 sm:$0xff] }
 0x163   : > { %v2807_v10 = vadd.f32 %v2806_v3, %v2805_v8  ;;  %v6929_v35 = vunpack.c.l.bf16 %v7151_v43  ;;  %v2062_v37 = vmul.f32 %v10053_v50, %v6674_v62  ;;  %v2764_v59 = vadd.f32 %v2763_v9, %v2762_v11  ;;  %v10383_v8 = vld [vmem:[%s8308_s27 + $0x30] sm:$0xff]  }
 0x164   : > { %v2810_v21 = vsel %vm2195_vm0, %v2030_v16, 0.0  ;;  %v6930_v17 = vunpack.c.h.bf16 %v7151_v43  ;;  %v2141_v26 = vmul.f32 %v10346_v39, %v6833_v34  ;;  %v2767_v1 = vsel %vm2195_vm0, %v2109_v47, 0.0  ;;  %v10364_v34 = vld [vmem:[%s12773_s29 + $0x19] ss:$0 sm:$0xff]  ;;  %v10392_v11 = vld [vmem:[%s8308_s27 + $0xb0] sm:$0xff]  }
 0x165   : > { %v2809_v27 = vadd.f32 %v2808_v22, %v2807_v10  ;;  %v2078_v29 = vmul.f32 %v10064_v18, %v6706_v56  ;;  %v2094_v62 = vmul.f32 %v10072_v41, %v6738_v61  ;;  %v2766_v15 = vadd.f32 %v2765_v42, %v2764_v59  ;;  %v10372_v61 = vld [vmem:[%s12773_s29 + $0x1a] ss:$0 sm:$0xff]  ;;  %v10401_v59 = vld [vmem:[%s8308_s27 + $0xf0] sm:$0xff]  }
 0x166   : > { %v2812_v31 = vsel %vm2195_vm0, %v2046_v36, 0.0  ;;  %v2157_v23 = vmul.f32 %v10358_v25, %v6865_v5  ;;  %v2173_v45 = vmul.f32 %v10364_v34, %v6897_v51  ;;  %v2769_v18 = vsel %vm2195_vm0, %v2125_v7, 0.0 }
 0x167   : > { %v2811_v41 = vadd.f32 %v2810_v21, %v2809_v27  ;;  %v2110_v56 = vmul.f32 %v10081_v60, %v6770_v0  ;;  %v2189_v52 = vmul.f32 %v10372_v61, %v6929_v35  ;;  %v2768_v58 = vadd.f32 %v2767_v1, %v2766_v15  ;;  %v10407_v27 = vld [vmem:[%s8308_s27 + $0x130] sm:$0xff]  }
 0x168   : > { %v2814_v5 = vsel %vm2195_vm0, %v2062_v37, 0.0  ;;  %v2126_v16 = vmul.f32 %v10092_v44, %v6802_v46  ;;  %v2142_v28 = vmul.f32 %v10346_v39, %v6834_v49  ;;  %v2771_v3 = vsel %vm2195_vm0, %v2141_v26, 0.0  ;;  %v10389_v49 = vld [vmem:[%s8308_s27 + $0x70] sm:$0xff]  }
 0x169   : > { %v2813_v43 = vadd.f32 %v2812_v31, %v2811_v41  ;;  %v2158_v60 = vmul.f32 %v10358_v25, %v6866_v6  ;;  %v2174_v0 = vmul.f32 %v10364_v34, %v6898_v63  ;;  %v2770_v47 = vadd.f32 %v2769_v18, %v2768_v58  ;;  %v10425_v58 = vld [vmem:[%s8308_s27 + $0x1f0] sm:$0xff]  }
 0x16a   : > { %v2816_v9 = vsel %vm2195_vm0, %v2078_v29, 0.0  ;;  %v2190_v51 = vmul.f32 %v10372_v61, %v6930_v17  ;;  %v2773_v36 = vsel %vm2195_vm0, %v2157_v23, 0.0  ;;  %v2775_v44 = vsel %vm2195_vm0, %v2173_v45, 0.0  ;;  %v10415_v23 = vld [vmem:[%s8308_s27 + $0x170] sm:$0xff]  }
 0x16b   : > { %v2815_v46 = vadd.f32 %v2814_v5, %v2813_v43  ;;  %v2772_v6 = vadd.f32 %v2771_v3, %v2770_v47  ;;  %v2777_v22 = vsel %vm2195_vm0, %v2189_v52, 0.0  ;;  %v2818_v63 = vsel %vm2195_vm0, %v2094_v62, 0.0  ;;  %v10422_v52 = vld [vmem:[%s8308_s27 + $0x1b0] sm:$0xff]  }
 0x16c   : > { %v2820_v7 = vsel %vm2195_vm0, %v2110_v56, 0.0  ;;  %v2822_v10 = vsel %vm2195_vm0, %v2126_v16, 0.0  ;;  %v2824_v35 = vsel %vm2195_vm0, %v2142_v28, 0.0  ;;  %v6101_v37 = vunpack.c.l.bf16 %v10383_v8  ;;  %v10429_v3 = vld [vmem:[%s8308_s27 + $0x230] sm:$0xff]  }
 0x16d   : > { %v2817_v42 = vadd.f32 %v2816_v9, %v2815_v46  ;;  %v2774_v21 = vadd.f32 %v2773_v36, %v2772_v6  ;;  %v2826_v17 = vsel %vm2195_vm0, %v2158_v60, 0.0  ;;  %v6133_v26 = vunpack.c.l.bf16 %v10389_v49  ;;  %v7876_v60 = vld [vmem:[%s12846_s24] sm:$0xff]   ;;  %v7879_v46 = vld [vmem:[%s12847_s1 + $0x8] sm:$0xff]  }
 0x16e   : > { %v6165_v1 = vunpack.c.l.bf16 %v10392_v11  ;;  %v2828_v62 = vsel %vm2195_vm0, %v2174_v0, 0.0  ;;  %v10411_v15 = vsel %vm2195_vm0, %v2190_v51, 0.0  ;;  %v6102_v31 = vunpack.c.h.bf16 %v10383_v8  ;;  %v7877_v0 = vld [vmem:[%s12847_s1] sm:$0xff]   ;;  %7399 = vmatprep.subr.bf16.mxu1 %v7876_v60 }
 0x16f   : > { %v2819_v29 = vadd.f32 %v2818_v63, %v2817_v42  ;;  %v6134_v45 = vunpack.c.h.bf16 %v10389_v49  ;;  %v6166_v18 = vunpack.c.h.bf16 %v10392_v11  ;;  %v6197_v41 = vunpack.c.l.bf16 %v10401_v59  ;;  %7431 = vmatprep.subr.bf16.mxu0 %v7877_v0  ;;  %v10463_v42 = vld [vmem:[%s8308_s27 + $0x2f0] sm:$0xff]   ;;  %7400 = vmatpush3.bf16.msra.mxu1 %v7876_v60 }
 0x170   : > { %v2776_v5 = vadd.f32 %v2775_v44, %v2774_v21  ;;  %v6229_v28 = vunpack.c.l.bf16 %v10407_v27  ;;  %v1775_v43 = vmul.f32 %v9808_v48, %v6101_v37  ;;  %v6261_v9 = vunpack.c.l.bf16 %v10415_v23  ;;  %v7878_v44 = vld [vmem:[%s12846_s24 + $0x8] sm:$0xff]   ;;  %v10452_v37 = vld [vmem:[%s8308_s27 + $0x270] sm:$0xff]   ;;  %7432 = vmatpush3.bf16.msra.mxu0 %v7877_v0 }
 0x171   : > { %v2821_v16 = vadd.f32 %v2820_v7, %v2819_v29  ;;  %v1791_v51 = vmul.f32 %v9814_v30, %v6133_v26  ;;  %v1807_v36 = vmul.f32 %v9820_v54, %v6165_v1  ;;  %v6293_v7 = vunpack.c.l.bf16 %v10422_v52  ;;  %v10458_v1 = vld [vmem:[%s8308_s27 + $0x2b0] sm:$0xff]   ;;  %7401 = vmatprep.subr.bf16.mxu1 %v7878_v44  ;;  %7433 = vmatprep.subr.bf16.mxu0 %v7879_v46 }
 0x172   : > { %v6325_v30 = vunpack.c.l.bf16 %v10425_v58  ;;  %v1823_v29 = vmul.f32 %v9829_v13, %v6197_v41  ;;  %v2832_v47 = vsel %vm2195_vm0, %v1775_v43, 0.0  ;;  %v6389_v21 = vunpack.c.l.bf16 %v10452_v37  ;;  %v10493_v63 = vld [vmem:[%s8308_s27 + $0x370] sm:$0xff]  }
 0x173   : > { %v2823_v6 = vadd.f32 %v2822_v10, %v2821_v16  ;;  %v2778_v10 = vadd.f32 %v2777_v22, %v2776_v5  ;;  %v1839_v26 = vmul.f32 %v9835_v20, %v6229_v28  ;;  %v2833_v56 = vsel %vm2195_vm0, %v1791_v51, 0.0  ;;  %v7880_v22 = vld [vmem:[%s12846_s24 + $0x10] sm:$0xff]   ;;  %7402 = vmatpush3.bf16.msra.mxu1 %v7878_v44  ;;  %v7883_v44 = vld [vmem:[%s12847_s1 + $0x18] sm:$0xff]  }
 0x174   : > { %v2835_v13 = vsel %vm2195_vm0, %v1807_v36, 0.0  ;;  %v6421_v20 = vunpack.c.l.bf16 %v10458_v1  ;;  %v10479_v28 = vld [vmem:[%s8308_s27 + $0x330] sm:$0xff]   ;;  %v2834_v43 = vadd.f32 %v2833_v56, %v2832_v47  ;;  %v6422_v60 = vunpack.c.h.bf16 %v10458_v1  ;;  %7434 = vmatpush3.bf16.msra.mxu0 %v7879_v46  ;;  %7403 = vmatprep.subr.bf16.mxu1 %v7880_v22  ;;  %v10698_v1 = vld [vmem:[%s12773_s29 + $0xb] ss:$0 sm:$0xff] }
 0x175   : > { %v2825_v16 = vadd.f32 %v2824_v35, %v2823_v6  ;;  %v7881_v35 = vld [vmem:[%s12847_s1 + $0x10] sm:$0xff]   ;;  %v6453_v0 = vunpack.c.l.bf16 %v10463_v42  ;;  %v1855_v51 = vmul.f32 %v9853_v57, %v6261_v9  ;;  %v2837_v36 = vsel %vm2195_vm0, %v1823_v29, 0.0  ;;  %v7882_v29 = vld [vmem:[%s12846_s24 + $0x18] sm:$0xff]  }
 0x176   : > { %v2836_v56 = vadd.f32 %v2835_v13, %v2834_v43  ;;  %v6485_v47 = vunpack.c.l.bf16 %v10479_v28  ;;  %v1776_v57 = vmul.f32 %v9808_v48, %v6102_v31  ;;  %v2839_v9 = vsel %vm2195_vm0, %v1839_v26, 0.0  ;;  %7435 = vmatprep.subr.bf16.mxu0 %v7881_v35  ;;  %v10511_v48 = vld [vmem:[%s12773_s29 + $0x1] ss:$0 sm:$0xff]  ;;  %v10570_v5 = vld [vmem:[%s8308_s27 + $0x3f0] sm:$0xff]  }
 0x177   : > { %v2827_v41 = vadd.f32 %v2826_v17, %v2825_v16  ;;  %v10488_v17 = vld [vmem:[%s12795_s28] ss:$0 sm:$0xff]  ;;  %v1808_v8 = vmul.f32 %v9820_v54, %v6166_v18  ;;  %v2841_v13 = vsel %vm2195_vm0, %v1855_v51, 0.0  ;;  %v10531_v54 = vld [vmem:[%s12773_s29 + $0x3] ss:$0 sm:$0xff]  ;;  %v12848_v11 = vunpack.c.h.bf16 %v10401_v59  ;;  %7404 = vmatpush3.bf16.msra.mxu1 %v7880_v22 }
 0x178   : > { %v3061_v16 = vadd.f32 %v10488_v17, %v2778_v10  ;;  %v2838_v31 = vadd.f32 %v2837_v36, %v2836_v56  ;;  %v1887_v10 = vmul.f32 %v9885_v33, %v6325_v30  ;;  %7436 = vmatpush3.bf16.msra.mxu0 %v7881_v35  ;;  %v10541_v30 = vld [vmem:[%s12773_s29 + $0x4] ss:$0 sm:$0xff]  ;;  %v12849_v51 = vunpack.c.h.bf16 %v10407_v27  ;;  %7405 = vmatprep.subr.bf16.mxu1 %v7882_v29 }
 0x179   : > { %v2829_v6 = vadd.f32 %v2828_v62, %v2827_v41  ;;  %v1871_v62 = vmul.f32 %v9868_v55, %v6293_v7  ;;  %v1792_v55 = vmul.f32 %v10511_v48, %v6134_v45  ;;  %v1824_v18 = vmul.f32 %v10531_v54, %v12848_v11  ;;  %7437 = vmatprep.subr.bf16.mxu0 %v7883_v44  ;;  %v7884_v35 = vld [vmem:[%s12846_s24 + $0x20] sm:$0xff]  }
 0x17a   : > { %v3077_v45 = vmax.f32 %v3061_v16, 0.0  ;;  %v2840_v43 = vadd.f32 %v2839_v9, %v2838_v31  ;;  %v1840_v36 = vmul.f32 %v10541_v30, %v12849_v51  ;;  %v2885_v22 = vsel %vm2195_vm0, %v1776_v57, 0.0  ;;  %v7885_v27 = vld [vmem:[%s12847_s1 + $0x20] sm:$0xff]  }
 0x17b   : > { %v2831_v46 = vadd.f32 %v10411_v15, %v2829_v6  ;;  %v10519_v7 = vpop.f32.mrb[0].mxu1  ;;  %v6517_v15 = vunpack.c.l.bf16 %v10493_v63  ;;  %v12850_v6 = vunpack.c.l.bf16 %v10429_v3  ;;  %v2843_v16 = vsel %vm2195_vm0, %v1871_v62, 0.0  ;;  %7406 = vmatpush3.bf16.msra.mxu1 %v7882_v29  ;;  %v7887_v29 = vld [vmem:[%s12847_s1 + $0x28] sm:$0xff]  }
 0x17c   : > { %v10525_v41 = vpop.f32.mrb[1].mxu1  ;;  %v2886_v62 = vsel %vm2195_vm0, %v1792_v55, 0.0  ;;  %v2888_v57 = vsel %vm2195_vm0, %v1808_v8, 0.0  ;;  %v6518_v31 = vunpack.c.h.bf16 %v10493_v63  ;;  %v1919_v11 = vmul.f32 %v9919_v53, %v6389_v21  ;;  %7438 = vmatpush3.bf16.msra.mxu0 %v7883_v44  ;;  %7407 = vmatprep.subr.bf16.mxu1 %v7884_v35  ;;  %v10747_v63 = vld [vmem:[%s8308_s27 + $0x630] sm:$0xff]  }
 0x17d   : > { %v3062_v49 = vadd.f32 %v10488_v17, %v2831_v46  ;;  %v10536_v33 = vpop.f32.mrb[2].mxu1  ;;  %v1903_v59 = vmul.f32 %v9903_v24, %v12850_v6  ;;  %v10560_v46 = vld [vmem:[%s8308_s27 + $0x3b0] sm:$0xff]   ;;  %v2842_v24 = vadd.f32 %v2841_v13, %v2840_v43  ;;  %v2845_v51 = vsel %vm2195_vm0, %v1887_v10, 0.0  ;;  %v10575_v13 = vld [vmem:[%s12773_s29 + $0x5] ss:$0 sm:$0xff]  ;;  %7439 = vmatprep.subr.bf16.mxu0 %v7885_v27 }
 0x17e   : > { %v10557_v56 = vpop.f32.mrb[3].mxu1  ;;  %v2887_v6 = vadd.f32 %v2886_v62, %v2885_v22  ;;  %v12851_v55 = vunpack.c.h.bf16 %v10415_v23  ;;  %v2890_v43 = vsel %vm2195_vm0, %v1824_v18, 0.0  ;;  %v6549_v53 = vunpack.c.l.bf16 %v10560_v46  ;;  %v7886_v23 = vld [vmem:[%s12846_s24 + $0x28] sm:$0xff]   ;;  %v10595_v18 = vld [vmem:[%s8308_s27 + $0x430] sm:$0xff]  }
 0x17f   : > { %v3078_v9 = vmax.f32 %v3062_v49, 0.0  ;;  %v2844_v49 = vadd.f32 %v2843_v16, %v2842_v24  ;;  %v1935_v21 = vmul.f32 %v9935_v38, %v6421_v20  ;;  %v2847_v10 = vsel %vm2195_vm0, %v1903_v59, 0.0  ;;  %v10600_v38 = vld [vmem:[%s12773_s29 + $0x6] ss:$0 sm:$0xff]  ;;  %7408 = vmatpush3.bf16.msra.mxu1 %v7884_v35  ;;  %v7889_v35 = vld [vmem:[%s12847_s1 + $0x30] sm:$0xff]  }
 0x180   : > { %v1856_v8 = vmul.f32 %v10575_v13, %v12851_v55  ;;  %v6550_v44 = vunpack.c.h.bf16 %v10560_v46  ;;  %v12852_v20 = vunpack.c.h.bf16 %v10422_v52  ;;  %v2892_v22 = vsel %vm2195_vm0, %v1840_v36, 0.0  ;;  %v10618_v52 = vld [vmem:[%s12773_s29 + $0x7] ss:$0 sm:$0xff]  ;;  %7440 = vmatpush3.bf16.msra.mxu0 %v7885_v27  ;;  %7409 = vmatprep.subr.bf16.mxu1 %v7886_v23  ;;  %v10655_v27 = vld [vmem:[%s8308_s27 + $0x4f0] sm:$0xff]  }
 0x181   : > { %v3088_v26 = vpack.c.bf16 %v3078_v9, %v3077_v45  ;;  %v2889_v45 = vadd.f32 %v2888_v57, %v2887_v6  ;;  %v2846_v16 = vadd.f32 %v2845_v51, %v2844_v49  ;;  %v6581_v9 = vunpack.c.l.bf16 %v10570_v5  ;;  %v10613_v6 = vld [vmem:[%s8308_s27 + $0x470] sm:$0xff]   ;;  %7441 = vmatprep.subr.bf16.mxu0 %v7887_v29 }
 0x182   : > { %v1872_v59 = vmul.f32 %v10600_v38, %v12852_v20  ;;  %v2849_v24 = vsel %vm2195_vm0, %v1919_v11, 0.0  ;;  %v6582_v57 = vunpack.c.h.bf16 %v10570_v5  ;;  %v12853_v36 = vunpack.c.h.bf16 %v10425_v58  ;;  %v7888_v58 = vld [vmem:[%s12846_s24 + $0x30] sm:$0xff]  }
 0x183   : > { %7392 = vmatmul.mubr.msk.bf16.gmra.mrb[8].mxu1 %vm2195_vm0, %v3088_v26  ;;  %v1951_v26 = vmul.f32 %v9951_v40, %v6453_v0  ;;  %v2891_v62 = vadd.f32 %v2890_v43, %v2889_v45  ;;  %v2848_v55 = vadd.f32 %v2847_v10, %v2846_v16  ;;  %v2894_v40 = vsel %vm2195_vm0, %v1856_v8, 0.0  ;;  %v10637_v8 = vld [vmem:[%s8308_s27 + $0x4b0] sm:$0xff]  }
 0x184   : > { %v1888_v51 = vmul.f32 %v10618_v52, %v12853_v36  ;;  %v6613_v0 = vunpack.c.l.bf16 %v10595_v18  ;;  %v1967_v11 = vmul.f32 %v9967_v2, %v6485_v47  ;;  %v2851_v49 = vsel %vm2195_vm0, %v1935_v21, 0.0  ;;  %v10642_v2 = vld [vmem:[%s12773_s29 + $0x8] ss:$0 sm:$0xff]  ;;  %7410 = vmatpush3.bf16.msra.mxu1 %v7886_v23  ;;  %7442 = vmatpush3.bf16.msra.mxu0 %v7887_v29  ;;  %v10677_v29 = vld [vmem:[%s8308_s27 + $0x530] sm:$0xff]  }
 0x185   : > { %v2893_v43 = vadd.f32 %v2892_v22, %v2891_v62  ;;  %v12854_v47 = vunpack.c.h.bf16 %v10429_v3  ;;  %v2850_v10 = vadd.f32 %v2849_v24, %v2848_v55  ;;  %v2896_v45 = vsel %vm2195_vm0, %v1872_v59, 0.0  ;;  %v10660_v3 = vld [vmem:[%s12773_s29 + $0x9] ss:$0 sm:$0xff]  ;;  %7411 = vmatprep.subr.bf16.mxu1 %v7888_v58  ;;  %7443 = vmatprep.subr.bf16.mxu0 %v7889_v35  ;;  %v10693_v23 = vld [vmem:[%s8308_s27 + $0x570] sm:$0xff]  }
 0x186   : > { %v6645_v20 = vunpack.c.l.bf16 %v10613_v6  ;;  %v1983_v16 = vmul.f32 %v9983_v14, %v6517_v15  ;;  %v2853_v22 = vsel %vm2195_vm0, %v1951_v26, 0.0  ;;  %v6646_v36 = vunpack.c.h.bf16 %v10613_v6  ;;  %v7152_v5 = vld [vmem:[%s8308_s27 + $0x6b0] sm:$0xff]  }
 0x187   : > { %v1904_v21 = vmul.f32 %v10642_v2, %v12854_v47  ;;  %v2895_v62 = vadd.f32 %v2894_v40, %v2893_v43  ;;  %v12855_v59 = vunpack.c.h.bf16 %v10452_v37  ;;  %v2852_v55 = vadd.f32 %v2851_v49, %v2850_v10  ;;  %v7890_v37 = vld [vmem:[%s12846_s24 + $0x38] sm:$0xff]   ;;  %v10822_v6 = vld [vmem:[%s12773_s29 + $0x12] ss:$0 sm:$0xff] }
 0x188   : > { %v2898_v14 = vsel %vm2195_vm0, %v1888_v51, 0.0  ;;  %v6677_v15 = vunpack.c.l.bf16 %v10637_v8  ;;  %v1999_v26 = vmul.f32 %v9999_v19, %v6549_v53  ;;  %v2855_v40 = vsel %vm2195_vm0, %v1967_v11, 0.0  ;;  %v7891_v51 = vld [vmem:[%s12847_s1 + $0x38] sm:$0xff]   ;;  %v10682_v19 = vld [vmem:[%s12773_s29 + $0xa] ss:$0 sm:$0xff]  ;;  %7412 = vmatpush3.bf16.msra.mxu1 %v7888_v58  ;;  %7444 = vmatpush3.bf16.msra.mxu0 %v7889_v35 }
 0x189   : > { %v1920_v24 = vmul.f32 %v10660_v3, %v12855_v59  ;;  %v2897_v43 = vadd.f32 %v2896_v45, %v2895_v62  ;;  %v1936_v53 = vmul.f32 %v10682_v19, %v6422_v60  ;;  %v2854_v11 = vadd.f32 %v2853_v22, %v2852_v55  ;;  %7413 = vmatprep.subr.bf16.mxu1 %v7890_v37  ;;  %v10719_v58 = vld [vmem:[%s12773_s29 + $0xc] ss:$0 sm:$0xff] }
 0x18a   : > { %v2900_v49 = vsel %vm2195_vm0, %v1904_v21, 0.0  ;;  %v6709_v47 = vunpack.c.l.bf16 %v10655_v27  ;;  %v2015_v10 = vmul.f32 %v10015_v32, %v6581_v9  ;;  %v2857_v45 = vsel %vm2195_vm0, %v1983_v16, 0.0  ;;  %7445 = vmatprep.subr.bf16.mxu0 %v7891_v51 }
 0x18b   : > { %v2899_v62 = vadd.f32 %v2898_v14, %v2897_v43  ;;  %v6710_v59 = vunpack.c.h.bf16 %v10655_v27  ;;  %v12856_v60 = vunpack.c.h.bf16 %v10463_v42  ;;  %v2856_v22 = vadd.f32 %v2855_v40, %v2854_v11  ;;  %v10710_v42 = vld [vmem:[%s12662_s9] sm:$0xff]   ;;  %v10730_v40 = vld [vmem:[%s8308_s27 + $0x5f0] sm:$0xff]  }
 0x18c   : > { %v2902_v32 = vsel %vm2195_vm0, %v1920_v24, 0.0  ;;  %v6741_v9 = vunpack.c.l.bf16 %v10677_v29  ;;  %v2031_v16 = vmul.f32 %v10029_v4, %v6613_v0  ;;  %v2859_v55 = vsel %vm2195_vm0, %v1999_v26, 0.0  ;;  %12857 = vst [vmem:[#allocation6_spill] sm:$0xff] %v10710_v42  ;;  %v10714_v24 = vld [vmem:[%s8308_s27 + $0x5b0] sm:$0xff]   ;;  %7414 = vmatpush3.bf16.msra.mxu1 %v7890_v37  ;;  %7446 = vmatpush3.bf16.msra.mxu0 %v7891_v51 }
 0x18d   : > { %v1952_v21 = vmul.f32 %v10698_v1, %v12856_v60  ;;  %v2901_v14 = vadd.f32 %v2900_v49, %v2899_v62  ;;  %v12858_v4 = vunpack.c.h.bf16 %v10479_v28  ;;  %v2858_v35 = vadd.f32 %v2857_v45, %v2856_v22  ;;  %v10735_v28 = vld [vmem:[%s12773_s29 + $0xd] ss:$0 sm:$0xff]  ;;  %7463 = vmatprep.subr.bf16.mxu1 %v10710_v42 }
 0x18e   : > { %v2904_v26 = vsel %vm2195_vm0, %v1936_v53, 0.0  ;;  %v6773_v43 = vunpack.c.l.bf16 %v10693_v23  ;;  %v2047_v11 = vmul.f32 %v10042_v12, %v6645_v20  ;;  %v2861_v49 = vsel %vm2195_vm0, %v2015_v10, 0.0 }
 0x18f   : > { %v1968_v0 = vmul.f32 %v10719_v58, %v12858_v4  ;;  %v2903_v62 = vadd.f32 %v2902_v32, %v2901_v14  ;;  %v1984_v53 = vmul.f32 %v10735_v28, %v6518_v31  ;;  %v2860_v45 = vadd.f32 %v2859_v55, %v2858_v35  ;;  %v10752_v31 = vld [vmem:[%s12773_s29 + $0xe] ss:$0 sm:$0xff]  ;;  %v7144_v4 = vld [vmem:[%s8308_s27 + $0x670] sm:$0xff]  }
 0x190   : > { %v2906_v12 = vsel %vm2195_vm0, %v1952_v21, 0.0  ;;  %v6805_v20 = vunpack.c.l.bf16 %v10714_v24  ;;  %v2063_v10 = vmul.f32 %v10053_v50, %v6677_v15  ;;  %v2863_v22 = vsel %vm2195_vm0, %v2031_v16, 0.0  ;;  %v10762_v21 = vld [vmem:[%s12773_s29 + $0x13] ss:$0 sm:$0xff] }
 0x191   : > { %v2905_v32 = vadd.f32 %v2904_v26, %v2903_v62  ;;  %v6806_v14 = vunpack.c.h.bf16 %v10714_v24  ;;  %v2000_v37 = vmul.f32 %v10752_v31, %v6550_v44  ;;  %v2862_v50 = vadd.f32 %v2861_v49, %v2860_v45  ;;  %v10771_v44 = vld [vmem:[%s12773_s29 + $0xf] ss:$0 sm:$0xff] }
 0x192   : > { %v2908_v15 = vsel %vm2195_vm0, %v1968_v0, 0.0  ;;  %v6837_v51 = vunpack.c.l.bf16 %v10730_v40  ;;  %v2079_v16 = vmul.f32 %v10762_v21, %v6709_v47  ;;  %v2865_v55 = vsel %vm2195_vm0, %v2047_v11, 0.0  ;;  %v10781_v11 = vld [vmem:[%s12773_s29 + $0x14] ss:$0 sm:$0xff] }
 0x193   : > { %v2907_v24 = vadd.f32 %v2906_v12, %v2905_v32  ;;  %v6838_v46 = vunpack.c.h.bf16 %v10730_v40  ;;  %v2016_v0 = vmul.f32 %v10771_v44, %v6582_v57  ;;  %v2864_v35 = vadd.f32 %v2863_v22, %v2862_v50  ;;  %12859 = vst [vmem:[#allocation7_spill] sm:$0xff] %v10781_v11  ;;  %v10790_v57 = vld [vmem:[%s12773_s29 + $0x10] ss:$0 sm:$0xff] }
 0x194   : > { %v2910_v26 = vsel %vm2195_vm0, %v1984_v53, 0.0  ;;  %v6869_v47 = vunpack.c.l.bf16 %v10747_v63  ;;  %v2095_v40 = vmul.f32 %v10781_v11, %v6741_v9  ;;  %v2867_v49 = vsel %vm2195_vm0, %v2063_v10, 0.0  ;;  %v10799_v9 = vld [vmem:[%s12773_s29 + $0x15] ss:$0 sm:$0xff] }
 0x195   : > { %v2909_v62 = vadd.f32 %v2908_v15, %v2907_v24  ;;  %v6870_v45 = vunpack.c.h.bf16 %v10747_v63  ;;  %v12860_v53 = vunpack.c.h.bf16 %v10595_v18  ;;  %v2866_v22 = vadd.f32 %v2865_v55, %v2864_v35  ;;  %12861 = vst [vmem:[#allocation8_spill] sm:$0xff] %v10799_v9  ;;  %v10806_v18 = vld [vmem:[%s12773_s29 + $0x11] ss:$0 sm:$0xff] }
 0x196   : > { %v2912_v32 = vsel %vm2195_vm0, %v2000_v37, 0.0  ;;  %v6901_v50 = vunpack.c.l.bf16 %v7144_v4  ;;  %v2111_v10 = vmul.f32 %v10799_v9, %v6773_v43  ;;  %v2869_v63 = vsel %vm2195_vm0, %v2079_v16, 0.0  ;;  %v10815_v43 = vld [vmem:[%s12773_s29 + $0x16] ss:$0 sm:$0xff] }
 0x197   : > { %v2032_v12 = vmul.f32 %v10790_v57, %v12860_v53  ;;  %v2911_v15 = vadd.f32 %v2910_v26, %v2909_v62  ;;  %v6902_v24 = vunpack.c.h.bf16 %v7144_v4  ;;  %v2048_v37 = vmul.f32 %v10806_v18, %v6646_v36  ;;  %12862 = vst [vmem:[#allocation9_spill] sm:$0xff] %v10815_v43 }
 0x198   : > { %v2868_v55 = vadd.f32 %v2867_v49, %v2866_v22  ;;  %v2914_v35 = vsel %vm2195_vm0, %v2016_v0, 0.0  ;;  %v6933_v53 = vunpack.c.l.bf16 %v7152_v5  ;;  %v2127_v16 = vmul.f32 %v10815_v43, %v6805_v20 }
 0x199   : > { %v2871_v4 = vsel %vm2195_vm0, %v2095_v40, 0.0  ;;  %v2913_v26 = vadd.f32 %v2912_v32, %v2911_v15  ;;  %v6934_v62 = vunpack.c.h.bf16 %v7152_v5  ;;  %v12863_v36 = vunpack.c.h.bf16 %v10637_v8 }
 0x19a   : > { %v2870_v49 = vadd.f32 %v2869_v63, %v2868_v55  ;;  %v2916_v22 = vsel %vm2195_vm0, %v2032_v12, 0.0  ;;  %v2080_v20 = vmul.f32 %v10762_v21, %v6710_v59  ;;  %v2143_v40 = vmul.f32 %v10346_v39, %v6837_v51 }
 0x19b   : > { %v2064_v0 = vmul.f32 %v10822_v6, %v12863_v36  ;;  %v2873_v5 = vsel %vm2195_vm0, %v2111_v10, 0.0  ;;  %v2915_v32 = vadd.f32 %v2914_v35, %v2913_v26  ;;  %v12864_v15 = vunpack.c.h.bf16 %v10677_v29 }
 0x19c   : > { %v2159_v8 = vmul.f32 %v10358_v25, %v6869_v47  ;;  %v2872_v42 = vadd.f32 %v2871_v4, %v2870_v49  ;;  %v2918_v63 = vsel %vm2195_vm0, %v2048_v37, 0.0  ;;  %v2175_v12 = vmul.f32 %v10364_v34, %v6901_v50  ;;  %v10868_v49 = vld [vmem:[%s8308_s27 + $0xf8] sm:$0xff]  }
 0x19d   : > { %v2096_v60 = vmul.f32 %v10781_v11, %v12864_v15  ;;  %v2191_v27 = vmul.f32 %v10372_v61, %v6933_v53  ;;  %v2875_v59 = vsel %vm2195_vm0, %v2127_v16, 0.0  ;;  %v2917_v51 = vadd.f32 %v2916_v22, %v2915_v32  ;;  %v10874_v32 = vld [vmem:[%s8308_s27 + $0x138] sm:$0xff]  }
 0x19e   : > { %v12865_v10 = vunpack.c.h.bf16 %v10693_v23  ;;  %v2128_v55 = vmul.f32 %v10815_v43, %v6806_v14  ;;  %v2874_v35 = vadd.f32 %v2873_v5, %v2872_v42  ;;  %v2920_v47 = vsel %vm2195_vm0, %v2064_v0, 0.0  ;;  %v10853_v14 = vld [vmem:[%s8308_s27 + $0x38] sm:$0xff]  }
 0x19f   : > { %v2144_v37 = vmul.f32 %v10346_v39, %v6838_v46  ;;  %v2160_v50 = vmul.f32 %v10358_v25, %v6870_v45  ;;  %v2877_v53 = vsel %vm2195_vm0, %v2143_v40, 0.0  ;;  %v2919_v4 = vadd.f32 %v2918_v63, %v2917_v51  ;;  %v10856_v42 = vld [vmem:[%s8308_s27 + $0x78] sm:$0xff]  }
 0x1a0   : > { %v2112_v29 = vmul.f32 %v10799_v9, %v12865_v10  ;;  %v2176_v16 = vmul.f32 %v10364_v34, %v6902_v24  ;;  %v2192_v23 = vmul.f32 %v10372_v61, %v6934_v62  ;;  %v2876_v26 = vadd.f32 %v2875_v59, %v2874_v35  ;;  %v10862_v0 = vld [vmem:[%s8308_s27 + $0xb8] sm:$0xff]  }
 0x1a1   : > { %v2922_v36 = vsel %vm2195_vm0, %v2080_v20, 0.0  ;;  %v2879_v39 = vsel %vm2195_vm0, %v2159_v8, 0.0  ;;  %v2881_v25 = vsel %vm2195_vm0, %v2175_v12, 0.0  ;;  %v2883_v46 = vsel %vm2195_vm0, %v2191_v27, 0.0  ;;  %v10883_v10 = vld [vmem:[%s8308_s27 + $0x178] sm:$0xff]  }
 0x1a2   : > { %v2921_v45 = vadd.f32 %v2920_v47, %v2919_v4  ;;  %v2878_v34 = vadd.f32 %v2877_v53, %v2876_v26  ;;  %v2924_v61 = vsel %vm2195_vm0, %v2096_v60, 0.0  ;;  %v2926_v24 = vsel %vm2195_vm0, %v2112_v29, 0.0  ;;  %v10893_v4 = vld [vmem:[%s8308_s27 + $0x1f8] sm:$0xff]  }
 0x1a3   : > { %v2928_v62 = vsel %vm2195_vm0, %v2128_v55, 0.0  ;;  %v2930_v20 = vsel %vm2195_vm0, %v2144_v37, 0.0  ;;  %v6105_v40 = vunpack.c.l.bf16 %v10853_v14  ;;  %v6137_v5 = vunpack.c.l.bf16 %v10856_v42  ;;  %v10890_v37 = vld [vmem:[%s8308_s27 + $0x1b8] sm:$0xff]  }
 0x1a4   : > { %v2923_v22 = vadd.f32 %v2922_v36, %v2921_v45  ;;  %v2880_v15 = vadd.f32 %v2879_v39, %v2878_v34  ;;  %v2932_v60 = vsel %vm2195_vm0, %v2160_v50, 0.0  ;;  %v2934_v8 = vsel %vm2195_vm0, %v2176_v16, 0.0  ;;  %v10896_v16 = vld [vmem:[%s8308_s27 + $0x238] sm:$0xff]  }
 0x1a5   : > { %v6169_v63 = vunpack.c.l.bf16 %v10862_v0  ;;  %v2936_v27 = vsel %vm2195_vm0, %v2192_v23, 0.0  ;;  %v6106_v59 = vunpack.c.h.bf16 %v10853_v14  ;;  %v6201_v51 = vunpack.c.l.bf16 %v10868_v49  ;;  %v8153_v23 = vld [vmem:[%s12773_s29] ss:$0 sm:$0xff] }
 0x1a6   : > { %v2925_v12 = vadd.f32 %v2924_v61, %v2923_v22  ;;  %v6138_v29 = vunpack.c.h.bf16 %v10856_v42  ;;  %v6170_v55 = vunpack.c.h.bf16 %v10862_v0  ;;  %v6202_v35 = vunpack.c.h.bf16 %v10868_v49 }
 0x1a7   : > { %v6233_v47 = vunpack.c.l.bf16 %v10874_v32  ;;  %v2882_v50 = vadd.f32 %v2881_v25, %v2880_v15  ;;  %v1777_v26 = vmul.f32 %v8153_v23, %v6105_v40  ;;  %v1793_v36 = vmul.f32 %v10511_v48, %v6137_v5  ;;  %v8154_v25 = vld [vmem:[%s12773_s29 + $0x2] ss:$0 sm:$0xff] }
 0x1a8   : > { %v2927_v53 = vadd.f32 %v2926_v24, %v2925_v12  ;;  %v6234_v14 = vunpack.c.h.bf16 %v10874_v32  ;;  %v6265_v42 = vunpack.c.l.bf16 %v10883_v10  ;;  %v6266_v39 = vunpack.c.h.bf16 %v10883_v10  ;;  %v10911_v24 = vld [vmem:[%s8308_s27 + $0x278] sm:$0xff]  }
 0x1a9   : > { %v1809_v45 = vmul.f32 %v8154_v25, %v6169_v63  ;;  %v6297_v34 = vunpack.c.l.bf16 %v10890_v37  ;;  %v1825_v49 = vmul.f32 %v10531_v54, %v6201_v51  ;;  %v6329_v22 = vunpack.c.l.bf16 %v10893_v4  ;;  %v10919_v63 = vld [vmem:[%s8308_s27 + $0x2b8] sm:$0xff]  }
 0x1aa   : > { %v2929_v0 = vadd.f32 %v2928_v62, %v2927_v53  ;;  %v6361_v5 = vunpack.c.l.bf16 %v10896_v16  ;;  %v1841_v32 = vmul.f32 %v10541_v30, %v6233_v47  ;;  %v2884_v15 = vadd.f32 %v2883_v46, %v2882_v50  ;;  %v10922_v62 = vld [vmem:[%s8308_s27 + $0x2f8] sm:$0xff]  }
 0x1ab   : > { %v2938_v10 = vsel %vm2195_vm0, %v1777_v26, 0.0  ;;  %v2939_v53 = vsel %vm2195_vm0, %v1793_v36, 0.0  ;;  %v6393_v61 = vunpack.c.l.bf16 %v10911_v24  ;;  %v2941_v43 = vsel %vm2195_vm0, %v1809_v45, 0.0 }
 0x1ac   : > { %v2931_v12 = vadd.f32 %v2930_v20, %v2929_v0  ;;  %v2940_v40 = vadd.f32 %v2939_v53, %v2938_v10  ;;  %v1857_v20 = vmul.f32 %v10575_v13, %v6265_v42  ;;  %v2943_v47 = vsel %vm2195_vm0, %v1825_v49, 0.0  ;;  %v10937_v10 = vld [vmem:[%s8308_s27 + $0x338] sm:$0xff]  }
 0x1ad   : > { %v6425_v50 = vunpack.c.l.bf16 %v10919_v63  ;;  %v6457_v36 = vunpack.c.l.bf16 %v10922_v62  ;;  %v3063_v11 = vadd.f32 %v10488_v17, %v2884_v15  ;;  %v2945_v45 = vsel %vm2195_vm0, %v1841_v32, 0.0 }
 0x1ae   : > { %v2933_v9 = vadd.f32 %v2932_v60, %v2931_v12  ;;  %v2942_v0 = vadd.f32 %v2941_v43, %v2940_v40  ;;  %v1873_v60 = vmul.f32 %v10600_v38, %v6297_v34  ;;  %v6458_v42 = vunpack.c.h.bf16 %v10922_v62  ;;  %v11063_v62 = vld [vmem:[%s8308_s27 + $0x578] sm:$0xff]  }
 0x1af   : > { %v1778_v49 = vmul.f32 %v8153_v23, %v6106_v59  ;;  %v1794_v12 = vmul.f32 %v10511_v48, %v6138_v29  ;;  %v1810_v46 = vmul.f32 %v8154_v25, %v6170_v55  ;;  %v1889_v43 = vmul.f32 %v10618_v52, %v6329_v22  ;;  %v10950_v23 = vld [vmem:[%s8308_s27 + $0x378] sm:$0xff]  }
 0x1b0   : > { %v2935_v51 = vadd.f32 %v2934_v8, %v2933_v9  ;;  %v2944_v53 = vadd.f32 %v2943_v47, %v2942_v0  ;;  %v2947_v9 = vsel %vm2195_vm0, %v1857_v20, 0.0  ;;  %v6489_v8 = vunpack.c.l.bf16 %v10937_v10 }
 0x1b1   : > { %v6490_v34 = vunpack.c.h.bf16 %v10937_v10  ;;  %v1826_v40 = vmul.f32 %v10531_v54, %v6202_v35  ;;  %v3079_v59 = vmax.f32 %v3063_v11, 0.0  ;;  %v1905_v48 = vmul.f32 %v10642_v2, %v6361_v5  ;;  %v10958_v54 = vld [vmem:[%s8308_s27 + $0x3b8] sm:$0xff]  }
 0x1b2   : > { %v2937_v26 = vadd.f32 %v2936_v27, %v2935_v51  ;;  %v2946_v32 = vadd.f32 %v2945_v45, %v2944_v53  ;;  %v2949_v27 = vsel %vm2195_vm0, %v1873_v60, 0.0  ;;  %v1842_v29 = vmul.f32 %v10541_v30, %v6234_v14 }
 0x1b3   : > { %v1921_v55 = vmul.f32 %v10660_v3, %v6393_v61  ;;  %v2991_v22 = vsel %vm2195_vm0, %v1778_v49, 0.0  ;;  %v2951_v11 = vsel %vm2195_vm0, %v1889_v43, 0.0  ;;  %v2992_v35 = vsel %vm2195_vm0, %v1794_v12, 0.0  ;;  %v10974_v12 = vld [vmem:[%s8308_s27 + $0x438] sm:$0xff]  }
 0x1b4   : > { %v3064_v15 = vadd.f32 %v10488_v17, %v2937_v26  ;;  %v2948_v25 = vadd.f32 %v2947_v9, %v2946_v32  ;;  %v2994_v5 = vsel %vm2195_vm0, %v1810_v46, 0.0  ;;  %v6521_v20 = vunpack.c.l.bf16 %v10950_v23  ;;  %v10966_v26 = vld [vmem:[%s8308_s27 + $0x3f8] sm:$0xff]  }
 0x1b5   : > { %v1858_v30 = vmul.f32 %v10575_v13, %v6266_v39  ;;  %v2993_v61 = vadd.f32 %v2992_v35, %v2991_v22  ;;  %v1937_v0 = vmul.f32 %v10682_v19, %v6425_v50  ;;  %v2953_v60 = vsel %vm2195_vm0, %v1905_v48, 0.0  ;;  %v10978_v13 = vld [vmem:[%s8308_s27 + $0x478] sm:$0xff]   ;;  %v11001_v35 = vld [vmem:[%s12869_s26] ss:$0 sm:$0xff]  ;;  %s12880_s26 = sld [smem:[#allocation31_spill]] }
 0x1b6   : > { %v3080_v51 = vmax.f32 %v3064_v15, 0.0  ;;  %v2950_v14 = vadd.f32 %v2949_v27, %v2948_v25  ;;  %v2996_v45 = vsel %vm2195_vm0, %v1826_v40, 0.0  ;;  %v6522_v49 = vunpack.c.h.bf16 %v10950_v23 }
 0x1b7   : > { %v6553_v46 = vunpack.c.l.bf16 %v10958_v54  ;;  %v2995_v43 = vadd.f32 %v2994_v5, %v2993_v61  ;;  %v12866_v39 = vunpack.c.h.bf16 %v10890_v37  ;;  %v1953_v9 = vmul.f32 %v10698_v1, %v6457_v36 }
 0x1b8   : > { %v3089_v47 = vpack.c.bf16 %v3080_v51, %v3079_v59  ;;  %v2952_v53 = vadd.f32 %v2951_v11, %v2950_v14  ;;  %v2955_v40 = vsel %vm2195_vm0, %v1921_v55, 0.0  ;;  %v2998_v32 = vsel %vm2195_vm0, %v1842_v29, 0.0 }
 0x1b9   : > { %v1874_v50 = vmul.f32 %v10600_v38, %v12866_v39  ;;  %v6585_v15 = vunpack.c.l.bf16 %v10966_v26  ;;  %v1969_v59 = vmul.f32 %v10719_v58, %v6489_v8  ;;  %v2997_v27 = vadd.f32 %v2996_v45, %v2995_v43 }
 0x1ba   : > { %7395 = vmatprep.mubr.msk.bf16.mxu1 %vm2195_vm0, %v3089_v47  ;;  %v2954_v48 = vadd.f32 %v2953_v60, %v2952_v53  ;;  %v6617_v25 = vunpack.c.l.bf16 %v10974_v12  ;;  %v12867_v22 = vunpack.c.h.bf16 %v10893_v4  ;;  %v2957_v38 = vsel %vm2195_vm0, %v1937_v0, 0.0  ;;  %v11012_v0 = vld [vmem:[%s8308_s27 + $0x4b8] sm:$0xff]  }
 0x1bb   : > { %v3000_v36 = vsel %vm2195_vm0, %v1858_v30, 0.0  ;;  %v6649_v55 = vunpack.c.l.bf16 %v10978_v13  ;;  %v12868_v29 = vunpack.c.h.bf16 %v10896_v16  ;;  %v2999_v11 = vadd.f32 %v2998_v32, %v2997_v27  ;;  %v11050_v32 = vld [vmem:[%s8308_s27 + $0x538] sm:$0xff]  }
 0x1bc   : > { %v1890_v37 = vmul.f32 %v10618_v52, %v12867_v22  ;;  %v2956_v8 = vadd.f32 %v2955_v40, %v2954_v48  ;;  %v12870_v52 = vunpack.c.h.bf16 %v10911_v24  ;;  %v1985_v5 = vmul.f32 %v10735_v28, %v6521_v20 }
 0x1bd   : > { %v1906_v51 = vmul.f32 %v10642_v2, %v12868_v29  ;;  %v2959_v30 = vsel %vm2195_vm0, %v1953_v9, 0.0  ;;  %v3002_v16 = vsel %vm2195_vm0, %v1874_v50, 0.0  ;;  %v2001_v2 = vmul.f32 %v10752_v31, %v6553_v46 }
 0x1be   : > { %v1922_v4 = vmul.f32 %v10660_v3, %v12870_v52  ;;  %v2958_v14 = vadd.f32 %v2957_v38, %v2956_v8  ;;  %v2961_v61 = vsel %vm2195_vm0, %v1969_v59, 0.0  ;;  %v3001_v47 = vadd.f32 %v3000_v36, %v2999_v11  ;;  %v11074_v52 = vld [vmem:[%s8308_s27 + $0x5b8] sm:$0xff]  }
 0x1bf   : > { %v3004_v60 = vsel %vm2195_vm0, %v1890_v37, 0.0  ;;  %v11017_v3 = vadd.f32 %v11001_v35, %v10525_v41  ;;  %v11021_v24 = vadd.f32 %v10536_v33, %v11001_v35  ;;  %v11025_v20 = vadd.f32 %v11001_v35, %v10557_v56  ;;  %v11035_v41 = vld [vmem:[%s8308_s27 + $0x4f8] sm:$0xff]  }
 0x1c0   : > { %v12871_v45 = vunpack.c.h.bf16 %v10919_v63  ;;  %v2960_v53 = vadd.f32 %v2959_v30, %v2958_v14  ;;  %v3003_v43 = vadd.f32 %v3002_v16, %v3001_v47  ;;  %v11032_v39 = vadd.f32 %v10519_v7, %v11001_v35  ;;  %v11085_v16 = vld [vmem:[%s8308_s27 + $0x5f8] sm:$0xff]  }
 0x1c1   : > { %v2017_v50 = vmul.f32 %v10771_v44, %v6585_v15  ;;  %v2963_v33 = vsel %vm2195_vm0, %v1985_v5, 0.0  ;;  %v3006_v9 = vsel %vm2195_vm0, %v1906_v51, 0.0  ;;  %v11042_v56 = vpack.c.bf16 %v11025_v20, %v11017_v3 }
 0x1c2   : > { %v1938_v46 = vmul.f32 %v10682_v19, %v12871_v45  ;;  %v6681_v19 = vunpack.c.l.bf16 %v11012_v0  ;;  %v2962_v63 = vadd.f32 %v2961_v61, %v2960_v53  ;;  %v3005_v40 = vadd.f32 %v3004_v60, %v3003_v43  ;;  %v11094_v60 = vld [vmem:[%s8308_s27 + $0x638] sm:$0xff]  }
 0x1c3   : > { %v11047_v7 = vpack.c.bf16 %v11021_v24, %v11032_v39  ;;  %v1954_v15 = vmul.f32 %v10698_v1, %v6458_v42  ;;  %v2033_v59 = vmul.f32 %v10790_v57, %v6617_v25  ;;  %v2965_v48 = vsel %vm2195_vm0, %v2001_v2, 0.0  ;;  %7447 = vmatprep.mubr.bf16.mxu0 %v11042_v56 }
 0x1c4   : > { %v3008_v27 = vsel %vm2195_vm0, %v1922_v4, 0.0  ;;  %v6554_v22 = vunpack.c.h.bf16 %v10958_v54  ;;  %v6713_v37 = vunpack.c.l.bf16 %v11035_v41  ;;  %v2964_v38 = vadd.f32 %v2963_v33, %v2962_v63  ;;  %v12873_v63 = vld [vmem:[#allocation8_spill] sm:$0xff] }
 0x1c5   : > { %v3007_v36 = vadd.f32 %v3006_v9, %v3005_v40  ;;  %7448 = vmatmul.mubr.bf16.vlgmr.msra.gmra.mrb[0].mxu0 %v11047_v7  ;;  %v1970_v1 = vmul.f32 %v10719_v58, %v6490_v34  ;;  %v2049_v42 = vmul.f32 %v10806_v18, %v6649_v55  ;;  %v2967_v25 = vsel %vm2195_vm0, %v2017_v50, 0.0 }
 0x1c6   : > { %v3010_v29 = vsel %vm2195_vm0, %v1938_v46, 0.0  ;;  %v6586_v54 = vunpack.c.h.bf16 %v10966_v26  ;;  %v6745_v51 = vunpack.c.l.bf16 %v11050_v32  ;;  %v2966_v8 = vadd.f32 %v2965_v48, %v2964_v38  ;;  %v12872_v46 = vld [vmem:[#allocation7_spill] sm:$0xff]  ;;  %v12874_v38 = vld [vmem:[#allocation9_spill] sm:$0xff] }
 0x1c7   : > { %v3009_v11 = vadd.f32 %v3008_v27, %v3007_v36  ;;  %v1986_v10 = vmul.f32 %v10735_v28, %v6522_v49  ;;  %v2065_v58 = vmul.f32 %v10822_v6, %v6681_v19  ;;  %v2969_v34 = vsel %vm2195_vm0, %v2033_v59, 0.0 }
 0x1c8   : > { %v3012_v55 = vsel %vm2195_vm0, %v1954_v15, 0.0  ;;  %v6618_v4 = vunpack.c.h.bf16 %v10974_v12  ;;  %v6777_v26 = vunpack.c.l.bf16 %v11063_v62  ;;  %v2968_v5 = vadd.f32 %v2967_v25, %v2966_v8 }
 0x1c9   : > { %v3011_v30 = vadd.f32 %v3010_v29, %v3009_v11  ;;  %v2002_v2 = vmul.f32 %v10752_v31, %v6554_v22  ;;  %v2081_v23 = vmul.f32 %v10762_v21, %v6713_v37  ;;  %v2971_v28 = vsel %vm2195_vm0, %v2049_v42, 0.0  ;;  %v7145_v37 = vld [vmem:[%s8308_s27 + $0x678] sm:$0xff]  }
 0x1ca   : > { %v3014_v49 = vsel %vm2195_vm0, %v1970_v1, 0.0  ;;  %v6650_v14 = vunpack.c.h.bf16 %v10978_v13  ;;  %v6809_v61 = vunpack.c.l.bf16 %v11074_v52  ;;  %v2970_v47 = vadd.f32 %v2969_v34, %v2968_v5 }
 0x1cb   : > { %v3013_v12 = vadd.f32 %v3012_v55, %v3011_v30  ;;  %v2018_v45 = vmul.f32 %v10771_v44, %v6586_v54  ;;  %v2097_v53 = vmul.f32 %v12872_v46, %v6745_v51  ;;  %v2973_v31 = vsel %vm2195_vm0, %v2065_v58, 0.0  ;;  %v8155_v54 = vld [vmem:[%s12773_s29 + $0x17] ss:$0 sm:$0xff]  ;;  %v7153_v55 = vld [vmem:[%s8308_s27 + $0x6b8] sm:$0xff]  }
 0x1cc   : > { %v3016_v43 = vsel %vm2195_vm0, %v1986_v10, 0.0  ;;  %v6682_v50 = vunpack.c.h.bf16 %v11012_v0  ;;  %v6841_v33 = vunpack.c.l.bf16 %v11085_v16  ;;  %v2972_v13 = vadd.f32 %v2971_v28, %v2970_v47 }
 0x1cd   : > { %v3015_v9 = vadd.f32 %v3014_v49, %v3013_v12  ;;  %v2034_v19 = vmul.f32 %v10790_v57, %v6618_v4  ;;  %v2113_v40 = vmul.f32 %v12873_v63, %v6777_v26  ;;  %v2975_v15 = vsel %vm2195_vm0, %v2081_v23, 0.0 }
 0x1ce   : > { %v3018_v44 = vsel %vm2195_vm0, %v2002_v2, 0.0  ;;  %v6714_v59 = vunpack.c.h.bf16 %v11035_v41  ;;  %v6873_v48 = vunpack.c.l.bf16 %v11094_v60  ;;  %v2974_v27 = vadd.f32 %v2973_v31, %v2972_v13 }
 0x1cf   : > { %v3017_v22 = vadd.f32 %v3016_v43, %v3015_v9  ;;  %v2050_v0 = vmul.f32 %v10806_v18, %v6650_v14  ;;  %v2129_v36 = vmul.f32 %v12874_v38, %v6809_v61  ;;  %v2977_v57 = vsel %vm2195_vm0, %v2097_v53, 0.0 }
 0x1d0   : > { %v3020_v1 = vsel %vm2195_vm0, %v2018_v45, 0.0  ;;  %v6746_v42 = vunpack.c.h.bf16 %v11050_v32  ;;  %v2976_v25 = vadd.f32 %v2975_v15, %v2974_v27  ;;  %v2066_v41 = vmul.f32 %v10822_v6, %v6682_v50  ;;  %v8156_v6 = vld [vmem:[%s12773_s29 + $0x18] ss:$0 sm:$0xff]  ;;  %v8157_v45 = vld [vmem:[%s12773_s29 + $0x19] ss:$0 sm:$0xff] }
 0x1d1   : > { %v3019_v29 = vadd.f32 %v3018_v44, %v3017_v22  ;;  %v2145_v51 = vmul.f32 %v8155_v54, %v6841_v33  ;;  %v2979_v18 = vsel %vm2195_vm0, %v2113_v40, 0.0  ;;  %v3022_v8 = vsel %vm2195_vm0, %v2034_v19, 0.0  ;;  %v8158_v40 = vld [vmem:[%s12773_s29 + $0x1a] ss:$0 sm:$0xff] }
 0x1d2   : > { %v6778_v11 = vunpack.c.h.bf16 %v11063_v62  ;;  %v6905_v10 = vunpack.c.l.bf16 %v7145_v37  ;;  %v2978_v58 = vadd.f32 %v2977_v57, %v2976_v25  ;;  %v2082_v32 = vmul.f32 %v10762_v21, %v6714_v59 }
 0x1d3   : > { %v3021_v34 = vadd.f32 %v3020_v1, %v3019_v29  ;;  %v2161_v4 = vmul.f32 %v8156_v6, %v6873_v48  ;;  %v2981_v26 = vsel %vm2195_vm0, %v2129_v36, 0.0  ;;  %v3024_v5 = vsel %vm2195_vm0, %v2050_v0, 0.0 }
 0x1d4   : > { %v2980_v30 = vadd.f32 %v2979_v18, %v2978_v58  ;;  %v6810_v23 = vunpack.c.h.bf16 %v11074_v52  ;;  %v2098_v62 = vmul.f32 %v12872_v46, %v6746_v42  ;;  %v2983_v28 = vsel %vm2195_vm0, %v2145_v51, 0.0 }
 0x1d5   : > { %v3023_v2 = vadd.f32 %v3022_v8, %v3021_v34  ;;  %v3026_v49 = vsel %vm2195_vm0, %v2066_v41, 0.0  ;;  %v6842_v21 = vunpack.c.h.bf16 %v11085_v16  ;;  %v6937_v14 = vunpack.c.l.bf16 %v7153_v55 }
 0x1d6   : > { %v2982_v61 = vadd.f32 %v2981_v26, %v2980_v30  ;;  %v2114_v12 = vmul.f32 %v12873_v63, %v6778_v11  ;;  %v2177_v53 = vmul.f32 %v8157_v45, %v6905_v10  ;;  %v2985_v52 = vsel %vm2195_vm0, %v2161_v4, 0.0 }
 0x1d7   : > { %v3025_v47 = vadd.f32 %v3024_v5, %v3023_v2  ;;  %v3028_v46 = vsel %vm2195_vm0, %v2082_v32, 0.0  ;;  %v6874_v50 = vunpack.c.h.bf16 %v11094_v60  ;;  %v2130_v16 = vmul.f32 %v12874_v38, %v6810_v23 }
 0x1d8   : > { %v2984_v31 = vadd.f32 %v2983_v28, %v2982_v61  ;;  %v3030_v33 = vsel %vm2195_vm0, %v2098_v62, 0.0  ;;  %v6906_v13 = vunpack.c.h.bf16 %v7145_v37  ;;  %v2146_v63 = vmul.f32 %v8155_v54, %v6842_v21  ;;  %v12875_v21 = vld [vmem:[#allocation6_spill] sm:$0xff]  ;;  %v7895_v61 = vld [vmem:[%s12662_s9 + $0x18] sm:$0xff]  }
 0x1d9   : > { %v3027_v43 = vadd.f32 %v3026_v49, %v3025_v47  ;;  %v2193_v15 = vmul.f32 %v8158_v40, %v6937_v14  ;;  %v2987_v44 = vsel %vm2195_vm0, %v2177_v53, 0.0  ;;  %v3032_v59 = vsel %vm2195_vm0, %v2114_v12, 0.0  ;;  %v7893_v49 = vld [vmem:[%s12662_s9 + $0x8] sm:$0xff]   ;;  %v7894_v14 = vld [vmem:[%s12662_s9 + $0x10] sm:$0xff]   ;;  %v7896_v47 = vld [vmem:[%s12662_s9 + $0x20] sm:$0xff]  }
 0x1da   : > { %v2986_v9 = vadd.f32 %v2985_v52, %v2984_v31  ;;  %v6938_v27 = vunpack.c.h.bf16 %v7153_v55  ;;  %v2162_v60 = vmul.f32 %v8156_v6, %v6874_v50  ;;  %v3034_v22 = vsel %vm2195_vm0, %v2130_v16, 0.0  ;;  %v7897_v12 = vld [vmem:[%s12662_s9 + $0x28] sm:$0xff]   ;;  %v7899_v53 = vld [vmem:[%s12662_s9 + $0x38] sm:$0xff]  }
 0x1db   : > { %v3029_v19 = vadd.f32 %v3028_v46, %v3027_v43  ;;  %v2178_v37 = vmul.f32 %v8157_v45, %v6906_v13  ;;  %v2989_v36 = vsel %vm2195_vm0, %v2193_v15, 0.0  ;;  %v3036_v57 = vsel %vm2195_vm0, %v2146_v63, 0.0  ;;  %v7898_v45 = vld [vmem:[%s12662_s9 + $0x30] sm:$0xff]  }
 0x1dc   : > { %v2988_v0 = vadd.f32 %v2987_v44, %v2986_v9  ;;  %v2194_v42 = vmul.f32 %v8158_v40, %v6938_v27  ;;  %v3038_v25 = vsel %vm2195_vm0, %v2162_v60, 0.0  ;;  %v11231_v40 = vld [vmem:[%s12661_s8] ss:$0 sm:$0xff] }
 0x1dd   : > { %v3031_v48 = vadd.f32 %v3030_v33, %v3029_v19  ;;  %v3040_v54 = vsel %vm2195_vm0, %v2178_v37, 0.0 }
 0x1de   : > { %v2990_v29 = vadd.f32 %v2989_v36, %v2988_v0  ;;  %v3042_v18 = vsel %vm2195_vm0, %v2194_v42, 0.0 }
 0x1df   : > { %v3033_v38 = vadd.f32 %v3032_v59, %v3031_v48 }
 0x1e0   : > { %v3065_v11 = vadd.f32 %v10488_v17, %v2990_v29 }
 0x1e1   : > { %v3035_v1 = vadd.f32 %v3034_v22, %v3033_v38 }
 0x1e2   : > { %v3081_v6 = vmax.f32 %v3065_v11, 0.0 }
 0x1e3   : > { %v3037_v41 = vadd.f32 %v3036_v57, %v3035_v1 }
 0x1e5   : > { %v3039_v51 = vadd.f32 %v3038_v25, %v3037_v41 }
 0x1e7   : > { %v3041_v8 = vadd.f32 %v3040_v54, %v3039_v51 }
 0x1e9   : > { %v3043_v10 = vadd.f32 %v3042_v18, %v3041_v8  ;;  %v7389_v58 = vpop.f32.mrb[4].mxu1 }
 0x1ea   : > { %v11155_v34 = vadd.f32 %v7389_v58, %v11001_v35  ;;  %v3180_v55 = vpop.f32.mrb[5].mxu1 }
 0x1eb   : > { %v3066_v32 = vadd.f32 %v10488_v17, %v3043_v10  ;;  %v11159_v4 = vadd.f32 %v11001_v35, %v3180_v55  ;;  %v7390_v26 = vpop.f32.mrb[6].mxu1 }
 0x1ec   : > { %v11162_v5 = vadd.f32 %v7390_v26, %v11001_v35  ;;  %v3183_v30 = vpop.f32.mrb[7].mxu1  ;;  %v11260_v26 = vld [vmem:[%s12880_s26] ss:$0 sm:$0xff] }
 0x1ed   : > { %v3082_v2 = vmax.f32 %v3066_v32, 0.0  ;;  %v11165_v23 = vadd.f32 %v11001_v35, %v3183_v30 }
 0x1ee   : > { %v11169_v62 = vpack.c.bf16 %v11162_v5, %v11155_v34 }
 0x1ef   : > { %v3090_v28 = vpack.c.bf16 %v3082_v2, %v3081_v6  ;;  %v11173_v17 = vpack.c.bf16 %v11165_v23, %v11159_v4 }
 0x1f1   : > { %7396 = vmatmul.mubr.msk.bf16.gmra.mrb[12].mxu1 %vm2195_vm0, %v3090_v28  ;;  %7451 = vmatprep.mubr.bf16.mxu0 %v11173_v17 }
 0x1f2   : > { %7415 = vmatprep.mubr.bf16.mxu1 %v11042_v56  ;;  %7452 = vmatmul.mubr.bf16.gmra.mrb[4].mxu0 %v11169_v62 }
 0x1f9   : > { %7416 = vmatmul.mubr.bf16.vlgmr.msra.gmra.mrb[16].mxu1 %v11047_v7 }
 0x1fa   : > { %7464 = vmatpush3.bf16.msra.mxu1 %v12875_v21  ;;  %7419 = vmatprep.mubr.bf16.mxu1 %v11173_v17 }
 0x1fb   : > { %7465 = vmatprep.subr.bf16.mxu1 %v7893_v49 }
 0x1fe   : > { %7466 = vmatpush3.bf16.msra.mxu1 %v7893_v49 }
 0x1ff   : > { %7467 = vmatprep.subr.bf16.mxu1 %v7894_v14 }
 0x201   : > { %7420 = vmatmul.mubr.bf16.gmra.mrb[20].mxu1 %v11169_v62 }
 0x202   : > { %7468 = vmatpush3.bf16.msra.mxu1 %v7894_v14 }
 0x203   : > { %7469 = vmatprep.subr.bf16.mxu1 %v7895_v61 }
 0x206   : > { %7470 = vmatpush3.bf16.msra.mxu1 %v7895_v61 }
 0x207   : > { %7471 = vmatprep.subr.bf16.mxu1 %v7896_v47 }
 0x20a   : > { %7472 = vmatpush3.bf16.msra.mxu1 %v7896_v47 }
 0x20b   : > { %7473 = vmatprep.subr.bf16.mxu1 %v7897_v12 }
 0x20e   : > { %7474 = vmatpush3.bf16.msra.mxu1 %v7897_v12 }
 0x20f   : > { %7475 = vmatprep.subr.bf16.mxu1 %v7898_v45 }
 0x212   : > { %7476 = vmatpush3.bf16.msra.mxu1 %v7898_v45 }
 0x213   : > { %7477 = vmatprep.subr.bf16.mxu1 %v7899_v53 }
 0x216   : > { %7478 = vmatpush3.bf16.msra.mxu1 %v7899_v53 }
 0x256   : > { %v7393_v52 = vpop.f32.mrb[8].mxu1 }
 0x257   : > { %v11205_v46 = vadd.f32 %v7393_v52, %v11001_v35  ;;  %v3196_v31 = vpop.f32.mrb[9].mxu1 }
 0x258   : > { %v11208_v43 = vadd.f32 %v11001_v35, %v3196_v31  ;;  %v7394_v50 = vpop.f32.mrb[10].mxu1 }
 0x259   : > { %v11211_v16 = vadd.f32 %v7394_v50, %v11001_v35  ;;  %v3199_v33 = vpop.f32.mrb[11].mxu1 }
 0x25a   : > { %v11214_v13 = vadd.f32 %v11001_v35, %v3199_v33 }
 0x25b   : > { %v11218_v9 = vpack.c.bf16 %v11211_v16, %v11205_v46 }
 0x25c   : > { %v11222_v19 = vpack.c.bf16 %v11214_v13, %v11208_v43 }
 0x25e   : > { %7423 = vmatprep.mubr.bf16.mxu1 %v11222_v19  ;;  %7455 = vmatprep.mubr.bf16.mxu0 %v11222_v19 }
 0x25f   : > { %7424 = vmatmul.mubr.bf16.gmra.mrb[24].mxu1 %v11218_v9  ;;  %7456 = vmatmul.mubr.bf16.gmra.mrb[8].mxu0 %v11218_v9 }
 0x298   : > { %v7449_v63 = vpop.f32.mrb[0].mxu0 }
 0x299   : > { %v3827_v15 = vpop.f32.mrb[1].mxu0  ;;  %v3836_v59 = vadd.f32 %v7449_v63, %v11231_v40 }
 0x29a   : > { %v7450_v44 = vpop.f32.mrb[2].mxu0  ;;  %v3828_v60 = vadd.f32 %v11231_v40, %v3827_v15 }
 0x29b   : > { %v3839_v48 = vadd.f32 %v7450_v44, %v11231_v40  ;;  %v3830_v27 = vpop.f32.mrb[3].mxu0 }
 0x29c   : > { %v3831_v22 = vadd.f32 %v11231_v40, %v3830_v27 }
 0x29d   : > { %v4050_v0 = vpack.c.bf16 %v3839_v48, %v3836_v59 }
 0x29e   : > { %v4049_v38 = vpack.c.bf16 %v3831_v22, %v3828_v60 }
 0x2a0   : > { %7495 = vmatprep.subr.bf16.mxu0 %v4049_v38 }
 0x2a1   : > { %7496 = vmatpush3.bf16.xpose.msra.mxu0 %v4049_v38 }
 0x2a2   : > { %7497 = vmatprep.subr.bf16.mxu0 %v4050_v0 }
 0x2a9   : > { %7498 = vmatpush3.bf16.xpose.msra.mxu0 %v4050_v0 }
 0x2c4   : > { %v7397_v37 = vpop.f32.mrb[12].mxu1 }
 0x2c5   : > { %v11238_v36 = vadd.f32 %v7397_v37, %v11001_v35  ;;  %v3212_v57 = vpop.f32.mrb[13].mxu1  ;;  %v7453_v1 = vpop.f32.mrb[4].mxu0 }
 0x2c6   : > { %v11241_v42 = vadd.f32 %v11001_v35, %v3212_v57  ;;  %v7398_v25 = vpop.f32.mrb[14].mxu1  ;;  %v3852_v29 = vadd.f32 %v7453_v1, %v11231_v40  ;;  %v3843_v41 = vpop.f32.mrb[5].mxu0 }
 0x2c7   : > { %12876 = vst [vmem:[#allocation10_spill] sm:$0xff] %v11238_v36  ;;  %v11245_v54 = vadd.f32 %v7398_v25, %v11001_v35  ;;  %v3215_v51 = vpop.f32.mrb[15].mxu1  ;;  %v3844_v18 = vadd.f32 %v11231_v40, %v3843_v41  ;;  %v7454_v8 = vpop.f32.mrb[6].mxu0 }
 0x2c8   : > { %12877 = vst [vmem:[#allocation11_spill] sm:$0xff] %v11241_v42  ;;  %v11249_v11 = vadd.f32 %v11001_v35, %v3215_v51  ;;  %v3855_v10 = vadd.f32 %v7454_v8, %v11231_v40  ;;  %v3846_v58 = vpop.f32.mrb[7].mxu0 }
 0x2c9   : > { %12878 = vst [vmem:[#allocation3_spill] sm:$0xff] %v11245_v54  ;;  %v3571_v55 = vpack.c.bf16 %v11245_v54, %v11238_v36  ;;  %v3847_v32 = vadd.f32 %v11231_v40, %v3846_v58 }
 0x2ca   : > { %12879 = vst [vmem:[#allocation4_spill] sm:$0xff] %v11249_v11  ;;  %v3570_v6 = vpack.c.bf16 %v11249_v11, %v11241_v42  ;;  %v4052_v30 = vpack.c.bf16 %v3855_v10, %v3852_v29 }
 0x2cb   : > { %v4051_v2 = vpack.c.bf16 %v3847_v32, %v3844_v18 }
 0x2cc   : > { %7427 = vmatprep.mubr.bf16.mxu1 %v3570_v6  ;;  %7459 = vmatprep.mubr.bf16.mxu0 %v3570_v6  ;;  %v7417_v35 = vpop.f32.mrb[16].mxu1 }
 0x2cd   : > { %7428 = vmatmul.mubr.bf16.gmra.mrb[28].mxu1 %v3571_v55  ;;  %7460 = vmatmul.mubr.bf16.gmra.mrb[12].mxu0 %v3571_v55  ;;  %v3669_v28 = vadd.f32 %v7417_v35, %v11260_v26  ;;  %v3660_v49 = vpop.f32.mrb[17].mxu1 }
 0x2ce   : > { %7479 = vmatprep.mubr.bf16.mxu1 %v11042_v56  ;;  %v3661_v21 = vadd.f32 %v11260_v26, %v3660_v49  ;;  %v7418_v14 = vpop.f32.mrb[18].mxu1  ;;  %7499 = vmatprep.subr.bf16.mxu0 %v4051_v2 }
 0x2cf   : > { %v3672_v61 = vadd.f32 %v7418_v14, %v11260_v26  ;;  %v3663_v47 = vpop.f32.mrb[19].mxu1  ;;  %7500 = vmatpush3.bf16.xpose.msra.mxu0 %v4051_v2  ;;  %v11267_v45 = vmul.f32 0.088388346, %v3669_v28 }
 0x2d0   : > { %v3664_v12 = vadd.f32 %v11260_v26, %v3663_v47  ;;  %7501 = vmatprep.subr.bf16.mxu0 %v4052_v30  ;;  %v3723_v52 = vmul.f32 0.088388346, %v3661_v21 }
 0x2d1   : > { %v11269_v53 = vmul.f32 0.088388346, %v3672_v61 }
 0x2d2   : > { %v3724_v31 = vmul.f32 0.088388346, %v3664_v12 }
 0x2d3   : > { %v4042_v56 = vpack.c.bf16 %v11269_v53, %v11267_v45 }
 0x2d4   : > { %v4041_v50 = vpack.c.bf16 %v3724_v31, %v3723_v52  ;;  %v7421_v33 = vpop.f32.mrb[20].mxu1 }
 0x2d5   : > { %7480 = vmatmul.mubr.bf16.vlgmr.msra.gmra.mrb[32].mxu1 %v11047_v7  ;;  %v3685_v63 = vadd.f32 %v7421_v33, %v11260_v26  ;;  %v3676_v15 = vpop.f32.mrb[21].mxu1 }
 0x2d6   : > { %7483 = vmatprep.mubr.bf16.mxu1 %v11173_v17  ;;  %v3677_v44 = vadd.f32 %v11260_v26, %v3676_v15  ;;  %7511 = vmatprep.mubr.bf16.mxu0 %v4041_v50  ;;  %v7422_v59 = vpop.f32.mrb[22].mxu1 }
 0x2d7   : > { %v11277_v48 = vmul.f32 0.088388346, %v3685_v63  ;;  %v3688_v27 = vadd.f32 %v7422_v59, %v11260_v26  ;;  %v3679_v60 = vpop.f32.mrb[23].mxu1  ;;  %7502 = vmatpush3.bf16.xpose.msra.mxu0 %v4052_v30 }
 0x2d8   : > { %v11280_v22 = vmul.f32 0.088388346, %v3677_v44  ;;  %v3680_v0 = vadd.f32 %v11260_v26, %v3679_v60 }
 0x2d9   : > { %v11283_v7 = vmul.f32 0.088388346, %v3688_v27 }
 0x2da   : > { %v11285_v38 = vmul.f32 0.088388346, %v3680_v0 }
 0x2db   : > { %v4044_v17 = vpack.c.bf16 %v11283_v7, %v11277_v48  ;;  %v3227_v48 = vlaneseq }
 0x2dc   : > { %v4043_v37 = vpack.c.bf16 %v11285_v38, %v11280_v22 }
 0x2dd   : > { %7484 = vmatmul.mubr.bf16.gmra.mrb[36].mxu1 %v11169_v62  ;;  %v11358_v7 = vshrl.u32 %v3227_v48, 7 }
 0x2de   : > { %7487 = vmatprep.mubr.bf16.mxu1 %v11222_v19 }
 0x2df   : > { %12881 = vst [vmem:[#allocation5_spill] sm:$0xff] %v11358_v7 }
 0x2e5   : > { %7488 = vmatmul.mubr.bf16.gmra.mrb[40].mxu1 %v11218_v9 }
 0x2e6   : > { %7491 = vmatprep.mubr.bf16.mxu1 %v3570_v6 }
 0x2ed   : > { %7492 = vmatmul.mubr.bf16.gmra.mrb[44].mxu1 %v3571_v55 }
 0x332   : > { %v7425_v57 = vpop.f32.mrb[24].mxu1  ;;  %v7457_v1 = vpop.f32.mrb[8].mxu0 }
 0x333   : > { %v3701_v25 = vadd.f32 %v7425_v57, %v11260_v26  ;;  %v3692_v29 = vpop.f32.mrb[25].mxu1  ;;  %v3868_v41 = vadd.f32 %v7457_v1, %v11231_v40  ;;  %v3859_v51 = vpop.f32.mrb[9].mxu0 }
 0x334   : > { %v3693_v18 = vadd.f32 %v11260_v26, %v3692_v29  ;;  %v7426_v8 = vpop.f32.mrb[26].mxu1  ;;  %v3860_v10 = vadd.f32 %v11231_v40, %v3859_v51  ;;  %v7458_v62 = vpop.f32.mrb[10].mxu0 }
 0x335   : > { %v11298_v58 = vmul.f32 0.088388346, %v3701_v25  ;;  %v3704_v9 = vadd.f32 %v7426_v8, %v11260_v26  ;;  %v3695_v19 = vpop.f32.mrb[27].mxu1  ;;  %v3871_v55 = vadd.f32 %v7458_v62, %v11231_v40  ;;  %v3862_v32 = vpop.f32.mrb[11].mxu0 }
 0x336   : > { %v11302_v6 = vmul.f32 0.088388346, %v3693_v18  ;;  %v3696_v30 = vadd.f32 %v11260_v26, %v3695_v19  ;;  %v3863_v2 = vadd.f32 %v11231_v40, %v3862_v32 }
 0x337   : > { %v11306_v35 = vmul.f32 0.088388346, %v3704_v9  ;;  %v4054_v28 = vpack.c.bf16 %v3871_v55, %v3868_v41  ;;  %v6009_v55 = vld [vmem:[%s12663_s10] ss:$0 sm:$0xff] }
 0x338   : > { %v11308_v49 = vmul.f32 0.088388346, %v3696_v30  ;;  %v4053_v21 = vpack.c.bf16 %v3863_v2, %v3860_v10 }
 0x339   : > { %v4046_v14 = vpack.c.bf16 %v11306_v35, %v11298_v58  ;;  %v12715_v58 = vcvt.s32.f32 %v11358_v7 }
 0x33a   : > { %v4045_v61 = vpack.c.bf16 %v11308_v49, %v11302_v6  ;;  %7503 = vmatprep.subr.bf16.mxu0 %v4053_v21  ;;  %v3245_v6 = vand.u32 127, %v3227_v48 }
 0x33b   : > { %7504 = vmatpush3.bf16.xpose.msra.mxu0 %v4053_v21 }
 0x33c   : > { %7505 = vmatprep.subr.bf16.mxu0 %v4054_v28  ;;  %v3278_v49 = vcvt.s32.f32 %v3245_v6 }
 0x343   : > { %7506 = vmatpush3.bf16.xpose.msra.mxu0 %v4054_v28 }
 0x3a0   : > { %v7429_v47 = vpop.f32.mrb[28].mxu1  ;;  %v7461_v12 = vpop.f32.mrb[12].mxu0 }
 0x3a1   : > { %v3717_v52 = vadd.f32 %v7429_v47, %v11260_v26  ;;  %v3708_v31 = vpop.f32.mrb[29].mxu1  ;;  %v3884_v50 = vadd.f32 %v7461_v12, %v11231_v40  ;;  %v3875_v33 = vpop.f32.mrb[13].mxu0 }
 0x3a2   : > { %v3709_v63 = vadd.f32 %v11260_v26, %v3708_v31  ;;  %v7430_v15 = vpop.f32.mrb[30].mxu1  ;;  %v3876_v44 = vadd.f32 %v11231_v40, %v3875_v33  ;;  %v7462_v59 = vpop.f32.mrb[14].mxu0 }
 0x3a3   : > { %v11318_v27 = vmul.f32 0.088388346, %v3717_v52  ;;  %v3720_v60 = vadd.f32 %v7430_v15, %v11260_v26  ;;  %v3711_v0 = vpop.f32.mrb[31].mxu1  ;;  %v3887_v57 = vadd.f32 %v7462_v59, %v11231_v40  ;;  %v3878_v1 = vpop.f32.mrb[15].mxu0 }
 0x3a4   : > { %v11322_v25 = vmul.f32 0.088388346, %v3709_v63  ;;  %v3712_v29 = vadd.f32 %v11260_v26, %v3711_v0  ;;  %v3879_v41 = vadd.f32 %v11231_v40, %v3878_v1 }
 0x3a5   : > { %v11326_v51 = vmul.f32 0.088388346, %v3720_v60  ;;  %v4056_v18 = vpack.c.bf16 %v3887_v57, %v3884_v50 }
 0x3a6   : > { %v11328_v8 = vmul.f32 0.088388346, %v3712_v29  ;;  %v4055_v10 = vpack.c.bf16 %v3879_v41, %v3876_v44 }
 0x3a7   : > { %v4048_v62 = vpack.c.bf16 %v11326_v51, %v11318_v27  ;;  %v3279_v27 = vadd.f32 0.5, %v3278_v49 }
 0x3a8   : > { %v4047_v9 = vpack.c.bf16 %v11328_v8, %v11322_v25  ;;  %v7481_v19 = vpop.f32.mrb[32].mxu1  ;;  %7507 = vmatprep.subr.bf16.mxu0 %v4055_v10  ;;  %v3229_v25 = vadd.s32 8, %v11358_v7 }
 0x3a9   : > { %v3978_v26 = vpop.f32.mrb[33].mxu1  ;;  %7508 = vmatpush3.bf16.xpose.msra.mxu0 %v4055_v10  ;;  %v3987_v32 = vadd.f32 %v7481_v19, %v6009_v55 }
 0x3aa   : > { %v7482_v40 = vpop.f32.mrb[34].mxu1  ;;  %7509 = vmatprep.subr.bf16.mxu0 %v4056_v18  ;;  %v3979_v28 = vadd.f32 %v6009_v55, %v3978_v26 }
 0x3ab   : > { %v3990_v30 = vadd.f32 %v7482_v40, %v6009_v55  ;;  %v3981_v2 = vpop.f32.mrb[35].mxu1 }
 0x3ac   : > { %v3982_v21 = vadd.f32 %v6009_v55, %v3981_v2 }
 0x3ad   : > { %v4323_v47 = vpack.c.bf16 %v3990_v30, %v3987_v32 }
 0x3ae   : > { %v4322_v12 = vpack.c.bf16 %v3982_v21, %v3979_v28 }
 0x3b0   : > { %v7485_v52 = vpop.f32.mrb[36].mxu1  ;;  %7527 = vmatprep.subr.bf16.mxu1 %v4322_v12 }
 0x3b1   : > { %v3994_v31 = vpop.f32.mrb[37].mxu1  ;;  %7528 = vmatpush3.bf16.msra.mxu1 %v4322_v12  ;;  %7510 = vmatpush3.bf16.xpose.msra.mxu0 %v4056_v18  ;;  %v4003_v33 = vadd.f32 %v7485_v52, %v6009_v55  ;;  %v3232_v12 = vadd.s32 32, %v11358_v7 }
 0x3b2   : > { %v7486_v50 = vpop.f32.mrb[38].mxu1  ;;  %7529 = vmatprep.subr.bf16.mxu1 %v4323_v47  ;;  %v3995_v44 = vadd.f32 %v6009_v55, %v3994_v31  ;;  %v3233_v31 = vadd.s32 40, %v11358_v7 }
 0x3b3   : > { %v4006_v63 = vadd.f32 %v7486_v50, %v6009_v55  ;;  %v3997_v15 = vpop.f32.mrb[39].mxu1 }
 0x3b4   : > { %v3998_v59 = vadd.f32 %v6009_v55, %v3997_v15 }
 0x3b5   : > { %v4325_v60 = vpack.c.bf16 %v4006_v63, %v4003_v33  ;;  %7530 = vmatpush3.bf16.msra.mxu1 %v4323_v47  ;;  %v3312_v47 = vmul.f32 0.0625, %v3279_v27 }
 0x3b6   : > { %v4324_v0 = vpack.c.bf16 %v3998_v59, %v3995_v44  ;;  %v3250_v44 = vcvt.s32.f32 %v3232_v12  ;;  %v3234_v59 = vadd.s32 48, %v11358_v7  ;;  %v3240_v12 = vadd.s32 96, %v11358_v7 }
 0x3b7   : > { %v11374_v15 = vfloor.f32 %v3312_v47 }
 0x3b8   : > { %v7489_v57 = vpop.f32.mrb[40].mxu1  ;;  %7531 = vmatprep.subr.bf16.mxu1 %v4324_v0  ;;  %7512 = vmatmul.mubr.bf16.vlgmr.msra.gmra.mrb[16].mxu0 %v4042_v56 }
 0x3b9   : > { %v4010_v1 = vpop.f32.mrb[41].mxu1  ;;  %7532 = vmatpush3.bf16.msra.mxu1 %v4324_v0  ;;  %7515 = vmatprep.mubr.bf16.mxu0 %v4043_v37  ;;  %v4019_v41 = vadd.f32 %v7489_v57, %v6009_v55  ;;  %12882 = vst [vmem:[#allocation2_spill] sm:$0xff] %v11374_v15  ;;  %v3251_v0 = vcvt.s32.f32 %v3233_v31  ;;  %v3235_v57 = vadd.s32 56, %v11358_v7 }
 0x3ba   : > { %v7490_v29 = vpop.f32.mrb[42].mxu1  ;;  %7533 = vmatprep.subr.bf16.mxu1 %v4325_v60  ;;  %v4011_v19 = vadd.f32 %v6009_v55, %v4010_v1 }
 0x3bb   : > { %v4022_v18 = vadd.f32 %v7490_v29, %v6009_v55  ;;  %v4013_v10 = vpop.f32.mrb[43].mxu1 }
 0x3bc   : > { %v4014_v26 = vadd.f32 %v6009_v55, %v4013_v10  ;;  %v3266_v10 = vadd.f32 0.5, %v3250_v44 }
 0x3bd   : > { %v4327_v40 = vpack.c.bf16 %v4022_v18, %v4019_v41  ;;  %7534 = vmatpush3.bf16.msra.mxu1 %v4325_v60  ;;  %v3346_v18 = vmul.f32 16.0, %v11374_v15 }
 0x3be   : > { %v4326_v32 = vpack.c.bf16 %v4014_v26, %v4011_v19  ;;  %v3236_v19 = vadd.s32 64, %v11358_v7  ;;  %v3252_v26 = vcvt.s32.f32 %v3234_v59 }
 0x3c0   : > { %v7493_v30 = vpop.f32.mrb[44].mxu1  ;;  %7535 = vmatprep.subr.bf16.mxu1 %v4326_v32  ;;  %7516 = vmatmul.mubr.bf16.gmra.mrb[20].mxu0 %v4044_v17  ;;  %v3230_v17 = vadd.s32 16, %v11358_v7 }
 0x3c1   : > { %v4026_v45 = vpop.f32.mrb[45].mxu1  ;;  %7536 = vmatpush3.bf16.msra.mxu1 %v4326_v32  ;;  %7519 = vmatprep.mubr.bf16.mxu0 %v4045_v61  ;;  %v4035_v56 = vadd.f32 %v7493_v30, %v6009_v55  ;;  %v3231_v61 = vadd.s32 24, %v11358_v7  ;;  %v3267_v32 = vadd.f32 0.5, %v3251_v0  ;;  %v3253_v30 = vcvt.s32.f32 %v3235_v57 }
 0x3c2   : > { %v7494_v53 = vpop.f32.mrb[46].mxu1  ;;  %7537 = vmatprep.subr.bf16.mxu1 %v4327_v40  ;;  %v4027_v37 = vadd.f32 %v6009_v55, %v4026_v45  ;;  %v3248_v35 = vcvt.s32.f32 %v3230_v17 }
 0x3c3   : > { %v4038_v22 = vadd.f32 %v7494_v53, %v6009_v55  ;;  %v4029_v38 = vpop.f32.mrb[47].mxu1  ;;  %v11403_v17 = vmul.f32 0.0625, %v3267_v32  ;;  %v11405_v6 = vadd.f32 0.5, %v3253_v30 }
 0x3c4   : > { %v4030_v2 = vadd.f32 %v6009_v55, %v4029_v38  ;;  %v3264_v8 = vadd.f32 0.5, %v3248_v35  ;;  %v11395_v38 = vsub.f32 %v3279_v27, %v3346_v18  ;;  %v3239_v35 = vadd.s32 88, %v11358_v7 }
 0x3c5   : > { %v4329_v28 = vpack.c.bf16 %v4038_v22, %v4035_v56  ;;  %7538 = vmatpush3.bf16.msra.mxu1 %v4327_v40  ;;  %v3237_v56 = vadd.s32 72, %v11358_v7  ;;  %v12718_v44 = vfloor.f32 %v11403_v17  ;;  %v11425_v59 = vmul.f32 0.0625, %v11405_v6 }
 0x3c6   : > { %v4328_v21 = vpack.c.bf16 %v4030_v2, %v4027_v37  ;;  %v11368_v55 = vmul.f32 0.0625, %v3264_v8  ;;  %v11397_v37 = vmul.f32 0.0625, %v3266_v10  ;;  %v3254_v2 = vcvt.s32.f32 %v3236_v19 }
 0x3c7   : > { %v3241_v18 = vadd.s32 104, %v11358_v7 }
 0x3c8   : > { %7539 = vmatprep.subr.bf16.mxu1 %v4328_v21  ;;  %7520 = vmatmul.mubr.bf16.gmra.mrb[24].mxu0 %v4046_v14  ;;  %v3262_v14 = vadd.f32 0.5, %v12715_v58  ;;  %v12722_v63 = vfloor.f32 %v11368_v55  ;;  %v12716_v27 = vfloor.f32 %v11397_v37 }
 0x3c9   : > { %7540 = vmatpush3.bf16.msra.mxu1 %v4328_v21  ;;  %7523 = vmatprep.mubr.bf16.mxu0 %v4047_v9  ;;  %v3247_v9 = vcvt.s32.f32 %v3229_v25  ;;  %v3238_v21 = vadd.s32 80, %v11358_v7 }
 0x3ca   : > { %7541 = vmatprep.subr.bf16.mxu1 %v4329_v28  ;;  %v11366_v51 = vmul.f32 0.0625, %v3262_v14  ;;  %v3316_v41 = vmul.f32 16.0, %v12722_v63  ;;  %v3318_v30 = vmul.f32 16.0, %v12716_v27 }
 0x3cb   : > { %v3263_v33 = vadd.f32 0.5, %v3247_v9  ;;  %v3256_v47 = vcvt.s32.f32 %v3238_v21  ;;  %v3242_v21 = vadd.s32 112, %v11358_v7 }
 0x3cc   : > { %v12721_v52 = vfloor.f32 %v11366_v51  ;;  %v11393_v22 = vsub.f32 %v3264_v8, %v3316_v41  ;;  %v3380_v8 = vmul.f32 0.25, %v11395_v38 }
 0x3cd   : > { %7542 = vmatpush3.bf16.msra.mxu1 %v4329_v28  ;;  %v11382_v29 = vmul.f32 0.0625, %v3263_v33  ;;  %v3268_v28 = vadd.f32 0.5, %v3252_v26 }
 0x3ce   : > { %v3314_v60 = vmul.f32 16.0, %v12721_v52  ;;  %v11413_v25 = vmul.f32 0.25, %v11393_v22  ;;  %v11435_v26 = vfloor.f32 %v3380_v8 }
 0x3cf   : > { %v12719_v53 = vfloor.f32 %v11382_v29  ;;  %v11419_v9 = vmul.f32 0.0625, %v3268_v28 }
 0x3d0   : > { %7524 = vmatmul.mubr.bf16.gmra.mrb[28].mxu0 %v4048_v62  ;;  %v3249_v62 = vcvt.s32.f32 %v3231_v61  ;;  %v11388_v40 = vsub.f32 %v3262_v14, %v3314_v60  ;;  %v3255_v61 = vcvt.s32.f32 %v3237_v56  ;;  %12884 = vst [vmem:[#allocation8_spill] sm:$0xff] %v11413_v25  ;;  %v3257_v60 = vcvt.s32.f32 %v3239_v35  ;;  %12885 = vst [vmem:[#allocation9_spill] sm:$0xff] %v11435_v26 }
 0x3d1   : > { %v3315_v14 = vmul.f32 16.0, %v12719_v53  ;;  %v12723_v19 = vfloor.f32 %v11413_v25  ;;  %v3414_v63 = vmul.f32 4.0, %v11435_v26 }
 0x3d2   : > { %v3265_v50 = vadd.f32 0.5, %v3249_v62  ;;  %v11401_v48 = vmul.f32 0.25, %v11388_v40  ;;  %v11417_v62 = vadd.f32 0.5, %v3254_v2  ;;  %v11431_v41 = vadd.f32 0.5, %v3255_v61 }
 0x3d3   : > { %v11429_v57 = vsub.f32 %v3263_v33, %v3315_v14  ;;  %v12725_v2 = vfloor.f32 %v11419_v9  ;;  %v3258_v33 = vcvt.s32.f32 %v3240_v12  ;;  %v11451_v61 = vadd.f32 0.5, %v3257_v60 }
 0x3d4   : > { %v11380_v1 = vmul.f32 0.0625, %v3265_v50  ;;  %12883 = vst [vmem:[#allocation7_spill] sm:$0xff] %v11401_v48  ;;  %v12717_v31 = vfloor.f32 %v11401_v48  ;;  %v11440_v56 = vmul.f32 0.0625, %v11417_v62  ;;  %v11457_v58 = vmul.f32 0.0625, %v11431_v41 }
 0x3d5   : > { %v3243_v12 = vadd.s32 120, %v11358_v7  ;;  %v3384_v27 = vmul.f32 4.0, %v12723_v19  ;;  %v3320_v53 = vmul.f32 16.0, %v12725_v2  ;;  %v11473_v52 = vadd.f32 0.5, %v3258_v33 }
 0x3d6   : > { %v12720_v45 = vfloor.f32 %v11380_v1  ;;  %v3382_v35 = vmul.f32 4.0, %v12717_v31  ;;  %v11463_v31 = vmul.f32 0.25, %v11429_v57  ;;  %v12888_v19 = vfloor.f32 %v11425_v59 }
 0x3d7   : > { %v3261_v25 = vcvt.s32.f32 %v3243_v12  ;;  %v3400_v33 = vsub.f32 %v11393_v22, %v3384_v27  ;;  %v11512_v12 = vmul.f32 0.0625, %v11473_v52 }
 0x3d8   : > { %v3317_v49 = vmul.f32 16.0, %v12720_v45  ;;  %12887 = vst [vmem:[#allocation12_spill] sm:$0xff] %v11463_v31  ;;  %v3321_v7 = vmul.f32 16.0, %v12888_v19  ;;  %v11517_v19 = vsub.f32 %v11395_v38, %v3414_v63  ;;  %v12900_v26 = vfloor.f32 %v11463_v31 }
 0x3da   : > { %v11427_v0 = vsub.f32 %v3265_v50, %v3317_v49  ;;  %v11443_v50 = vadd.f32 0.5, %v3256_v47  ;;  %v3319_v49 = vmul.f32 16.0, %v12718_v44  ;;  %v3259_v47 = vcvt.s32.f32 %v3241_v18 }
 0x3db   : > { %v11465_v44 = vsub.f32 %v3266_v10, %v3318_v30  ;;  %v3260_v18 = vcvt.s32.f32 %v3242_v21  ;;  %v11481_v10 = vmul.f32 0.0625, %v11451_v61  ;;  %v12889_v21 = vfloor.f32 %v11368_v55 }
 0x3dc   : > { %v11454_v8 = vmul.f32 0.25, %v11427_v0  ;;  %v11471_v45 = vmul.f32 0.0625, %v11443_v50  ;;  %v11476_v14 = vsub.f32 %v3267_v32, %v3319_v49  ;;  %v11485_v60 = vadd.f32 0.5, %v3259_v47 }
 0x3dd   : > { %vm11491_vm1 = vcmp.eq.f32.partialorder %v12889_v21, %v11374_v15  ;;  %v11497_v49 = vmul.f32 0.25, %v11465_v44  ;;  %v12893_v30 = vfloor.f32 %v11440_v56  ;;  %v12894_v47 = vfloor.f32 %v11366_v51 }
 0x3de   : > { %12886 = vst [vmem:[#allocation6_spill] sm:$0xff] %v11454_v8  ;;  %v11508_v55 = vsub.f32 %v3268_v28, %v3320_v53  ;;  %v11514_v21 = vadd.f32 0.5, %v3260_v18  ;;  %v11523_v51 = vsub.f32 %v11405_v6, %v3321_v7  ;;  %v3398_v53 = vsub.f32 %v11388_v40, %v3382_v35 }
 0x3df   : > { %12892 = vst [vmem:[#allocation13_spill] sm:$0xff] %v11497_v49  ;;  %v3322_v2 = vmul.f32 16.0, %v12893_v30  ;;  %vm11504_vm2 = vcmp.eq.f32.partialorder %v12894_v47, %v11374_v15  ;;  %v11520_v30 = vmul.f32 0.25, %v11476_v14  ;;  %v12898_v28 = vfloor.f32 %v11457_v58 }
 0x3e0   : > { %v11530_v48 = vmul.f32 0.0625, %v11485_v60  ;;  %v11532_v18 = vadd.f32 0.5, %v3261_v25  ;;  %v12899_v63 = vfloor.f32 %v11454_v8  ;;  %v3383_v36 = vmul.f32 4.0, %v12900_v26 }
 0x3e1   : > { %12897 = vst [vmem:[#allocation14_spill] sm:$0xff] %v11520_v30  ;;  %v3323_v27 = vmul.f32 16.0, %v12898_v28  ;;  %v11540_v6 = vsub.f32 %v11417_v62, %v3322_v2  ;;  %v11543_v40 = vmul.f32 0.25, %v11508_v55  ;;  %v12902_v35 = vfloor.f32 %v11471_v45 }
 0x3e2   : > { %v3385_v38 = vmul.f32 4.0, %v12899_v63  ;;  %v11549_v47 = vmul.f32 0.0625, %v11514_v21  ;;  %vm11552_vm3 = vcmp.eq.f32.partialorder %v3400_v33, %v11517_v19  ;;  %v11558_v62 = vmul.f32 0.25, %v11523_v51 }
 0x3e3   : > { %12901 = vst [vmem:[#allocation15_spill] sm:$0xff] %v11543_v40  ;;  %v3324_v28 = vmul.f32 16.0, %v12902_v35  ;;  %v12905_v2 = vfloor.f32 %v11481_v10  ;;  %vm11563_vm4 = vcmp.eq.f32.partialorder %v3398_v53, %v11517_v19  ;;  %v11568_v25 = vsub.f32 %v11431_v41, %v3323_v27  ;;  %vm3450_vm6 = vmand %vm11491_vm1, %vm11552_vm3 }
 0x3e4   : > { %v11572_v8 = vmul.f32 0.0625, %v11532_v18  ;;  %v3401_v26 = vsub.f32 %v11427_v0, %v3385_v38  ;;  %v3399_v31 = vsub.f32 %v11429_v57, %v3383_v36  ;;  %v12908_v11 = vfloor.f32 %v11497_v49  ;;  %vm3448_vm8 = vmand %vm11504_vm2, %vm11563_vm4 }
 0x3e5   : > { %v3325_v7 = vmul.f32 16.0, %v12905_v2  ;;  %v11579_v53 = vmul.f32 0.25, %v11540_v6  ;;  %v12738_v42 = vfloor.f32 %v11543_v40  ;;  %v11583_v41 = vsub.f32 %v11443_v50, %v3324_v28 }
 0x3e6   : > { %v3386_v2 = vmul.f32 4.0, %v12908_v11  ;;  %v12909_v27 = vfloor.f32 %v11512_v12  ;;  %v12910_v0 = vfloor.f32 %v11380_v1  ;;  %v12913_v11 = vfloor.f32 %v11520_v30 }
 0x3e7   : > { %v11599_v50 = vsub.f32 %v11451_v61, %v3325_v7  ;;  %v12914_v1 = vfloor.f32 %v11382_v29  ;;  %vm11623_vm9 = vcmp.eq.f32.partialorder %v3401_v26, %v11517_v19  ;;  %vm11628_vm10 = vcmp.eq.f32.partialorder %v3399_v31, %v11517_v19 }
 0x3e8   : > { %v3326_v33 = vmul.f32 16.0, %v12909_v27  ;;  %vm11591_vm5 = vcmp.eq.f32.partialorder %v12910_v0, %v11374_v15  ;;  %v3387_v57 = vmul.f32 4.0, %v12913_v11  ;;  %v11613_v27 = vmul.f32 0.25, %v11568_v25 }
 0x3e9   : > { %vm11608_vm7 = vcmp.eq.f32.partialorder %v12914_v1, %v11374_v15  ;;  %v12917_v0 = vfloor.f32 %v11530_v48  ;;  %v3402_v1 = vsub.f32 %v11465_v44, %v3386_v2  ;;  %v3388_v38 = vmul.f32 4.0, %v12738_v42  ;;  %vm3451_vm11 = vmand %vm11591_vm5, %vm11623_vm9 }
 0x3ea   : > { %v11637_v54 = vmul.f32 0.25, %v11583_v41  ;;  %v11640_v26 = vsub.f32 %v11473_v52, %v3326_v33  ;;  %v12923_v30 = vfloor.f32 %v11549_v47  ;;  %v3403_v2 = vsub.f32 %v11476_v14, %v3387_v57  ;;  %vm3449_vm12 = vmand %vm11608_vm7, %vm11628_vm10  ;;  %v13025_v36 = vld [vmem:[#allocation15_spill] sm:$0xff] }
 0x3eb   : > { %v3327_v11 = vmul.f32 16.0, %v12917_v0  ;;  %v12924_v42 = vfloor.f32 %v11558_v62  ;;  %v11655_v40 = vmul.f32 0.25, %v11599_v50  ;;  %v12926_v63 = vfloor.f32 %v11572_v8 }
 0x3ec   : > { %12922 = vst [vmem:[#allocation16_spill] sm:$0xff] %v11637_v54  ;;  %v3328_v31 = vmul.f32 16.0, %v12923_v30  ;;  %vm11688_vm14 = vcmp.eq.f32.partialorder %v3402_v1, %v11517_v19  ;;  %v12935_v29 = vfloor.f32 %v11579_v53  ;;  %vm11712_vm0 = vcmp.eq.f32.partialorder %v3403_v2, %v11517_v19 }
 0x3ed   : > { %v3389_v0 = vmul.f32 4.0, %v12924_v42  ;;  %12925 = vst [vmem:[#allocation17_spill] sm:$0xff] %v11655_v40  ;;  %v11671_v14 = vsub.f32 %v11485_v60, %v3327_v11  ;;  %v3329_v33 = vmul.f32 16.0, %v12926_v63  ;;  %v12932_v11 = vfloor.f32 %v11403_v17 }
 0x3ee   : > { %v3390_v7 = vmul.f32 4.0, %v12935_v29  ;;  %v11707_v1 = vsub.f32 %v11514_v21, %v3328_v31  ;;  %v12741_v29 = vfloor.f32 %v11655_v40  ;;  %v13027_v35 = vfloor.f32 %v11558_v62 }
 0x3ef   : > { %vm11695_vm15 = vcmp.eq.f32.partialorder %v12932_v11, %v11374_v15  ;;  %v3405_v11 = vsub.f32 %v11523_v51, %v3389_v0  ;;  %v11724_v21 = vmul.f32 0.25, %v11671_v14  ;;  %v11727_v31 = vsub.f32 %v11532_v18, %v3329_v33 }
 0x3f0   : > { %v12939_v51 = vfloor.f32 %v11419_v9  ;;  %v3406_v2 = vsub.f32 %v11540_v6, %v3390_v7  ;;  %v12944_v33 = vfloor.f32 %v11637_v54  ;;  %v12945_v6 = vfloor.f32 %v11425_v59 }
 0x3f1   : > { %v12946_v7 = vmov 0  ;;  %vm11765_vm10 = vcmp.eq.f32.partialorder %v3405_v11, %v11517_v19  ;;  %v11776_v59 = vmul.f32 0.25, %v11727_v31  ;;  %v12951_v11 = vfloor.f32 %v11440_v56 }
 0x3f2   : > { %vm11737_vm4 = vcmp.eq.f32.partialorder %v12939_v51, %v11374_v15  ;;  %vm11760_vm9 = vcmp.eq.f32.partialorder %v12945_v6, %v11374_v15  ;;  %v3393_v51 = vmul.f32 4.0, %v12741_v29  ;;  %v12957_v56 = vfloor.f32 %v11457_v58 }
 0x3f3   : > { %v12947_v7 = vsel %vm11760_vm9, 4294967295, %v12946_v7  ;;  %12950 = vst [vmem:[#allocation18_spill] sm:$0xff] %v11776_v59  ;;  %v12963_v58 = vfloor.f32 %v11471_v45  ;;  %v13030_v62 = vfloor.f32 %v11613_v27 }
 0x48b   : > { %v7513_v61 = vpop.f32.mrb[16].mxu0 }
 0x48c   : > { %v4091_v49 = vpop.f32.mrb[17].mxu0  ;;  %v11649_v44 = vsel %vm3450_vm6, %v7513_v61, -1e+30 }
 0x48d   : > { %4174 = vmax.xlane.f32.xlu1 %v11649_v44  ;;  %v7514_v52 = vpop.f32.mrb[18].mxu0  ;;  %v11663_v30 = vsel %vm3448_vm8, %v4091_v49, -1e+30  ;;  %v12927_v49 = vfloor.f32 %v11397_v37  ;;  %v3404_v37 = vsub.f32 %v11508_v55, %v3388_v38  ;;  %v12938_v38 = vfloor.f32 %v11613_v27  ;;  %vm3453_vm8 = vmand %vm11695_vm15, %vm11712_vm0 }
 0x48e   : > { %4170 = vmax.xlane.f32.xlu0 %v11663_v30  ;;  %v4094_v57 = vpop.f32.mrb[19].mxu0  ;;  %v11709_v42 = vsel %vm3451_vm11, %v7514_v52, -1e+30  ;;  %vm3455_vm0 = vmand %vm11760_vm9, %vm11765_vm10  ;;  %vm11832_vm10 = vcmp.eq.f32.partialorder %v12963_v58, %v11374_v15 }
 0x48f   : > { %vm11683_vm13 = vcmp.eq.f32.partialorder %v12927_v49, %v11374_v15  ;;  %v11704_v49 = vmul.f32 0.25, %v11640_v26  ;;  %v11719_v55 = vsel %vm3449_vm12, %v4094_v57, -1e+30  ;;  %v3391_v63 = vmul.f32 4.0, %v12938_v38 }
 0x490   : > { %vm3452_vm3 = vmand %vm11683_vm13, %vm11688_vm14  ;;  %vm11743_vm6 = vcmp.eq.f32.partialorder %v3404_v37, %v11517_v19  ;;  %v3392_v57 = vmul.f32 4.0, %v12944_v33  ;;  %v11751_v38 = vmul.f32 0.25, %v11707_v1  ;;  %vm11786_vm12 = vcmp.eq.f32.partialorder %v12951_v11, %v11374_v15 }
 0x491   : > { %4176 = vmax.xlane.f32.xlu1 %v11709_v42  ;;  %v3407_v60 = vsub.f32 %v11568_v25, %v3391_v63  ;;  %vm3454_vm11 = vmand %vm11737_vm4, %vm11743_vm6  ;;  %vm11791_vm14 = vcmp.eq.f32.partialorder %v3406_v2, %v11517_v19  ;;  %v12956_v18 = vfloor.f32 %v11704_v49  ;;  %v12958_v2 = vmov 0 }
 0x492   : > { %4172 = vmax.xlane.f32.xlu0 %v11719_v55  ;;  %v3408_v29 = vsub.f32 %v11583_v41, %v3392_v57  ;;  %v12750_v40 = vfloor.f32 %v11751_v38  ;;  %v3409_v41 = vsub.f32 %v11599_v50, %v3393_v51  ;;  %v12962_v37 = vfloor.f32 %v11724_v21 }
 0x493   : > { %v7517_v52 = vpop.f32.mrb[20].mxu0  ;;  %v3394_v54 = vmul.f32 4.0, %v12956_v18  ;;  %vm11817_vm6 = vcmp.eq.f32.partialorder %v3407_v60, %v11517_v19  ;;  %v12749_v18 = vfloor.f32 %v11776_v59  ;;  %v12964_v50 = vmov 0 }
 0x494   : > { %v4107_v9 = vpop.f32.mrb[21].mxu0  ;;  %v11814_v57 = vsel %vm3454_vm11, %v7517_v52, -1e+30  ;;  %v3395_v11 = vmul.f32 4.0, %v12962_v37  ;;  %v12965_v50 = vsel %vm11832_vm10, 4294967295, %v12964_v50  ;;  %vm11839_vm11 = vcmp.eq.f32.partialorder %v3408_v29, %v11517_v19 }
 0x495   : > { %v7518_v33 = vpop.f32.mrb[22].mxu0  ;;  %v11771_v17 = vsel %vm3452_vm3, %v4107_v9, -1e+30  ;;  %v12952_v9 = vmov 0  ;;  %vm11809_vm3 = vcmp.eq.f32.partialorder %v12957_v56, %v11374_v15  ;;  %v3410_v25 = vsub.f32 %v11640_v26, %v3394_v54 }
 0x496   : > { %4178 = vmax.xlane.f32.xlu0 %v11771_v17  ;;  %v4110_v6 = vpop.f32.mrb[23].mxu0  ;;  %v12953_v9 = vsel %vm11786_vm12, 4294967295, %v12952_v9  ;;  %v12959_v2 = vsel %vm11809_vm3, 4294967295, %v12958_v2  ;;  %v11836_v60 = vsel %vm3455_vm0, %v7518_v33, -1e+30  ;;  %v3396_v56 = vmul.f32 4.0, %v12750_v40 }
 0x497   : > { %v11795_v63 = vsel %vm3453_vm8, %v4110_v6, -1e+30  ;;  %vm3456_vm8 = vmand %vm11786_vm12, %vm11791_vm14  ;;  %v12968_v33 = vfloor.f32 %v11481_v10  ;;  %v12969_v29 = vmov 0  ;;  %vm11861_vm12 = vcmp.eq.f32.partialorder %v3409_v41, %v11517_v19 }
 0x498   : > { %4180 = vmax.xlane.f32.xlu1 %v11795_v63  ;;  %vm3457_vm14 = vmand %vm11809_vm3, %vm11817_vm6  ;;  %v3411_v6 = vsub.f32 %v11671_v14, %v3395_v11  ;;  %v3397_v58 = vmul.f32 4.0, %v12749_v18  ;;  %v12973_v41 = vfloor.f32 %v11512_v12  ;;  %vm11883_vm3 = vcmp.eq.f32.partialorder %v3410_v25, %v11517_v19 }
 0x499   : > { %vm11854_vm0 = vcmp.eq.f32.partialorder %v12968_v33, %v11374_v15  ;;  %vm3458_vm6 = vmand %vm11832_vm10, %vm11839_vm11  ;;  %v12974_v33 = vmov 0  ;;  %v3412_v11 = vsub.f32 %v11707_v1, %v3396_v56  ;;  %v12978_v12 = vfloor.f32 %v11530_v48 }
 0x49a   : > { %4182 = vmax.xlane.f32.xlu0 %v11814_v57  ;;  %v12970_v29 = vsel %vm11854_vm0, 4294967295, %v12969_v29  ;;  %vm3459_vm11 = vmand %vm11854_vm0, %vm11861_vm12  ;;  %vm11903_vm10 = vcmp.eq.f32.partialorder %v3411_v6, %v11517_v19  ;;  %v3413_v1 = vsub.f32 %v11727_v31, %v3397_v58  ;;  %v12983_v56 = vfloor.f32 %v11549_v47 }
 0x49b   : > { %v7521_v52 = vpop.f32.mrb[24].mxu0  ;;  %v12984_v26 = vmov 0  ;;  %vm3446_vm0 = vcmp.eq.f32.partialorder %v3412_v11, %v11517_v19  ;;  %v12987_v47 = vfloor.f32 %v11572_v8  ;;  %v12988_v58 = vmov 0 }
 0x49c   : > { %4184 = vmax.xlane.f32.xlu1 %v11836_v60  ;;  %v4123_v45 = vpop.f32.mrb[25].mxu0  ;;  %v11893_v51 = vsel %vm3458_vm6, %v7521_v52, -1e+30  ;;  %vm11918_vm6 = vcmp.eq.f32.partialorder %v12983_v56, %v11374_v15 }
 0x49d   : > { %v7522_v37 = vpop.f32.mrb[26].mxu0  ;;  %v11858_v54 = vsel %vm3456_vm8, %v4123_v45, -1e+30  ;;  %vm11878_vm8 = vcmp.eq.f32.partialorder %v12973_v41, %v11374_v15  ;;  %v12985_v26 = vsel %vm11918_vm6, 4294967295, %v12984_v26  ;;  %vm3462_vm9 = vmand %vm11918_vm6, %vm3446_vm0 }
 0x49e   : > { %4186 = vmax.xlane.f32.xlu0 %v11858_v54  ;;  %v4126_v10 = vpop.f32.mrb[27].mxu0  ;;  %v12975_v33 = vsel %vm11878_vm8, 4294967295, %v12974_v33  ;;  %vm3460_vm12 = vmand %vm11878_vm8, %vm11883_vm3  ;;  %v11913_v48 = vsel %vm3459_vm11, %v7522_v37, -1e+30  ;;  %12986 = vst [vmem:[#allocation19_spill] sm:$0xff] %v12985_v26  ;;  %vm11933_vm11 = vcmp.eq.f32.partialorder %v12987_v47, %v11374_v15  ;;  %vm3447_vm8 = vcmp.eq.f32.partialorder %v3413_v1, %v11517_v19 }
 0x49f   : > { %v11873_v45 = vsel %vm3457_vm14, %v4126_v10, -1e+30  ;;  %vm11898_vm14 = vcmp.eq.f32.partialorder %v12978_v12, %v11374_v15  ;;  %v12989_v58 = vsel %vm11933_vm11, 4294967295, %v12988_v58 }
 0x4a0   : > { %4188 = vmax.xlane.f32.xlu1 %v11873_v45  ;;  %vm3461_vm3 = vmand %vm11898_vm14, %vm11903_vm10  ;;  %12990 = vst [vmem:[#allocation20_spill] sm:$0xff] %v12989_v58 }
 0x4a1   : > { %vm3463_vm10 = vmand %vm11933_vm11, %vm3447_vm8 }
 0x4a2   : > { %4190 = vmax.xlane.f32.xlu0 %v11893_v51 }
 0x4a3   : > { %v7525_v52 = vpop.f32.mrb[28].mxu0 }
 0x4a4   : > { %4192 = vmax.xlane.f32.xlu1 %v11913_v48  ;;  %v4139_v31 = vpop.f32.mrb[29].mxu0  ;;  %v11946_v8 = vsel %vm3462_vm9, %v7525_v52, -1e+30 }
 0x4a5   : > { %v7526_v6 = vpop.f32.mrb[30].mxu0  ;;  %v11928_v37 = vsel %vm3460_vm12, %v4139_v31, -1e+30 }
 0x4a6   : > { %4194 = vmax.xlane.f32.xlu0 %v11928_v37  ;;  %v4142_v41 = vpop.f32.mrb[31].mxu0  ;;  %v11949_v11 = vsel %vm3463_vm10, %v7526_v6, -1e+30 }
 0x4a7   : > { %v11941_v14 = vsel %vm3461_vm3, %v4142_v41, -1e+30 }
 0x4a8   : > { %4196 = vmax.xlane.f32.xlu1 %v11941_v14 }
 0x4aa   : > { %4198 = vmax.xlane.f32.xlu0 %v11946_v8 }
 0x4ac   : > { %4200 = vmax.xlane.f32.xlu1 %v11949_v11 }
 0x51a   : > { %v4175_v19 = vpop.xlane.xlu1 %4174 }
 0x51b   : > { %v4204_v12 = vsub.f32 %v11649_v44, %v4175_v19  ;;  %v4171_v25 = vpop.xlane.xlu0 %4170 }
 0x51c   : > { %v4202_v1 = vsub.f32 %v11663_v30, %v4171_v25 }
 0x51d   : > { %v4222_v47 = vmul.f32 1.442695, %v4204_v12 }
 0x51e   : > { %v4218_v56 = vmul.f32 1.442695, %v4202_v1  ;;  %v4177_v31 = vpop.xlane.xlu1 %4176 }
 0x51f   : > { %v4205_v41 = vsub.f32 %v11709_v42, %v4177_v31  ;;  %v4173_v18 = vpop.xlane.xlu0 %4172 }
 0x520   : > { %7948 = vpow2.f32 %v4218_v56  ;;  %v4203_v52 = vsub.f32 %v11719_v55, %v4173_v18 }
 0x521   : > { %7950 = vpow2.f32 %v4222_v47  ;;  %v4224_v6 = vmul.f32 1.442695, %v4205_v41 }
 0x522   : > { %v4220_v40 = vmul.f32 1.442695, %v4203_v52 }
 0x523   : > { %v4179_v15 = vpop.xlane.xlu0 %4178 }
 0x524   : > { %7952 = vpow2.f32 %v4220_v40  ;;  %v4206_v58 = vsub.f32 %v11771_v17, %v4179_v15 }
 0x525   : > { %v4181_v44 = vpop.xlane.xlu1 %4180  ;;  %7954 = vpow2.f32 %v4224_v6 }
 0x526   : > { %v4226_v19 = vmul.f32 1.442695, %v4206_v58  ;;  %v4207_v30 = vsub.f32 %v11795_v63, %v4181_v44 }
 0x527   : > { %v4183_v25 = vpop.xlane.xlu0 %4182 }
 0x528   : > { %7956 = vpow2.f32 %v4226_v19  ;;  %v4228_v12 = vmul.f32 1.442695, %v4207_v30  ;;  %v4208_v42 = vsub.f32 %v11814_v57, %v4183_v25 }
 0x529   : > { %v4185_v1 = vpop.xlane.xlu1 %4184 }
 0x52a   : > { %v11959_v56 = vpop.eup %7948  ;;  %v4230_v55 = vmul.f32 1.442695, %v4208_v42  ;;  %v4209_v18 = vsub.f32 %v11836_v60, %v4185_v1  ;;  %7958 = vpow2.f32 %v4228_v12 }
 0x52b   : > { %v4187_v40 = vpop.xlane.xlu0 %4186  ;;  %4250 = vadd.xlane.f32.xlu0 %v11959_v56  ;;  %v11964_v63 = vpop.eup %7950 }
 0x52c   : > { %7960 = vpow2.f32 %v4230_v55  ;;  %v4232_v15 = vmul.f32 1.442695, %v4209_v18  ;;  %v4210_v17 = vsub.f32 %v11858_v54, %v4187_v40 }
 0x52d   : > { %v4189_v58 = vpop.xlane.xlu1 %4188 }
 0x52e   : > { %v11966_v31 = vpop.eup %7952  ;;  %v4234_v57 = vmul.f32 1.442695, %v4210_v17  ;;  %v4211_v47 = vsub.f32 %v11873_v45, %v4189_v58  ;;  %7962 = vpow2.f32 %v4232_v15 }
 0x52f   : > { %v4191_v41 = vpop.xlane.xlu0 %4190  ;;  %4254 = vadd.xlane.f32.xlu0 %v11964_v63  ;;  %4252 = vadd.xlane.f32.xlu1 %v11966_v31  ;;  %v11972_v6 = vpop.eup %7954 }
 0x530   : > { %7964 = vpow2.f32 %v4234_v57  ;;  %v4236_v60 = vmul.f32 1.442695, %v4211_v47  ;;  %v4212_v52 = vsub.f32 %v11893_v51, %v4191_v41 }
 0x531   : > { %v4193_v54 = vpop.xlane.xlu1 %4192 }
 0x532   : > { %v11974_v44 = vpop.eup %7956  ;;  %v4238_v19 = vmul.f32 1.442695, %v4212_v52  ;;  %v4213_v30 = vsub.f32 %v11913_v48, %v4193_v54  ;;  %7966 = vpow2.f32 %v4236_v60 }
 0x533   : > { %4258 = vadd.xlane.f32.xlu0 %v11974_v44  ;;  %v4195_v45 = vpop.xlane.xlu0 %4194  ;;  %4256 = vadd.xlane.f32.xlu1 %v11972_v6 }
 0x534   : > { %7968 = vpow2.f32 %v4238_v19  ;;  %v4240_v25 = vmul.f32 1.442695, %v4213_v30  ;;  %v4214_v12 = vsub.f32 %v11928_v37, %v4195_v45  ;;  %v11980_v42 = vpop.eup %7958  ;;  %v7900_v30 = vld [vmem:[%s12664_s11] sm:$0xff]  }
 0x535   : > { %v4197_v51 = vpop.xlane.xlu1 %4196  ;;  %7559 = vmatprep.subr.bf16.mxu1 %v7900_v30 }
 0x536   : > { %v11982_v1 = vpop.eup %7960  ;;  %v4242_v55 = vmul.f32 1.442695, %v4214_v12  ;;  %v4215_v18 = vsub.f32 %v11941_v14, %v4197_v51  ;;  %7970 = vpow2.f32 %v4240_v25 }
 0x537   : > { %4262 = vadd.xlane.f32.xlu0 %v11982_v1  ;;  %v4199_v48 = vpop.xlane.xlu0 %4198  ;;  %4260 = vadd.xlane.f32.xlu1 %v11980_v42 }
 0x538   : > { %7972 = vpow2.f32 %v4242_v55  ;;  %v4244_v40 = vmul.f32 1.442695, %v4215_v18  ;;  %v4216_v15 = vsub.f32 %v11946_v8, %v4199_v48  ;;  %v11988_v17 = vpop.eup %7962 }
 0x539   : > { %v4201_v37 = vpop.xlane.xlu1 %4200 }
 0x53a   : > { %v11990_v58 = vpop.eup %7964  ;;  %v4246_v57 = vmul.f32 1.442695, %v4216_v15  ;;  %v4217_v47 = vsub.f32 %v11949_v11, %v4201_v37  ;;  %7974 = vpow2.f32 %v4244_v40 }
 0x53b   : > { %4266 = vadd.xlane.f32.xlu0 %v11990_v58  ;;  %4264 = vadd.xlane.f32.xlu1 %v11988_v17 }
 0x53c   : > { %7976 = vpow2.f32 %v4246_v57  ;;  %v4248_v14 = vmul.f32 1.442695, %v4217_v47  ;;  %v11995_v41 = vpop.eup %7966 }
 0x53e   : > { %v11997_v60 = vpop.eup %7968  ;;  %7978 = vpow2.f32 %v4248_v14 }
 0x53f   : > { %4270 = vadd.xlane.f32.xlu0 %v11997_v60  ;;  %4268 = vadd.xlane.f32.xlu1 %v11995_v41 }
 0x540   : > { %v12001_v8 = vpop.eup %7970 }
 0x542   : > { %v12003_v52 = vpop.eup %7972 }
 0x543   : > { %4274 = vadd.xlane.f32.xlu0 %v12003_v52  ;;  %4272 = vadd.xlane.f32.xlu1 %v12001_v8 }
 0x544   : > { %v12007_v11 = vpop.eup %7974 }
 0x546   : > { %v12009_v54 = vpop.eup %7976 }
 0x547   : > { %4278 = vadd.xlane.f32.xlu0 %v12009_v54  ;;  %4276 = vadd.xlane.f32.xlu1 %v12007_v11 }
 0x548   : > { %v12013_v19 = vpop.eup %7978 }
 0x54b   : > { %4280 = vadd.xlane.f32.xlu1 %v12013_v19 }
 0x5b8   : > { %v4251_v45 = vpop.xlane.xlu0 %4250 }
 0x5b9   : > { %7980 = vrcp.f32 %v4251_v45 }
 0x5bc   : > { %v4255_v25 = vpop.xlane.xlu0 %4254  ;;  %v4253_v12 = vpop.xlane.xlu1 %4252 }
 0x5bd   : > { %7982 = vrcp.f32 %v4253_v12 }
 0x5be   : > { %7984 = vrcp.f32 %v4255_v25 }
 0x5c0   : > { %v4259_v51 = vpop.xlane.xlu0 %4258  ;;  %v4257_v55 = vpop.xlane.xlu1 %4256 }
 0x5c1   : > { %7986 = vrcp.f32 %v4257_v55 }
 0x5c2   : > { %7988 = vrcp.f32 %v4259_v51 }
 0x5c3   : > { %v7981_v40 = vpop.eup %7980 }
 0x5c4   : > { %v4263_v18 = vpop.xlane.xlu0 %4262  ;;  %v4261_v48 = vpop.xlane.xlu1 %4260  ;;  %v4298_v47 = vmul.f32 %v7981_v40, %v11959_v56  ;;  %v7901_v56 = vld [vmem:[%s12664_s11 + $0x8] sm:$0xff]  }
 0x5c5   : > { %7990 = vrcp.f32 %v4261_v48 }
 0x5c6   : > { %7992 = vrcp.f32 %v4263_v18 }
 0x5c7   : > { %v7983_v15 = vpop.eup %7982 }
 0x5c8   : > { %v4267_v37 = vpop.xlane.xlu0 %4266  ;;  %v4265_v57 = vpop.xlane.xlu1 %4264  ;;  %v4299_v14 = vmul.f32 %v7983_v15, %v11966_v31 }
 0x5c9   : > { %v7985_v45 = vpop.eup %7984  ;;  %7994 = vrcp.f32 %v4265_v57 }
 0x5ca   : > { %v4314_v12 = vpack.c.bf16 %v4299_v14, %v4298_v47  ;;  %7996 = vrcp.f32 %v4267_v37  ;;  %v4300_v51 = vmul.f32 %v7985_v45, %v11964_v63 }
 0x5cb   : > { %v7987_v25 = vpop.eup %7986 }
 0x5cc   : > { %v4271_v26 = vpop.xlane.xlu0 %4270  ;;  %v4269_v55 = vpop.xlane.xlu1 %4268  ;;  %v4301_v59 = vmul.f32 %v7987_v25, %v11972_v6  ;;  %7543 = vmatprep.mubr.bf16.mxu1 %v4314_v12 }
 0x5cd   : > { %v7989_v48 = vpop.eup %7988  ;;  %7998 = vrcp.f32 %v4269_v55 }
 0x5ce   : > { %v4315_v18 = vpack.c.bf16 %v4301_v59, %v4300_v51  ;;  %8000 = vrcp.f32 %v4271_v26  ;;  %v4302_v37 = vmul.f32 %v7989_v48, %v11974_v44  ;;  %v7902_v59 = vld [vmem:[%s12664_s11 + $0x10] sm:$0xff]  }
 0x5cf   : > { %v7991_v31 = vpop.eup %7990 }
 0x5d0   : > { %v4275_v40 = vpop.xlane.xlu0 %4274  ;;  %v4273_v15 = vpop.xlane.xlu1 %4272  ;;  %7544 = vmatmul.mubr.bf16.vlgmr.msra.gmra.mrb[48].mxu1 %v4315_v18  ;;  %v4303_v57 = vmul.f32 %v7991_v31, %v11980_v42  ;;  %v7904_v18 = vld [vmem:[%s12664_s11 + $0x20] sm:$0xff]  }
 0x5d1   : > { %v7993_v63 = vpop.eup %7992  ;;  %8002 = vrcp.f32 %v4273_v15  ;;  %7560 = vmatpush3.bf16.msra.mxu1 %v7900_v30  ;;  %v7903_v30 = vld [vmem:[%s12664_s11 + $0x18] sm:$0xff]  }
 0x5d2   : > { %v4316_v6 = vpack.c.bf16 %v4303_v57, %v4302_v37  ;;  %7561 = vmatprep.subr.bf16.mxu1 %v7901_v56  ;;  %8004 = vrcp.f32 %v4275_v40  ;;  %v4304_v45 = vmul.f32 %v7993_v63, %v11982_v1 }
 0x5d3   : > { %v7995_v47 = vpop.eup %7994 }
 0x5d4   : > { %v4279_v14 = vpop.xlane.xlu0 %4278  ;;  %v4277_v26 = vpop.xlane.xlu1 %4276  ;;  %7547 = vmatprep.mubr.bf16.mxu1 %v4316_v6  ;;  %v4305_v44 = vmul.f32 %v7995_v47, %v11988_v17 }
 0x5d5   : > { %v7997_v12 = vpop.eup %7996  ;;  %8006 = vrcp.f32 %v4277_v26  ;;  %7562 = vmatpush3.bf16.msra.mxu1 %v7901_v56 }
 0x5d6   : > { %8008 = vrcp.f32 %v4279_v14  ;;  %v4317_v42 = vpack.c.bf16 %v4305_v44, %v4304_v45  ;;  %7563 = vmatprep.subr.bf16.mxu1 %v7902_v59  ;;  %v4306_v51 = vmul.f32 %v7997_v12, %v11990_v58  ;;  %v7905_v58 = vld [vmem:[%s12664_s11 + $0x28] sm:$0xff]   ;;  %v7912_v45 = vld [vmem:[%s12666_s13 + $0x10] sm:$0xff]   ;;  %v7914_v44 = vld [vmem:[%s12666_s13 + $0x18] sm:$0xff]  }
 0x5d7   : > { %v7999_v25 = vpop.eup %7998  ;;  %v7916_v12 = vld [vmem:[%s12666_s13 + $0x20] sm:$0xff]  }
 0x5d8   : > { %v4281_v55 = vpop.xlane.xlu1 %4280  ;;  %7548 = vmatmul.mubr.bf16.gmra.mrb[52].mxu1 %v4317_v42  ;;  %v4307_v1 = vmul.f32 %v7999_v25, %v11995_v41  ;;  %v8001_v48 = vpop.eup %8000  ;;  %v7918_v42 = vld [vmem:[%s12666_s13 + $0x28] sm:$0xff]  }
 0x5d9   : > { %8010 = vrcp.f32 %v4281_v55  ;;  %7564 = vmatpush3.bf16.msra.mxu1 %v7902_v59  ;;  %v4308_v31 = vmul.f32 %v8001_v48, %v11997_v60 }
 0x5da   : > { %v4318_v17 = vpack.c.bf16 %v4307_v1, %v4306_v51  ;;  %7565 = vmatprep.subr.bf16.mxu1 %v7903_v30 }
 0x5db   : > { %v8003_v56 = vpop.eup %8002 }
 0x5dc   : > { %7551 = vmatprep.mubr.bf16.mxu1 %v4318_v17  ;;  %v4309_v40 = vmul.f32 %v8003_v56, %v12001_v8  ;;  %v8005_v15 = vpop.eup %8004  ;;  %v7906_v8 = vld [vmem:[%s12664_s11 + $0x30] sm:$0xff]   ;;  %v7911_v17 = vld [vmem:[%s12668_s15 + $0x8] sm:$0xff]  }
 0x5dd   : > { %7566 = vmatpush3.bf16.msra.mxu1 %v7903_v30  ;;  %v4310_v63 = vmul.f32 %v8005_v15, %v12003_v52  ;;  %v7907_v52 = vld [vmem:[%s12664_s11 + $0x38] sm:$0xff]  }
 0x5de   : > { %v4319_v37 = vpack.c.bf16 %v4309_v40, %v4308_v31  ;;  %7567 = vmatprep.subr.bf16.mxu1 %v7904_v18  ;;  %v7913_v31 = vld [vmem:[%s12668_s15 + $0x10] sm:$0xff]  }
 0x5df   : > { %v8007_v41 = vpop.eup %8006 }
 0x5e0   : > { %v8009_v57 = vpop.eup %8008  ;;  %7552 = vmatmul.mubr.bf16.gmra.mrb[56].mxu1 %v4319_v37  ;;  %v4311_v6 = vmul.f32 %v8007_v41, %v12007_v11  ;;  %v7908_v11 = vld [vmem:[%s12666_s13] sm:$0xff]   ;;  %v7915_v41 = vld [vmem:[%s12668_s15 + $0x18] sm:$0xff]  }
 0x5e1   : > { %7568 = vmatpush3.bf16.msra.mxu1 %v7904_v18  ;;  %v4312_v47 = vmul.f32 %v8009_v57, %v12009_v54  ;;  %v7909_v54 = vld [vmem:[%s12668_s15] sm:$0xff]   ;;  %7591 = vmatprep.subr.bf16.mxu0 %v7908_v11 }
 0x5e2   : > { %v4320_v60 = vpack.c.bf16 %v4311_v6, %v4310_v63  ;;  %7569 = vmatprep.subr.bf16.mxu1 %v7905_v58  ;;  %7592 = vmatpush3.bf16.msra.mxu0 %v7908_v11  ;;  %v7917_v6 = vld [vmem:[%s12668_s15 + $0x20] sm:$0xff]  }
 0x5e3   : > { %v8011_v59 = vpop.eup %8010 }
 0x5e4   : > { %v4313_v14 = vmul.f32 %v8011_v59, %v12013_v19  ;;  %7555 = vmatprep.mubr.bf16.mxu1 %v4320_v60  ;;  %v7910_v19 = vld [vmem:[%s12666_s13 + $0x8] sm:$0xff]  }
 0x5e5   : > { %7570 = vmatpush3.bf16.msra.mxu1 %v7905_v58  ;;  %7593 = vmatprep.subr.bf16.mxu0 %v7910_v19 }
 0x5e6   : > { %v4321_v26 = vpack.c.bf16 %v4313_v14, %v4312_v47  ;;  %7571 = vmatprep.subr.bf16.mxu1 %v7906_v8  ;;  %7594 = vmatpush3.bf16.msra.mxu0 %v7910_v19  ;;  %v7919_v14 = vld [vmem:[%s12668_s15 + $0x28] sm:$0xff]  }
 0x5e7   : > { %7595 = vmatprep.subr.bf16.mxu0 %v7912_v45 }
 0x5e8   : > { %7556 = vmatmul.mubr.bf16.gmra.mrb[60].mxu1 %v4321_v26 }
 0x5e9   : > { %7572 = vmatpush3.bf16.msra.mxu1 %v7906_v8 }
 0x5ea   : > { %7573 = vmatprep.subr.bf16.mxu1 %v7907_v52  ;;  %7596 = vmatpush3.bf16.msra.mxu0 %v7912_v45 }
 0x5eb   : > { %7597 = vmatprep.subr.bf16.mxu0 %v7914_v44 }
 0x5ed   : > { %7574 = vmatpush3.bf16.msra.mxu1 %v7907_v52 }
 0x5ee   : > { %7623 = vmatprep.subr.bf16.mxu1 %v7909_v54  ;;  %7598 = vmatpush3.bf16.msra.mxu0 %v7914_v44  ;;  %v7920_v44 = vld [vmem:[%s12666_s13 + $0x30] sm:$0xff]  }
 0x5ef   : > { %7599 = vmatprep.subr.bf16.mxu0 %v7916_v12 }
 0x5f2   : > { %7600 = vmatpush3.bf16.msra.mxu0 %v7916_v12  ;;  %v7921_v12 = vld [vmem:[%s12668_s15 + $0x30] sm:$0xff]  }
 0x5f3   : > { %7601 = vmatprep.subr.bf16.mxu0 %v7918_v42 }
 0x5f6   : > { %7602 = vmatpush3.bf16.msra.mxu0 %v7918_v42  ;;  %v7922_v42 = vld [vmem:[%s12666_s13 + $0x38] sm:$0xff]  }
 0x5f7   : > { %7603 = vmatprep.subr.bf16.mxu0 %v7920_v44 }
 0x5fa   : > { %7604 = vmatpush3.bf16.msra.mxu0 %v7920_v44 }
 0x5fb   : > { %7605 = vmatprep.subr.bf16.mxu0 %v7922_v42 }
 0x5fe   : > { %7606 = vmatpush3.bf16.msra.mxu0 %v7922_v42 }
 0x6a3   : > { %v7545_v30 = vpop.f32.mrb[48].mxu1 }
 0x6a4   : > { %v4364_v25 = vpop.f32.mrb[49].mxu1 }
 0x6a5   : > { %v7546_v55 = vpop.f32.mrb[50].mxu1 }
 0x6a6   : > { %v4428_v51 = vpack.c.bf16 %v7546_v55, %v7545_v30  ;;  %v4367_v1 = vpop.f32.mrb[51].mxu1  ;;  %v7923_v30 = vld [vmem:[%s12668_s15 + $0x38] sm:$0xff]   ;;  %v12110_v55 = vld [vmem:[%s12665_s12] ss:$0 sm:$0xff] }
 0x6a7   : > { %v4427_v48 = vpack.c.bf16 %v4367_v1, %v4364_v25  ;;  %v7924_v25 = vld [vmem:[%s12670_s17] sm:$0xff]  }
 0x6a8   : > { %7655 = vmatprep.subr.bf16.mxu0 %v7924_v25 }
 0x6a9   : > { %7575 = vmatprep.mubr.bf16.mxu1 %v4427_v48 }
 0x6aa   : > { %7576 = vmatmul.mubr.bf16.vlgmr.msra.gmra.mrb[64].mxu1 %v4428_v51 }
 0x6ab   : > { %v7549_v18 = vpop.f32.mrb[52].mxu1  ;;  %7624 = vmatpush3.bf16.msra.mxu1 %v7909_v54 }
 0x6ac   : > { %v4380_v56 = vpop.f32.mrb[53].mxu1  ;;  %7625 = vmatprep.subr.bf16.mxu1 %v7911_v17 }
 0x6ad   : > { %v7550_v40 = vpop.f32.mrb[54].mxu1 }
 0x6ae   : > { %v4430_v15 = vpack.c.bf16 %v7550_v40, %v7549_v18  ;;  %v4383_v37 = vpop.f32.mrb[55].mxu1 }
 0x6af   : > { %v4429_v58 = vpack.c.bf16 %v4383_v37, %v4380_v56  ;;  %7626 = vmatpush3.bf16.msra.mxu1 %v7911_v17 }
 0x6b0   : > { %7627 = vmatprep.subr.bf16.mxu1 %v7913_v31 }
 0x6b1   : > { %7579 = vmatprep.mubr.bf16.mxu1 %v4429_v58 }
 0x6b2   : > { %7580 = vmatmul.mubr.bf16.gmra.mrb[68].mxu1 %v4430_v15 }
 0x6b3   : > { %v7553_v57 = vpop.f32.mrb[56].mxu1  ;;  %7628 = vmatpush3.bf16.msra.mxu1 %v7913_v31 }
 0x6b4   : > { %v4396_v63 = vpop.f32.mrb[57].mxu1  ;;  %7629 = vmatprep.subr.bf16.mxu1 %v7915_v41 }
 0x6b5   : > { %v7554_v59 = vpop.f32.mrb[58].mxu1 }
 0x6b6   : > { %v4432_v60 = vpack.c.bf16 %v7554_v59, %v7553_v57  ;;  %v4399_v8 = vpop.f32.mrb[59].mxu1 }
 0x6b7   : > { %v4431_v47 = vpack.c.bf16 %v4399_v8, %v4396_v63  ;;  %7630 = vmatpush3.bf16.msra.mxu1 %v7915_v41 }
 0x6b8   : > { %7631 = vmatprep.subr.bf16.mxu1 %v7917_v6 }
 0x6b9   : > { %7583 = vmatprep.mubr.bf16.mxu1 %v4431_v47 }
 0x6ba   : > { %7584 = vmatmul.mubr.bf16.gmra.mrb[72].mxu1 %v4432_v60 }
 0x6bb   : > { %v7557_v26 = vpop.f32.mrb[60].mxu1  ;;  %7632 = vmatpush3.bf16.msra.mxu1 %v7917_v6 }
 0x6bc   : > { %v4412_v52 = vpop.f32.mrb[61].mxu1  ;;  %7633 = vmatprep.subr.bf16.mxu1 %v7919_v14 }
 0x6bd   : > { %v7558_v11 = vpop.f32.mrb[62].mxu1 }
 0x6be   : > { %v4434_v54 = vpack.c.bf16 %v7558_v11, %v7557_v26  ;;  %v4415_v19 = vpop.f32.mrb[63].mxu1  ;;  %v7926_v26 = vld [vmem:[%s12670_s17 + $0x10] sm:$0xff]  }
 0x6bf   : > { %v4433_v45 = vpack.c.bf16 %v4415_v19, %v4412_v52  ;;  %7634 = vmatpush3.bf16.msra.mxu1 %v7919_v14 }
 0x6c0   : > { %7635 = vmatprep.subr.bf16.mxu1 %v7921_v12 }
 0x6c1   : > { %7587 = vmatprep.mubr.bf16.mxu1 %v4433_v45 }
 0x6c2   : > { %7588 = vmatmul.mubr.bf16.gmra.mrb[76].mxu1 %v4434_v54 }
 0x6c3   : > { %7636 = vmatpush3.bf16.msra.mxu1 %v7921_v12 }
 0x6c4   : > { %7637 = vmatprep.subr.bf16.mxu1 %v7923_v30 }
 0x6c7   : > { %7638 = vmatpush3.bf16.msra.mxu1 %v7923_v30 }
 0x77d   : > { %v7577_v51 = vpop.f32.mrb[64].mxu1 }
 0x77e   : > { %v4523_v1 = vpop.f32.mrb[65].mxu1  ;;  %v4532_v18 = vadd.f32 %v7577_v51, %v12110_v55 }
 0x77f   : > { %v4524_v48 = vadd.f32 %v12110_v55, %v4523_v1  ;;  %v7578_v17 = vpop.f32.mrb[66].mxu1  ;;  %v7928_v1 = vld [vmem:[%s12670_s17 + $0x20] sm:$0xff]  }
 0x780   : > { %v4535_v56 = vadd.f32 %v7578_v17, %v12110_v55  ;;  %v4526_v31 = vpop.f32.mrb[67].mxu1  ;;  %v12126_v41 = vadd.f32 %v4532_v18, %v11032_v39 }
 0x781   : > { %v4527_v40 = vadd.f32 %v12110_v55, %v4526_v31  ;;  %v12120_v37 = vadd.f32 %v4524_v48, %v11017_v3  ;;  %v7925_v3 = vld [vmem:[%s12670_s17 + $0x8] sm:$0xff]  }
 0x782   : > { %v12117_v15 = vadd.f32 %v4535_v56, %v11021_v24 }
 0x783   : > { %v12123_v58 = vadd.f32 %v4527_v40, %v11025_v20 }
 0x784   : > { %v12134_v6 = vpack.c.bf16 %v12117_v15, %v12126_v41 }
 0x785   : > { %v7581_v57 = vpop.f32.mrb[68].mxu1  ;;  %v12130_v63 = vpack.c.bf16 %v12123_v58, %v12120_v37 }
 0x786   : > { %v4539_v24 = vpop.f32.mrb[69].mxu1  ;;  %v4548_v39 = vadd.f32 %v7581_v57, %v12110_v55 }
 0x787   : > { %v4540_v20 = vadd.f32 %v12110_v55, %v4539_v24  ;;  %v7582_v59 = vpop.f32.mrb[70].mxu1  ;;  %7607 = vmatprep.mubr.bf16.mxu0 %v12130_v63  ;;  %7639 = vmatprep.mubr.bf16.mxu1 %v12130_v63 }
 0x788   : > { %v4551_v60 = vadd.f32 %v7582_v59, %v12110_v55  ;;  %v4542_v8 = vpop.f32.mrb[71].mxu1  ;;  %7608 = vmatmul.mubr.bf16.vlgmr.msra.gmra.mrb[32].mxu0 %v12134_v6  ;;  %7640 = vmatmul.mubr.bf16.vlgmr.msra.gmra.mrb[80].mxu1 %v12134_v6  ;;  %v12160_v54 = vadd.f32 %v4548_v39, %v11155_v34  ;;  %v12995_v59 = vld [vmem:[#allocation3_spill] sm:$0xff] }
 0x789   : > { %v4543_v47 = vadd.f32 %v12110_v55, %v4542_v8  ;;  %7656 = vmatpush3.bf16.msra.mxu0 %v7924_v25  ;;  %v12154_v52 = vadd.f32 %v4540_v20, %v11159_v4  ;;  %v7927_v4 = vld [vmem:[%s12670_s17 + $0x18] sm:$0xff]   ;;  %v12997_v8 = vld [vmem:[#allocation11_spill] sm:$0xff] }
 0x78a   : > { %v12148_v14 = vadd.f32 %v4551_v60, %v11162_v5  ;;  %7657 = vmatprep.subr.bf16.mxu0 %v7925_v3  ;;  %v7930_v60 = vld [vmem:[%s12670_s17 + $0x30] sm:$0xff]  }
 0x78b   : > { %v12157_v11 = vadd.f32 %v4543_v47, %v11165_v23 }
 0x78c   : > { %v4673_v44 = vpack.c.bf16 %v12148_v14, %v12160_v54 }
 0x78d   : > { %v7585_v19 = vpop.f32.mrb[72].mxu1  ;;  %7658 = vmatpush3.bf16.msra.mxu0 %v7925_v3  ;;  %v4672_v5 = vpack.c.bf16 %v12157_v11, %v12154_v52 }
 0x78e   : > { %v4555_v45 = vpop.f32.mrb[73].mxu1  ;;  %7659 = vmatprep.subr.bf16.mxu0 %v7926_v26  ;;  %v4564_v34 = vadd.f32 %v7585_v19, %v12110_v55 }
 0x78f   : > { %v4556_v23 = vadd.f32 %v12110_v55, %v4555_v45  ;;  %v7586_v12 = vpop.f32.mrb[74].mxu1  ;;  %7611 = vmatprep.mubr.bf16.mxu0 %v4672_v5  ;;  %7643 = vmatprep.mubr.bf16.mxu1 %v4672_v5  ;;  %v13001_v45 = vld [vmem:[#allocation10_spill] sm:$0xff] }
 0x790   : > { %v4567_v42 = vadd.f32 %v7586_v12, %v12110_v55  ;;  %v4558_v30 = vpop.f32.mrb[75].mxu1  ;;  %7612 = vmatmul.mubr.bf16.gmra.mrb[36].mxu0 %v4673_v44  ;;  %7644 = vmatmul.mubr.bf16.gmra.mrb[84].mxu1 %v4673_v44  ;;  %v12186_v18 = vadd.f32 %v4564_v34, %v11205_v46  ;;  %v7931_v12 = vld [vmem:[%s12670_s17 + $0x38] sm:$0xff]   ;;  %v12226_v34 = vld [vmem:[%s12667_s14] ss:$0 sm:$0xff] }
 0x791   : > { %v4559_v25 = vadd.f32 %v12110_v55, %v4558_v30  ;;  %7660 = vmatpush3.bf16.msra.mxu0 %v7926_v26  ;;  %v12180_v48 = vadd.f32 %v4556_v23, %v11208_v43  ;;  %v7929_v43 = vld [vmem:[%s12670_s17 + $0x28] sm:$0xff]   ;;  %v12999_v26 = vld [vmem:[#allocation4_spill] sm:$0xff] }
 0x792   : > { %v12174_v51 = vadd.f32 %v4567_v42, %v11211_v16  ;;  %7661 = vmatprep.subr.bf16.mxu0 %v7927_v4  ;;  %12994 = vst [vmem:[#allocation24_spill] sm:$0xff] %v12186_v18 }
 0x793   : > { %12992 = vst [vmem:[#allocation22_spill] sm:$0xff] %v12180_v48  ;;  %v12183_v17 = vadd.f32 %v4559_v25, %v11214_v13 }
 0x794   : > { %12991 = vst [vmem:[#allocation21_spill] sm:$0xff] %v12174_v51  ;;  %v4675_v40 = vpack.c.bf16 %v12174_v51, %v12186_v18 }
 0x795   : > { %12993 = vst [vmem:[#allocation23_spill] sm:$0xff] %v12183_v17  ;;  %v7589_v56 = vpop.f32.mrb[76].mxu1  ;;  %7662 = vmatpush3.bf16.msra.mxu0 %v7927_v4  ;;  %v4674_v16 = vpack.c.bf16 %v12183_v17, %v12180_v48 }
 0x796   : > { %v4571_v31 = vpop.f32.mrb[77].mxu1  ;;  %7663 = vmatprep.subr.bf16.mxu0 %v7928_v1  ;;  %v4580_v46 = vadd.f32 %v7589_v56, %v12110_v55 }
 0x797   : > { %v4572_v13 = vadd.f32 %v12110_v55, %v4571_v31  ;;  %v7590_v57 = vpop.f32.mrb[78].mxu1  ;;  %7615 = vmatprep.mubr.bf16.mxu0 %v4674_v16  ;;  %7647 = vmatprep.mubr.bf16.mxu1 %v4674_v16 }
 0x798   : > { %v4583_v24 = vadd.f32 %v7590_v57, %v12110_v55  ;;  %v4574_v3 = vpop.f32.mrb[79].mxu1  ;;  %7616 = vmatmul.mubr.bf16.gmra.mrb[40].mxu0 %v4675_v40  ;;  %7648 = vmatmul.mubr.bf16.gmra.mrb[88].mxu1 %v4675_v40  ;;  %v12212_v4 = vadd.f32 %v4580_v46, %v13001_v45 }
 0x799   : > { %v4575_v20 = vadd.f32 %v12110_v55, %v4574_v3  ;;  %7664 = vmatpush3.bf16.msra.mxu0 %v7928_v1  ;;  %v12206_v47 = vadd.f32 %v4572_v13, %v12997_v8 }
 0x79a   : > { %v12200_v39 = vadd.f32 %v4583_v24, %v12995_v59  ;;  %7665 = vmatprep.subr.bf16.mxu0 %v7929_v43  ;;  %13002 = vst [vmem:[#allocation10_spill] sm:$0xff] %v12212_v4 }
 0x79b   : > { %12998 = vst [vmem:[#allocation11_spill] sm:$0xff] %v12206_v47  ;;  %v12209_v19 = vadd.f32 %v4575_v20, %v12999_v26 }
 0x79c   : > { %12996 = vst [vmem:[#allocation3_spill] sm:$0xff] %v12200_v39  ;;  %v4677_v23 = vpack.c.bf16 %v12200_v39, %v12212_v4 }
 0x79d   : > { %13000 = vst [vmem:[#allocation4_spill] sm:$0xff] %v12209_v19  ;;  %7666 = vmatpush3.bf16.msra.mxu0 %v7929_v43  ;;  %v4676_v55 = vpack.c.bf16 %v12209_v19, %v12206_v47 }
 0x79e   : > { %7667 = vmatprep.subr.bf16.mxu0 %v7930_v60 }
 0x79f   : > { %7619 = vmatprep.mubr.bf16.mxu0 %v4676_v55  ;;  %7651 = vmatprep.mubr.bf16.mxu1 %v4676_v55 }
 0x7a0   : > { %7620 = vmatmul.mubr.bf16.gmra.mrb[44].mxu0 %v4677_v23  ;;  %7652 = vmatmul.mubr.bf16.gmra.mrb[92].mxu1 %v4677_v23 }
 0x7a1   : > { %7668 = vmatpush3.bf16.msra.mxu0 %v7930_v60  ;;  %7671 = vmatprep.mubr.bf16.mxu0 %v12130_v63  ;;  %v12231_v63 = vld [vmem:[%s12669_s16] ss:$0 sm:$0xff] }
 0x7a2   : > { %7669 = vmatprep.subr.bf16.mxu0 %v7931_v12 }
 0x7a5   : > { %7670 = vmatpush3.bf16.msra.mxu0 %v7931_v12 }
 0x7a8   : > { %7672 = vmatmul.mubr.bf16.vlgmr.msra.gmra.mrb[48].mxu0 %v12134_v6 }
 0x7a9   : > { %7675 = vmatprep.mubr.bf16.mxu0 %v4672_v5 }
 0x7b0   : > { %7676 = vmatmul.mubr.bf16.gmra.mrb[52].mxu0 %v4673_v44 }
 0x7b1   : > { %7679 = vmatprep.mubr.bf16.mxu0 %v4674_v16 }
 0x7b8   : > { %7680 = vmatmul.mubr.bf16.gmra.mrb[56].mxu0 %v4675_v40 }
 0x7b9   : > { %7683 = vmatprep.mubr.bf16.mxu0 %v4676_v55 }
 0x7c0   : > { %7684 = vmatmul.mubr.bf16.gmra.mrb[60].mxu0 %v4677_v23 }
 0x85b   : > { %v7609_v42 = vpop.f32.mrb[32].mxu0  ;;  %v7641_v30 = vpop.f32.mrb[80].mxu1 }
 0x85c   : > { %v4775_v6 = vadd.f32 %v7609_v42, %v12226_v34  ;;  %v4766_v5 = vpop.f32.mrb[33].mxu0  ;;  %v4933_v44 = vpop.f32.mrb[81].mxu1  ;;  %v4942_v16 = vadd.f32 %v7641_v30, %v12231_v63 }
 0x85d   : > { %v4767_v25 = vadd.f32 %v12226_v34, %v4766_v5  ;;  %v7610_v1 = vpop.f32.mrb[34].mxu0  ;;  %v7642_v56 = vpop.f32.mrb[82].mxu1  ;;  %v4934_v57 = vadd.f32 %v12231_v63, %v4933_v44 }
 0x85e   : > { %v4778_v31 = vadd.f32 %v7610_v1, %v12226_v34  ;;  %v4945_v40 = vadd.f32 %v7642_v56, %v12231_v63  ;;  %v4769_v43 = vpop.f32.mrb[35].mxu0  ;;  %v4936_v13 = vpop.f32.mrb[83].mxu1  ;;  %v12241_v3 = vmul.f32 0.088388346, %v4775_v6 }
 0x85f   : > { %v4770_v46 = vadd.f32 %v12226_v34, %v4769_v43  ;;  %v4937_v24 = vadd.f32 %v12231_v63, %v4936_v13  ;;  %v4829_v60 = vmul.f32 0.088388346, %v4767_v25 }
 0x860   : > { %v12243_v20 = vmul.f32 0.088388346, %v4778_v31  ;;  %v5156_v59 = vpack.c.bf16 %v4945_v40, %v4942_v16 }
 0x861   : > { %v4830_v8 = vmul.f32 0.088388346, %v4770_v46  ;;  %v5155_v26 = vpack.c.bf16 %v4937_v24, %v4934_v57 }
 0x863   : > { %v5147_v55 = vpack.c.bf16 %v4830_v8, %v4829_v60  ;;  %v7613_v23 = vpop.f32.mrb[36].mxu0  ;;  %v7645_v12 = vpop.f32.mrb[84].mxu1  ;;  %7687 = vmatprep.subr.bf16.mxu1 %v5155_v26 }
 0x864   : > { %v4791_v42 = vadd.f32 %v7613_v23, %v12226_v34  ;;  %v4782_v30 = vpop.f32.mrb[37].mxu0  ;;  %v4949_v5 = vpop.f32.mrb[85].mxu1  ;;  %7688 = vmatpush3.bf16.xpose.msra.mxu1 %v5155_v26  ;;  %v4958_v25 = vadd.f32 %v7645_v12, %v12231_v63 }
 0x865   : > { %v4783_v6 = vadd.f32 %v12226_v34, %v4782_v30  ;;  %v7614_v44 = vpop.f32.mrb[38].mxu0  ;;  %v7646_v1 = vpop.f32.mrb[86].mxu1  ;;  %7689 = vmatprep.subr.bf16.mxu1 %v5156_v59  ;;  %7703 = vmatprep.mubr.bf16.mxu1 %v5147_v55  ;;  %v4950_v43 = vadd.f32 %v12231_v63, %v4949_v5 }
 0x866   : > { %v4794_v56 = vadd.f32 %v7614_v44, %v12226_v34  ;;  %v4961_v16 = vadd.f32 %v7646_v1, %v12231_v63  ;;  %v4785_v31 = vpop.f32.mrb[39].mxu0  ;;  %v4952_v40 = vpop.f32.mrb[87].mxu1  ;;  %v12255_v46 = vmul.f32 0.088388346, %v4791_v42 }
 0x867   : > { %v4786_v13 = vadd.f32 %v12226_v34, %v4785_v31  ;;  %v4953_v57 = vadd.f32 %v12231_v63, %v4952_v40  ;;  %v12259_v8 = vmul.f32 0.088388346, %v4783_v6 }
 0x868   : > { %v12257_v24 = vmul.f32 0.088388346, %v4794_v56  ;;  %v5158_v60 = vpack.c.bf16 %v4961_v16, %v4958_v25 }
 0x869   : > { %v12261_v26 = vmul.f32 0.088388346, %v4786_v13  ;;  %v5157_v55 = vpack.c.bf16 %v4953_v57, %v4950_v43 }
 0x86b   : > { %v7617_v30 = vpop.f32.mrb[40].mxu0  ;;  %v7649_v5 = vpop.f32.mrb[88].mxu1 }
 0x86c   : > { %v4807_v44 = vadd.f32 %v7617_v30, %v12226_v34  ;;  %v4798_v42 = vpop.f32.mrb[41].mxu0  ;;  %v4965_v1 = vpop.f32.mrb[89].mxu1  ;;  %7690 = vmatpush3.bf16.xpose.msra.mxu1 %v5156_v59  ;;  %v4974_v16 = vadd.f32 %v7649_v5, %v12231_v63 }
 0x86d   : > { %v4799_v25 = vadd.f32 %v12226_v34, %v4798_v42  ;;  %v7618_v6 = vpop.f32.mrb[42].mxu0  ;;  %v7650_v56 = vpop.f32.mrb[90].mxu1  ;;  %7691 = vmatprep.subr.bf16.mxu1 %v5157_v55  ;;  %v4966_v57 = vadd.f32 %v12231_v63, %v4965_v1 }
 0x86e   : > { %v4810_v31 = vadd.f32 %v7618_v6, %v12226_v34  ;;  %v4977_v40 = vadd.f32 %v7650_v56, %v12231_v63  ;;  %v4801_v43 = vpop.f32.mrb[43].mxu0  ;;  %v4968_v13 = vpop.f32.mrb[91].mxu1  ;;  %v12275_v59 = vmul.f32 0.088388346, %v4807_v44 }
 0x86f   : > { %v4802_v30 = vadd.f32 %v12226_v34, %v4801_v43  ;;  %v4969_v23 = vadd.f32 %v12231_v63, %v4968_v13  ;;  %v12281_v45 = vmul.f32 0.088388346, %v4799_v25 }
 0x870   : > { %v12277_v42 = vmul.f32 0.088388346, %v4810_v31  ;;  %v12279_v12 = vpack.c.bf16 %v4977_v40, %v4974_v16 }
 0x871   : > { %v12283_v5 = vmul.f32 0.088388346, %v4802_v30  ;;  %v5159_v6 = vpack.c.bf16 %v4969_v23, %v4966_v57 }
 0x873   : > { %v7621_v43 = vpop.f32.mrb[44].mxu0  ;;  %v7653_v19 = vpop.f32.mrb[92].mxu1 }
 0x874   : > { %v4823_v44 = vadd.f32 %v7621_v43, %v12226_v34  ;;  %v4814_v13 = vpop.f32.mrb[45].mxu0  ;;  %v4981_v31 = vpop.f32.mrb[93].mxu1  ;;  %7692 = vmatpush3.bf16.xpose.msra.mxu1 %v5157_v55  ;;  %v4990_v23 = vadd.f32 %v7653_v19, %v12231_v63 }
 0x875   : > { %v4815_v16 = vadd.f32 %v12226_v34, %v4814_v13  ;;  %v7622_v25 = vpop.f32.mrb[46].mxu0  ;;  %v7654_v40 = vpop.f32.mrb[94].mxu1  ;;  %7693 = vmatprep.subr.bf16.mxu1 %v5158_v60  ;;  %v4982_v47 = vadd.f32 %v12231_v63, %v4981_v31 }
 0x876   : > { %v4826_v57 = vadd.f32 %v7622_v25, %v12226_v34  ;;  %v4993_v30 = vadd.f32 %v7654_v40, %v12231_v63  ;;  %v4817_v56 = vpop.f32.mrb[47].mxu0  ;;  %v4984_v1 = vpop.f32.mrb[95].mxu1  ;;  %v12297_v55 = vmul.f32 0.088388346, %v4823_v44 }
 0x877   : > { %v4818_v43 = vadd.f32 %v12226_v34, %v4817_v56  ;;  %v4985_v39 = vadd.f32 %v12231_v63, %v4984_v1  ;;  %v12303_v17 = vmul.f32 0.088388346, %v4815_v16  ;;  %v6045_v63 = vld [vmem:[%s12671_s18] ss:$0 sm:$0xff] }
 0x878   : > { %v12299_v13 = vmul.f32 0.088388346, %v4826_v57  ;;  %v12301_v4 = vpack.c.bf16 %v4993_v30, %v4990_v23 }
 0x879   : > { %v12305_v19 = vmul.f32 0.088388346, %v4818_v43  ;;  %v5161_v25 = vpack.c.bf16 %v4985_v39, %v4982_v47 }
 0x87b   : > { %v7673_v34 = vpop.f32.mrb[48].mxu0 }
 0x87c   : > { %v5084_v56 = vpop.f32.mrb[49].mxu0  ;;  %7694 = vmatpush3.bf16.xpose.msra.mxu1 %v5158_v60  ;;  %v5093_v44 = vadd.f32 %v7673_v34, %v6045_v63 }
 0x87d   : > { %v7674_v1 = vpop.f32.mrb[50].mxu0  ;;  %7695 = vmatprep.subr.bf16.mxu1 %v5159_v6  ;;  %v5085_v57 = vadd.f32 %v6045_v63, %v5084_v56 }
 0x87e   : > { %v5096_v16 = vadd.f32 %v7674_v1, %v6045_v63  ;;  %v5087_v23 = vpop.f32.mrb[51].mxu0 }
 0x87f   : > { %v5088_v39 = vadd.f32 %v6045_v63, %v5087_v23 }
 0x880   : > { %v5429_v47 = vpack.c.bf16 %v5096_v16, %v5093_v44 }
 0x881   : > { %v5428_v30 = vpack.c.bf16 %v5088_v39, %v5085_v57 }
 0x883   : > { %v7677_v43 = vpop.f32.mrb[52].mxu0  ;;  %7719 = vmatprep.subr.bf16.mxu0 %v5428_v30 }
 0x884   : > { %v5100_v40 = vpop.f32.mrb[53].mxu0  ;;  %7696 = vmatpush3.bf16.xpose.msra.mxu1 %v5159_v6  ;;  %7720 = vmatpush3.bf16.msra.mxu0 %v5428_v30  ;;  %v5109_v48 = vadd.f32 %v7677_v43, %v6045_v63 }
 0x885   : > { %v7678_v31 = vpop.f32.mrb[54].mxu0  ;;  %7697 = vmatprep.subr.bf16.mxu1 %v12279_v12  ;;  %7721 = vmatprep.subr.bf16.mxu0 %v5429_v47  ;;  %v5101_v18 = vadd.f32 %v6045_v63, %v5100_v40 }
 0x886   : > { %v5112_v60 = vadd.f32 %v7678_v31, %v6045_v63  ;;  %v5103_v51 = vpop.f32.mrb[55].mxu0 }
 0x887   : > { %v5104_v34 = vadd.f32 %v6045_v63, %v5103_v51 }
 0x888   : > { %v5431_v1 = vpack.c.bf16 %v5112_v60, %v5109_v48  ;;  %7722 = vmatpush3.bf16.msra.mxu0 %v5429_v47 }
 0x889   : > { %v5430_v56 = vpack.c.bf16 %v5104_v34, %v5101_v18 }
 0x88b   : > { %v7681_v23 = vpop.f32.mrb[56].mxu0  ;;  %7723 = vmatprep.subr.bf16.mxu0 %v5430_v56 }
 0x88c   : > { %v5116_v44 = vpop.f32.mrb[57].mxu0  ;;  %7698 = vmatpush3.bf16.xpose.msra.mxu1 %v12279_v12  ;;  %7724 = vmatpush3.bf16.msra.mxu0 %v5430_v56  ;;  %v5125_v16 = vadd.f32 %v7681_v23, %v6045_v63 }
 0x88d   : > { %v7682_v6 = vpop.f32.mrb[58].mxu0  ;;  %7699 = vmatprep.subr.bf16.mxu1 %v5161_v25  ;;  %7725 = vmatprep.subr.bf16.mxu0 %v5431_v1  ;;  %v5117_v30 = vadd.f32 %v6045_v63, %v5116_v44 }
 0x88e   : > { %v5128_v57 = vadd.f32 %v7682_v6, %v6045_v63  ;;  %v5119_v39 = vpop.f32.mrb[59].mxu0  ;;  %v13006_v6 = vpack.c.bf16 %v12283_v5, %v12281_v45 }
 0x88f   : > { %v5120_v31 = vadd.f32 %v6045_v63, %v5119_v39  ;;  %v13019_v39 = vld [vmem:[#allocation13_spill] sm:$0xff] }
 0x890   : > { %v5433_v43 = vpack.c.bf16 %v5128_v57, %v5125_v16  ;;  %7726 = vmatpush3.bf16.msra.mxu0 %v5431_v1  ;;  %v13004_v1 = vpack.c.bf16 %v12261_v26, %v12259_v8  ;;  %v13010_v8 = vld [vmem:[#allocation9_spill] sm:$0xff]  ;;  %v13011_v26 = vld [vmem:[#allocation7_spill] sm:$0xff] }
 0x891   : > { %v5432_v51 = vpack.c.bf16 %v5120_v31, %v5117_v30  ;;  %v13020_v30 = vfloor.f32 %v13019_v39  ;;  %v13021_v31 = vld [vmem:[#allocation14_spill] sm:$0xff] }
 0x893   : > { %v7685_v48 = vpop.f32.mrb[60].mxu0  ;;  %7727 = vmatprep.subr.bf16.mxu0 %v5432_v51 }
 0x894   : > { %v5132_v18 = vpop.f32.mrb[61].mxu0  ;;  %7700 = vmatpush3.bf16.xpose.msra.mxu1 %v5161_v25  ;;  %7728 = vmatpush3.bf16.msra.mxu0 %v5432_v51  ;;  %v5141_v12 = vadd.f32 %v7685_v48, %v6045_v63  ;;  %v13003_v25 = vpack.c.bf16 %v12243_v20, %v12241_v3  ;;  %v13008_v3 = vpack.c.bf16 %v12305_v19, %v12303_v17  ;;  %v13017_v19 = vld [vmem:[#allocation6_spill] sm:$0xff] }
 0x895   : > { %v7686_v40 = vpop.f32.mrb[62].mxu0  ;;  %7701 = vmatprep.subr.bf16.mxu1 %v12301_v4  ;;  %7729 = vmatprep.subr.bf16.mxu0 %v5433_v43  ;;  %v5133_v34 = vadd.f32 %v6045_v63, %v5132_v18  ;;  %v13009_v20 = vpack.c.bf16 %v12299_v13, %v12297_v55  ;;  %v13018_v16 = vfloor.f32 %v13017_v19  ;;  %v13026_v18 = vfloor.f32 %v13025_v36 }
 0x896   : > { %v5144_v47 = vadd.f32 %v7686_v40, %v6045_v63  ;;  %v5135_v60 = vpop.f32.mrb[63].mxu0 }
 0x897   : > { %v5136_v56 = vadd.f32 %v6045_v63, %v5135_v60  ;;  %v13005_v63 = vpack.c.bf16 %v12257_v24, %v12255_v46  ;;  %v13012_v46 = vfloor.f32 %v13011_v26  ;;  %v13013_v24 = vld [vmem:[#allocation12_spill] sm:$0xff]  ;;  %vm3467_vm10 = vcmp.eq.f32.partialorder %v13018_v16, %v13010_v8 }
 0x898   : > { %v5435_v23 = vpack.c.bf16 %v5144_v47, %v5141_v12  ;;  %7730 = vmatpush3.bf16.msra.mxu0 %v5433_v43  ;;  %v13014_v45 = vfloor.f32 %v13013_v24  ;;  %v13022_v43 = vfloor.f32 %v13021_v31 }
 0x899   : > { %v5434_v44 = vpack.c.bf16 %v5136_v56, %v5133_v34  ;;  %vm3464_vm9 = vcmp.eq.f32.partialorder %v13012_v46, %v13010_v8  ;;  %v13028_v56 = vfloor.f32 %v11579_v53 }
 0x89a   : > { %vm3465_vm0 = vcmp.eq.f32.partialorder %v13014_v45, %v13010_v8  ;;  %vm3480_vm8 = vmand %vm11504_vm2, %vm3464_vm9  ;;  %vm3468_vm9 = vcmp.eq.f32.partialorder %v13020_v30, %v13010_v8 }
 0x89b   : > { %7731 = vmatprep.subr.bf16.mxu0 %v5434_v44  ;;  %vm3481_vm3 = vmand %vm11608_vm7, %vm3465_vm0  ;;  %vm12373_vm0 = vcmp.eq.f32.partialorder %v13022_v43, %v13010_v8 }
 0x89c   : > { %7702 = vmatpush3.bf16.xpose.msra.mxu1 %v12301_v4  ;;  %7732 = vmatpush3.bf16.msra.mxu0 %v5434_v44  ;;  %v13007_v4 = vpack.c.bf16 %v12277_v42, %v12275_v59  ;;  %v13015_v42 = vld [vmem:[#allocation8_spill] sm:$0xff]  ;;  %vm3483_vm7 = vmand %vm11591_vm5, %vm3467_vm10  ;;  %vm3470_vm5 = vcmp.eq.f32.partialorder %v13026_v18, %v13010_v8 }
 0x89d   : > { %7733 = vmatprep.subr.bf16.mxu0 %v5435_v23  ;;  %v13016_v17 = vfloor.f32 %v13015_v42 }
 0x89f   : > { %vm3466_vm12 = vcmp.eq.f32.partialorder %v13016_v17, %v13010_v8 }
 0x8a0   : > { %7734 = vmatpush3.bf16.msra.mxu0 %v5435_v23  ;;  %vm3482_vm2 = vmand %vm11491_vm1, %vm3466_vm12 }
 0x8a1   : > { %vm3484_vm1 = vmand %vm11683_vm13, %vm3468_vm9  ;;  %vm3471_vm13 = vcmp.eq.f32.partialorder %v13027_v35, %v13010_v8 }
 0x8a2   : > { %vm3486_vm12 = vmand %vm11737_vm4, %vm3470_vm5  ;;  %vm13033_vm4 = vnez %v12953_v9  ;;  %v13037_v9 = vld [vmem:[#allocation17_spill] sm:$0xff] }
 0x8a3   : > { %7704 = vmatmul.mubr.bf16.vlgmr.msra.gmra.mrb[96].mxu1 %v13003_v25 }
 0x8a4   : > { %7707 = vmatprep.mubr.bf16.mxu1 %v13004_v1 }
 0x8ab   : > { %7708 = vmatmul.mubr.bf16.gmra.mrb[100].mxu1 %v13005_v63  ;;  %v13038_v63 = vfloor.f32 %v13037_v9 }
 0x8ac   : > { %7711 = vmatprep.mubr.bf16.mxu1 %v13006_v6 }
 0x8ad   : > { %vm3475_vm5 = vcmp.eq.f32.partialorder %v13038_v63, %v13010_v8 }
 0x8b3   : > { %7712 = vmatmul.mubr.bf16.gmra.mrb[104].mxu1 %v13007_v4 }
 0x8b4   : > { %7715 = vmatprep.mubr.bf16.mxu1 %v13008_v3  ;;  %v13040_v3 = vfloor.f32 %v11704_v49 }
 0x8bb   : > { %7716 = vmatmul.mubr.bf16.gmra.mrb[108].mxu1 %v13009_v20  ;;  %v13042_v20 = vfloor.f32 %v11724_v21 }
 0x976   : > { %v7705_v59 = vpop.f32.mrb[96].mxu1 }
 0x977   : > { %v5197_v5 = vpop.f32.mrb[97].mxu1  ;;  %v12368_v28 = vsel %vm3482_vm2, %v7705_v59, -1e+30  ;;  %vm12411_vm2 = vcmp.eq.f32.partialorder %v13030_v62, %v13010_v8 }
 0x978   : > { %v7706_v55 = vpop.f32.mrb[98].mxu1  ;;  %v12352_v13 = vsel %vm3480_vm8, %v5197_v5, -1e+30  ;;  %vm3485_vm8 = vmand %vm11695_vm15, %vm12373_vm0  ;;  %vm13029_vm15 = vnez %v12947_v7  ;;  %v13034_v7 = vld [vmem:[#allocation16_spill] sm:$0xff]  ;;  %vm13036_vm0 = vnez %v12959_v2 }
 0x979   : > { %5276 = vmax.xlane.f32.xlu0 %v12352_v13  ;;  %v5200_v22 = vpop.f32.mrb[99].mxu1  ;;  %v12380_v48 = vsel %vm3483_vm7, %v7706_v55, -1e+30  ;;  %vm3487_vm10 = vmand %vm13029_vm15, %vm3471_vm13  ;;  %v13035_v44 = vfloor.f32 %v13034_v7 }
 0x97a   : > { %v12360_v57 = vsel %vm3481_vm3, %v5200_v22, -1e+30  ;;  %vm3472_vm3 = vcmp.eq.f32.partialorder %v13028_v56, %v13010_v8 }
 0x97b   : > { %5278 = vmax.xlane.f32.xlu1 %v12360_v57  ;;  %vm3488_vm9 = vmand %vm13033_vm4, %vm3472_vm3  ;;  %vm3474_vm7 = vcmp.eq.f32.partialorder %v13035_v44, %v13010_v8  ;;  %vm13041_vm3 = vnez %v12970_v29  ;;  %v13046_v29 = vfloor.f32 %v11751_v38 }
 0x97c   : > { %vm3491_vm15 = vmand %vm13041_vm3, %vm3475_vm5 }
 0x97d   : > { %5280 = vmax.xlane.f32.xlu0 %v12368_v28 }
 0x97e   : > { %v7709_v32 = vpop.f32.mrb[100].mxu1 }
 0x97f   : > { %5282 = vmax.xlane.f32.xlu1 %v12380_v48  ;;  %v5213_v40 = vpop.f32.mrb[101].mxu1  ;;  %v12406_v61 = vsel %vm3486_vm12, %v7709_v32, -1e+30  ;;  %vm3476_vm12 = vcmp.eq.f32.partialorder %v13040_v3, %v13010_v8 }
 0x980   : > { %v7710_v12 = vpop.f32.mrb[102].mxu1  ;;  %v12390_v47 = vsel %vm3484_vm1, %v5213_v40, -1e+30  ;;  %vm3489_vm1 = vmand %vm13036_vm0, %vm12411_vm2  ;;  %vm13045_vm2 = vnez %v12975_v33  ;;  %v13047_v33 = vld [vmem:[#allocation18_spill] sm:$0xff] }
 0x981   : > { %5284 = vmax.xlane.f32.xlu0 %v12390_v47  ;;  %v5216_v60 = vpop.f32.mrb[103].mxu1  ;;  %v12418_v0 = vsel %vm3487_vm10, %v7710_v12, -1e+30  ;;  %vm12449_vm10 = vcmp.eq.f32.partialorder %v13042_v20, %v13010_v8  ;;  %vm3492_vm4 = vmand %vm13045_vm2, %vm3476_vm12  ;;  %v13048_v45 = vfloor.f32 %v13047_v33 }
 0x982   : > { %v12398_v34 = vsel %vm3485_vm8, %v5216_v60, -1e+30  ;;  %vm13039_vm8 = vnez %v12965_v50 }
 0x983   : > { %5286 = vmax.xlane.f32.xlu1 %v12398_v34  ;;  %vm3490_vm13 = vmand %vm13039_vm8, %vm3474_vm7  ;;  %vm3479_vm0 = vcmp.eq.f32.partialorder %v13048_v45, %v13010_v8 }
 0x984   : > { %vm3493_vm7 = vmand %vm11898_vm14, %vm12449_vm10 }
 0x985   : > { %5288 = vmax.xlane.f32.xlu0 %v12406_v61  ;;  %vm3495_vm14 = vmand %vm11933_vm11, %vm3479_vm0 }
 0x986   : > { %v7713_v53 = vpop.f32.mrb[104].mxu1 }
 0x987   : > { %5290 = vmax.xlane.f32.xlu1 %v12418_v0  ;;  %v5229_v25 = vpop.f32.mrb[105].mxu1  ;;  %v12444_v2 = vsel %vm3490_vm13, %v7713_v53, -1e+30 }
 0x988   : > { %v7714_v27 = vpop.f32.mrb[106].mxu1  ;;  %v12428_v1 = vsel %vm3488_vm9, %v5229_v25, -1e+30  ;;  %vm3478_vm9 = vcmp.eq.f32.partialorder %v13046_v29, %v13010_v8 }
 0x989   : > { %5292 = vmax.xlane.f32.xlu0 %v12428_v1  ;;  %v5232_v6 = vpop.f32.mrb[107].mxu1  ;;  %v12456_v50 = vsel %vm3491_vm15, %v7714_v27, -1e+30 }
 0x98a   : > { %v12436_v4 = vsel %vm3489_vm1, %v5232_v6, -1e+30  ;;  %vm3494_vm1 = vmand %vm11918_vm6, %vm3478_vm9  ;;  %vm8168_vm6 = vmmov 0  }
 0x98b   : > { %5294 = vmax.xlane.f32.xlu1 %v12436_v4 }
 0x98d   : > { %5296 = vmax.xlane.f32.xlu0 %v12444_v2 }
 0x98e   : > { %v7717_v49 = vpop.f32.mrb[108].mxu1 }
 0x98f   : > { %5298 = vmax.xlane.f32.xlu1 %v12456_v50  ;;  %v5245_v46 = vpop.f32.mrb[109].mxu1  ;;  %v12479_v10 = vsel %vm3494_vm1, %v7717_v49, -1e+30 }
 0x990   : > { %v7718_v21 = vpop.f32.mrb[110].mxu1  ;;  %v12466_v24 = vsel %vm3492_vm4, %v5245_v46, -1e+30 }
 0x991   : > { %5300 = vmax.xlane.f32.xlu0 %v12466_v24  ;;  %v5248_v59 = vpop.f32.mrb[111].mxu1  ;;  %v12482_v5 = vsel %vm3495_vm14, %v7718_v21, -1e+30 }
 0x992   : > { %v12474_v42 = vsel %vm3493_vm7, %v5248_v59, -1e+30 }
 0x993   : > { %5302 = vmax.xlane.f32.xlu1 %v12474_v42 }
 0x995   : > { %5304 = vmax.xlane.f32.xlu0 %v12479_v10 }
 0x997   : > { %5306 = vmax.xlane.f32.xlu1 %v12482_v5 }
 0xa06   : > { %v5277_v8 = vpop.xlane.xlu0 %5276 }
 0xa07   : > { %v5308_v55 = vsub.f32 %v12352_v13, %v5277_v8 }
 0xa08   : > { %v5279_v19 = vpop.xlane.xlu1 %5278 }
 0xa09   : > { %v5324_v16 = vmul.f32 1.442695, %v5308_v55  ;;  %v5309_v22 = vsub.f32 %v12360_v57, %v5279_v19 }
 0xa0a   : > { %v5281_v39 = vpop.xlane.xlu0 %5280 }
 0xa0b   : > { %8012 = vpow2.f32 %v5324_v16  ;;  %v5326_v30 = vmul.f32 1.442695, %v5309_v22  ;;  %v5310_v31 = vsub.f32 %v12368_v28, %v5281_v39 }
 0xa0c   : > { %v5283_v43 = vpop.xlane.xlu1 %5282 }
 0xa0d   : > { %8014 = vpow2.f32 %v5326_v30  ;;  %v5328_v51 = vmul.f32 1.442695, %v5310_v31  ;;  %v5311_v32 = vsub.f32 %v12380_v48, %v5283_v43  ;;  %v7932_v43 = vld [vmem:[%s12672_s19] sm:$0xff]  }
 0xa0e   : > { %v5285_v36 = vpop.xlane.xlu0 %5284  ;;  %7751 = vmatprep.subr.bf16.mxu0 %v7932_v43 }
 0xa0f   : > { %8016 = vpow2.f32 %v5328_v51  ;;  %v5330_v18 = vmul.f32 1.442695, %v5311_v32  ;;  %v5312_v40 = vsub.f32 %v12390_v47, %v5285_v36 }
 0xa10   : > { %v5287_v13 = vpop.xlane.xlu1 %5286 }
 0xa11   : > { %8018 = vpow2.f32 %v5330_v18  ;;  %v5332_v12 = vmul.f32 1.442695, %v5312_v40  ;;  %v5313_v57 = vsub.f32 %v12398_v34, %v5287_v13 }
 0xa12   : > { %v5289_v35 = vpop.xlane.xlu0 %5288 }
 0xa13   : > { %8020 = vpow2.f32 %v5332_v12  ;;  %v5334_v60 = vmul.f32 1.442695, %v5313_v57  ;;  %v5314_v28 = vsub.f32 %v12406_v61, %v5289_v35 }
 0xa14   : > { %v5291_v56 = vpop.xlane.xlu1 %5290 }
 0xa15   : > { %v12492_v62 = vpop.eup %8012  ;;  %8022 = vpow2.f32 %v5334_v60  ;;  %v5336_v48 = vmul.f32 1.442695, %v5314_v28  ;;  %v5315_v23 = vsub.f32 %v12418_v0, %v5291_v56 }
 0xa16   : > { %v5293_v53 = vpop.xlane.xlu0 %5292  ;;  %5356 = vadd.xlane.f32.xlu0 %v12492_v62 }
 0xa17   : > { %v12496_v47 = vpop.eup %8014  ;;  %8024 = vpow2.f32 %v5336_v48  ;;  %v5338_v7 = vmul.f32 1.442695, %v5315_v23  ;;  %v5316_v34 = vsub.f32 %v12428_v1, %v5293_v53 }
 0xa18   : > { %v5295_v44 = vpop.xlane.xlu1 %5294  ;;  %5358 = vadd.xlane.f32.xlu1 %v12496_v47 }
 0xa19   : > { %v12500_v61 = vpop.eup %8016  ;;  %8026 = vpow2.f32 %v5338_v7  ;;  %v5340_v25 = vmul.f32 1.442695, %v5316_v34  ;;  %v5317_v27 = vsub.f32 %v12436_v4, %v5295_v44 }
 0xa1a   : > { %v5297_v9 = vpop.xlane.xlu0 %5296  ;;  %5360 = vadd.xlane.f32.xlu0 %v12500_v61 }
 0xa1b   : > { %v12504_v0 = vpop.eup %8018  ;;  %8028 = vpow2.f32 %v5340_v25  ;;  %v5342_v63 = vmul.f32 1.442695, %v5317_v27  ;;  %v5318_v6 = vsub.f32 %v12444_v2, %v5297_v9 }
 0xa1c   : > { %v5299_v3 = vpop.xlane.xlu1 %5298  ;;  %5362 = vadd.xlane.f32.xlu1 %v12504_v0 }
 0xa1d   : > { %v12508_v1 = vpop.eup %8020  ;;  %8030 = vpow2.f32 %v5342_v63  ;;  %v5344_v20 = vmul.f32 1.442695, %v5318_v6  ;;  %v5319_v26 = vsub.f32 %v12456_v50, %v5299_v3 }
 0xa1e   : > { %5364 = vadd.xlane.f32.xlu0 %v12508_v1  ;;  %v5301_v4 = vpop.xlane.xlu0 %5300 }
 0xa1f   : > { %v12512_v49 = vpop.eup %8022  ;;  %8032 = vpow2.f32 %v5344_v20  ;;  %v5346_v29 = vmul.f32 1.442695, %v5319_v26  ;;  %v5320_v46 = vsub.f32 %v12466_v24, %v5301_v4  ;;  %v7934_v4 = vld [vmem:[%s12672_s19 + $0x10] sm:$0xff]  }
 0xa20   : > { %5366 = vadd.xlane.f32.xlu1 %v12512_v49  ;;  %v5303_v2 = vpop.xlane.xlu1 %5302 }
 0xa21   : > { %v12516_v21 = vpop.eup %8024  ;;  %8034 = vpow2.f32 %v5346_v29  ;;  %v5348_v33 = vmul.f32 1.442695, %v5320_v46  ;;  %v5321_v45 = vsub.f32 %v12474_v42, %v5303_v2 }
 0xa22   : > { %5368 = vadd.xlane.f32.xlu0 %v12516_v21  ;;  %v5305_v50 = vpop.xlane.xlu0 %5304 }
 0xa23   : > { %v12520_v59 = vpop.eup %8026  ;;  %8036 = vpow2.f32 %v5348_v33  ;;  %v5350_v38 = vmul.f32 1.442695, %v5321_v45  ;;  %v5322_v17 = vsub.f32 %v12479_v10, %v5305_v50  ;;  %v7935_v50 = vld [vmem:[%s12672_s19 + $0x18] sm:$0xff]  }
 0xa24   : > { %5370 = vadd.xlane.f32.xlu1 %v12520_v59  ;;  %v5307_v24 = vpop.xlane.xlu1 %5306 }
 0xa25   : > { %v12524_v8 = vpop.eup %8028  ;;  %8038 = vpow2.f32 %v5350_v38  ;;  %v5352_v55 = vmul.f32 1.442695, %v5322_v17  ;;  %v5323_v19 = vsub.f32 %v12482_v5, %v5307_v24 }
 0xa26   : > { %5372 = vadd.xlane.f32.xlu0 %v12524_v8 }
 0xa27   : > { %v12528_v42 = vpop.eup %8030  ;;  %8040 = vpow2.f32 %v5352_v55  ;;  %v5354_v16 = vmul.f32 1.442695, %v5323_v19  ;;  %v7936_v19 = vld [vmem:[%s12672_s19 + $0x20] sm:$0xff]  }
 0xa28   : > { %5374 = vadd.xlane.f32.xlu1 %v12528_v42 }
 0xa29   : > { %v12531_v22 = vpop.eup %8032  ;;  %8042 = vpow2.f32 %v5354_v16 }
 0xa2a   : > { %5376 = vadd.xlane.f32.xlu0 %v12531_v22 }
 0xa2b   : > { %v12534_v10 = vpop.eup %8034 }
 0xa2c   : > { %5378 = vadd.xlane.f32.xlu1 %v12534_v10 }
 0xa2d   : > { %v12537_v39 = vpop.eup %8036 }
 0xa2e   : > { %5380 = vadd.xlane.f32.xlu0 %v12537_v39 }
 0xa2f   : > { %v12540_v5 = vpop.eup %8038 }
 0xa30   : > { %5382 = vadd.xlane.f32.xlu1 %v12540_v5 }
 0xa31   : > { %v12543_v30 = vpop.eup %8040 }
 0xa32   : > { %5384 = vadd.xlane.f32.xlu0 %v12543_v30 }
 0xa33   : > { %v12546_v31 = vpop.eup %8042 }
 0xa34   : > { %5386 = vadd.xlane.f32.xlu1 %v12546_v31 }
 0xaa3   : > { %v5357_v51 = vpop.xlane.xlu0 %5356 }
 0xaa4   : > { %8044 = vrcp.f32 %v5357_v51 }
 0xaa5   : > { %v5359_v32 = vpop.xlane.xlu1 %5358 }
 0xaa6   : > { %8046 = vrcp.f32 %v5359_v32 }
 0xaa7   : > { %v5361_v36 = vpop.xlane.xlu0 %5360 }
 0xaa8   : > { %8048 = vrcp.f32 %v5361_v36 }
 0xaa9   : > { %v5363_v18 = vpop.xlane.xlu1 %5362 }
 0xaaa   : > { %8050 = vrcp.f32 %v5363_v18 }
 0xaab   : > { %v5365_v40 = vpop.xlane.xlu0 %5364 }
 0xaac   : > { %8052 = vrcp.f32 %v5365_v40 }
 0xaad   : > { %v5367_v13 = vpop.xlane.xlu1 %5366 }
 0xaae   : > { %v8045_v12 = vpop.eup %8044  ;;  %8054 = vrcp.f32 %v5367_v13 }
 0xaaf   : > { %v5369_v57 = vpop.xlane.xlu0 %5368  ;;  %v5404_v28 = vmul.f32 %v8045_v12, %v12492_v62  ;;  %v7933_v62 = vld [vmem:[%s12672_s19 + $0x8] sm:$0xff]  }
 0xab0   : > { %v8047_v35 = vpop.eup %8046  ;;  %8056 = vrcp.f32 %v5369_v57 }
 0xab1   : > { %v5371_v60 = vpop.xlane.xlu1 %5370  ;;  %v5405_v56 = vmul.f32 %v8047_v35, %v12496_v47 }
 0xab2   : > { %v8049_v48 = vpop.eup %8048  ;;  %8058 = vrcp.f32 %v5371_v60 }
 0xab3   : > { %v5373_v23 = vpop.xlane.xlu0 %5372  ;;  %v5420_v53 = vpack.c.bf16 %v5405_v56, %v5404_v28  ;;  %v5406_v34 = vmul.f32 %v8049_v48, %v12500_v61 }
 0xab4   : > { %v8051_v7 = vpop.eup %8050  ;;  %8060 = vrcp.f32 %v5373_v23 }
 0xab5   : > { %v5407_v44 = vmul.f32 %v8051_v7, %v12504_v0  ;;  %7735 = vmatprep.mubr.bf16.mxu0 %v5420_v53  ;;  %v5375_v25 = vpop.xlane.xlu1 %5374 }
 0xab6   : > { %v8053_v27 = vpop.eup %8052  ;;  %8062 = vrcp.f32 %v5375_v25 }
 0xab7   : > { %v5377_v9 = vpop.xlane.xlu0 %5376  ;;  %v5421_v63 = vpack.c.bf16 %v5407_v44, %v5406_v34  ;;  %v5408_v3 = vmul.f32 %v8053_v27, %v12508_v1 }
 0xab8   : > { %v8055_v47 = vpop.eup %8054  ;;  %8064 = vrcp.f32 %v5377_v9 }
 0xab9   : > { %7736 = vmatmul.mubr.bf16.vlgmr.msra.gmra.mrb[64].mxu0 %v5421_v63  ;;  %v5379_v6 = vpop.xlane.xlu1 %5378  ;;  %v5409_v61 = vmul.f32 %v8055_v47, %v12512_v49 }
 0xaba   : > { %v8057_v20 = vpop.eup %8056  ;;  %8066 = vrcp.f32 %v5379_v6  ;;  %7752 = vmatpush3.bf16.msra.mxu0 %v7932_v43 }
 0xabb   : > { %v5381_v0 = vpop.xlane.xlu0 %5380  ;;  %v5422_v26 = vpack.c.bf16 %v5409_v61, %v5408_v3  ;;  %7753 = vmatprep.subr.bf16.mxu0 %v7933_v62  ;;  %v5410_v2 = vmul.f32 %v8057_v20, %v12516_v21 }
 0xabc   : > { %v8059_v29 = vpop.eup %8058  ;;  %8068 = vrcp.f32 %v5381_v0 }
 0xabd   : > { %7739 = vmatprep.mubr.bf16.mxu0 %v5422_v26  ;;  %v5383_v46 = vpop.xlane.xlu1 %5382  ;;  %v5411_v1 = vmul.f32 %v8059_v29, %v12520_v59  ;;  %v8167_v29 = vmov 0.0|0.0  }
 0xabe   : > { %v8061_v33 = vpop.eup %8060  ;;  %8070 = vrcp.f32 %v5383_v46  ;;  %7754 = vmatpush3.bf16.msra.mxu0 %v7933_v62  ;;  %7838 = vmatprep.subr.bf16.mxu1 %v8167_v29  ;;  %v8169_v46 = vmov 0.0  }
 0xabf   : > { %v5385_v49 = vpop.xlane.xlu0 %5384  ;;  %v5423_v45 = vpack.c.bf16 %v5411_v1, %v5410_v2  ;;  %7755 = vmatprep.subr.bf16.mxu0 %v7934_v4  ;;  %v5412_v24 = vmul.f32 %v8061_v33, %v12524_v8  ;;  %7815 = vmatprep.mubr.msk.f32.mxu1 %vm8168_vm6, %v8169_v46  ;;  %v7940_v2 = vld [vmem:[%s12674_s21] sm:$0xff]   ;;  %v7941_v1 = vld [vmem:[%s12674_s21 + $0x8] sm:$0xff]   ;;  %v7942_v33 = vld [vmem:[%s12674_s21 + $0x10] sm:$0xff]  }
 0xac0   : > { %v8063_v38 = vpop.eup %8062  ;;  %8072 = vrcp.f32 %v5385_v49  ;;  %v7943_v49 = vld [vmem:[%s12674_s21 + $0x18] sm:$0xff]  }
 0xac1   : > { %7740 = vmatmul.mubr.bf16.gmra.mrb[68].mxu0 %v5423_v45  ;;  %v5387_v17 = vpop.xlane.xlu1 %5386  ;;  %v5413_v21 = vmul.f32 %v8063_v38, %v12528_v42  ;;  %v7937_v42 = vld [vmem:[%s12672_s19 + $0x28] sm:$0xff]   ;;  %v7944_v45 = vld [vmem:[%s12674_s21 + $0x20] sm:$0xff]   ;;  %v7946_v38 = vld [vmem:[%s12674_s21 + $0x30] sm:$0xff]  }
 0xac2   : > { %v8065_v55 = vpop.eup %8064  ;;  %8074 = vrcp.f32 %v5387_v17  ;;  %7756 = vmatpush3.bf16.msra.mxu0 %v7934_v4  ;;  %v6054_v17 = vld [vmem:[%s12673_s20] ss:$0 sm:$0xff] }
 0xac3   : > { %v5424_v59 = vpack.c.bf16 %v5413_v21, %v5412_v24  ;;  %7757 = vmatprep.subr.bf16.mxu0 %v7935_v50  ;;  %v5414_v43 = vmul.f32 %v8065_v55, %v12531_v22  ;;  %v7938_v22 = vld [vmem:[%s12672_s19 + $0x30] sm:$0xff]  }
 0xac4   : > { %v8067_v16 = vpop.eup %8066 }
 0xac5   : > { %7743 = vmatprep.mubr.bf16.mxu0 %v5424_v59  ;;  %v5415_v51 = vmul.f32 %v8067_v16, %v12534_v10 }
 0xac6   : > { %v8069_v32 = vpop.eup %8068  ;;  %7758 = vmatpush3.bf16.msra.mxu0 %v7935_v50  ;;  %v7945_v50 = vld [vmem:[%s12674_s21 + $0x28] sm:$0xff]  }
 0xac7   : > { %v5425_v8 = vpack.c.bf16 %v5415_v51, %v5414_v43  ;;  %7759 = vmatprep.subr.bf16.mxu0 %v7936_v19  ;;  %v5416_v18 = vmul.f32 %v8069_v32, %v12537_v39  ;;  %v7939_v39 = vld [vmem:[%s12672_s19 + $0x38] sm:$0xff]  }
 0xac8   : > { %v8071_v36 = vpop.eup %8070 }
 0xac9   : > { %7744 = vmatmul.mubr.bf16.gmra.mrb[72].mxu0 %v5425_v8  ;;  %v5417_v40 = vmul.f32 %v8071_v36, %v12540_v5 }
 0xaca   : > { %v8073_v13 = vpop.eup %8072  ;;  %7760 = vmatpush3.bf16.msra.mxu0 %v7936_v19 }
 0xacb   : > { %v5426_v12 = vpack.c.bf16 %v5417_v40, %v5416_v18  ;;  %7761 = vmatprep.subr.bf16.mxu0 %v7937_v42  ;;  %v5418_v57 = vmul.f32 %v8073_v13, %v12543_v30 }
 0xacc   : > { %v8075_v10 = vpop.eup %8074 }
 0xacd   : > { %7747 = vmatprep.mubr.bf16.mxu0 %v5426_v12  ;;  %v5419_v35 = vmul.f32 %v8075_v10, %v12546_v31 }
 0xace   : > { %7762 = vmatpush3.bf16.msra.mxu0 %v7937_v42 }
 0xacf   : > { %v5427_v60 = vpack.c.bf16 %v5419_v35, %v5418_v57  ;;  %7763 = vmatprep.subr.bf16.mxu0 %v7938_v22 }
 0xad1   : > { %7748 = vmatmul.mubr.bf16.gmra.mrb[76].mxu0 %v5427_v60 }
 0xad2   : > { %7764 = vmatpush3.bf16.msra.mxu0 %v7938_v22 }
 0xad3   : > { %7765 = vmatprep.subr.bf16.mxu0 %v7939_v39 }
 0xad6   : > { %7766 = vmatpush3.bf16.msra.mxu0 %v7939_v39 }
 0xad7   : > { %7818 = vmatprep.subr.bf16.mxu0 %v8169_v46 }
 0xb8c   : > { %v7737_v5 = vpop.f32.mrb[64].mxu0 }
 0xb8d   : > { %v5470_v28 = vpop.f32.mrb[65].mxu0 }
 0xb8e   : > { %v7738_v56 = vpop.f32.mrb[66].mxu0 }
 0xb8f   : > { %v5534_v48 = vpack.c.bf16 %v7738_v56, %v7737_v5  ;;  %v5473_v23 = vpop.f32.mrb[67].mxu0 }
 0xb90   : > { %v5533_v53 = vpack.c.bf16 %v5473_v23, %v5470_v28 }
 0xb92   : > { %7767 = vmatprep.mubr.bf16.mxu0 %v5533_v53 }
 0xb93   : > { %7768 = vmatmul.mubr.bf16.vlgmr.msra.gmra.mrb[80].mxu0 %v5534_v48 }
 0xb94   : > { %v7741_v30 = vpop.f32.mrb[68].mxu0  ;;  %7819 = vmatpush3.bf16.msra.mxu0 %v7940_v2 }
 0xb95   : > { %v5486_v31 = vpop.f32.mrb[69].mxu0  ;;  %7820 = vmatprep.subr.bf16.mxu0 %v8169_v46 }
 0xb96   : > { %v7742_v7 = vpop.f32.mrb[70].mxu0 }
 0xb97   : > { %v5536_v34 = vpack.c.bf16 %v7742_v7, %v7741_v30  ;;  %v5489_v44 = vpop.f32.mrb[71].mxu0 }
 0xb98   : > { %v5535_v25 = vpack.c.bf16 %v5489_v44, %v5486_v31  ;;  %7821 = vmatpush3.bf16.msra.mxu0 %v7941_v1  ;;  %v13053_v44 = vld [vmem:[#allocation22_spill] sm:$0xff]  ;;  %v13056_v1 = vld [vmem:[#allocation3_spill] sm:$0xff] }
 0xb99   : > { %7822 = vmatprep.subr.bf16.mxu0 %v8169_v46 }
 0xb9a   : > { %7771 = vmatprep.mubr.bf16.mxu0 %v5535_v25 }
 0xb9b   : > { %7772 = vmatmul.mubr.bf16.gmra.mrb[84].mxu0 %v5536_v34  ;;  %v13052_v34 = vld [vmem:[#allocation21_spill] sm:$0xff] }
 0xb9c   : > { %v7745_v27 = vpop.f32.mrb[72].mxu0  ;;  %7823 = vmatpush3.bf16.msra.mxu0 %v7942_v33 }
 0xb9d   : > { %v5502_v9 = vpop.f32.mrb[73].mxu0  ;;  %7824 = vmatprep.subr.bf16.mxu0 %v8169_v46 }
 0xb9e   : > { %v7746_v63 = vpop.f32.mrb[74].mxu0 }
 0xb9f   : > { %v5538_v62 = vpack.c.bf16 %v7746_v63, %v7745_v27  ;;  %v5505_v47 = vpop.f32.mrb[75].mxu0  ;;  %v13054_v27 = vld [vmem:[#allocation23_spill] sm:$0xff] }
 0xba0   : > { %v5537_v6 = vpack.c.bf16 %v5505_v47, %v5502_v9  ;;  %7825 = vmatpush3.bf16.msra.mxu0 %v7943_v49  ;;  %v13057_v49 = vld [vmem:[#allocation11_spill] sm:$0xff] }
 0xba1   : > { %7826 = vmatprep.subr.bf16.mxu0 %v8169_v46 }
 0xba2   : > { %7775 = vmatprep.mubr.bf16.mxu0 %v5537_v6 }
 0xba3   : > { %7776 = vmatmul.mubr.bf16.gmra.mrb[88].mxu0 %v5538_v62 }
 0xba4   : > { %v7749_v3 = vpop.f32.mrb[76].mxu0  ;;  %7827 = vmatpush3.bf16.msra.mxu0 %v7944_v45 }
 0xba5   : > { %v5518_v61 = vpop.f32.mrb[77].mxu0  ;;  %7828 = vmatprep.subr.bf16.mxu0 %v8169_v46 }
 0xba6   : > { %v7750_v20 = vpop.f32.mrb[78].mxu0 }
 0xba7   : > { %v5540_v0 = vpack.c.bf16 %v7750_v20, %v7749_v3  ;;  %v5521_v26 = vpop.f32.mrb[79].mxu0 }
 0xba8   : > { %v5539_v4 = vpack.c.bf16 %v5521_v26, %v5518_v61  ;;  %7829 = vmatpush3.bf16.msra.mxu0 %v7945_v50  ;;  %v13058_v50 = vld [vmem:[#allocation4_spill] sm:$0xff] }
 0xba9   : > { %7830 = vmatprep.subr.bf16.mxu0 %v8169_v46 }
 0xbaa   : > { %7779 = vmatprep.mubr.bf16.mxu0 %v5539_v4 }
 0xbab   : > { %7780 = vmatmul.mubr.bf16.gmra.mrb[92].mxu0 %v5540_v0 }
 0xbac   : > { %7834 = vmatprep.mubr.msk.bf16.mxu0 %vm8168_vm6, %v8169_v46  ;;  %7831 = vmatpush3.bf16.msra.mxu0 %v7946_v38 }
 0xbad   : > { %7832 = vmatprep.subr.bf16.mxu0 %v8169_v46  ;;  %v13055_v46 = vld [vmem:[#allocation10_spill] sm:$0xff] }
 0xc66   : > { %v7769_v24 = vpop.f32.mrb[80].mxu0 }
 0xc67   : > { %v5638_v21 = vadd.f32 %v7769_v24, %v6054_v17  ;;  %v5629_v55 = vpop.f32.mrb[81].mxu0 }
 0xc68   : > { %v5630_v59 = vadd.f32 %v6054_v17, %v5629_v55  ;;  %v7770_v19 = vpop.f32.mrb[82].mxu0  ;;  %v13059_v55 = vld [vmem:[#allocation5_spill] sm:$0xff] }
 0xc69   : > { %v5641_v16 = vadd.f32 %v7770_v19, %v6054_v17  ;;  %v5632_v43 = vpop.f32.mrb[83].mxu0  ;;  %v5694_v32 = vadd.f32 %v5638_v21, %v12126_v41  ;;  %v8170_v19 = vmov 0.0625  }
 0xc6a   : > { %v5633_v51 = vadd.f32 %v6054_v17, %v5632_v43  ;;  %v5692_v42 = vadd.f32 %v5630_v59, %v12120_v37  ;;  %v13061_v59 = vld [vmem:[#allocation2_spill] sm:$0xff] }
 0xc6b   : > { %v5695_v8 = vadd.f32 %v5641_v16, %v12117_v15  ;;  %v7947_v16 = vld [vmem:[%s12674_s21 + $0x38] sm:$0xff]  }
 0xc6c   : > { %v5693_v36 = vadd.f32 %v5633_v51, %v12123_v58  ;;  %7833 = vmatpush3.bf16.msra.mxu0 %v7947_v16 }
 0xc6d   : > { %v7842_v18 = vpack.c.bf16 %v5695_v8, %v5694_v32 }
 0xc6e   : > { %v7839_v40 = vpack.c.bf16 %v5693_v36, %v5692_v42  ;;  %v7773_v13 = vpop.f32.mrb[84].mxu0 }
 0xc6f   : > { %v5654_v12 = vadd.f32 %v7773_v13, %v6054_v17  ;;  %v5645_v22 = vpop.f32.mrb[85].mxu0 }
 0xc70   : > { %v5646_v10 = vadd.f32 %v6054_v17, %v5645_v22  ;;  %v7774_v57 = vpop.f32.mrb[86].mxu0  ;;  %7840 = vmatpush3.bf16.msra.mxu1 %v7839_v40 }
 0xc71   : > { %v5657_v35 = vadd.f32 %v7774_v57, %v6054_v17  ;;  %v5648_v60 = vpop.f32.mrb[87].mxu0  ;;  %7841 = vmatprep.subr.bf16.mxu1 %v8167_v29  ;;  %v5698_v41 = vadd.f32 %v5654_v12, %v12160_v54  ;;  %v13051_v54 = vld [vmem:[#allocation24_spill] sm:$0xff] }
 0xc72   : > { %v5649_v39 = vadd.f32 %v6054_v17, %v5648_v60  ;;  %v5696_v37 = vadd.f32 %v5646_v10, %v12154_v52 }
 0xc73   : > { %v5699_v15 = vadd.f32 %v5657_v35, %v12148_v14 }
 0xc74   : > { %v5697_v58 = vadd.f32 %v5649_v39, %v12157_v11  ;;  %7843 = vmatpush3.bf16.msra.mxu1 %v7842_v18 }
 0xc75   : > { %v7848_v5 = vpack.c.bf16 %v5699_v15, %v5698_v41  ;;  %7844 = vmatprep.subr.bf16.mxu1 %v8167_v29 }
 0xc76   : > { %v7845_v28 = vpack.c.bf16 %v5697_v58, %v5696_v37  ;;  %v7777_v56 = vpop.f32.mrb[88].mxu0 }
 0xc77   : > { %v5670_v48 = vadd.f32 %v7777_v56, %v6054_v17  ;;  %v5661_v23 = vpop.f32.mrb[89].mxu0 }
 0xc78   : > { %v5662_v53 = vadd.f32 %v6054_v17, %v5661_v23  ;;  %v7778_v30 = vpop.f32.mrb[90].mxu0  ;;  %7846 = vmatpush3.bf16.msra.mxu1 %v7845_v28 }
 0xc79   : > { %v5673_v31 = vadd.f32 %v7778_v30, %v6054_v17  ;;  %v5664_v7 = vpop.f32.mrb[91].mxu0  ;;  %7847 = vmatprep.subr.bf16.mxu1 %v8167_v29  ;;  %v5702_v52 = vadd.f32 %v5670_v48, %v13051_v54 }
 0xc7a   : > { %v5665_v14 = vadd.f32 %v6054_v17, %v5664_v7  ;;  %v5700_v25 = vadd.f32 %v5662_v53, %v13053_v44 }
 0xc7b   : > { %v5703_v11 = vadd.f32 %v5673_v31, %v13052_v34 }
 0xc7c   : > { %v5701_v9 = vadd.f32 %v5665_v14, %v13054_v27  ;;  %7849 = vmatpush3.bf16.msra.mxu1 %v7848_v5 }
 0xc7d   : > { %v7854_v63 = vpack.c.bf16 %v5703_v11, %v5702_v52  ;;  %7850 = vmatprep.subr.bf16.mxu1 %v8167_v29 }
 0xc7e   : > { %v7851_v62 = vpack.c.bf16 %v5701_v9, %v5700_v25  ;;  %v7781_v47 = vpop.f32.mrb[92].mxu0 }
 0xc7f   : > { %v5686_v6 = vadd.f32 %v7781_v47, %v6054_v17  ;;  %v5677_v3 = vpop.f32.mrb[93].mxu0 }
 0xc80   : > { %v5678_v61 = vadd.f32 %v6054_v17, %v5677_v3  ;;  %v7782_v20 = vpop.f32.mrb[94].mxu0  ;;  %7852 = vmatpush3.bf16.msra.mxu1 %v7851_v62 }
 0xc81   : > { %v5689_v0 = vadd.f32 %v7782_v20, %v6054_v17  ;;  %v5680_v26 = vpop.f32.mrb[95].mxu0  ;;  %7853 = vmatprep.subr.bf16.mxu1 %v8167_v29  ;;  %v5706_v2 = vadd.f32 %v5686_v6, %v13055_v46 }
 0xc82   : > { %v5681_v4 = vadd.f32 %v6054_v17, %v5680_v26  ;;  %v5704_v45 = vadd.f32 %v5678_v61, %v13057_v49  ;;  %v13060_v17 = vcvt.s32.f32 %v13059_v55 }
 0xc83   : > { %v5707_v33 = vadd.f32 %v5689_v0, %v13056_v1 }
 0xc84   : > { %v5705_v38 = vadd.f32 %v5681_v4, %v13058_v50  ;;  %7855 = vmatpush3.bf16.msra.mxu1 %v7854_v63  ;;  %vm5708_vm11 = vcmp.eq.f32.partialorder %v13061_v59, %v13060_v17 }
 0xc85   : > { %v7860_v24 = vpack.c.bf16 %v5707_v33, %v5706_v2  ;;  %7856 = vmatprep.subr.bf16.mxu1 %v8167_v29 }
 0xc86   : > { %v7857_v21 = vpack.c.bf16 %v5705_v38, %v5704_v45 }
 0xc88   : > { %7858 = vmatpush3.bf16.msra.mxu1 %v7857_v21 }
 0xc89   : > { %7859 = vmatprep.subr.bf16.mxu1 %v8167_v29  ;;  %v6064_v29 = vld [vmem:[%s12675_s22] ss:$0 sm:$0xff] }
 0xc8c   : > { %7861 = vmatpush3.bf16.msra.mxu1 %v7860_v24 }
 0xc8f   : > { %7816 = vmatmul.mubr.msk.f32.vlgmr.msra.gmra.mrb[112].mxu1 %vm5708_vm11, %v8170_v19 }
 0xd62   : > { %v5776_v43 = vpop.f32.mrb[112].mxu1 }
 0xd63   : > { %v5780_v51 = vpack.c.bf16 %v5776_v43, %v5776_v43  ;;  %v7817_v32 = vpop.f32.mrb[113].mxu1 }
 0xd65   : > { %7835 = vmatmul.mubr.bf16.vlgmr.msra.gmra.mrb[96].mxu0 %v5780_v51 }
 0xe38   : > { %v5886_v8 = vpop.f32.mrb[96].mxu0 }
 0xe39   : > { %v5887_v42 = vadd.f32 %v6064_v29, %v5886_v8  ;;  %v7836_v36 = vpop.f32.mrb[97].mxu0 }
 0xe3a   : > { %v5889_v18 = vpop.f32.mrb[98].mxu0 }
 0xe3b   : > { %5892 = vst [vmem:[%s708_s0] sm:$0xff] %v5887_v42  ;;  %v7837_v40 = vpop.f32.mrb[99].mxu0 }
 0xe3c PF: > { %s33_s4 = sadd.s32 1, %s8165_s4  }
 0xe3d   : > { %p30_p4 = scmp.ge.s32.totalorder %s33_s4, 4  }
 0xe3f   :  { %32 = sbr.rel (!%p30_p4) target bundleno = 9 (0x9), region = 142 }

</bundles_post_ra>
